<compile_context>
chip_gen: v7x
topology: tpu7x:2x2x1
jax: 0.10.0
libtpu: 0.0.40
codegen_flags: <defaults>
</compile_context>

<pallas_src>
import math

import jax
import jax.numpy as jnp
from jax.experimental import pallas as pl
from jax.experimental.pallas import tpu as pltpu

# ----------------------------- model configuration ---------------------------
NUM_POINTS = 8          # few-shot points per task (the attention "sequence")
INPUT_DIM = 2           # module default
BL_HIDDEN = 64          # BasisFunctionLearner hidden_dim (module default 64)
BASIS_DIM = 32          # basis_function_dim (module default 32)
N_MID = 4               # fc2..fc5 of the BasisFunctionLearner
WG_HIDDEN = 128         # WeightsGenerator hidden_dim (module default 512; scaled down)
NUM_ATT_LAYERS = 2      # inner attention layers (module default 8; scaled down)
LN_EPS = 1e-5
SCALE = 1.0 / math.sqrt(WG_HIDDEN)   # query.size(-1) ** 0.5 divisor

# ----------------------------- kernel tiling ---------------------------------
TASKS_PER_BLOCK = 16                 # 16 tasks * 8 points = 128 rows per grid step
OUT_PAD = 128                        # lane-dense output slab width

# ----------------------------- packed bias slab -------------------------------
BIAS_PAD = 3 * WG_HIDDEN             # widest bias (fused QKV); lane-aligned (384)
_B_BL1 = 0
_B_BLM = 1                            # rows 1 .. 1+N_MID-1
_B_BL6 = 1 + N_MID
_B_TOP = _B_BL6 + 1                   # qkv, ff0, ff1
_B_ATT = _B_TOP + 3                   # 3 rows per inner layer
_B_WG = _B_ATT + 3 * NUM_ATT_LAYERS   # fc1, fc2, final_dense
NUM_BIAS_ROWS = _B_WG + 3

WEIGHT_ORDER = ("bl_w1", "bl_wm", "bl_w6",
                "top_wqkv", "top_w0", "top_w1",
                "att_wqkv", "att_w0", "att_w1",
                "wg_w1", "wg_w2", "wg_wf")


def _layer_norm(z):
    """F.layer_norm(z, (z.shape[-1],)): per-row, biased variance, no affine.
    Two-pass statistics (mean, then mean of centered squares) to avoid cancellation."""
    mu = jnp.mean(z, axis=-1, keepdims=True)
    zc = z - mu
    var = jnp.mean(zc * zc, axis=-1, keepdims=True)
    return zc * jax.lax.rsqrt(var + LN_EPS)


def model_kernel(x_ref,
                 bl_w1, bl_wm, bl_w6,
                 top_wqkv, top_w0, top_w1,
                 att_wqkv, att_w0, att_w1,
                 wg_w1, wg_w2, wg_wf,
                 bias_ref,
                 out_ref):
    f32 = jnp.float32
    m = x_ref.shape[0]                   # TASKS_PER_BLOCK * NUM_POINTS rows
    tb = m // NUM_POINTS

    b_all = bias_ref[...].astype(f32)    # (NUM_BIAS_ROWS, BIAS_PAD) - one small load

    def bias(row, width):
        return b_all[row:row + 1, :width]            # (1, width) static slice

    def linear(h, w, row, width):
        # bf16 weights up-cast in VMEM; matmul accumulates in f32 on the MXU.
        return jnp.dot(h, w.astype(f32), preferred_element_type=f32) + bias(row, width)

    x = x_ref[...].astype(f32)                       # (m, INPUT_DIM)

    # ------------------------ BasisFunctionLearner ------------------------
    h = jnp.maximum(linear(x, bl_w1[...], _B_BL1, BL_HIDDEN), 0.0)
    for i in range(N_MID):                           # fc2..fc5 (stacked refs)
        h = jnp.maximum(linear(h, bl_wm[i], _B_BLM + i, BL_HIDDEN), 0.0)
    basis = linear(h, bl_w6[...], _B_BL6, BASIS_DIM)           # (m, BASIS_DIM)

    # --------------------------- AttentionLayer ---------------------------
    def attention_block(y, wqkv, w0, w1, brow):
        qkv = linear(y, wqkv, brow, 3 * WG_HIDDEN)             # (m, 3H), lane-aligned slices
        q = qkv[:, :WG_HIDDEN].reshape(tb, NUM_POINTS, WG_HIDDEN)
        k = qkv[:, WG_HIDDEN:2 * WG_HIDDEN].reshape(tb, NUM_POINTS, WG_HIDDEN)
        v = qkv[:, 2 * WG_HIDDEN:].reshape(tb, NUM_POINTS, WG_HIDDEN)
        # per-task q @ k.T without materializing a transpose
        s = jnp.einsum('bqd,bkd->bqk', q, k,
                       preferred_element_type=f32) * SCALE      # (tb, N, N)
        e = jnp.exp(s - jnp.max(s, axis=-1, keepdims=True))
        attn = e / jnp.sum(e, axis=-1, keepdims=True)           # exact softmax
        z = jnp.einsum('bqk,bkd->bqd', attn, v,
                       preferred_element_type=f32) + q          # weighted_sum + query
        z = _layer_norm(z).reshape(m, WG_HIDDEN)
        d0 = jnp.maximum(linear(z, w0, brow + 1, 2 * WG_HIDDEN), 0.0)
        z = z + linear(d0, w1, brow + 2, WG_HIDDEN)
        return _layer_norm(z)                                   # (m, H)

    # -------------------------- WeightsGenerator --------------------------
    y = attention_block(basis, top_wqkv[...], top_w0[...], top_w1[...], _B_TOP)
    # TODO(synk): at module-default depth (8 layers) stream the stacked layer axis
    # (fori_loop / extra grid axis) instead of trace-time unrolling.
    for l in range(NUM_ATT_LAYERS):
        y = attention_block(y, att_wqkv[l], att_w0[l], att_w1[l], _B_ATT + 3 * l)

    y = jnp.maximum(linear(y, wg_w1[...], _B_WG, WG_HIDDEN), 0.0)
    y = jnp.maximum(linear(y, wg_w2[...], _B_WG + 1, WG_HIDDEN), 0.0)
    weights = linear(y, wg_wf[...], _B_WG + 2, BASIS_DIM)       # (m, BASIS_DIM)

    # diag(basis @ weights.T) == row-wise dot product (skip the (N, N) matmul)
    pred = jnp.sum(basis * weights, axis=-1, keepdims=True)     # (m, 1)

    # one lane-dense (m, 128) store: [weights | pred | zero pad]
    pad = jnp.zeros((m, OUT_PAD - BASIS_DIM - 1), f32)
    out_ref[...] = jnp.concatenate([weights, pred, pad], axis=-1)


def _pack_biases(p):
    """All biases into one lane-dense bf16 slab (row per bias, zero padded to 384)."""
    rows = []

    def add(b):
        b = b.reshape(-1).astype(jnp.bfloat16)
        rows.append(jnp.pad(b, (0, BIAS_PAD - b.shape[0])))

    add(p["bl_b1"])
    for i in range(N_MID):
        add(p["bl_bm"][i])
    add(p["bl_b6"])
    add(p["top_bqkv"]); add(p["top_b0"]); add(p["top_b1"])
    for l in range(NUM_ATT_LAYERS):
        add(p["att_bqkv"][l]); add(p["att_b0"][l]); add(p["att_b1"][l])
    add(p["wg_b1"]); add(p["wg_b2"]); add(p["wg_bf"])
    assert len(rows) == NUM_BIAS_ROWS
    return jnp.stack(rows)                                      # (NUM_BIAS_ROWS, BIAS_PAD)


def _cost_estimate(x, weight_args, bias_slab):
    rows = x.shape[0] * x.shape[1]
    param_bytes = sum(int(a.size) * a.dtype.itemsize for a in weight_args)
    param_bytes += int(bias_slab.size) * bias_slab.dtype.itemsize
    bytes_accessed = param_bytes + int(x.size) * x.dtype.itemsize + rows * OUT_PAD * 4
    matmul_flops = 2 * rows * sum(int(a.size) for a in weight_args)   # holds for stacked too
    n_blocks = 1 + NUM_ATT_LAYERS
    attn_flops = n_blocks * x.shape[0] * 4 * NUM_POINTS * NUM_POINTS * WG_HIDDEN
    transcendentals = n_blocks * (x.shape[0] * NUM_POINTS * NUM_POINTS + 2 * rows)
    return pl.CostEstimate(flops=int(matmul_flops + attn_flops + 2 * rows * BASIS_DIM),
                           transcendentals=int(transcendentals),
                           bytes_accessed=int(bytes_accessed))


@jax.jit
def few_shot_forward(x, params):
    """x: (B, NUM_POINTS, INPUT_DIM) batch of few-shot tasks -> (weights, pred)."""
    b_tasks = x.shape[0]
    assert b_tasks % TASKS_PER_BLOCK == 0, "batch must be a multiple of TASKS_PER_BLOCK"
    num_blocks = b_tasks // TASKS_PER_BLOCK
    rows = b_tasks * NUM_POINTS
    block_rows = TASKS_PER_BLOCK * NUM_POINTS

    x2d = x.reshape(rows, INPUT_DIM)
    weight_args = [params[k] for k in WEIGHT_ORDER]
    bias_slab = _pack_biases(params)

    def const_spec(arr):
        nd = arr.ndim
        return pl.BlockSpec(arr.shape, lambda i, _nd=nd: (0,) * _nd)  # DMA'd once, resident

    in_specs = ([pl.BlockSpec((block_rows, INPUT_DIM), lambda i: (i, 0))]
                + [const_spec(a) for a in weight_args]
                + [const_spec(bias_slab)])
    out_specs = pl.BlockSpec((block_rows, OUT_PAD), lambda i: (i, 0))

    out = pl.pallas_call(
        model_kernel,
        grid=(num_blocks,),
        out_shape=jax.ShapeDtypeStruct((rows, OUT_PAD), jnp.float32),
        in_specs=in_specs,
        out_specs=out_specs,
        compiler_params=pltpu.CompilerParams(dimension_semantics=("parallel",)),
        cost_estimate=_cost_estimate(x, weight_args, bias_slab),
    )(x2d, *weight_args, bias_slab)

    weights = out[:, :BASIS_DIM].reshape(b_tasks, NUM_POINTS, BASIS_DIM)
    pred = out[:, BASIS_DIM].reshape(b_tasks, NUM_POINTS)
    return weights, pred


def few_shot_reference(x, p):
    """Pure-JAX mirror of FewShotRegressionModel.forward, vmapped over tasks."""
    pf = jax.tree_util.tree_map(lambda a: a.astype(jnp.float32), p)

    def ln(z):
        mu = jnp.mean(z, axis=-1, keepdims=True)
        var = jnp.mean((z - mu) ** 2, axis=-1, keepdims=True)
        return (z - mu) / jnp.sqrt(var + LN_EPS)

    def single_task(xt):                                        # xt: (N, INPUT_DIM)
        h = jax.nn.relu(xt @ pf["bl_w1"] + pf["bl_b1"])
        for i in range(N_MID):
            h = jax.nn.relu(h @ pf["bl_wm"][i] + pf["bl_bm"][i])
        basis = h @ pf["bl_w6"] + pf["bl_b6"]

        def attn_block(y, wqkv, bqkv, w0, b0, w1, b1):
            qkv = y @ wqkv + bqkv
            q = qkv[:, :WG_HIDDEN]
            k = qkv[:, WG_HIDDEN:2 * WG_HIDDEN]
            v = qkv[:, 2 * WG_HIDDEN:]
            s = (q @ k.T) * SCALE
            a = jax.nn.softmax(s, axis=-1)
            z = ln(a @ v + q)
            d0 = jax.nn.relu(z @ w0 + b0)
            return ln(z + d0 @ w1 + b1)

        y = attn_block(basis, pf["top_wqkv"], pf["top_bqkv"],
                       pf["top_w0"], pf["top_b0"], pf["top_w1"], pf["top_b1"])
        for l in range(NUM_ATT_LAYERS):
            y = attn_block(y, pf["att_wqkv"][l], pf["att_bqkv"][l],
                           pf["att_w0"][l], pf["att_b0"][l],
                           pf["att_w1"][l], pf["att_b1"][l])
        y = jax.nn.relu(y @ pf["wg_w1"] + pf["wg_b1"])
        y = jax.nn.relu(y @ pf["wg_w2"] + pf["wg_b2"])
        weights = y @ pf["wg_wf"] + pf["wg_bf"]
        pred = jnp.sum(basis * weights, axis=-1)
        return weights, pred

    return jax.vmap(single_task)(x)


def init_params(key):
    """PyTorch nn.Linear-style init; weights stored (in, out) so y = x @ W + b.
    Parameters are kept in bf16 (HBM traffic); all math uses their f32 up-cast."""
    keys = iter(jax.random.split(key, 64))

    def linear(fan_in, fan_out, stack=None):
        bound = 1.0 / math.sqrt(fan_in)
        w_shape = (fan_in, fan_out) if stack is None else (stack, fan_in, fan_out)
        b_shape = (fan_out,) if stack is None else (stack, fan_out)
        w = jax.random.uniform(next(keys), w_shape, jnp.float32, -bound, bound)
        b = jax.random.uniform(next(keys), b_shape, jnp.float32, -bound, bound)
        return w.astype(jnp.bfloat16), b.astype(jnp.bfloat16)

    p = {}
    # BasisFunctionLearner fc1..fc6 (fc2..fc5 stacked on a leading axis).
    p["bl_w1"], p["bl_b1"] = linear(INPUT_DIM, BL_HIDDEN)
    p["bl_wm"], p["bl_bm"] = linear(BL_HIDDEN, BL_HIDDEN, stack=N_MID)
    p["bl_w6"], p["bl_b6"] = linear(BL_HIDDEN, BASIS_DIM)
    # WeightsGenerator.top_attention_layer (Q|K|V fused).
    p["top_wqkv"], p["top_bqkv"] = linear(BASIS_DIM, 3 * WG_HIDDEN)
    p["top_w0"], p["top_b0"] = linear(WG_HIDDEN, 2 * WG_HIDDEN)
    p["top_w1"], p["top_b1"] = linear(2 * WG_HIDDEN, WG_HIDDEN)
    # WeightsGenerator.attention_layers, stacked on a leading axis (Q|K|V fused).
    p["att_wqkv"], p["att_bqkv"] = linear(WG_HIDDEN, 3 * WG_HIDDEN, stack=NUM_ATT_LAYERS)
    p["att_w0"], p["att_b0"] = linear(WG_HIDDEN, 2 * WG_HIDDEN, stack=NUM_ATT_LAYERS)
    p["att_w1"], p["att_b1"] = linear(2 * WG_HIDDEN, WG_HIDDEN, stack=NUM_ATT_LAYERS)
    # WeightsGenerator tail: fc1, fc2, final_dense.
    p["wg_w1"], p["wg_b1"] = linear(WG_HIDDEN, WG_HIDDEN)
    p["wg_w2"], p["wg_b2"] = linear(WG_HIDDEN, WG_HIDDEN)
    p["wg_wf"], p["wg_bf"] = linear(WG_HIDDEN, BASIS_DIM)
    return p


if __name__ == "__main__":
    key = jax.random.PRNGKey(0)
    kx, kp = jax.random.split(key)
    B_TASKS = 32                                      # 2 grid steps of 16 tasks each
    x = jax.random.normal(kx, (B_TASKS, NUM_POINTS, INPUT_DIM), jnp.float32)
    params = init_params(kp)

    weights, pred = jax.block_until_ready(few_shot_forward(x, params))

    ref_w, ref_p = few_shot_reference(x, params)
    assert weights.shape == (B_TASKS, NUM_POINTS, BASIS_DIM)
    assert pred.shape == (B_TASKS, NUM_POINTS)
    assert jnp.allclose(weights, ref_w, atol=1e-3, rtol=1e-3), "weights mismatch vs reference"
    assert jnp.allclose(pred, ref_p, atol=1e-3, rtol=1e-3), "pred mismatch vs reference"
    print("KERNEL_OK")
</pallas_src>

<mosaic_0001>
module attributes {stable_mosaic.version = 11 : i64} {
  func.func @model_kernel(%arg0: i32, %arg1: memref<128x2xf32, #tpu.memory_space<vmem>>, %arg2: memref<2x64xbf16, #tpu.memory_space<vmem>>, %arg3: memref<4x64x64xbf16, #tpu.memory_space<vmem>>, %arg4: memref<64x32xbf16, #tpu.memory_space<vmem>>, %arg5: memref<32x384xbf16, #tpu.memory_space<vmem>>, %arg6: memref<128x256xbf16, #tpu.memory_space<vmem>>, %arg7: memref<256x128xbf16, #tpu.memory_space<vmem>>, %arg8: memref<2x128x384xbf16, #tpu.memory_space<vmem>>, %arg9: memref<2x128x256xbf16, #tpu.memory_space<vmem>>, %arg10: memref<2x256x128xbf16, #tpu.memory_space<vmem>>, %arg11: memref<128x128xbf16, #tpu.memory_space<vmem>>, %arg12: memref<128x128xbf16, #tpu.memory_space<vmem>>, %arg13: memref<128x32xbf16, #tpu.memory_space<vmem>>, %arg14: memref<18x384xbf16, #tpu.memory_space<vmem>>, %arg15: memref<128x128xf32, #tpu.memory_space<vmem>>) attributes {dimension_semantics = [#tpu.dimension_semantics<parallel>], iteration_bounds = array<i64: 2>, scalar_prefetch = 0 : i64, scratch_operands = 0 : i64, tpu.core_type = #tpu.core_type<tc>, window_params = [{transform_indices = @transform_0, window_bounds = array<i64: 128, 2>}, {pipeline_mode = #tpu.pipeline_mode<synchronous>, transform_indices = @transform_1, window_bounds = array<i64: 2, 64>}, {pipeline_mode = #tpu.pipeline_mode<synchronous>, transform_indices = @transform_2, window_bounds = array<i64: 4, 64, 64>}, {pipeline_mode = #tpu.pipeline_mode<synchronous>, transform_indices = @transform_3, window_bounds = array<i64: 64, 32>}, {pipeline_mode = #tpu.pipeline_mode<synchronous>, transform_indices = @transform_4, window_bounds = array<i64: 32, 384>}, {pipeline_mode = #tpu.pipeline_mode<synchronous>, transform_indices = @transform_5, window_bounds = array<i64: 128, 256>}, {pipeline_mode = #tpu.pipeline_mode<synchronous>, transform_indices = @transform_6, window_bounds = array<i64: 256, 128>}, {pipeline_mode = #tpu.pipeline_mode<synchronous>, transform_indices = @transform_7, window_bounds = array<i64: 2, 128, 384>}, {pipeline_mode = #tpu.pipeline_mode<synchronous>, transform_indices = @transform_8, window_bounds = array<i64: 2, 128, 256>}, {pipeline_mode = #tpu.pipeline_mode<synchronous>, transform_indices = @transform_9, window_bounds = array<i64: 2, 256, 128>}, {pipeline_mode = #tpu.pipeline_mode<synchronous>, transform_indices = @transform_10, window_bounds = array<i64: 128, 128>}, {pipeline_mode = #tpu.pipeline_mode<synchronous>, transform_indices = @transform_11, window_bounds = array<i64: 128, 128>}, {pipeline_mode = #tpu.pipeline_mode<synchronous>, transform_indices = @transform_12, window_bounds = array<i64: 128, 32>}, {pipeline_mode = #tpu.pipeline_mode<synchronous>, transform_indices = @transform_13, window_bounds = array<i64: 18, 384>}, {transform_indices = @transform_14, window_bounds = array<i64: 128, 128>}]} {
    %c0 = arith.constant 0 : index
    %c0_0 = arith.constant 0 : index
    %0 = vector.load %arg14[%c0, %c0_0] : memref<18x384xbf16, #tpu.memory_space<vmem>>, vector<18x384xbf16>
    %1 = arith.extf %0 : vector<18x384xbf16> to vector<18x384xf32>
    %c0_1 = arith.constant 0 : index
    %c0_2 = arith.constant 0 : index
    %2 = vector.load %arg1[%c0_1, %c0_2] : memref<128x2xf32, #tpu.memory_space<vmem>>, vector<128x2xf32>
    %c0_3 = arith.constant 0 : index
    %c0_4 = arith.constant 0 : index
    %3 = vector.load %arg2[%c0_3, %c0_4] : memref<2x64xbf16, #tpu.memory_space<vmem>>, vector<2x64xbf16>
    %4 = arith.extf %3 : vector<2x64xbf16> to vector<2x64xf32>
    %cst = arith.constant dense<0.000000e+00> : vector<128x64xf32>
    %5 = tpu.matmul %2, %4, %cst {dimension_numbers = #tpu.dot_dimension_numbers<[1], [0], [0], [1], [0, 0, 1, 1], [], []>} : vector<128x2xf32>, vector<2x64xf32>, vector<128x64xf32> -> vector<128x64xf32>
    %6 = vector.extract_strided_slice %1 {offsets = [0, 0], sizes = [1, 64], strides = [1, 1]} : vector<18x384xf32> to vector<1x64xf32>
    %7 = vector.broadcast %6 : vector<1x64xf32> to vector<128x64xf32>
    %8 = arith.addf %5, %7 : vector<128x64xf32>
    %cst_5 = arith.constant 0.000000e+00 : f32
    %9 = vector.broadcast %cst_5 : f32 to vector<128x64xf32>
    %10 = arith.maximumf %8, %9 : vector<128x64xf32>
    %c0_6 = arith.constant 0 : index
    %c0_7 = arith.constant 0 : index
    %c0_8 = arith.constant 0 : index
    %11 = vector.load %arg3[%c0_6, %c0_7, %c0_8] : memref<4x64x64xbf16, #tpu.memory_space<vmem>>, vector<1x64x64xbf16>
    %12 = vector.shape_cast %11 : vector<1x64x64xbf16> to vector<64x64xbf16>
    %13 = arith.extf %12 : vector<64x64xbf16> to vector<64x64xf32>
    %cst_9 = arith.constant dense<0.000000e+00> : vector<128x64xf32>
    %14 = tpu.matmul %10, %13, %cst_9 {dimension_numbers = #tpu.dot_dimension_numbers<[1], [0], [0], [1], [0, 0, 1, 1], [], []>} : vector<128x64xf32>, vector<64x64xf32>, vector<128x64xf32> -> vector<128x64xf32>
    %15 = vector.extract_strided_slice %1 {offsets = [1, 0], sizes = [1, 64], strides = [1, 1]} : vector<18x384xf32> to vector<1x64xf32>
    %16 = vector.broadcast %15 : vector<1x64xf32> to vector<128x64xf32>
    %17 = arith.addf %14, %16 : vector<128x64xf32>
    %cst_10 = arith.constant 0.000000e+00 : f32
    %18 = vector.broadcast %cst_10 : f32 to vector<128x64xf32>
    %19 = arith.maximumf %17, %18 : vector<128x64xf32>
    %c1 = arith.constant 1 : index
    %c0_11 = arith.constant 0 : index
    %c0_12 = arith.constant 0 : index
    %20 = vector.load %arg3[%c1, %c0_11, %c0_12] : memref<4x64x64xbf16, #tpu.memory_space<vmem>>, vector<1x64x64xbf16>
    %21 = vector.shape_cast %20 : vector<1x64x64xbf16> to vector<64x64xbf16>
    %22 = arith.extf %21 : vector<64x64xbf16> to vector<64x64xf32>
    %cst_13 = arith.constant dense<0.000000e+00> : vector<128x64xf32>
    %23 = tpu.matmul %19, %22, %cst_13 {dimension_numbers = #tpu.dot_dimension_numbers<[1], [0], [0], [1], [0, 0, 1, 1], [], []>} : vector<128x64xf32>, vector<64x64xf32>, vector<128x64xf32> -> vector<128x64xf32>
    %24 = vector.extract_strided_slice %1 {offsets = [2, 0], sizes = [1, 64], strides = [1, 1]} : vector<18x384xf32> to vector<1x64xf32>
    %25 = vector.broadcast %24 : vector<1x64xf32> to vector<128x64xf32>
    %26 = arith.addf %23, %25 : vector<128x64xf32>
    %cst_14 = arith.constant 0.000000e+00 : f32
    %27 = vector.broadcast %cst_14 : f32 to vector<128x64xf32>
    %28 = arith.maximumf %26, %27 : vector<128x64xf32>
    %c2 = arith.constant 2 : index
    %c0_15 = arith.constant 0 : index
    %c0_16 = arith.constant 0 : index
    %29 = vector.load %arg3[%c2, %c0_15, %c0_16] : memref<4x64x64xbf16, #tpu.memory_space<vmem>>, vector<1x64x64xbf16>
    %30 = vector.shape_cast %29 : vector<1x64x64xbf16> to vector<64x64xbf16>
    %31 = arith.extf %30 : vector<64x64xbf16> to vector<64x64xf32>
    %cst_17 = arith.constant dense<0.000000e+00> : vector<128x64xf32>
    %32 = tpu.matmul %28, %31, %cst_17 {dimension_numbers = #tpu.dot_dimension_numbers<[1], [0], [0], [1], [0, 0, 1, 1], [], []>} : vector<128x64xf32>, vector<64x64xf32>, vector<128x64xf32> -> vector<128x64xf32>
    %33 = vector.extract_strided_slice %1 {offsets = [3, 0], sizes = [1, 64], strides = [1, 1]} : vector<18x384xf32> to vector<1x64xf32>
    %34 = vector.broadcast %33 : vector<1x64xf32> to vector<128x64xf32>
    %35 = arith.addf %32, %34 : vector<128x64xf32>
    %cst_18 = arith.constant 0.000000e+00 : f32
    %36 = vector.broadcast %cst_18 : f32 to vector<128x64xf32>
    %37 = arith.maximumf %35, %36 : vector<128x64xf32>
    %c3 = arith.constant 3 : index
    %c0_19 = arith.constant 0 : index
    %c0_20 = arith.constant 0 : index
    %38 = vector.load %arg3[%c3, %c0_19, %c0_20] : memref<4x64x64xbf16, #tpu.memory_space<vmem>>, vector<1x64x64xbf16>
    %39 = vector.shape_cast %38 : vector<1x64x64xbf16> to vector<64x64xbf16>
    %40 = arith.extf %39 : vector<64x64xbf16> to vector<64x64xf32>
    %cst_21 = arith.constant dense<0.000000e+00> : vector<128x64xf32>
    %41 = tpu.matmul %37, %40, %cst_21 {dimension_numbers = #tpu.dot_dimension_numbers<[1], [0], [0], [1], [0, 0, 1, 1], [], []>} : vector<128x64xf32>, vector<64x64xf32>, vector<128x64xf32> -> vector<128x64xf32>
    %42 = vector.extract_strided_slice %1 {offsets = [4, 0], sizes = [1, 64], strides = [1, 1]} : vector<18x384xf32> to vector<1x64xf32>
    %43 = vector.broadcast %42 : vector<1x64xf32> to vector<128x64xf32>
    %44 = arith.addf %41, %43 : vector<128x64xf32>
    %cst_22 = arith.constant 0.000000e+00 : f32
    %45 = vector.broadcast %cst_22 : f32 to vector<128x64xf32>
    %46 = arith.maximumf %44, %45 : vector<128x64xf32>
    %c0_23 = arith.constant 0 : index
    %c0_24 = arith.constant 0 : index
    %47 = vector.load %arg4[%c0_23, %c0_24] : memref<64x32xbf16, #tpu.memory_space<vmem>>, vector<64x32xbf16>
    %48 = arith.extf %47 : vector<64x32xbf16> to vector<64x32xf32>
    %cst_25 = arith.constant dense<0.000000e+00> : vector<128x32xf32>
    %49 = tpu.matmul %46, %48, %cst_25 {dimension_numbers = #tpu.dot_dimension_numbers<[1], [0], [0], [1], [0, 0, 1, 1], [], []>} : vector<128x64xf32>, vector<64x32xf32>, vector<128x32xf32> -> vector<128x32xf32>
    %50 = vector.extract_strided_slice %1 {offsets = [5, 0], sizes = [1, 32], strides = [1, 1]} : vector<18x384xf32> to vector<1x32xf32>
    %51 = vector.broadcast %50 : vector<1x32xf32> to vector<128x32xf32>
    %52 = arith.addf %49, %51 : vector<128x32xf32>
    %c0_26 = arith.constant 0 : index
    %c0_27 = arith.constant 0 : index
    %53 = vector.load %arg5[%c0_26, %c0_27] : memref<32x384xbf16, #tpu.memory_space<vmem>>, vector<32x384xbf16>
    %c0_28 = arith.constant 0 : index
    %c0_29 = arith.constant 0 : index
    %54 = vector.load %arg6[%c0_28, %c0_29] : memref<128x256xbf16, #tpu.memory_space<vmem>>, vector<128x256xbf16>
    %c0_30 = arith.constant 0 : index
    %c0_31 = arith.constant 0 : index
    %55 = vector.load %arg7[%c0_30, %c0_31] : memref<256x128xbf16, #tpu.memory_space<vmem>>, vector<256x128xbf16>
    %56 = arith.extf %53 : vector<32x384xbf16> to vector<32x384xf32>
    %cst_32 = arith.constant dense<0.000000e+00> : vector<128x384xf32>
    %57 = tpu.matmul %52, %56, %cst_32 {dimension_numbers = #tpu.dot_dimension_numbers<[1], [0], [0], [1], [0, 0, 1, 1], [], []>} : vector<128x32xf32>, vector<32x384xf32>, vector<128x384xf32> -> vector<128x384xf32>
    %58 = vector.extract_strided_slice %1 {offsets = [6, 0], sizes = [1, 384], strides = [1, 1]} : vector<18x384xf32> to vector<1x384xf32>
    %59 = vector.broadcast %58 : vector<1x384xf32> to vector<128x384xf32>
    %60 = arith.addf %57, %59 : vector<128x384xf32>
    %61 = vector.extract_strided_slice %60 {offsets = [0, 0], sizes = [128, 128], strides = [1, 1]} : vector<128x384xf32> to vector<128x128xf32>
    %62 = vector.shape_cast %61 : vector<128x128xf32> to vector<16x8x128xf32>
    %63 = vector.extract_strided_slice %60 {offsets = [0, 128], sizes = [128, 128], strides = [1, 1]} : vector<128x384xf32> to vector<128x128xf32>
    %64 = vector.shape_cast %63 : vector<128x128xf32> to vector<16x8x128xf32>
    %65 = vector.extract_strided_slice %60 {offsets = [0, 256], sizes = [128, 128], strides = [1, 1]} : vector<128x384xf32> to vector<128x128xf32>
    %66 = vector.shape_cast %65 : vector<128x128xf32> to vector<16x8x128xf32>
    "tpu.trace_start"() <{level = 10 : i32, message = "bqd,bkd->bqk"}> : () -> ()
    %cst_33 = arith.constant dense<0.000000e+00> : vector<16x8x8xf32>
    %67 = tpu.matmul %62, %64, %cst_33 {dimension_numbers = #tpu.dot_dimension_numbers<[2], [2], [1], [1], [0, 0, 0, 1, 1, 1], [0], [0]>} : vector<16x8x128xf32>, vector<16x8x128xf32>, vector<16x8x8xf32> -> vector<16x8x8xf32>
    "tpu.trace_stop"() : () -> ()
    %cst_34 = arith.constant 0.0883883461 : f32
    %68 = vector.broadcast %cst_34 : f32 to vector<16x8x8xf32>
    %69 = arith.mulf %67, %68 : vector<16x8x8xf32>
    %cst_35 = arith.constant dense<0xFF800000> : vector<16x8xf32>
    %70 = vector.multi_reduction <maximumf>, %69, %cst_35 [2] : vector<16x8x8xf32> to vector<16x8xf32>
    %71 = vector.shape_cast %70 : vector<16x8xf32> to vector<16x8x1xf32>
    %72 = vector.broadcast %71 : vector<16x8x1xf32> to vector<16x8x8xf32>
    %73 = arith.subf %69, %72 : vector<16x8x8xf32>
    %74 = math.exp %73 : vector<16x8x8xf32>
    %cst_36 = arith.constant dense<0.000000e+00> : vector<16x8xf32>
    %75 = vector.multi_reduction <add>, %74, %cst_36 [2] : vector<16x8x8xf32> to vector<16x8xf32>
    %76 = vector.shape_cast %75 : vector<16x8xf32> to vector<16x8x1xf32>
    %77 = vector.broadcast %76 : vector<16x8x1xf32> to vector<16x8x8xf32>
    %78 = arith.divf %74, %77 : vector<16x8x8xf32>
    "tpu.trace_start"() <{level = 10 : i32, message = "bqk,bkd->bqd"}> : () -> ()
    %cst_37 = arith.constant dense<0.000000e+00> : vector<16x8x128xf32>
    %79 = tpu.matmul %78, %66, %cst_37 {dimension_numbers = #tpu.dot_dimension_numbers<[2], [1], [1], [2], [0, 0, 0, 1, 1, 2], [0], [0]>} : vector<16x8x8xf32>, vector<16x8x128xf32>, vector<16x8x128xf32> -> vector<16x8x128xf32>
    "tpu.trace_stop"() : () -> ()
    %80 = arith.addf %79, %62 : vector<16x8x128xf32>
    %cst_38 = arith.constant dense<0.000000e+00> : vector<16x8xf32>
    %81 = vector.multi_reduction <add>, %80, %cst_38 [2] : vector<16x8x128xf32> to vector<16x8xf32>
    %82 = vector.shape_cast %81 : vector<16x8xf32> to vector<16x8x1xf32>
    %cst_39 = arith.constant 1.280000e+02 : f32
    %83 = vector.broadcast %cst_39 : f32 to vector<16x8x1xf32>
    %84 = arith.divf %82, %83 : vector<16x8x1xf32>
    %85 = vector.broadcast %84 : vector<16x8x1xf32> to vector<16x8x128xf32>
    %86 = arith.subf %80, %85 : vector<16x8x128xf32>
    %87 = arith.mulf %86, %86 : vector<16x8x128xf32>
    %cst_40 = arith.constant dense<0.000000e+00> : vector<16x8xf32>
    %88 = vector.multi_reduction <add>, %87, %cst_40 [2] : vector<16x8x128xf32> to vector<16x8xf32>
    %89 = vector.shape_cast %88 : vector<16x8xf32> to vector<16x8x1xf32>
    %cst_41 = arith.constant 1.280000e+02 : f32
    %90 = vector.broadcast %cst_41 : f32 to vector<16x8x1xf32>
    %91 = arith.divf %89, %90 : vector<16x8x1xf32>
    %cst_42 = arith.constant 9.99999974E-6 : f32
    %92 = vector.broadcast %cst_42 : f32 to vector<16x8x1xf32>
    %93 = arith.addf %91, %92 : vector<16x8x1xf32>
    %94 = math.rsqrt %93 : vector<16x8x1xf32>
    %95 = vector.broadcast %94 : vector<16x8x1xf32> to vector<16x8x128xf32>
    %96 = arith.mulf %86, %95 : vector<16x8x128xf32>
    %97 = vector.shape_cast %96 : vector<16x8x128xf32> to vector<128x128xf32>
    %98 = arith.extf %54 : vector<128x256xbf16> to vector<128x256xf32>
    %cst_43 = arith.constant dense<0.000000e+00> : vector<128x256xf32>
    %99 = tpu.matmul %97, %98, %cst_43 {dimension_numbers = #tpu.dot_dimension_numbers<[1], [0], [0], [1], [0, 0, 1, 1], [], []>} : vector<128x128xf32>, vector<128x256xf32>, vector<128x256xf32> -> vector<128x256xf32>
    %100 = vector.extract_strided_slice %1 {offsets = [7, 0], sizes = [1, 256], strides = [1, 1]} : vector<18x384xf32> to vector<1x256xf32>
    %101 = vector.broadcast %100 : vector<1x256xf32> to vector<128x256xf32>
    %102 = arith.addf %99, %101 : vector<128x256xf32>
    %cst_44 = arith.constant 0.000000e+00 : f32
    %103 = vector.broadcast %cst_44 : f32 to vector<128x256xf32>
    %104 = arith.maximumf %102, %103 : vector<128x256xf32>
    %105 = arith.extf %55 : vector<256x128xbf16> to vector<256x128xf32>
    %cst_45 = arith.constant dense<0.000000e+00> : vector<128x128xf32>
    %106 = tpu.matmul %104, %105, %cst_45 {dimension_numbers = #tpu.dot_dimension_numbers<[1], [0], [0], [1], [0, 0, 1, 1], [], []>} : vector<128x256xf32>, vector<256x128xf32>, vector<128x128xf32> -> vector<128x128xf32>
    %107 = vector.extract_strided_slice %1 {offsets = [8, 0], sizes = [1, 128], strides = [1, 1]} : vector<18x384xf32> to vector<1x128xf32>
    %108 = vector.broadcast %107 : vector<1x128xf32> to vector<128x128xf32>
    %109 = arith.addf %106, %108 : vector<128x128xf32>
    %110 = arith.addf %97, %109 : vector<128x128xf32>
    %cst_46 = arith.constant dense<0.000000e+00> : vector<128xf32>
    %111 = vector.multi_reduction <add>, %110, %cst_46 [1] : vector<128x128xf32> to vector<128xf32>
    %112 = vector.shape_cast %111 : vector<128xf32> to vector<128x1xf32>
    %cst_47 = arith.constant 1.280000e+02 : f32
    %113 = vector.broadcast %cst_47 : f32 to vector<128x1xf32>
    %114 = arith.divf %112, %113 : vector<128x1xf32>
    %115 = vector.broadcast %114 : vector<128x1xf32> to vector<128x128xf32>
    %116 = arith.subf %110, %115 : vector<128x128xf32>
    %117 = arith.mulf %116, %116 : vector<128x128xf32>
    %cst_48 = arith.constant dense<0.000000e+00> : vector<128xf32>
    %118 = vector.multi_reduction <add>, %117, %cst_48 [1] : vector<128x128xf32> to vector<128xf32>
    %119 = vector.shape_cast %118 : vector<128xf32> to vector<128x1xf32>
    %cst_49 = arith.constant 1.280000e+02 : f32
    %120 = vector.broadcast %cst_49 : f32 to vector<128x1xf32>
    %121 = arith.divf %119, %120 : vector<128x1xf32>
    %cst_50 = arith.constant 9.99999974E-6 : f32
    %122 = vector.broadcast %cst_50 : f32 to vector<128x1xf32>
    %123 = arith.addf %121, %122 : vector<128x1xf32>
    %124 = math.rsqrt %123 : vector<128x1xf32>
    %125 = vector.broadcast %124 : vector<128x1xf32> to vector<128x128xf32>
    %126 = arith.mulf %116, %125 : vector<128x128xf32>
    %c0_51 = arith.constant 0 : index
    %c0_52 = arith.constant 0 : index
    %c0_53 = arith.constant 0 : index
    %127 = vector.load %arg8[%c0_51, %c0_52, %c0_53] : memref<2x128x384xbf16, #tpu.memory_space<vmem>>, vector<1x128x384xbf16>
    %128 = vector.shape_cast %127 : vector<1x128x384xbf16> to vector<128x384xbf16>
    %c0_54 = arith.constant 0 : index
    %c0_55 = arith.constant 0 : index
    %c0_56 = arith.constant 0 : index
    %129 = vector.load %arg9[%c0_54, %c0_55, %c0_56] : memref<2x128x256xbf16, #tpu.memory_space<vmem>>, vector<1x128x256xbf16>
    %130 = vector.shape_cast %129 : vector<1x128x256xbf16> to vector<128x256xbf16>
    %c0_57 = arith.constant 0 : index
    %c0_58 = arith.constant 0 : index
    %c0_59 = arith.constant 0 : index
    %131 = vector.load %arg10[%c0_57, %c0_58, %c0_59] : memref<2x256x128xbf16, #tpu.memory_space<vmem>>, vector<1x256x128xbf16>
    %132 = vector.shape_cast %131 : vector<1x256x128xbf16> to vector<256x128xbf16>
    %133 = arith.extf %128 : vector<128x384xbf16> to vector<128x384xf32>
    %cst_60 = arith.constant dense<0.000000e+00> : vector<128x384xf32>
    %134 = tpu.matmul %126, %133, %cst_60 {dimension_numbers = #tpu.dot_dimension_numbers<[1], [0], [0], [1], [0, 0, 1, 1], [], []>} : vector<128x128xf32>, vector<128x384xf32>, vector<128x384xf32> -> vector<128x384xf32>
    %135 = vector.extract_strided_slice %1 {offsets = [9, 0], sizes = [1, 384], strides = [1, 1]} : vector<18x384xf32> to vector<1x384xf32>
    %136 = vector.broadcast %135 : vector<1x384xf32> to vector<128x384xf32>
    %137 = arith.addf %134, %136 : vector<128x384xf32>
    %138 = vector.extract_strided_slice %137 {offsets = [0, 0], sizes = [128, 128], strides = [1, 1]} : vector<128x384xf32> to vector<128x128xf32>
    %139 = vector.shape_cast %138 : vector<128x128xf32> to vector<16x8x128xf32>
    %140 = vector.extract_strided_slice %137 {offsets = [0, 128], sizes = [128, 128], strides = [1, 1]} : vector<128x384xf32> to vector<128x128xf32>
    %141 = vector.shape_cast %140 : vector<128x128xf32> to vector<16x8x128xf32>
    %142 = vector.extract_strided_slice %137 {offsets = [0, 256], sizes = [128, 128], strides = [1, 1]} : vector<128x384xf32> to vector<128x128xf32>
    %143 = vector.shape_cast %142 : vector<128x128xf32> to vector<16x8x128xf32>
    "tpu.trace_start"() <{level = 10 : i32, message = "bqd,bkd->bqk"}> : () -> ()
    %cst_61 = arith.constant dense<0.000000e+00> : vector<16x8x8xf32>
    %144 = tpu.matmul %139, %141, %cst_61 {dimension_numbers = #tpu.dot_dimension_numbers<[2], [2], [1], [1], [0, 0, 0, 1, 1, 1], [0], [0]>} : vector<16x8x128xf32>, vector<16x8x128xf32>, vector<16x8x8xf32> -> vector<16x8x8xf32>
    "tpu.trace_stop"() : () -> ()
    %cst_62 = arith.constant 0.0883883461 : f32
    %145 = vector.broadcast %cst_62 : f32 to vector<16x8x8xf32>
    %146 = arith.mulf %144, %145 : vector<16x8x8xf32>
    %cst_63 = arith.constant dense<0xFF800000> : vector<16x8xf32>
    %147 = vector.multi_reduction <maximumf>, %146, %cst_63 [2] : vector<16x8x8xf32> to vector<16x8xf32>
    %148 = vector.shape_cast %147 : vector<16x8xf32> to vector<16x8x1xf32>
    %149 = vector.broadcast %148 : vector<16x8x1xf32> to vector<16x8x8xf32>
    %150 = arith.subf %146, %149 : vector<16x8x8xf32>
    %151 = math.exp %150 : vector<16x8x8xf32>
    %cst_64 = arith.constant dense<0.000000e+00> : vector<16x8xf32>
    %152 = vector.multi_reduction <add>, %151, %cst_64 [2] : vector<16x8x8xf32> to vector<16x8xf32>
    %153 = vector.shape_cast %152 : vector<16x8xf32> to vector<16x8x1xf32>
    %154 = vector.broadcast %153 : vector<16x8x1xf32> to vector<16x8x8xf32>
    %155 = arith.divf %151, %154 : vector<16x8x8xf32>
    "tpu.trace_start"() <{level = 10 : i32, message = "bqk,bkd->bqd"}> : () -> ()
    %cst_65 = arith.constant dense<0.000000e+00> : vector<16x8x128xf32>
    %156 = tpu.matmul %155, %143, %cst_65 {dimension_numbers = #tpu.dot_dimension_numbers<[2], [1], [1], [2], [0, 0, 0, 1, 1, 2], [0], [0]>} : vector<16x8x8xf32>, vector<16x8x128xf32>, vector<16x8x128xf32> -> vector<16x8x128xf32>
    "tpu.trace_stop"() : () -> ()
    %157 = arith.addf %156, %139 : vector<16x8x128xf32>
    %cst_66 = arith.constant dense<0.000000e+00> : vector<16x8xf32>
    %158 = vector.multi_reduction <add>, %157, %cst_66 [2] : vector<16x8x128xf32> to vector<16x8xf32>
    %159 = vector.shape_cast %158 : vector<16x8xf32> to vector<16x8x1xf32>
    %cst_67 = arith.constant 1.280000e+02 : f32
    %160 = vector.broadcast %cst_67 : f32 to vector<16x8x1xf32>
    %161 = arith.divf %159, %160 : vector<16x8x1xf32>
    %162 = vector.broadcast %161 : vector<16x8x1xf32> to vector<16x8x128xf32>
    %163 = arith.subf %157, %162 : vector<16x8x128xf32>
    %164 = arith.mulf %163, %163 : vector<16x8x128xf32>
    %cst_68 = arith.constant dense<0.000000e+00> : vector<16x8xf32>
    %165 = vector.multi_reduction <add>, %164, %cst_68 [2] : vector<16x8x128xf32> to vector<16x8xf32>
    %166 = vector.shape_cast %165 : vector<16x8xf32> to vector<16x8x1xf32>
    %cst_69 = arith.constant 1.280000e+02 : f32
    %167 = vector.broadcast %cst_69 : f32 to vector<16x8x1xf32>
    %168 = arith.divf %166, %167 : vector<16x8x1xf32>
    %cst_70 = arith.constant 9.99999974E-6 : f32
    %169 = vector.broadcast %cst_70 : f32 to vector<16x8x1xf32>
    %170 = arith.addf %168, %169 : vector<16x8x1xf32>
    %171 = math.rsqrt %170 : vector<16x8x1xf32>
    %172 = vector.broadcast %171 : vector<16x8x1xf32> to vector<16x8x128xf32>
    %173 = arith.mulf %163, %172 : vector<16x8x128xf32>
    %174 = vector.shape_cast %173 : vector<16x8x128xf32> to vector<128x128xf32>
    %175 = arith.extf %130 : vector<128x256xbf16> to vector<128x256xf32>
    %cst_71 = arith.constant dense<0.000000e+00> : vector<128x256xf32>
    %176 = tpu.matmul %174, %175, %cst_71 {dimension_numbers = #tpu.dot_dimension_numbers<[1], [0], [0], [1], [0, 0, 1, 1], [], []>} : vector<128x128xf32>, vector<128x256xf32>, vector<128x256xf32> -> vector<128x256xf32>
    %177 = vector.extract_strided_slice %1 {offsets = [10, 0], sizes = [1, 256], strides = [1, 1]} : vector<18x384xf32> to vector<1x256xf32>
    %178 = vector.broadcast %177 : vector<1x256xf32> to vector<128x256xf32>
    %179 = arith.addf %176, %178 : vector<128x256xf32>
    %cst_72 = arith.constant 0.000000e+00 : f32
    %180 = vector.broadcast %cst_72 : f32 to vector<128x256xf32>
    %181 = arith.maximumf %179, %180 : vector<128x256xf32>
    %182 = arith.extf %132 : vector<256x128xbf16> to vector<256x128xf32>
    %cst_73 = arith.constant dense<0.000000e+00> : vector<128x128xf32>
    %183 = tpu.matmul %181, %182, %cst_73 {dimension_numbers = #tpu.dot_dimension_numbers<[1], [0], [0], [1], [0, 0, 1, 1], [], []>} : vector<128x256xf32>, vector<256x128xf32>, vector<128x128xf32> -> vector<128x128xf32>
    %184 = vector.extract_strided_slice %1 {offsets = [11, 0], sizes = [1, 128], strides = [1, 1]} : vector<18x384xf32> to vector<1x128xf32>
    %185 = vector.broadcast %184 : vector<1x128xf32> to vector<128x128xf32>
    %186 = arith.addf %183, %185 : vector<128x128xf32>
    %187 = arith.addf %174, %186 : vector<128x128xf32>
    %cst_74 = arith.constant dense<0.000000e+00> : vector<128xf32>
    %188 = vector.multi_reduction <add>, %187, %cst_74 [1] : vector<128x128xf32> to vector<128xf32>
    %189 = vector.shape_cast %188 : vector<128xf32> to vector<128x1xf32>
    %cst_75 = arith.constant 1.280000e+02 : f32
    %190 = vector.broadcast %cst_75 : f32 to vector<128x1xf32>
    %191 = arith.divf %189, %190 : vector<128x1xf32>
    %192 = vector.broadcast %191 : vector<128x1xf32> to vector<128x128xf32>
    %193 = arith.subf %187, %192 : vector<128x128xf32>
    %194 = arith.mulf %193, %193 : vector<128x128xf32>
    %cst_76 = arith.constant dense<0.000000e+00> : vector<128xf32>
    %195 = vector.multi_reduction <add>, %194, %cst_76 [1] : vector<128x128xf32> to vector<128xf32>
    %196 = vector.shape_cast %195 : vector<128xf32> to vector<128x1xf32>
    %cst_77 = arith.constant 1.280000e+02 : f32
    %197 = vector.broadcast %cst_77 : f32 to vector<128x1xf32>
    %198 = arith.divf %196, %197 : vector<128x1xf32>
    %cst_78 = arith.constant 9.99999974E-6 : f32
    %199 = vector.broadcast %cst_78 : f32 to vector<128x1xf32>
    %200 = arith.addf %198, %199 : vector<128x1xf32>
    %201 = math.rsqrt %200 : vector<128x1xf32>
    %202 = vector.broadcast %201 : vector<128x1xf32> to vector<128x128xf32>
    %203 = arith.mulf %193, %202 : vector<128x128xf32>
    %c1_79 = arith.constant 1 : index
    %c0_80 = arith.constant 0 : index
    %c0_81 = arith.constant 0 : index
    %204 = vector.load %arg8[%c1_79, %c0_80, %c0_81] : memref<2x128x384xbf16, #tpu.memory_space<vmem>>, vector<1x128x384xbf16>
    %205 = vector.shape_cast %204 : vector<1x128x384xbf16> to vector<128x384xbf16>
    %c1_82 = arith.constant 1 : index
    %c0_83 = arith.constant 0 : index
    %c0_84 = arith.constant 0 : index
    %206 = vector.load %arg9[%c1_82, %c0_83, %c0_84] : memref<2x128x256xbf16, #tpu.memory_space<vmem>>, vector<1x128x256xbf16>
    %207 = vector.shape_cast %206 : vector<1x128x256xbf16> to vector<128x256xbf16>
    %c1_85 = arith.constant 1 : index
    %c0_86 = arith.constant 0 : index
    %c0_87 = arith.constant 0 : index
    %208 = vector.load %arg10[%c1_85, %c0_86, %c0_87] : memref<2x256x128xbf16, #tpu.memory_space<vmem>>, vector<1x256x128xbf16>
    %209 = vector.shape_cast %208 : vector<1x256x128xbf16> to vector<256x128xbf16>
    %210 = arith.extf %205 : vector<128x384xbf16> to vector<128x384xf32>
    %cst_88 = arith.constant dense<0.000000e+00> : vector<128x384xf32>
    %211 = tpu.matmul %203, %210, %cst_88 {dimension_numbers = #tpu.dot_dimension_numbers<[1], [0], [0], [1], [0, 0, 1, 1], [], []>} : vector<128x128xf32>, vector<128x384xf32>, vector<128x384xf32> -> vector<128x384xf32>
    %212 = vector.extract_strided_slice %1 {offsets = [12, 0], sizes = [1, 384], strides = [1, 1]} : vector<18x384xf32> to vector<1x384xf32>
    %213 = vector.broadcast %212 : vector<1x384xf32> to vector<128x384xf32>
    %214 = arith.addf %211, %213 : vector<128x384xf32>
    %215 = vector.extract_strided_slice %214 {offsets = [0, 0], sizes = [128, 128], strides = [1, 1]} : vector<128x384xf32> to vector<128x128xf32>
    %216 = vector.shape_cast %215 : vector<128x128xf32> to vector<16x8x128xf32>
    %217 = vector.extract_strided_slice %214 {offsets = [0, 128], sizes = [128, 128], strides = [1, 1]} : vector<128x384xf32> to vector<128x128xf32>
    %218 = vector.shape_cast %217 : vector<128x128xf32> to vector<16x8x128xf32>
    %219 = vector.extract_strided_slice %214 {offsets = [0, 256], sizes = [128, 128], strides = [1, 1]} : vector<128x384xf32> to vector<128x128xf32>
    %220 = vector.shape_cast %219 : vector<128x128xf32> to vector<16x8x128xf32>
    "tpu.trace_start"() <{level = 10 : i32, message = "bqd,bkd->bqk"}> : () -> ()
    %cst_89 = arith.constant dense<0.000000e+00> : vector<16x8x8xf32>
    %221 = tpu.matmul %216, %218, %cst_89 {dimension_numbers = #tpu.dot_dimension_numbers<[2], [2], [1], [1], [0, 0, 0, 1, 1, 1], [0], [0]>} : vector<16x8x128xf32>, vector<16x8x128xf32>, vector<16x8x8xf32> -> vector<16x8x8xf32>
    "tpu.trace_stop"() : () -> ()
    %cst_90 = arith.constant 0.0883883461 : f32
    %222 = vector.broadcast %cst_90 : f32 to vector<16x8x8xf32>
    %223 = arith.mulf %221, %222 : vector<16x8x8xf32>
    %cst_91 = arith.constant dense<0xFF800000> : vector<16x8xf32>
    %224 = vector.multi_reduction <maximumf>, %223, %cst_91 [2] : vector<16x8x8xf32> to vector<16x8xf32>
    %225 = vector.shape_cast %224 : vector<16x8xf32> to vector<16x8x1xf32>
    %226 = vector.broadcast %225 : vector<16x8x1xf32> to vector<16x8x8xf32>
    %227 = arith.subf %223, %226 : vector<16x8x8xf32>
    %228 = math.exp %227 : vector<16x8x8xf32>
    %cst_92 = arith.constant dense<0.000000e+00> : vector<16x8xf32>
    %229 = vector.multi_reduction <add>, %228, %cst_92 [2] : vector<16x8x8xf32> to vector<16x8xf32>
    %230 = vector.shape_cast %229 : vector<16x8xf32> to vector<16x8x1xf32>
    %231 = vector.broadcast %230 : vector<16x8x1xf32> to vector<16x8x8xf32>
    %232 = arith.divf %228, %231 : vector<16x8x8xf32>
    "tpu.trace_start"() <{level = 10 : i32, message = "bqk,bkd->bqd"}> : () -> ()
    %cst_93 = arith.constant dense<0.000000e+00> : vector<16x8x128xf32>
    %233 = tpu.matmul %232, %220, %cst_93 {dimension_numbers = #tpu.dot_dimension_numbers<[2], [1], [1], [2], [0, 0, 0, 1, 1, 2], [0], [0]>} : vector<16x8x8xf32>, vector<16x8x128xf32>, vector<16x8x128xf32> -> vector<16x8x128xf32>
    "tpu.trace_stop"() : () -> ()
    %234 = arith.addf %233, %216 : vector<16x8x128xf32>
    %cst_94 = arith.constant dense<0.000000e+00> : vector<16x8xf32>
    %235 = vector.multi_reduction <add>, %234, %cst_94 [2] : vector<16x8x128xf32> to vector<16x8xf32>
    %236 = vector.shape_cast %235 : vector<16x8xf32> to vector<16x8x1xf32>
    %cst_95 = arith.constant 1.280000e+02 : f32
    %237 = vector.broadcast %cst_95 : f32 to vector<16x8x1xf32>
    %238 = arith.divf %236, %237 : vector<16x8x1xf32>
    %239 = vector.broadcast %238 : vector<16x8x1xf32> to vector<16x8x128xf32>
    %240 = arith.subf %234, %239 : vector<16x8x128xf32>
    %241 = arith.mulf %240, %240 : vector<16x8x128xf32>
    %cst_96 = arith.constant dense<0.000000e+00> : vector<16x8xf32>
    %242 = vector.multi_reduction <add>, %241, %cst_96 [2] : vector<16x8x128xf32> to vector<16x8xf32>
    %243 = vector.shape_cast %242 : vector<16x8xf32> to vector<16x8x1xf32>
    %cst_97 = arith.constant 1.280000e+02 : f32
    %244 = vector.broadcast %cst_97 : f32 to vector<16x8x1xf32>
    %245 = arith.divf %243, %244 : vector<16x8x1xf32>
    %cst_98 = arith.constant 9.99999974E-6 : f32
    %246 = vector.broadcast %cst_98 : f32 to vector<16x8x1xf32>
    %247 = arith.addf %245, %246 : vector<16x8x1xf32>
    %248 = math.rsqrt %247 : vector<16x8x1xf32>
    %249 = vector.broadcast %248 : vector<16x8x1xf32> to vector<16x8x128xf32>
    %250 = arith.mulf %240, %249 : vector<16x8x128xf32>
    %251 = vector.shape_cast %250 : vector<16x8x128xf32> to vector<128x128xf32>
    %252 = arith.extf %207 : vector<128x256xbf16> to vector<128x256xf32>
    %cst_99 = arith.constant dense<0.000000e+00> : vector<128x256xf32>
    %253 = tpu.matmul %251, %252, %cst_99 {dimension_numbers = #tpu.dot_dimension_numbers<[1], [0], [0], [1], [0, 0, 1, 1], [], []>} : vector<128x128xf32>, vector<128x256xf32>, vector<128x256xf32> -> vector<128x256xf32>
    %254 = vector.extract_strided_slice %1 {offsets = [13, 0], sizes = [1, 256], strides = [1, 1]} : vector<18x384xf32> to vector<1x256xf32>
    %255 = vector.broadcast %254 : vector<1x256xf32> to vector<128x256xf32>
    %256 = arith.addf %253, %255 : vector<128x256xf32>
    %cst_100 = arith.constant 0.000000e+00 : f32
    %257 = vector.broadcast %cst_100 : f32 to vector<128x256xf32>
    %258 = arith.maximumf %256, %257 : vector<128x256xf32>
    %259 = arith.extf %209 : vector<256x128xbf16> to vector<256x128xf32>
    %cst_101 = arith.constant dense<0.000000e+00> : vector<128x128xf32>
    %260 = tpu.matmul %258, %259, %cst_101 {dimension_numbers = #tpu.dot_dimension_numbers<[1], [0], [0], [1], [0, 0, 1, 1], [], []>} : vector<128x256xf32>, vector<256x128xf32>, vector<128x128xf32> -> vector<128x128xf32>
    %261 = vector.extract_strided_slice %1 {offsets = [14, 0], sizes = [1, 128], strides = [1, 1]} : vector<18x384xf32> to vector<1x128xf32>
    %262 = vector.broadcast %261 : vector<1x128xf32> to vector<128x128xf32>
    %263 = arith.addf %260, %262 : vector<128x128xf32>
    %264 = arith.addf %251, %263 : vector<128x128xf32>
    %cst_102 = arith.constant dense<0.000000e+00> : vector<128xf32>
    %265 = vector.multi_reduction <add>, %264, %cst_102 [1] : vector<128x128xf32> to vector<128xf32>
    %266 = vector.shape_cast %265 : vector<128xf32> to vector<128x1xf32>
    %cst_103 = arith.constant 1.280000e+02 : f32
    %267 = vector.broadcast %cst_103 : f32 to vector<128x1xf32>
    %268 = arith.divf %266, %267 : vector<128x1xf32>
    %269 = vector.broadcast %268 : vector<128x1xf32> to vector<128x128xf32>
    %270 = arith.subf %264, %269 : vector<128x128xf32>
    %271 = arith.mulf %270, %270 : vector<128x128xf32>
    %cst_104 = arith.constant dense<0.000000e+00> : vector<128xf32>
    %272 = vector.multi_reduction <add>, %271, %cst_104 [1] : vector<128x128xf32> to vector<128xf32>
    %273 = vector.shape_cast %272 : vector<128xf32> to vector<128x1xf32>
    %cst_105 = arith.constant 1.280000e+02 : f32
    %274 = vector.broadcast %cst_105 : f32 to vector<128x1xf32>
    %275 = arith.divf %273, %274 : vector<128x1xf32>
    %cst_106 = arith.constant 9.99999974E-6 : f32
    %276 = vector.broadcast %cst_106 : f32 to vector<128x1xf32>
    %277 = arith.addf %275, %276 : vector<128x1xf32>
    %278 = math.rsqrt %277 : vector<128x1xf32>
    %279 = vector.broadcast %278 : vector<128x1xf32> to vector<128x128xf32>
    %280 = arith.mulf %270, %279 : vector<128x128xf32>
    %c0_107 = arith.constant 0 : index
    %c0_108 = arith.constant 0 : index
    %281 = vector.load %arg11[%c0_107, %c0_108] : memref<128x128xbf16, #tpu.memory_space<vmem>>, vector<128x128xbf16>
    %282 = arith.extf %281 : vector<128x128xbf16> to vector<128x128xf32>
    %cst_109 = arith.constant dense<0.000000e+00> : vector<128x128xf32>
    %283 = tpu.matmul %280, %282, %cst_109 {dimension_numbers = #tpu.dot_dimension_numbers<[1], [0], [0], [1], [0, 0, 1, 1], [], []>} : vector<128x128xf32>, vector<128x128xf32>, vector<128x128xf32> -> vector<128x128xf32>
    %284 = vector.extract_strided_slice %1 {offsets = [15, 0], sizes = [1, 128], strides = [1, 1]} : vector<18x384xf32> to vector<1x128xf32>
    %285 = vector.broadcast %284 : vector<1x128xf32> to vector<128x128xf32>
    %286 = arith.addf %283, %285 : vector<128x128xf32>
    %cst_110 = arith.constant 0.000000e+00 : f32
    %287 = vector.broadcast %cst_110 : f32 to vector<128x128xf32>
    %288 = arith.maximumf %286, %287 : vector<128x128xf32>
    %c0_111 = arith.constant 0 : index
    %c0_112 = arith.constant 0 : index
    %289 = vector.load %arg12[%c0_111, %c0_112] : memref<128x128xbf16, #tpu.memory_space<vmem>>, vector<128x128xbf16>
    %290 = arith.extf %289 : vector<128x128xbf16> to vector<128x128xf32>
    %cst_113 = arith.constant dense<0.000000e+00> : vector<128x128xf32>
    %291 = tpu.matmul %288, %290, %cst_113 {dimension_numbers = #tpu.dot_dimension_numbers<[1], [0], [0], [1], [0, 0, 1, 1], [], []>} : vector<128x128xf32>, vector<128x128xf32>, vector<128x128xf32> -> vector<128x128xf32>
    %292 = vector.extract_strided_slice %1 {offsets = [16, 0], sizes = [1, 128], strides = [1, 1]} : vector<18x384xf32> to vector<1x128xf32>
    %293 = vector.broadcast %292 : vector<1x128xf32> to vector<128x128xf32>
    %294 = arith.addf %291, %293 : vector<128x128xf32>
    %cst_114 = arith.constant 0.000000e+00 : f32
    %295 = vector.broadcast %cst_114 : f32 to vector<128x128xf32>
    %296 = arith.maximumf %294, %295 : vector<128x128xf32>
    %c0_115 = arith.constant 0 : index
    %c0_116 = arith.constant 0 : index
    %297 = vector.load %arg13[%c0_115, %c0_116] : memref<128x32xbf16, #tpu.memory_space<vmem>>, vector<128x32xbf16>
    %298 = arith.extf %297 : vector<128x32xbf16> to vector<128x32xf32>
    %cst_117 = arith.constant dense<0.000000e+00> : vector<128x32xf32>
    %299 = tpu.matmul %296, %298, %cst_117 {dimension_numbers = #tpu.dot_dimension_numbers<[1], [0], [0], [1], [0, 0, 1, 1], [], []>} : vector<128x128xf32>, vector<128x32xf32>, vector<128x32xf32> -> vector<128x32xf32>
    %300 = vector.extract_strided_slice %1 {offsets = [17, 0], sizes = [1, 32], strides = [1, 1]} : vector<18x384xf32> to vector<1x32xf32>
    %301 = vector.broadcast %300 : vector<1x32xf32> to vector<128x32xf32>
    %302 = arith.addf %299, %301 : vector<128x32xf32>
    %303 = arith.mulf %52, %302 : vector<128x32xf32>
    %cst_118 = arith.constant dense<0.000000e+00> : vector<128xf32>
    %304 = vector.multi_reduction <add>, %303, %cst_118 [1] : vector<128x32xf32> to vector<128xf32>
    %305 = vector.shape_cast %304 : vector<128xf32> to vector<128x1xf32>
    %cst_119 = arith.constant 0.000000e+00 : f32
    %306 = vector.broadcast %cst_119 : f32 to vector<128x95xf32>
    %307 = tpu.concatenate %302, %305, %306 in 1 : vector<128x32xf32>, vector<128x1xf32>, vector<128x95xf32> -> vector<128x128xf32>
    %c0_120 = arith.constant 0 : index
    %c0_121 = arith.constant 0 : index
    %308 = vector.load %arg15[%c0_120, %c0_121] : memref<128x128xf32, #tpu.memory_space<vmem>>, vector<128x128xf32>
    tpu.vector_store %arg15[%c0_120, %c0_121], %307 {strides = array<i32>} : memref<128x128xf32, #tpu.memory_space<vmem>>, vector<128x128xf32>,
    return
  }
  func.func @transform_0(%arg0: i32) -> (i32, i32) {
    %c0_i32 = arith.constant 0 : i32
    %c0_i32_0 = arith.constant 0 : i32
    return %arg0, %c0_i32 : i32, i32
  }
  func.func @transform_1(%arg0: i32) -> (i32, i32) {
    %c0_i32 = arith.constant 0 : i32
    %c0_i32_0 = arith.constant 0 : i32
    %c0_i32_1 = arith.constant 0 : i32
    return %c0_i32, %c0_i32_0 : i32, i32
  }
  func.func @transform_2(%arg0: i32) -> (i32, i32, i32) {
    %c0_i32 = arith.constant 0 : i32
    %c0_i32_0 = arith.constant 0 : i32
    %c0_i32_1 = arith.constant 0 : i32
    %c0_i32_2 = arith.constant 0 : i32
    return %c0_i32, %c0_i32_0, %c0_i32_1 : i32, i32, i32
  }
  func.func @transform_3(%arg0: i32) -> (i32, i32) {
    %c0_i32 = arith.constant 0 : i32
    %c0_i32_0 = arith.constant 0 : i32
    %c0_i32_1 = arith.constant 0 : i32
    return %c0_i32, %c0_i32_0 : i32, i32
  }
  func.func @transform_4(%arg0: i32) -> (i32, i32) {
    %c0_i32 = arith.constant 0 : i32
    %c0_i32_0 = arith.constant 0 : i32
    %c0_i32_1 = arith.constant 0 : i32
    return %c0_i32, %c0_i32_0 : i32, i32
  }
  func.func @transform_5(%arg0: i32) -> (i32, i32) {
    %c0_i32 = arith.constant 0 : i32
    %c0_i32_0 = arith.constant 0 : i32
    %c0_i32_1 = arith.constant 0 : i32
    return %c0_i32, %c0_i32_0 : i32, i32
  }
  func.func @transform_6(%arg0: i32) -> (i32, i32) {
    %c0_i32 = arith.constant 0 : i32
    %c0_i32_0 = arith.constant 0 : i32
    %c0_i32_1 = arith.constant 0 : i32
    return %c0_i32, %c0_i32_0 : i32, i32
  }
  func.func @transform_7(%arg0: i32) -> (i32, i32, i32) {
    %c0_i32 = arith.constant 0 : i32
    %c0_i32_0 = arith.constant 0 : i32
    %c0_i32_1 = arith.constant 0 : i32
    %c0_i32_2 = arith.constant 0 : i32
    return %c0_i32, %c0_i32_0, %c0_i32_1 : i32, i32, i32
  }
  func.func @transform_8(%arg0: i32) -> (i32, i32, i32) {
    %c0_i32 = arith.constant 0 : i32
    %c0_i32_0 = arith.constant 0 : i32
    %c0_i32_1 = arith.constant 0 : i32
    %c0_i32_2 = arith.constant 0 : i32
    return %c0_i32, %c0_i32_0, %c0_i32_1 : i32, i32, i32
  }
  func.func @transform_9(%arg0: i32) -> (i32, i32, i32) {
    %c0_i32 = arith.constant 0 : i32
    %c0_i32_0 = arith.constant 0 : i32
    %c0_i32_1 = arith.constant 0 : i32
    %c0_i32_2 = arith.constant 0 : i32
    return %c0_i32, %c0_i32_0, %c0_i32_1 : i32, i32, i32
  }
  func.func @transform_10(%arg0: i32) -> (i32, i32) {
    %c0_i32 = arith.constant 0 : i32
    %c0_i32_0 = arith.constant 0 : i32
    %c0_i32_1 = arith.constant 0 : i32
    return %c0_i32, %c0_i32_0 : i32, i32
  }
  func.func @transform_11(%arg0: i32) -> (i32, i32) {
    %c0_i32 = arith.constant 0 : i32
    %c0_i32_0 = arith.constant 0 : i32
    %c0_i32_1 = arith.constant 0 : i32
    return %c0_i32, %c0_i32_0 : i32, i32
  }
  func.func @transform_12(%arg0: i32) -> (i32, i32) {
    %c0_i32 = arith.constant 0 : i32
    %c0_i32_0 = arith.constant 0 : i32
    %c0_i32_1 = arith.constant 0 : i32
    return %c0_i32, %c0_i32_0 : i32, i32
  }
  func.func @transform_13(%arg0: i32) -> (i32, i32) {
    %c0_i32 = arith.constant 0 : i32
    %c0_i32_0 = arith.constant 0 : i32
    %c0_i32_1 = arith.constant 0 : i32
    return %c0_i32, %c0_i32_0 : i32, i32
  }
  func.func @transform_14(%arg0: i32) -> (i32, i32) {
    %c0_i32 = arith.constant 0 : i32
    %c0_i32_0 = arith.constant 0 : i32
    return %arg0, %c0_i32 : i32, i32
  }
}

</mosaic_0001>

<bundles_post_ra>
// kernel: squeeze.21
= control target key start
LH: loop header
LB: loop body
LE: loop exit
PB: predicated region body
PF: predicated region fallthrough
CT: control target
= control target key end

     0   :  { %s130_s8 = smov 104   ;;  %s131_s9 = smov 112   ;;  %vm7_vm0 = vcmask 64512   ;;  %s221_s0 = inlined_call_operand.vmem [shape: f32[256], index: 0, kind: input, shape index: {}]   ;;  %s222_s1 = inlined_call_operand.vmem [shape: f32[32,8], index: 1, kind: output, shape index: {}]  }
   0x1   :  { %v4_v0 = vld [vmem:[%s221_s0] sm:$0x3]  ;;  %s129_s0 = smov 120   ;;  %s132_s10 = smov 96  }
   0x2   :  { %5 = vst [vmem:[#allocation0] sm:$0x3] %v4_v0  ;;  %s133_s11 = smov 88   ;;  %s134_s12 = smov 80  }
   0x3   :  { %s135_s13 = smov 72   ;;  %s136_s14 = smov 64  }
   0x4   :  { %s137_s17 = smov 56   ;;  %s138_s18 = smov 48  }
   0x5   :  { %s139_s19 = smov 40   ;;  %s140_s20 = smov 32  }
   0x6   :  { %s141_s21 = smov 24   ;;  %s142_s22 = smov 16  }
   0x7   :  { %s143_s23 = smov 8  }
   0x9   :  { %v9_v1 = vld [vmem:[#allocation0] sm:$0x3]  }
   0xa   :  { %v21_v2 = vld [vmem:[#allocation0] sm:$0x3]   ;;  %10 = vrot.lane.b32.xlu0 %v9_v1, %s129_s0 }
   0xb   :  { %22 = vrot.lane.b32.xlu1 %v21_v2, %s130_s8  ;;  %v15_v3 = vld [vmem:[#allocation0] sm:$0x3]  }
   0xc   :  { %v27_v4 = vld [vmem:[#allocation0] sm:$0x3]  }
   0xd   :  { %v33_v5 = vld [vmem:[#allocation0] sm:$0x3]  }
   0xe   :  { %16 = vrot.lane.b32.xlu0 %v15_v3, %s131_s9  ;;  %v39_v6 = vld [vmem:[#allocation0] sm:$0x3]  }
   0xf   :  { %28 = vrot.lane.b32.xlu1 %v27_v4, %s132_s10  ;;  %v45_v7 = vld [vmem:[#allocation0] sm:$0x3]  }
  0x10   :  { %v51_v8 = vld [vmem:[#allocation0] sm:$0x3]  }
  0x11   :  { %v57_v9 = vld [vmem:[#allocation0] sm:$0x3]  }
  0x12   :  { %34 = vrot.lane.b32.xlu0 %v33_v5, %s133_s11  ;;  %v63_v10 = vld [vmem:[#allocation0] sm:$0x3]  }
  0x13   :  { %40 = vrot.lane.b32.xlu1 %v39_v6, %s134_s12  ;;  %v6_v11 = vld [vmem:[#allocation0] sm:$0x3]  }
  0x14   :  { %8 = vst.msk [vmem:[%s222_s1] ss:$16 sm:$0x3] %vm7_vm0, %v6_v11   ;;  %v69_v12 = vld [vmem:[#allocation0] sm:$0x3]  }
  0x15   :  { %v75_v13 = vld [vmem:[#allocation0] sm:$0x3]  }
  0x16   :  { %46 = vrot.lane.b32.xlu0 %v45_v7, %s135_s13  ;;  %v81_v14 = vld [vmem:[#allocation0] sm:$0x3]  }
  0x17   :  { %52 = vrot.lane.b32.xlu1 %v51_v8, %s136_s14  ;;  %v87_v15 = vld [vmem:[#allocation0] sm:$0x3]  }
  0x18   :  { %v93_v16 = vld [vmem:[#allocation0] sm:$0x3]  }
  0x1a   :  { %58 = vrot.lane.b32.xlu0 %v57_v9, %s137_s17 }
  0x1b   :  { %64 = vrot.lane.b32.xlu1 %v63_v10, %s138_s18 }
  0x1e   :  { %70 = vrot.lane.b32.xlu0 %v69_v12, %s139_s19 }
  0x1f   :  { %76 = vrot.lane.b32.xlu1 %v75_v13, %s140_s20 }
  0x22   :  { %82 = vrot.lane.b32.xlu0 %v81_v14, %s141_s21 }
  0x23   :  { %88 = vrot.lane.b32.xlu1 %v87_v15, %s142_s22 }
  0x26   :  { %94 = vrot.lane.b32.xlu0 %v93_v16, %s143_s23 }
  0x7c   :  { %v11_v17 = vpop.permute.xlu0 %10  }
  0x7d   :  { %v23_v18 = vpop.permute.xlu1 %22   ;;  %99 = vst.msk [vmem:[%s222_s1 + $0x1] ss:$16 sm:$0x3] %vm7_vm0, %v11_v17  }
  0x7e   :  { %101 = vst.msk [vmem:[%s222_s1 + $0x3] ss:$16 sm:$0x3] %vm7_vm0, %v23_v18  }
  0x80   :  { %v17_v19 = vpop.permute.xlu0 %16  }
  0x81   :  { %v29_v20 = vpop.permute.xlu1 %28   ;;  %100 = vst.msk [vmem:[%s222_s1 + $0x2] ss:$16 sm:$0x3] %vm7_vm0, %v17_v19  }
  0x82   :  { %102 = vst.msk [vmem:[%s222_s1 + $0x4] ss:$16 sm:$0x3] %vm7_vm0, %v29_v20  }
  0x84   :  { %v35_v21 = vpop.permute.xlu0 %34  }
  0x85   :  { %v41_v22 = vpop.permute.xlu1 %40   ;;  %103 = vst.msk [vmem:[%s222_s1 + $0x5] ss:$16 sm:$0x3] %vm7_vm0, %v35_v21  }
  0x86   :  { %104 = vst.msk [vmem:[%s222_s1 + $0x6] ss:$16 sm:$0x3] %vm7_vm0, %v41_v22  }
  0x88   :  { %v47_v23 = vpop.permute.xlu0 %46  }
  0x89   :  { %v53_v24 = vpop.permute.xlu1 %52   ;;  %105 = vst.msk [vmem:[%s222_s1 + $0x7] ss:$16 sm:$0x3] %vm7_vm0, %v47_v23  }
  0x8a   :  { %106 = vst.msk [vmem:[%s222_s1 + $0x8] ss:$16 sm:$0x3] %vm7_vm0, %v53_v24  }
  0x8c   :  { %v59_v25 = vpop.permute.xlu0 %58  }
  0x8d   :  { %v65_v26 = vpop.permute.xlu1 %64   ;;  %107 = vst.msk [vmem:[%s222_s1 + $0x9] ss:$16 sm:$0x3] %vm7_vm0, %v59_v25  }
  0x8e   :  { %108 = vst.msk [vmem:[%s222_s1 + $0xa] ss:$16 sm:$0x3] %vm7_vm0, %v65_v26  }
  0x90   :  { %v71_v27 = vpop.permute.xlu0 %70  }
  0x91   :  { %v77_v28 = vpop.permute.xlu1 %76   ;;  %109 = vst.msk [vmem:[%s222_s1 + $0xb] ss:$16 sm:$0x3] %vm7_vm0, %v71_v27  }
  0x92   :  { %110 = vst.msk [vmem:[%s222_s1 + $0xc] ss:$16 sm:$0x3] %vm7_vm0, %v77_v28  }
  0x94   :  { %v83_v29 = vpop.permute.xlu0 %82  }
  0x95   :  { %v89_v30 = vpop.permute.xlu1 %88   ;;  %111 = vst.msk [vmem:[%s222_s1 + $0xd] ss:$16 sm:$0x3] %vm7_vm0, %v83_v29  }
  0x96   :  { %112 = vst.msk [vmem:[%s222_s1 + $0xe] ss:$16 sm:$0x3] %vm7_vm0, %v89_v30  }
  0x98   :  { %v95_v31 = vpop.permute.xlu0 %94  }
  0x99   :  { %113 = vst.msk [vmem:[%s222_s1 + $0xf] ss:$16 sm:$0x3] %vm7_vm0, %v95_v31  }

// kernel: few_shot_forward.1
= control target key start
LH: loop header
LB: loop body
LE: loop exit
PB: predicated region body
PF: predicated region fallthrough
CT: control target
= control target key end

     0   :  { %s21516_s0 = inlined_call_operand.vmem [shape: f32[256,2], index: 0, kind: input, shape index: {}]   ;;  %s21517_s1 = inlined_call_operand.hbm [shape: bf16[2,64], index: 1, kind: input, shape index: {}]   ;;  %s21518_s2 = inlined_call_operand.hbm [shape: bf16[4,64,64], index: 2, kind: input, shape index: {}]   ;;  %s21519_s3 = inlined_call_operand.vmem [shape: bf16[64,32], index: 3, kind: input, shape index: {}]   ;;  %s21520_s4 = inlined_call_operand.hbm [shape: bf16[32,384], index: 4, kind: input, shape index: {}]   ;;  %s21521_s5 = inlined_call_operand.hbm [shape: bf16[128,256], index: 5, kind: input, shape index: {}]   ;;  %s21522_s6 = inlined_call_operand.hbm [shape: bf16[256,128], index: 6, kind: input, shape index: {}]   ;;  %s21523_s7 = inlined_call_operand.vmem [shape: bf16[2,128,384], index: 7, kind: input, shape index: {}]   ;;  %s21524_s8 = inlined_call_operand.vmem [shape: bf16[2,128,256], index: 8, kind: input, shape index: {}]   ;;  %s21525_s9 = inlined_call_operand.hbm [shape: bf16[2,256,128], index: 9, kind: input, shape index: {}]   ;;  %s21526_s10 = inlined_call_operand.vmem [shape: bf16[128,128], index: 10, kind: input, shape index: {}]   ;;  %s21527_s11 = inlined_call_operand.vmem [shape: bf16[128,128], index: 11, kind: input, shape index: {}]   ;;  %s21528_s12 = inlined_call_operand.vmem [shape: bf16[128,32], index: 12, kind: input, shape index: {}]   ;;  %s21529_s13 = inlined_call_operand.vmem [shape: bf16[18,384], index: 13, kind: input, shape index: {}]   ;;  %s21530_s14 = inlined_call_operand.vmem [shape: f32[256,128], index: 14, kind: output, shape index: {}]  }
   0x1   :  { %21575 = sst [smem:[#allocation40_spill]] %s21517_s1 }
   0x2   :  { %21576 = sst [smem:[#allocation41_spill]] %s21518_s2 }
   0x3   :  { %21577 = sst [smem:[#allocation42_spill]] %s21527_s11 }
   0x4   :  { %21578 = sst [smem:[#allocation43_spill]] %s21528_s12 }
   0x5   :  { %21579 = sst [smem:[#allocation44_spill]] %s21530_s14 }
   0x6   :  { %19 = vsyncpa [#allocation3], 0 }
   0x7   :  { %20 = vsyncpa [#allocation5], 0 }
   0x8   :  { %21 = vsyncpa [#allocation8], 0 }
   0x9   :  { %22 = vsyncpa [#allocation11], 0  ;;  %s17850_s29 = smov 0  }
   0xa LB: > { %s17761_s30 = smov [#allocation4]   ;;  %s21531_s16 = sadd.s32 4294967295, %s17759_s29   ;;  %s17759_s29 = sphi %s17850_s29, %s28_s29  }
   0xb   : > { %s381_s15 = sshll.u32 %s17761_s30, 4  ;;  %p13862_p0 = scmp.ge.s32.totalorder %s17759_s29, 1  ;;  %s17864_s15 = int_to_ptr.vmem [resolvable:$true] %s381_s15 }
   0xc   : > { %p358_p1 = scmp.lt.s32.totalorder %s17759_s29, 3  ;;  %p17860_p2 = scmp.eq.s32.totalorder %s21531_s16, 0 }
   0xd   : > { %s17762_s19 = smov [#allocation7]   ;;  %s17763_s22 = smov [#allocation2]  }
   0xe   : > { %s21580_s17 = scalar_select %p17860_p2, 1, 0 }
   0xf   : > { %p17866_p3 = pnand %p13862_p0, %p358_p1  ;;  %s410_s20 = sshll.u32 %s17762_s19, 4  ;;  %s17872_s20 = int_to_ptr.vmem [resolvable:$true] %s410_s20 }
  0x10   : > { %s17880_s23 = sshll.u32 %s17763_s22, 4  ;;  %s21583_s2 = sld [smem:[#allocation41_spill]]  ;;  %s372_s23 = int_to_ptr.vmem [resolvable:$true] %s17880_s23 }
  0x11   : > { %s21581_s18 = scalar_select %p17866_p3, 1, 0 }
  0x12   : > { %p16988_p4 = pneg %p17866_p3 }
  0x14   : > { %p17876_p5 = pnand %p17860_p2, %p16988_p4 }
  0x16   : > { %s17569_s26 = scalar_lea.hbm %s21583_s2, 2048  ;;  %p17890_p7 = pneg %p17876_p5 }
  0x17   : > { %p17570_p6 = scmp.ne.s32.totalorder %s21583_s2, %s17569_s26  ;;  %p17576_p10 = scmp.lt.u32.totalorder %s17569_s26, %s21583_s2 }
  0x19   : > { %p17572_p8 = pnand %p17890_p7, %p17570_p6 }
  0x1b   : > { %p17573_p9 = pneg %p17572_p8 }
  0x1d   : > { %p17578_p11 = pnand %p17576_p10, %p17573_p9 }
  0x1f   : > { %17581 = shalt.err (!%p17578_p11)
}
  0x20   : > { %s17582_s24 = scalar_lea.vmem %s17864_s15, 2048  ;;  %p17590_p1 = scmp.lt.s32.totalorder %s17864_s15, %s17864_s15 }
  0x21   : > { %p17583_p12 = scmp.ne.s32.totalorder %s17864_s15, %s17582_s24  ;;  %p17591_p4 = scmp.lt.s32.totalorder %s17582_s24, %s17582_s24 }
  0x23   : > { %p17585_p13 = pnand %p17583_p12, %p17890_p7  ;;  %p17592_p6 = por %p17591_p4, %p17590_p1 }
  0x25   : > { %p17586_p0 = pneg %p17585_p13 }
  0x27   : > { %p17593_p8 = pnand %p17592_p6, %p17586_p0 }
  0x29   : > { %17596 = shalt.err (!%p17593_p8)
}
  0x2a   : > { %s21534_s25 = smov 64   ;;  %s21536_s26 = smov 4  }
  0x2b   : > { %16994 = dma.hbm_to_vmem [thread:$0]  (!%p17876_p5), %s21583_s2, 2048, %s17864_s15, [#allocation5], %s21534_s25, %s21534_s25, %s21536_s26  }
  0x2c   : > { %s17597_s24 = scalar_lea.hbm %s21521_s5, 2048 }
  0x2d   : > { %p17598_p9 = scmp.ne.s32.totalorder %s21521_s5, %s17597_s24  ;;  %p17604_p12 = scmp.lt.u32.totalorder %s17597_s24, %s21521_s5 }
  0x2f   : > { %p17600_p10 = pnand %p17598_p9, %p17890_p7 }
  0x31   : > { %p17601_p11 = pneg %p17600_p10 }
  0x33   : > { %p17606_p13 = pnand %p17604_p12, %p17601_p11 }
  0x35   : > { %17609 = shalt.err (!%p17606_p13)
}
  0x36   : > { %s17610_s15 = scalar_lea.vmem %s17872_s20, 2048  ;;  %p17618_p6 = scmp.lt.s32.totalorder %s17872_s20, %s17872_s20 }
  0x37   : > { %p17611_p0 = scmp.ne.s32.totalorder %s17872_s20, %s17610_s15  ;;  %p17619_p8 = scmp.lt.s32.totalorder %s17610_s15, %s17610_s15 }
  0x39   : > { %p17613_p1 = pnand %p17611_p0, %p17890_p7  ;;  %p17620_p9 = por %p17619_p8, %p17618_p6 }
  0x3b   : > { %p17614_p4 = pneg %p17613_p1 }
  0x3d   : > { %p17621_p10 = pnand %p17620_p9, %p17614_p4 }
  0x3f   : > { %17624 = shalt.err (!%p17621_p10)
}
  0x40   : > { %s17766_s14 = smov 128   ;;  %s17767_s11 = smov 8  }
  0x41   : > { %17000 = dma.hbm_to_vmem [thread:$0]  (!%p17876_p5), %s21521_s5, 2048, %s17872_s20, [#allocation8], %s17766_s14, %s17766_s14, %s17767_s11  }
  0x42   : > { %s17768_s27 = smov [#allocation6]   ;;  %s21585_s1 = sld [smem:[#allocation40_spill]] }
  0x43   : > { %s397_s28 = sshll.u32 %s17768_s27, 4  ;;  %s398_s28 = int_to_ptr.vmem [resolvable:$true] %s397_s28 }
  0x48   : > { %s17625_s24 = scalar_lea.hbm %s21585_s1, 16 }
  0x49   : > { %p17626_p11 = scmp.ne.s32.totalorder %s21585_s1, %s17625_s24  ;;  %p17632_p0 = scmp.lt.u32.totalorder %s17625_s24, %s21585_s1 }
  0x4b   : > { %p17628_p12 = pnand %p17626_p11, %p17890_p7 }
  0x4d   : > { %p17629_p13 = pneg %p17628_p12 }
  0x4f   : > { %p17634_p1 = pnand %p17632_p0, %p17629_p13 }
  0x51   : > { %17637 = shalt.err (!%p17634_p1)
}
  0x52   : > { %s17638_s20 = scalar_lea.vmem %s372_s23, 16  ;;  %s17645_s14 = scalar_lea.vmem %s372_s23, 32 }
  0x53   : > { %p17639_p4 = scmp.ne.s32.totalorder %s372_s23, %s17638_s20  ;;  %p17646_p9 = scmp.lt.s32.totalorder %s372_s23, %s372_s23 }
  0x54   : > { %p17647_p10 = scmp.lt.s32.totalorder %s17645_s14, %s17638_s20 }
  0x55   : > { %p17641_p6 = pnand %p17639_p4, %p17890_p7 }
  0x56   : > { %p17648_p2 = por %p17647_p10, %p17646_p9 }
  0x57   : > { %p17642_p8 = pneg %p17641_p6 }
  0x59   : > { %p17649_p3 = pnand %p17648_p2, %p17642_p8 }
  0x5b   : > { %17652 = shalt.err (!%p17649_p3)
}
  0x5c   : > { %16991 = dma.hbm_to_vmem [thread:$0]  (!%p17876_p5), %s21585_s1, 16, %s372_s23, [#allocation3]  }
  0x5d   : > { %s17653_s12 = scalar_lea.hbm %s21520_s4, 768 }
  0x5e   : > { %p17654_p11 = scmp.ne.s32.totalorder %s21520_s4, %s17653_s12  ;;  %p17660_p3 = scmp.lt.u32.totalorder %s17653_s12, %s21520_s4 }
  0x60   : > { %p17656_p12 = pnand %p17654_p11, %p17890_p7 }
  0x62   : > { %p17657_p2 = pneg %p17656_p12 }
  0x64   : > { %p17662_p13 = pnand %p17660_p3, %p17657_p2 }
  0x66   : > { %17665 = shalt.err (!%p17662_p13)
}
  0x67   : > { %s17666_s24 = scalar_lea.vmem %s398_s28, 768  ;;  %p17674_p6 = scmp.lt.s32.totalorder %s398_s28, %s398_s28 }
  0x68   : > { %p17667_p0 = scmp.ne.s32.totalorder %s398_s28, %s17666_s24  ;;  %p17675_p8 = scmp.lt.s32.totalorder %s17666_s24, %s17666_s24 }
  0x6a   : > { %p17669_p1 = pnand %p17667_p0, %p17890_p7  ;;  %p17676_p9 = por %p17675_p8, %p17674_p6 }
  0x6c   : > { %p17670_p4 = pneg %p17669_p1 }
  0x6e   : > { %p17677_p10 = pnand %p17676_p9, %p17670_p4 }
  0x70   : > { %17680 = shalt.err (!%p17677_p10)
}
  0x71   : > { %s17769_s23 = smov 192   ;;  %s17770_s15 = smov 12  }
  0x72   : > { %16997 = dma.hbm_to_vmem [thread:$0]  (!%p17876_p5), %s21520_s4, 768, %s398_s28, [#allocation5], %s17769_s23, %s17769_s23, %s17770_s15  }
  0x73   : > { %s17771_s25 = smov [#allocation9]   ;;  %s17772_s2 = smov [#allocation10]  }
  0x74   : > { %s423_s11 = sshll.u32 %s17771_s25, 4  ;;  %s442_s26 = sshll.u32 %s17772_s2, 4  ;;  %s424_s11 = int_to_ptr.vmem [resolvable:$true] %s423_s11  ;;  %s443_s26 = int_to_ptr.vmem [resolvable:$true] %s442_s26 }
  0x75   : > { %s17681_s27 = scalar_lea.hbm %s21522_s6, 2048 }
  0x76   : > { %p17682_p11 = scmp.ne.s32.totalorder %s21522_s6, %s17681_s27  ;;  %p17688_p3 = scmp.lt.u32.totalorder %s17681_s27, %s21522_s6 }
  0x78   : > { %p17684_p12 = pnand %p17682_p11, %p17890_p7 }
  0x7a   : > { %p17685_p2 = pneg %p17684_p12 }
  0x7c   : > { %p17690_p13 = pnand %p17688_p3, %p17685_p2 }
  0x7e   : > { %17693 = shalt.err (!%p17690_p13)
}
  0x7f   : > { %s17694_s28 = scalar_lea.vmem %s424_s11, 2048  ;;  %p17702_p6 = scmp.lt.s32.totalorder %s424_s11, %s424_s11 }
  0x80   : > { %p17695_p0 = scmp.ne.s32.totalorder %s424_s11, %s17694_s28  ;;  %p17703_p8 = scmp.lt.s32.totalorder %s17694_s28, %s17694_s28 }
  0x82   : > { %p17697_p1 = pnand %p17695_p0, %p17890_p7  ;;  %p17704_p9 = por %p17703_p8, %p17702_p6 }
  0x84   : > { %p17698_p4 = pneg %p17697_p1 }
  0x86   : > { %p17705_p10 = pnand %p17704_p9, %p17698_p4 }
  0x88   : > { %17708 = shalt.err (!%p17705_p10)
}
  0x89   : > { %s21586_s23 = smov 4   ;;  %s21587_s15 = smov 64  }
  0x8a   : > { %17003 = dma.hbm_to_vmem [thread:$0]  (!%p17876_p5), %s21522_s6, 2048, %s424_s11, [#allocation8], %s21587_s15, %s21587_s15, %s21586_s23  }
  0x8b   : > { %s17709_s2 = scalar_lea.hbm %s21525_s9, 4096 }
  0x8c   : > { %p17710_p11 = scmp.ne.s32.totalorder %s21525_s9, %s17709_s2  ;;  %p17716_p3 = scmp.lt.u32.totalorder %s17709_s2, %s21525_s9 }
  0x8e   : > { %p17712_p12 = pnand %p17710_p11, %p17890_p7 }
  0x90   : > { %p17713_p2 = pneg %p17712_p12 }
  0x92   : > { %p17718_p13 = pnand %p17716_p3, %p17713_p2 }
  0x94   : > { %17721 = shalt.err (!%p17718_p13)
}
  0x95   : > { %s17722_s22 = scalar_lea.vmem %s443_s26, 4096  ;;  %p17730_p6 = scmp.lt.s32.totalorder %s443_s26, %s443_s26 }
  0x96   : > { %p17723_p0 = scmp.ne.s32.totalorder %s443_s26, %s17722_s22  ;;  %p17731_p8 = scmp.lt.s32.totalorder %s17722_s22, %s17722_s22 }
  0x98   : > { %p17725_p1 = pnand %p17723_p0, %p17890_p7  ;;  %p17732_p9 = por %p17731_p8, %p17730_p6 }
  0x9a   : > { %p17726_p4 = pneg %p17725_p1 }
  0x9c   : > { %p17733_p10 = pnand %p17732_p9, %p17726_p4 }
  0x9e   : > { %17736 = shalt.err (!%p17733_p10)
}
  0x9f   : > { %17006 = dma.hbm_to_vmem [thread:$0]  (!%p17876_p5), %s21525_s9, 4096, %s443_s26, [#allocation11], %s21587_s15, %s21587_s15, %s21586_s23  }
  0xa0   : > { %p21588_p11 = scmp.ne.s32.totalorder %s21581_s18, 0 }
  0xa2   : > { %479 = sbr.rel (%p21588_p11) target bundleno = 8384 (0x20c0), region = 76 }
  0xa9   : > { %p21589_p7 = scmp.ne.s32.totalorder %s21580_s17, 0 }
  0xab   : > { %17742 = dma.done.wait (%p21589_p7), [#allocation3], 16  }
  0xac   : > { %17744 = vsyncadd (%p21589_p7), [#allocation3], 4294967280 }
  0xad   : > { %17746 = dma.done.wait (%p21589_p7), [#allocation5], 2816  }
  0xae   : > { %17748 = vsyncadd (%p21589_p7), [#allocation5], 4294964480 }
  0xaf   : > { %17750 = dma.done.wait (%p21589_p7), [#allocation8], 4096  }
  0xb0   : > { %17752 = vsyncadd (%p21589_p7), [#allocation8], 4294963200 }
  0xb1   : > { %17754 = dma.done.wait (%p21589_p7), [#allocation11], 4096  }
  0xb2   : > { %17756 = vsyncadd (%p21589_p7), [#allocation11], 4294963200  ;;  %s21590_s18 = sadd.s32 4294967295, %s17759_s29   ;;  %vm591_vm0 = vcmask 15360   ;;  %v585_v0 = vld [vmem:[#allocation2] sm:$0x1]  ;;  %v587_v23 = vlaneseq }
  0xb3   : > { %s13877_s21 = sshll.u32 %s21590_s18, 4  ;;  %vm640_vm1 = vcmask 1041408   ;;  %v586_v2 = vunpack.c.l.bf16 %v585_v0  ;;  %v14109_v5 = vld [vmem:[#allocation4] sm:$0xff]   ;;  %v14476_v8 = vld [vmem:[#allocation4 + $0x8] sm:$0xff]   ;;  %v14477_v9 = vld [vmem:[#allocation4 + $0x10] sm:$0xff]   ;;  %vm825_vm2 = vcmask 523264  }
  0xb4   : > { %p546_p5 = scmp.lt.s32.totalorder %s13877_s21, 31  ;;  %16836 = vmatprep.subr.bf16.mxu1 %v14109_v5  ;;  %v14478_v21 = vld [vmem:[#allocation4 + $0x18] sm:$0xff]   ;;  %v14125_v22 = vld [vmem:[#allocation4 + $0x20] sm:$0xff]   ;;  %v18078_v24 = vshrl.u32 %v587_v23, 7  ;;  %v14479_v39 = vld [vmem:[#allocation4 + $0x28] sm:$0xff]   ;;  %vm2018_vm3 = vcmask 261120  }
  0xb5   : > { %15306 = vmatprep.subr.msk.mxu0 %vm640_vm1, %v586_v2  ;;  %16840 = vmatpush3.bf16.msra.mxu1 %v14109_v5  ;;  %v18083_v25 = vld [vmem:[%s21529_s13] sm:$0xff]  ;;  %v14480_v46 = vld [vmem:[#allocation4 + $0x30] sm:$0xff]   ;;  %vm17774_vm4 = vmmov 0   ;;  %vm3509_vm5 = vcmask 64512   ;;  %s21625_s18 = sld [smem:[#allocation42_spill]]  ;;  %s21626_s24 = sld [smem:[#allocation43_spill]] }
  0xb6   : > { %s21648_s21 = smov (!%p546_p5, %s13877_s21), 31  ;;  %15307 = vmatpush3.msk.msra.mxu0 %vm640_vm1, %v586_v2  ;;  %16837 = vmatprep.subr.bf16.mxu1 %v14476_v8  ;;  %v18086_v26 = vunpack.c.l.bf16 %v18083_v25  ;;  %v18089_v27 = vsub.s32 0, %v18078_v24  ;;  %vm13711_vm6 = vcmask 269312  }
  0xb7   : > { %s13878_s30 = sshll.u32 %s21648_s21, 3  ;;  %16325 = vmatprep.subr.bf16.mxu0 %v14109_v5 }
  0xb8   : > { %s18044_s23 = scalar_lea.vmem %s21516_s0, %s13878_s30  ;;  %21591 = vst [vmem:[#allocation16_spill] sm:$0xff] %v18089_v27  ;;  %v18093_v28 = vrot.slane %v18086_v26, %v18089_v27 }
  0xb9   : > { %v569_v1 = vld [vmem:[%s18044_s23] sm:$0xff]  ;;  %v570_v3 = vld [vmem:[%s18044_s23 + $0x8] sm:$0xff]  ;;  %v571_v4 = vld [vmem:[%s18044_s23 + $0x10] sm:$0xff]  ;;  %16841 = vmatpush3.bf16.msra.mxu1 %v14476_v8 }
  0xba   : > { %15308 = vmatprep.mubr.msk.f32.mxu0 %vm591_vm0, %v569_v1  ;;  %v572_v6 = vld [vmem:[%s18044_s23 + $0x18] sm:$0xff]  ;;  %v573_v7 = vld [vmem:[%s18044_s23 + $0x20] sm:$0xff]  ;;  %v574_v10 = vld [vmem:[%s18044_s23 + $0x28] sm:$0xff]  ;;  %16838 = vmatprep.subr.bf16.mxu1 %v14477_v9 }
  0xbb   : > { %15309 = vmatmul.mubr.msk.f32.vlgmr.msra.gmra.mrb[0].mxu0 %vm591_vm0, %v570_v3  ;;  %v575_v11 = vld [vmem:[%s18044_s23 + $0x30] sm:$0xff]  ;;  %v576_v12 = vld [vmem:[%s18044_s23 + $0x38] sm:$0xff]  ;;  %v577_v13 = vld [vmem:[%s18044_s23 + $0x40] sm:$0xff] }
  0xbc   : > { %15311 = vmatprep.mubr.msk.f32.mxu0 %vm591_vm0, %v571_v4  ;;  %16327 = vmatpush3.bf16.msra.mxu0 %v14109_v5  ;;  %v578_v14 = vld [vmem:[%s18044_s23 + $0x48] sm:$0xff]  ;;  %v579_v15 = vld [vmem:[%s18044_s23 + $0x50] sm:$0xff]  ;;  %v580_v16 = vld [vmem:[%s18044_s23 + $0x58] sm:$0xff] }
  0xbd   : > { %16329 = vmatprep.subr.bf16.mxu0 %v14476_v8  ;;  %16842 = vmatpush3.bf16.msra.mxu1 %v14477_v9  ;;  %v581_v17 = vld [vmem:[%s18044_s23 + $0x60] sm:$0xff]  ;;  %v582_v18 = vld [vmem:[%s18044_s23 + $0x68] sm:$0xff]  ;;  %v583_v19 = vld [vmem:[%s18044_s23 + $0x70] sm:$0xff] }
  0xbe   : > { %v584_v20 = vld [vmem:[%s18044_s23 + $0x78] sm:$0xff]  ;;  %16839 = vmatprep.subr.bf16.mxu1 %v14478_v21  ;;  %s21646_s23 = sld [smem:[#allocation44_spill]] }
  0xbf   : > { %15312 = vmatmul.mubr.msk.f32.gmra.mrb[2].mxu0 %vm591_vm0, %v572_v6 }
  0xc0   : > { %15314 = vmatprep.mubr.msk.f32.mxu0 %vm591_vm0, %v573_v7  ;;  %16331 = vmatpush3.bf16.msra.mxu0 %v14476_v8 }
  0xc1   : > { %16333 = vmatprep.subr.bf16.mxu0 %v14477_v9  ;;  %16843 = vmatpush3.bf16.msra.mxu1 %v14478_v21 }
  0xc3   : > { %15315 = vmatmul.mubr.msk.f32.gmra.mrb[4].mxu0 %vm591_vm0, %v574_v10 }
  0xc4   : > { %15317 = vmatprep.mubr.msk.f32.mxu0 %vm591_vm0, %v575_v11  ;;  %16335 = vmatpush3.bf16.msra.mxu0 %v14477_v9  ;;  %s21447_s17 = scalar_lea.vmem %s21646_s23, %s13878_s30 }
  0xc5   : > { %16337 = vmatprep.subr.bf16.mxu0 %v14478_v21 }
  0xc7   : > { %15318 = vmatmul.mubr.msk.f32.gmra.mrb[6].mxu0 %vm591_vm0, %v576_v12 }
  0xc8   : > { %15320 = vmatprep.mubr.msk.f32.mxu0 %vm591_vm0, %v577_v13  ;;  %16339 = vmatpush3.bf16.msra.mxu0 %v14478_v21 }
  0xc9   : > { %16341 = vmatprep.subr.bf16.mxu0 %v14125_v22 }
  0xcb   : > { %15321 = vmatmul.mubr.msk.f32.gmra.mrb[8].mxu0 %vm591_vm0, %v578_v14 }
  0xcc   : > { %15323 = vmatprep.mubr.msk.f32.mxu0 %vm591_vm0, %v579_v15  ;;  %v14481_v15 = vld [vmem:[#allocation4 + $0x38] sm:$0xff]  }
  0xcf   : > { %15324 = vmatmul.mubr.msk.f32.gmra.mrb[10].mxu0 %vm591_vm0, %v580_v16  ;;  %v14141_v16 = vld [vmem:[#allocation4 + $0x40] sm:$0xff]  }
  0xd0   : > { %15326 = vmatprep.mubr.msk.f32.mxu0 %vm591_vm0, %v581_v17  ;;  %v14482_v17 = vld [vmem:[#allocation4 + $0x48] sm:$0xff]   ;;  %16357 = vmatprep.subr.bf16.mxu1 %v14141_v16 }
  0xd3   : > { %15327 = vmatmul.mubr.msk.f32.gmra.mrb[12].mxu0 %vm591_vm0, %v582_v18  ;;  %v14483_v18 = vld [vmem:[#allocation4 + $0x50] sm:$0xff]  }
  0xd4   : > { %15329 = vmatprep.mubr.msk.f32.mxu0 %vm591_vm0, %v583_v19  ;;  %v18128_v19 = vsub.s32 1, %v18078_v24 }
  0xd6   : > { %21592 = vst [vmem:[#allocation17_spill] sm:$0xff] %v18128_v19 }
  0xd7   : > { %15330 = vmatmul.mubr.msk.f32.gmra.mrb[14].mxu0 %vm591_vm0, %v584_v20  ;;  %v824_v20 = vrot.slane %v18086_v26, %v18128_v19 }
 0x18e   : > { %v15310_v29 = vpop.f32.mrb[0].mxu0 }
 0x18f   : > { %v716_v30 = vadd.f32 %v15310_v29, %v18093_v28  ;;  %v710_v31 = vpop.f32.mrb[1].mxu0 }
 0x190   : > { %v711_v32 = vadd.f32 %v710_v31, %v18093_v28 }
 0x191   : > { %v790_v35 = vmax.f32 %v716_v30, 0.0 }
 0x192   : > { %v789_v33 = vmax.f32 %v711_v32, 0.0  ;;  %v15313_v34 = vpop.f32.mrb[2].mxu0 }
 0x193   : > { %v726_v36 = vadd.f32 %v15313_v34, %v18093_v28  ;;  %v720_v37 = vpop.f32.mrb[3].mxu0 }
 0x194   : > { %v721_v38 = vadd.f32 %v720_v37, %v18093_v28  ;;  %15348 = vmatprep.mubr.msk.f32.mxu0 %vm825_vm2, %v789_v33 }
 0x195   : > { %v792_v40 = vmax.f32 %v726_v36, 0.0  ;;  %15349 = vmatmul.mubr.msk.f32.vlgmr.msra.gmra.mrb[16].mxu0 %vm825_vm2, %v790_v35 }
 0x196   : > { %v791_v41 = vmax.f32 %v721_v38, 0.0  ;;  %v15316_v42 = vpop.f32.mrb[4].mxu0  ;;  %16343 = vmatpush3.bf16.msra.mxu0 %v14125_v22 }
 0x197   : > { %v736_v43 = vadd.f32 %v15316_v42, %v18093_v28  ;;  %v730_v44 = vpop.f32.mrb[5].mxu0  ;;  %16345 = vmatprep.subr.bf16.mxu0 %v14479_v39 }
 0x198   : > { %v731_v45 = vadd.f32 %v730_v44, %v18093_v28  ;;  %15351 = vmatprep.mubr.msk.f32.mxu0 %vm825_vm2, %v791_v41 }
 0x199   : > { %v794_v47 = vmax.f32 %v736_v43, 0.0  ;;  %15352 = vmatmul.mubr.msk.f32.gmra.mrb[18].mxu0 %vm825_vm2, %v792_v40 }
 0x19a   : > { %v793_v48 = vmax.f32 %v731_v45, 0.0  ;;  %v15319_v49 = vpop.f32.mrb[6].mxu0  ;;  %16347 = vmatpush3.bf16.msra.mxu0 %v14479_v39 }
 0x19b   : > { %v746_v50 = vadd.f32 %v15319_v49, %v18093_v28  ;;  %v740_v51 = vpop.f32.mrb[7].mxu0  ;;  %16349 = vmatprep.subr.bf16.mxu0 %v14480_v46 }
 0x19c   : > { %v741_v52 = vadd.f32 %v740_v51, %v18093_v28  ;;  %15354 = vmatprep.mubr.msk.f32.mxu0 %vm825_vm2, %v793_v48 }
 0x19d   : > { %v796_v53 = vmax.f32 %v746_v50, 0.0  ;;  %15355 = vmatmul.mubr.msk.f32.gmra.mrb[20].mxu0 %vm825_vm2, %v794_v47 }
 0x19e   : > { %v795_v54 = vmax.f32 %v741_v52, 0.0  ;;  %v15322_v55 = vpop.f32.mrb[8].mxu0  ;;  %16351 = vmatpush3.bf16.msra.mxu0 %v14480_v46 }
 0x19f   : > { %v756_v56 = vadd.f32 %v15322_v55, %v18093_v28  ;;  %v750_v57 = vpop.f32.mrb[9].mxu0  ;;  %16353 = vmatprep.subr.bf16.mxu0 %v14481_v15 }
 0x1a0   : > { %15357 = vmatprep.mubr.msk.f32.mxu0 %vm825_vm2, %v795_v54  ;;  %v751_v58 = vadd.f32 %v750_v57, %v18093_v28 }
 0x1a1   : > { %v798_v59 = vmax.f32 %v756_v56, 0.0  ;;  %15358 = vmatmul.mubr.msk.f32.gmra.mrb[22].mxu0 %vm825_vm2, %v796_v53 }
 0x1a2   : > { %v797_v60 = vmax.f32 %v751_v58, 0.0  ;;  %v15325_v61 = vpop.f32.mrb[10].mxu0  ;;  %16355 = vmatpush3.bf16.msra.mxu0 %v14481_v15 }
 0x1a3   : > { %v766_v62 = vadd.f32 %v15325_v61, %v18093_v28  ;;  %v760_v63 = vpop.f32.mrb[11].mxu0 }
 0x1a4   : > { %15360 = vmatprep.mubr.msk.f32.mxu1 %vm825_vm2, %v797_v60  ;;  %v761_v0 = vadd.f32 %v760_v63, %v18093_v28 }
 0x1a5   : > { %15361 = vmatmul.mubr.msk.f32.vlgmr.msra.gmra.mrb[0].mxu1 %vm825_vm2, %v798_v59  ;;  %v800_v1 = vmax.f32 %v766_v62, 0.0 }
 0x1a6   : > { %v799_v2 = vmax.f32 %v761_v0, 0.0  ;;  %v15328_v3 = vpop.f32.mrb[12].mxu0  ;;  %16359 = vmatpush3.bf16.msra.mxu1 %v14141_v16 }
 0x1a7   : > { %v776_v4 = vadd.f32 %v15328_v3, %v18093_v28  ;;  %v770_v5 = vpop.f32.mrb[13].mxu0  ;;  %16361 = vmatprep.subr.bf16.mxu1 %v14482_v17 }
 0x1a8   : > { %15363 = vmatprep.mubr.msk.f32.mxu1 %vm825_vm2, %v799_v2  ;;  %v771_v6 = vadd.f32 %v770_v5, %v18093_v28 }
 0x1a9   : > { %15364 = vmatmul.mubr.msk.f32.gmra.mrb[2].mxu1 %vm825_vm2, %v800_v1  ;;  %v802_v7 = vmax.f32 %v776_v4, 0.0 }
 0x1aa   : > { %v801_v8 = vmax.f32 %v771_v6, 0.0  ;;  %v15331_v9 = vpop.f32.mrb[14].mxu0  ;;  %16363 = vmatpush3.bf16.msra.mxu1 %v14482_v17 }
 0x1ab   : > { %v786_v10 = vadd.f32 %v15331_v9, %v18093_v28  ;;  %v780_v11 = vpop.f32.mrb[15].mxu0  ;;  %16365 = vmatprep.subr.bf16.mxu1 %v14483_v18  ;;  %v14484_v9 = vld [vmem:[#allocation4 + $0x58] sm:$0xff]  }
 0x1ac   : > { %15366 = vmatprep.mubr.msk.f32.mxu1 %vm825_vm2, %v801_v8  ;;  %v781_v12 = vadd.f32 %v780_v11, %v18093_v28  ;;  %v14485_v11 = vld [vmem:[#allocation4 + $0x68] sm:$0xff]  }
 0x1ad   : > { %15367 = vmatmul.mubr.msk.f32.gmra.mrb[4].mxu1 %vm825_vm2, %v802_v7  ;;  %v804_v13 = vmax.f32 %v786_v10, 0.0  ;;  %v14157_v10 = vld [vmem:[#allocation4 + $0x60] sm:$0xff]  }
 0x1ae   : > { %v803_v14 = vmax.f32 %v781_v12, 0.0  ;;  %16367 = vmatpush3.bf16.msra.mxu1 %v14483_v18  ;;  %16373 = vmatprep.subr.bf16.mxu0 %v14157_v10  ;;  %v14486_v12 = vld [vmem:[#allocation4 + $0x70] sm:$0xff]  }
 0x1af   : > { %16369 = vmatprep.subr.bf16.mxu1 %v14484_v9 }
 0x1b0   : > { %15369 = vmatprep.mubr.msk.f32.mxu1 %vm825_vm2, %v803_v14 }
 0x1b1   : > { %15370 = vmatmul.mubr.msk.f32.gmra.mrb[6].mxu1 %vm825_vm2, %v804_v13  ;;  %v18149_v13 = vsub.s32 2, %v18078_v24 }
 0x1b2   : > { %16371 = vmatpush3.bf16.msra.mxu1 %v14484_v9 }
 0x1b3   : > { %21593 = vst [vmem:[#allocation18_spill] sm:$0xff] %v18149_v13  ;;  %v1055_v14 = vrot.slane %v18086_v26, %v18149_v13 }
 0x268   : > { %v15350_v21 = vpop.f32.mrb[16].mxu0 }
 0x269   : > { %v946_v22 = vadd.f32 %v15350_v21, %v824_v20  ;;  %v940_v23 = vpop.f32.mrb[17].mxu0 }
 0x26a   : > { %v941_v28 = vadd.f32 %v940_v23, %v824_v20 }
 0x26b   : > { %v1020_v31 = vmax.f32 %v946_v22, 0.0 }
 0x26c   : > { %v1019_v29 = vmax.f32 %v941_v28, 0.0  ;;  %v15353_v30 = vpop.f32.mrb[18].mxu0 }
 0x26d   : > { %v956_v32 = vadd.f32 %v15353_v30, %v824_v20  ;;  %v950_v33 = vpop.f32.mrb[19].mxu0 }
 0x26e   : > { %v951_v34 = vadd.f32 %v950_v33, %v824_v20  ;;  %15388 = vmatprep.mubr.msk.f32.mxu0 %vm825_vm2, %v1019_v29 }
 0x26f   : > { %v1022_v35 = vmax.f32 %v956_v32, 0.0  ;;  %15389 = vmatmul.mubr.msk.f32.vlgmr.msra.gmra.mrb[24].mxu0 %vm825_vm2, %v1020_v31 }
 0x270   : > { %v1021_v36 = vmax.f32 %v951_v34, 0.0  ;;  %v15356_v37 = vpop.f32.mrb[20].mxu0  ;;  %16375 = vmatpush3.bf16.msra.mxu0 %v14157_v10 }
 0x271   : > { %v966_v38 = vadd.f32 %v15356_v37, %v824_v20  ;;  %v960_v39 = vpop.f32.mrb[21].mxu0  ;;  %16377 = vmatprep.subr.bf16.mxu0 %v14485_v11 }
 0x272   : > { %v961_v40 = vadd.f32 %v960_v39, %v824_v20  ;;  %15391 = vmatprep.mubr.msk.f32.mxu0 %vm825_vm2, %v1021_v36 }
 0x273   : > { %v1024_v41 = vmax.f32 %v966_v38, 0.0  ;;  %15392 = vmatmul.mubr.msk.f32.gmra.mrb[26].mxu0 %vm825_vm2, %v1022_v35 }
 0x274   : > { %v1023_v42 = vmax.f32 %v961_v40, 0.0  ;;  %v15359_v43 = vpop.f32.mrb[22].mxu0  ;;  %16379 = vmatpush3.bf16.msra.mxu0 %v14485_v11 }
 0x275   : > { %v976_v44 = vadd.f32 %v15359_v43, %v824_v20  ;;  %v970_v45 = vpop.f32.mrb[23].mxu0  ;;  %16381 = vmatprep.subr.bf16.mxu0 %v14486_v12 }
 0x276   : > { %v971_v46 = vadd.f32 %v970_v45, %v824_v20  ;;  %15394 = vmatprep.mubr.msk.f32.mxu0 %vm825_vm2, %v1023_v42 }
 0x277   : > { %v1026_v47 = vmax.f32 %v976_v44, 0.0  ;;  %15395 = vmatmul.mubr.msk.f32.gmra.mrb[28].mxu0 %vm825_vm2, %v1024_v41 }
 0x278   : > { %v1025_v48 = vmax.f32 %v971_v46, 0.0  ;;  %v15362_v49 = vpop.f32.mrb[0].mxu1  ;;  %16383 = vmatpush3.bf16.msra.mxu0 %v14486_v12 }
 0x279   : > { %v986_v50 = vadd.f32 %v15362_v49, %v824_v20  ;;  %v980_v51 = vpop.f32.mrb[1].mxu1 }
 0x27a   : > { %15397 = vmatprep.mubr.msk.f32.mxu0 %vm825_vm2, %v1025_v48  ;;  %v981_v52 = vadd.f32 %v980_v51, %v824_v20 }
 0x27b   : > { %v1028_v53 = vmax.f32 %v986_v50, 0.0  ;;  %15398 = vmatmul.mubr.msk.f32.gmra.mrb[30].mxu0 %vm825_vm2, %v1026_v47 }
 0x27c   : > { %v1027_v54 = vmax.f32 %v981_v52, 0.0  ;;  %v15365_v55 = vpop.f32.mrb[2].mxu1 }
 0x27d   : > { %v996_v56 = vadd.f32 %v15365_v55, %v824_v20  ;;  %v990_v57 = vpop.f32.mrb[3].mxu1 }
 0x27e   : > { %15400 = vmatprep.mubr.msk.f32.mxu0 %vm825_vm2, %v1027_v54  ;;  %v991_v58 = vadd.f32 %v990_v57, %v824_v20 }
 0x27f   : > { %15401 = vmatmul.mubr.msk.f32.gmra.mrb[32].mxu0 %vm825_vm2, %v1028_v53  ;;  %v1030_v59 = vmax.f32 %v996_v56, 0.0 }
 0x280   : > { %v1029_v60 = vmax.f32 %v991_v58, 0.0  ;;  %v15368_v61 = vpop.f32.mrb[4].mxu1 }
 0x281   : > { %v1006_v62 = vadd.f32 %v15368_v61, %v824_v20  ;;  %v1000_v63 = vpop.f32.mrb[5].mxu1 }
 0x282   : > { %15403 = vmatprep.mubr.msk.f32.mxu0 %vm825_vm2, %v1029_v60  ;;  %v1001_v0 = vadd.f32 %v1000_v63, %v824_v20 }
 0x283   : > { %15404 = vmatmul.mubr.msk.f32.gmra.mrb[34].mxu0 %vm825_vm2, %v1030_v59  ;;  %v1032_v1 = vmax.f32 %v1006_v62, 0.0 }
 0x284   : > { %v1031_v2 = vmax.f32 %v1001_v0, 0.0  ;;  %v15371_v3 = vpop.f32.mrb[6].mxu1 }
 0x285   : > { %v1016_v4 = vadd.f32 %v15371_v3, %v824_v20  ;;  %v1010_v5 = vpop.f32.mrb[7].mxu1 }
 0x286   : > { %15406 = vmatprep.mubr.msk.f32.mxu0 %vm825_vm2, %v1031_v2  ;;  %v1011_v6 = vadd.f32 %v1010_v5, %v824_v20  ;;  %v14173_v5 = vld [vmem:[%s21519_s3] sm:$0xff]  }
 0x287   : > { %15407 = vmatmul.mubr.msk.f32.gmra.mrb[36].mxu0 %vm825_vm2, %v1032_v1  ;;  %v1034_v7 = vmax.f32 %v1016_v4, 0.0  ;;  %v14487_v4 = vld [vmem:[#allocation4 + $0x78] sm:$0xff]   ;;  %16389 = vmatprep.subr.bf16.mxu1 %v14173_v5 }
 0x288   : > { %v1033_v8 = vmax.f32 %v1011_v6, 0.0  ;;  %16385 = vmatprep.subr.bf16.mxu0 %v14487_v4  ;;  %v14488_v6 = vld [vmem:[%s21519_s3 + $0x8] sm:$0xff]  }
 0x289   : > { %16387 = vmatpush3.bf16.msra.mxu0 %v14487_v4  ;;  %v18202_v4 = vsub.s32 4, %v18078_v24 }
 0x28a   : > { %15409 = vmatprep.mubr.msk.f32.mxu0 %vm825_vm2, %v1033_v8  ;;  %v21541_v8 = vsub.s32 3, %v18078_v24 }
 0x28b   : > { %15410 = vmatmul.mubr.msk.f32.gmra.mrb[38].mxu0 %vm825_vm2, %v1034_v7  ;;  %v14489_v7 = vld [vmem:[%s21519_s3 + $0x10] sm:$0xff]   ;;  %21594 = vst [vmem:[#allocation19_spill] sm:$0xff] %v18202_v4 }
 0x28c   : > { %v1285_v9 = vrot.slane %v18086_v26, %v21541_v8 }
 0x342   : > { %v15390_v15 = vpop.f32.mrb[24].mxu0 }
 0x343   : > { %v1176_v16 = vadd.f32 %v15390_v15, %v1055_v14  ;;  %v1170_v17 = vpop.f32.mrb[25].mxu0 }
 0x344   : > { %v1171_v18 = vadd.f32 %v1170_v17, %v1055_v14 }
 0x345   : > { %v1250_v22 = vmax.f32 %v1176_v16, 0.0 }
 0x346   : > { %v1249_v20 = vmax.f32 %v1171_v18, 0.0  ;;  %v15393_v21 = vpop.f32.mrb[26].mxu0 }
 0x347   : > { %v1186_v23 = vadd.f32 %v15393_v21, %v1055_v14  ;;  %v1180_v28 = vpop.f32.mrb[27].mxu0 }
 0x348   : > { %v1181_v29 = vadd.f32 %v1180_v28, %v1055_v14  ;;  %15428 = vmatprep.mubr.msk.f32.mxu1 %vm825_vm2, %v1249_v20 }
 0x349   : > { %15429 = vmatmul.mubr.msk.f32.vlgmr.msra.gmra.mrb[8].mxu1 %vm825_vm2, %v1250_v22  ;;  %v1252_v32 = vmax.f32 %v1186_v23, 0.0 }
 0x34a   : > { %v1251_v30 = vmax.f32 %v1181_v29, 0.0  ;;  %v15396_v31 = vpop.f32.mrb[28].mxu0  ;;  %16391 = vmatpush3.bf16.msra.mxu1 %v14173_v5  ;;  %v1515_v5 = vrot.slane %v18086_v26, %v18202_v4 }
 0x34b   : > { %v1196_v33 = vadd.f32 %v15396_v31, %v1055_v14  ;;  %v1190_v34 = vpop.f32.mrb[29].mxu0  ;;  %16393 = vmatprep.subr.bf16.mxu1 %v14488_v6 }
 0x34c   : > { %v1191_v35 = vadd.f32 %v1190_v34, %v1055_v14  ;;  %15431 = vmatprep.mubr.msk.f32.mxu1 %vm825_vm2, %v1251_v30 }
 0x34d   : > { %v1254_v36 = vmax.f32 %v1196_v33, 0.0  ;;  %15432 = vmatmul.mubr.msk.f32.gmra.mrb[10].mxu1 %vm825_vm2, %v1252_v32 }
 0x34e   : > { %v1253_v37 = vmax.f32 %v1191_v35, 0.0  ;;  %v15399_v38 = vpop.f32.mrb[30].mxu0  ;;  %16395 = vmatpush3.bf16.msra.mxu1 %v14488_v6 }
 0x34f   : > { %v1206_v39 = vadd.f32 %v15399_v38, %v1055_v14  ;;  %v1200_v40 = vpop.f32.mrb[31].mxu0  ;;  %16397 = vmatprep.subr.bf16.mxu1 %v14489_v7 }
 0x350   : > { %v1201_v41 = vadd.f32 %v1200_v40, %v1055_v14  ;;  %15434 = vmatprep.mubr.msk.f32.mxu1 %vm825_vm2, %v1253_v37 }
 0x351   : > { %v1256_v42 = vmax.f32 %v1206_v39, 0.0  ;;  %15435 = vmatmul.mubr.msk.f32.gmra.mrb[12].mxu1 %vm825_vm2, %v1254_v36 }
 0x352   : > { %v1255_v43 = vmax.f32 %v1201_v41, 0.0  ;;  %v15402_v44 = vpop.f32.mrb[32].mxu0  ;;  %16399 = vmatpush3.bf16.msra.mxu1 %v14489_v7 }
 0x353   : > { %v1216_v45 = vadd.f32 %v15402_v44, %v1055_v14  ;;  %v1210_v46 = vpop.f32.mrb[33].mxu0 }
 0x354   : > { %15437 = vmatprep.mubr.msk.f32.mxu1 %vm825_vm2, %v1255_v43  ;;  %v1211_v47 = vadd.f32 %v1210_v46, %v1055_v14 }
 0x355   : > { %v1258_v48 = vmax.f32 %v1216_v45, 0.0  ;;  %15438 = vmatmul.mubr.msk.f32.gmra.mrb[14].mxu1 %vm825_vm2, %v1256_v42 }
 0x356   : > { %v1257_v49 = vmax.f32 %v1211_v47, 0.0  ;;  %v15405_v50 = vpop.f32.mrb[34].mxu0 }
 0x357   : > { %v1226_v51 = vadd.f32 %v15405_v50, %v1055_v14  ;;  %v1220_v52 = vpop.f32.mrb[35].mxu0 }
 0x358   : > { %15440 = vmatprep.mubr.msk.f32.mxu1 %vm825_vm2, %v1257_v49  ;;  %v1221_v53 = vadd.f32 %v1220_v52, %v1055_v14 }
 0x359   : > { %15441 = vmatmul.mubr.msk.f32.gmra.mrb[16].mxu1 %vm825_vm2, %v1258_v48  ;;  %v1260_v54 = vmax.f32 %v1226_v51, 0.0 }
 0x35a   : > { %v1259_v55 = vmax.f32 %v1221_v53, 0.0  ;;  %v15408_v56 = vpop.f32.mrb[36].mxu0 }
 0x35b   : > { %v1236_v57 = vadd.f32 %v15408_v56, %v1055_v14  ;;  %v1230_v58 = vpop.f32.mrb[37].mxu0 }
 0x35c   : > { %15443 = vmatprep.mubr.msk.f32.mxu1 %vm825_vm2, %v1259_v55  ;;  %v1231_v59 = vadd.f32 %v1230_v58, %v1055_v14 }
 0x35d   : > { %15444 = vmatmul.mubr.msk.f32.gmra.mrb[18].mxu1 %vm825_vm2, %v1260_v54  ;;  %v1262_v60 = vmax.f32 %v1236_v57, 0.0 }
 0x35e   : > { %v1261_v61 = vmax.f32 %v1231_v59, 0.0  ;;  %v15411_v62 = vpop.f32.mrb[38].mxu0 }
 0x35f   : > { %v1246_v63 = vadd.f32 %v15411_v62, %v1055_v14  ;;  %v1240_v0 = vpop.f32.mrb[39].mxu0 }
 0x360   : > { %15446 = vmatprep.mubr.msk.f32.mxu1 %vm825_vm2, %v1261_v61  ;;  %v1241_v1 = vadd.f32 %v1240_v0, %v1055_v14  ;;  %v14490_v0 = vld [vmem:[%s21519_s3 + $0x18] sm:$0xff]  }
 0x361   : > { %15447 = vmatmul.mubr.msk.f32.gmra.mrb[20].mxu1 %vm825_vm2, %v1262_v60  ;;  %v1264_v2 = vmax.f32 %v1246_v63, 0.0  ;;  %16401 = vmatprep.subr.bf16.mxu1 %v14490_v0 }
 0x362   : > { %v1263_v3 = vmax.f32 %v1241_v1, 0.0  ;;  %16403 = vmatpush3.bf16.msra.mxu1 %v14490_v0  ;;  %v17041_v1 = vld [vmem:[#allocation6 + $0x4] ss:$12 sps:$4 sm:$0xff]   ;;  %v21546_v0 = vmov 0.0  }
 0x363   : > { %16405 = vmatprep.subr.bf16.mxu0 %v17041_v1  ;;  %v18226_v1 = vsub.s32 5, %v18078_v24 }
 0x364   : > { %15449 = vmatprep.mubr.msk.f32.mxu1 %vm825_vm2, %v1263_v3  ;;  %v17044_v3 = vld [vmem:[#allocation6 + $0x8] ss:$12 sps:$4 sm:$0xff]  }
 0x365   : > { %15450 = vmatmul.mubr.msk.f32.gmra.mrb[22].mxu1 %vm825_vm2, %v1264_v2  ;;  %v17043_v2 = vld [vmem:[#allocation6] ss:$12 sps:$4 sm:$0xff]   ;;  %16413 = vmatprep.subr.bf16.mxu1 %v17044_v3  ;;  %21595 = vst [vmem:[#allocation20_spill] sm:$0xff] %v18226_v1 }
 0x41c   : > { %v15430_v10 = vpop.f32.mrb[8].mxu1 }
 0x41d   : > { %v1406_v11 = vadd.f32 %v15430_v10, %v1285_v9  ;;  %v1400_v12 = vpop.f32.mrb[9].mxu1 }
 0x41e   : > { %v1401_v14 = vadd.f32 %v1400_v12, %v1285_v9 }
 0x41f   : > { %v1480_v17 = vmax.f32 %v1406_v11, 0.0 }
 0x420   : > { %v1479_v15 = vmax.f32 %v1401_v14, 0.0  ;;  %v15433_v16 = vpop.f32.mrb[10].mxu1 }
 0x421   : > { %v1416_v18 = vadd.f32 %v15433_v16, %v1285_v9  ;;  %v1410_v20 = vpop.f32.mrb[11].mxu1 }
 0x422   : > { %v1411_v21 = vadd.f32 %v1410_v20, %v1285_v9  ;;  %15468 = vmatprep.mubr.msk.f32.mxu0 %vm825_vm2, %v1479_v15 }
 0x423   : > { %15469 = vmatmul.mubr.msk.f32.vlgmr.msra.gmra.mrb[40].mxu0 %vm825_vm2, %v1480_v17  ;;  %v1482_v28 = vmax.f32 %v1416_v18, 0.0 }
 0x424   : > { %v1481_v22 = vmax.f32 %v1411_v21, 0.0  ;;  %v15436_v23 = vpop.f32.mrb[12].mxu1  ;;  %16407 = vmatpush1.bf16.msra.mxu0 %v17043_v2  ;;  %v1744_v2 = vrot.slane %v18086_v26, %v18226_v1 }
 0x425   : > { %v1426_v29 = vadd.f32 %v15436_v23, %v1285_v9  ;;  %v1420_v30 = vpop.f32.mrb[13].mxu1 }
 0x426   : > { %v1421_v31 = vadd.f32 %v1420_v30, %v1285_v9  ;;  %15471 = vmatprep.mubr.msk.f32.mxu0 %vm825_vm2, %v1481_v22 }
 0x427   : > { %v1484_v32 = vmax.f32 %v1426_v29, 0.0  ;;  %15472 = vmatmul.mubr.msk.f32.gmra.mrb[42].mxu0 %vm825_vm2, %v1482_v28 }
 0x428   : > { %v1483_v33 = vmax.f32 %v1421_v31, 0.0  ;;  %v15439_v34 = vpop.f32.mrb[14].mxu1 }
 0x429   : > { %v1436_v35 = vadd.f32 %v15439_v34, %v1285_v9  ;;  %v1430_v36 = vpop.f32.mrb[15].mxu1 }
 0x42a   : > { %v1431_v37 = vadd.f32 %v1430_v36, %v1285_v9  ;;  %15474 = vmatprep.mubr.msk.f32.mxu0 %vm825_vm2, %v1483_v33 }
 0x42b   : > { %v1486_v38 = vmax.f32 %v1436_v35, 0.0  ;;  %15475 = vmatmul.mubr.msk.f32.gmra.mrb[44].mxu0 %vm825_vm2, %v1484_v32 }
 0x42c   : > { %v1485_v39 = vmax.f32 %v1431_v37, 0.0  ;;  %v15442_v40 = vpop.f32.mrb[16].mxu1 }
 0x42d   : > { %v1446_v41 = vadd.f32 %v15442_v40, %v1285_v9  ;;  %v1440_v42 = vpop.f32.mrb[17].mxu1 }
 0x42e   : > { %15477 = vmatprep.mubr.msk.f32.mxu0 %vm825_vm2, %v1485_v39  ;;  %v1441_v43 = vadd.f32 %v1440_v42, %v1285_v9 }
 0x42f   : > { %v1488_v44 = vmax.f32 %v1446_v41, 0.0  ;;  %15478 = vmatmul.mubr.msk.f32.gmra.mrb[46].mxu0 %vm825_vm2, %v1486_v38 }
 0x430   : > { %v1487_v45 = vmax.f32 %v1441_v43, 0.0  ;;  %v15445_v46 = vpop.f32.mrb[18].mxu1 }
 0x431   : > { %v1456_v47 = vadd.f32 %v15445_v46, %v1285_v9  ;;  %v1450_v48 = vpop.f32.mrb[19].mxu1 }
 0x432   : > { %15480 = vmatprep.mubr.msk.f32.mxu0 %vm825_vm2, %v1487_v45  ;;  %v1451_v49 = vadd.f32 %v1450_v48, %v1285_v9 }
 0x433   : > { %15481 = vmatmul.mubr.msk.f32.gmra.mrb[48].mxu0 %vm825_vm2, %v1488_v44  ;;  %v1490_v50 = vmax.f32 %v1456_v47, 0.0 }
 0x434   : > { %v1489_v51 = vmax.f32 %v1451_v49, 0.0  ;;  %v15448_v52 = vpop.f32.mrb[20].mxu1 }
 0x435   : > { %v1466_v53 = vadd.f32 %v15448_v52, %v1285_v9  ;;  %v1460_v54 = vpop.f32.mrb[21].mxu1 }
 0x436   : > { %15483 = vmatprep.mubr.msk.f32.mxu0 %vm825_vm2, %v1489_v51  ;;  %v1461_v55 = vadd.f32 %v1460_v54, %v1285_v9 }
 0x437   : > { %15484 = vmatmul.mubr.msk.f32.gmra.mrb[50].mxu0 %vm825_vm2, %v1490_v50  ;;  %v1492_v56 = vmax.f32 %v1466_v53, 0.0 }
 0x438   : > { %v1491_v57 = vmax.f32 %v1461_v55, 0.0  ;;  %v15451_v58 = vpop.f32.mrb[22].mxu1 }
 0x439   : > { %v1476_v59 = vadd.f32 %v15451_v58, %v1285_v9  ;;  %v1470_v60 = vpop.f32.mrb[23].mxu1 }
 0x43a   : > { %15486 = vmatprep.mubr.msk.f32.mxu0 %vm825_vm2, %v1491_v57  ;;  %v1471_v61 = vadd.f32 %v1470_v60, %v1285_v9 }
 0x43b   : > { %15487 = vmatmul.mubr.msk.f32.gmra.mrb[52].mxu0 %vm825_vm2, %v1492_v56  ;;  %v1494_v62 = vmax.f32 %v1476_v59, 0.0 }
 0x43c   : > { %v1493_v63 = vmax.f32 %v1471_v61, 0.0  ;;  %v17045_v61 = vld [vmem:[#allocation6 + $0x1c] ss:$12 sps:$4 sm:$0xff]  }
 0x43d   : > { %16409 = vmatprep.subr.bf16.mxu0 %v17045_v61 }
 0x43e   : > { %15489 = vmatprep.mubr.msk.f32.mxu0 %vm825_vm2, %v1493_v63  ;;  %v17048_v63 = vld [vmem:[#allocation6 + $0x20] ss:$12 sps:$4 sm:$0xff]  }
 0x43f   : > { %15490 = vmatmul.mubr.msk.f32.gmra.mrb[54].mxu0 %vm825_vm2, %v1494_v62  ;;  %v17047_v62 = vld [vmem:[#allocation6 + $0x18] ss:$12 sps:$4 sm:$0xff]  }
 0x440   : > { %16411 = vmatpush1.bf16.msra.mxu0 %v17047_v62  ;;  %2131 = vmatprep.mubr.f32.mxu0 %v21546_v0 }
 0x441   : > { %15589 = vmatprep.subr.mxu0 %v21546_v0 }
 0x4f6   : > { %v15470_v6 = vpop.f32.mrb[40].mxu0 }
 0x4f7   : > { %v1636_v7 = vadd.f32 %v15470_v6, %v1515_v5  ;;  %v1630_v9 = vpop.f32.mrb[41].mxu0 }
 0x4f8   : > { %v1631_v10 = vadd.f32 %v1630_v9, %v1515_v5 }
 0x4f9   : > { %v1710_v14 = vmax.f32 %v1636_v7, 0.0 }
 0x4fa   : > { %v1709_v11 = vmax.f32 %v1631_v10, 0.0  ;;  %v15473_v12 = vpop.f32.mrb[42].mxu0 }
 0x4fb   : > { %v1646_v15 = vadd.f32 %v15473_v12, %v1515_v5  ;;  %v1640_v16 = vpop.f32.mrb[43].mxu0 }
 0x4fc   : > { %v1641_v17 = vadd.f32 %v1640_v16, %v1515_v5  ;;  %15508 = vmatprep.mubr.msk.f32.mxu1 %vm825_vm2, %v1709_v11 }
 0x4fd   : > { %15509 = vmatmul.mubr.msk.f32.vlgmr.msra.gmra.mrb[24].mxu1 %vm825_vm2, %v1710_v14  ;;  %v1712_v21 = vmax.f32 %v1646_v15, 0.0 }
 0x4fe   : > { %v1711_v18 = vmax.f32 %v1641_v17, 0.0  ;;  %v15476_v20 = vpop.f32.mrb[44].mxu0  ;;  %16415 = vmatpush3.bf16.msra.mxu1 %v17044_v3 }
 0x4ff   : > { %v1656_v22 = vadd.f32 %v15476_v20, %v1515_v5  ;;  %v1650_v23 = vpop.f32.mrb[45].mxu0  ;;  %16417 = vmatprep.subr.bf16.mxu1 %v17048_v63 }
 0x500   : > { %v1651_v28 = vadd.f32 %v1650_v23, %v1515_v5  ;;  %15511 = vmatprep.mubr.msk.f32.mxu1 %vm825_vm2, %v1711_v18 }
 0x501   : > { %15512 = vmatmul.mubr.msk.f32.gmra.mrb[26].mxu1 %vm825_vm2, %v1712_v21  ;;  %v1714_v31 = vmax.f32 %v1656_v22, 0.0 }
 0x502   : > { %v1713_v29 = vmax.f32 %v1651_v28, 0.0  ;;  %v15479_v30 = vpop.f32.mrb[46].mxu0  ;;  %16419 = vmatpush3.bf16.msra.mxu1 %v17048_v63 }
 0x503   : > { %v1666_v32 = vadd.f32 %v15479_v30, %v1515_v5  ;;  %v1660_v33 = vpop.f32.mrb[47].mxu0  ;;  %15564 = vmatprep.subr.mxu1 %v21546_v0 }
 0x504   : > { %v1661_v34 = vadd.f32 %v1660_v33, %v1515_v5  ;;  %15514 = vmatprep.mubr.msk.f32.mxu1 %vm825_vm2, %v1713_v29 }
 0x505   : > { %v1716_v35 = vmax.f32 %v1666_v32, 0.0  ;;  %15515 = vmatmul.mubr.msk.f32.gmra.mrb[28].mxu1 %vm825_vm2, %v1714_v31 }
 0x506   : > { %v1715_v36 = vmax.f32 %v1661_v34, 0.0  ;;  %v15482_v37 = vpop.f32.mrb[48].mxu0 }
 0x507   : > { %v1676_v38 = vadd.f32 %v15482_v37, %v1515_v5  ;;  %v1670_v39 = vpop.f32.mrb[49].mxu0 }
 0x508   : > { %15517 = vmatprep.mubr.msk.f32.mxu1 %vm825_vm2, %v1715_v36  ;;  %v1671_v40 = vadd.f32 %v1670_v39, %v1515_v5 }
 0x509   : > { %v1718_v41 = vmax.f32 %v1676_v38, 0.0  ;;  %15518 = vmatmul.mubr.msk.f32.gmra.mrb[30].mxu1 %vm825_vm2, %v1716_v35 }
 0x50a   : > { %v1717_v42 = vmax.f32 %v1671_v40, 0.0  ;;  %v15485_v43 = vpop.f32.mrb[50].mxu0 }
 0x50b   : > { %v1686_v44 = vadd.f32 %v15485_v43, %v1515_v5  ;;  %v1680_v45 = vpop.f32.mrb[51].mxu0  ;;  %v18346_v43 = vsub.s32 6, %v18078_v24 }
 0x50c   : > { %15520 = vmatprep.mubr.msk.f32.mxu1 %vm825_vm2, %v1717_v42  ;;  %v1681_v46 = vadd.f32 %v1680_v45, %v1515_v5  ;;  %v558_v45 = vld [vmem:[%s21529_s13 + $0x8] sm:$0xf] }
 0x50d   : > { %15521 = vmatmul.mubr.msk.f32.gmra.mrb[32].mxu1 %vm825_vm2, %v1718_v41  ;;  %v1720_v47 = vmax.f32 %v1686_v44, 0.0  ;;  %21612 = vst [vmem:[#allocation37_spill] sm:$0xff] %v18346_v43  ;;  %v21542_v44 = vunpack.c.h.bf16 %v18083_v25 }
 0x50e   : > { %v1719_v48 = vmax.f32 %v1681_v46, 0.0  ;;  %v15488_v49 = vpop.f32.mrb[52].mxu0 }
 0x50f   : > { %v1696_v50 = vadd.f32 %v15488_v49, %v1515_v5  ;;  %v1690_v51 = vpop.f32.mrb[53].mxu0  ;;  %v18355_v46 = vrot.slane %v21542_v44, %v18346_v43  ;;  %v18359_v49 = vrot.slane %v18086_v26, %v18346_v43 }
 0x510   : > { %15523 = vmatprep.mubr.msk.f32.mxu1 %vm825_vm2, %v1719_v48  ;;  %v1691_v52 = vadd.f32 %v1690_v51, %v1515_v5  ;;  %v564_v48 = vunpack.c.l.bf16 %v558_v45 }
 0x511   : > { %15524 = vmatmul.mubr.msk.f32.gmra.mrb[34].mxu1 %vm825_vm2, %v1720_v47  ;;  %v1722_v53 = vmax.f32 %v1696_v50, 0.0 }
 0x512   : > { %v1721_v54 = vmax.f32 %v1691_v52, 0.0  ;;  %v15491_v55 = vpop.f32.mrb[54].mxu0 }
 0x513   : > { %v1706_v56 = vadd.f32 %v15491_v55, %v1515_v5  ;;  %v1700_v57 = vpop.f32.mrb[55].mxu0 }
 0x514   : > { %15526 = vmatprep.mubr.msk.f32.mxu1 %vm825_vm2, %v1721_v54  ;;  %v1701_v58 = vadd.f32 %v1700_v57, %v1515_v5  ;;  %v18367_v54 = vrot.slane %v564_v48, %v18346_v43 }
 0x515   : > { %15527 = vmatmul.mubr.msk.f32.gmra.mrb[36].mxu1 %vm825_vm2, %v1722_v53  ;;  %v1724_v59 = vmax.f32 %v1706_v56, 0.0 }
 0x516   : > { %v1723_v60 = vmax.f32 %v1701_v58, 0.0 }
 0x518   : > { %15529 = vmatprep.mubr.msk.f32.mxu1 %vm825_vm2, %v1723_v60 }
 0x519   : > { %15530 = vmatmul.mubr.msk.f32.gmra.mrb[38].mxu1 %vm825_vm2, %v1724_v59 }
 0x5d0   : > { %v15510_v3 = vpop.f32.mrb[24].mxu1 }
 0x5d1   : > { %v1859_v5 = vpop.f32.mrb[25].mxu1  ;;  %v18232_v7 = vadd.f32 %v15510_v3, %v1744_v2 }
 0x5d2   : > { %v18230_v6 = vadd.f32 %v1859_v5, %v1744_v2 }
 0x5d3   : > { %21597 = vst [vmem:[#allocation22_spill] sm:$0xff] %v18232_v7 }
 0x5d4   : > { %21596 = vst [vmem:[#allocation21_spill] sm:$0xff] %v18230_v6  ;;  %v15513_v9 = vpop.f32.mrb[26].mxu1  ;;  %13978 = vmatmul.mubr.msk.f32.vlgmr.msra.gmra.mrb[56].mxu0 %vm2018_vm3, %v18230_v6  ;;  %15540 = vmatprep.mubr.msk.f32.mxu1 %vm2018_vm3, %v18230_v6 }
 0x5d5   : > { %v1869_v10 = vpop.f32.mrb[27].mxu1  ;;  %15541 = vmatmul.mubr.msk.f32.vlgmr.msra.gmra.mrb[40].mxu1 %vm2018_vm3, %v18232_v7  ;;  %2137 = vmatprep.mubr.f32.mxu0 %v21546_v0  ;;  %v18243_v12 = vadd.f32 %v15513_v9, %v1744_v2 }
 0x5d6   : > { %v18241_v11 = vadd.f32 %v1869_v10, %v1744_v2 }
 0x5d7   : > { %21599 = vst [vmem:[#allocation24_spill] sm:$0xff] %v18243_v12 }
 0x5d8   : > { %21598 = vst [vmem:[#allocation23_spill] sm:$0xff] %v18241_v11  ;;  %v15516_v14 = vpop.f32.mrb[28].mxu1  ;;  %13979 = vmatmul.mubr.msk.f32.gmra.mrb[58].mxu0 %vm2018_vm3, %v18232_v7  ;;  %15543 = vmatprep.mubr.msk.f32.mxu1 %vm2018_vm3, %v18241_v11 }
 0x5d9   : > { %v1879_v15 = vpop.f32.mrb[29].mxu1  ;;  %15544 = vmatmul.mubr.msk.f32.gmra.mrb[42].mxu1 %vm2018_vm3, %v18243_v12  ;;  %2143 = vmatprep.mubr.f32.mxu0 %v21546_v0  ;;  %v18254_v17 = vadd.f32 %v15516_v14, %v1744_v2 }
 0x5da   : > { %v18252_v16 = vadd.f32 %v1879_v15, %v1744_v2 }
 0x5db   : > { %21601 = vst [vmem:[#allocation26_spill] sm:$0xff] %v18254_v17 }
 0x5dc   : > { %21600 = vst [vmem:[#allocation25_spill] sm:$0xff] %v18252_v16  ;;  %v15519_v18 = vpop.f32.mrb[30].mxu1  ;;  %13980 = vmatmul.mubr.msk.f32.gmra.mrb[60].mxu0 %vm2018_vm3, %v18241_v11  ;;  %15546 = vmatprep.mubr.msk.f32.mxu1 %vm2018_vm3, %v18252_v16 }
 0x5dd   : > { %v18260_v20 = vadd.f32 %v15519_v18, %v1744_v2  ;;  %v1889_v21 = vpop.f32.mrb[31].mxu1  ;;  %15547 = vmatmul.mubr.msk.f32.gmra.mrb[44].mxu1 %vm2018_vm3, %v18254_v17  ;;  %2149 = vmatprep.mubr.f32.mxu0 %v21546_v0 }
 0x5de   : > { %v18265_v22 = vadd.f32 %v1889_v21, %v1744_v2 }
 0x5df   : > { %21602 = vst [vmem:[#allocation27_spill] sm:$0xff] %v18260_v20 }
 0x5e0   : > { %21603 = vst [vmem:[#allocation28_spill] sm:$0xff] %v18265_v22  ;;  %13981 = vmatmul.mubr.msk.f32.gmra.mrb[62].mxu0 %vm2018_vm3, %v18243_v12  ;;  %15549 = vmatprep.mubr.msk.f32.mxu1 %vm2018_vm3, %v18265_v22  ;;  %v15522_v23 = vpop.f32.mrb[32].mxu1 }
 0x5e1   : > { %15550 = vmatmul.mubr.msk.f32.gmra.mrb[46].mxu1 %vm2018_vm3, %v18260_v20  ;;  %v18273_v28 = vadd.f32 %v15522_v23, %v1744_v2  ;;  %2155 = vmatprep.mubr.f32.mxu0 %v21546_v0  ;;  %v1899_v29 = vpop.f32.mrb[33].mxu1 }
 0x5e2   : > { %v18276_v30 = vadd.f32 %v1899_v29, %v1744_v2 }
 0x5e3   : > { %21604 = vst [vmem:[#allocation29_spill] sm:$0xff] %v18273_v28 }
 0x5e4   : > { %21605 = vst [vmem:[#allocation30_spill] sm:$0xff] %v18276_v30  ;;  %13982 = vmatmul.mubr.msk.f32.gmra.mrb[64].mxu0 %vm2018_vm3, %v18252_v16  ;;  %15552 = vmatprep.mubr.msk.f32.mxu1 %vm2018_vm3, %v18276_v30  ;;  %v15525_v31 = vpop.f32.mrb[34].mxu1 }
 0x5e5   : > { %2161 = vmatprep.mubr.f32.mxu0 %v21546_v0  ;;  %15553 = vmatmul.mubr.msk.f32.gmra.mrb[48].mxu1 %vm2018_vm3, %v18273_v28  ;;  %v18285_v32 = vadd.f32 %v15525_v31, %v1744_v2  ;;  %v1909_v33 = vpop.f32.mrb[35].mxu1 }
 0x5e6   : > { %v18287_v34 = vadd.f32 %v1909_v33, %v1744_v2 }
 0x5e7   : > { %21606 = vst [vmem:[#allocation31_spill] sm:$0xff] %v18285_v32 }
 0x5e8   : > { %21607 = vst [vmem:[#allocation32_spill] sm:$0xff] %v18287_v34  ;;  %13983 = vmatmul.mubr.msk.f32.gmra.mrb[66].mxu0 %vm2018_vm3, %v18254_v17  ;;  %v15528_v35 = vpop.f32.mrb[36].mxu1  ;;  %15555 = vmatprep.mubr.msk.f32.mxu1 %vm2018_vm3, %v18287_v34 }
 0x5e9   : > { %2167 = vmatprep.mubr.f32.mxu0 %v21546_v0  ;;  %v18294_v36 = vadd.f32 %v15528_v35, %v1744_v2  ;;  %v1919_v37 = vpop.f32.mrb[37].mxu1  ;;  %15556 = vmatmul.mubr.msk.f32.gmra.mrb[50].mxu1 %vm2018_vm3, %v18285_v32 }
 0x5ea   : > { %v18298_v38 = vadd.f32 %v1919_v37, %v1744_v2 }
 0x5eb   : > { %21608 = vst [vmem:[#allocation33_spill] sm:$0xff] %v18294_v36 }
 0x5ec   : > { %21609 = vst [vmem:[#allocation34_spill] sm:$0xff] %v18298_v38  ;;  %13984 = vmatmul.mubr.msk.f32.gmra.mrb[68].mxu0 %vm2018_vm3, %v18265_v22  ;;  %v15531_v39 = vpop.f32.mrb[38].mxu1  ;;  %15558 = vmatprep.mubr.msk.f32.mxu1 %vm2018_vm3, %v18298_v38 }
 0x5ed   : > { %2173 = vmatprep.mubr.f32.mxu0 %v21546_v0  ;;  %v18305_v40 = vadd.f32 %v15531_v39, %v1744_v2  ;;  %v1929_v41 = vpop.f32.mrb[39].mxu1  ;;  %15559 = vmatmul.mubr.msk.f32.gmra.mrb[52].mxu1 %vm2018_vm3, %v18294_v36 }
 0x5ee   : > { %v18309_v42 = vadd.f32 %v1929_v41, %v1744_v2 }
 0x5ef   : > { %21610 = vst [vmem:[#allocation35_spill] sm:$0xff] %v18305_v40 }
 0x5f0   : > { %21611 = vst [vmem:[#allocation36_spill] sm:$0xff] %v18309_v42  ;;  %13985 = vmatmul.mubr.msk.f32.gmra.mrb[70].mxu0 %vm2018_vm3, %v18260_v20  ;;  %15561 = vmatprep.mubr.msk.f32.mxu1 %vm2018_vm3, %v18309_v42 }
 0x5f1   : > { %2179 = vmatprep.mubr.f32.mxu0 %v21546_v0  ;;  %15562 = vmatmul.mubr.msk.f32.gmra.mrb[54].mxu1 %vm2018_vm3, %v18305_v40 }
 0x5f2   : > { %15566 = vmatprep.mubr.msk.f32.mxu1 %vm17774_vm4, %v21546_v0 }
 0x5f4   : > { %13986 = vmatmul.mubr.msk.f32.gmra.mrb[72].mxu0 %vm2018_vm3, %v18276_v30 }
 0x5f5   : > { %2185 = vmatprep.mubr.f32.mxu0 %v21546_v0 }
 0x5f8   : > { %13987 = vmatmul.mubr.msk.f32.gmra.mrb[74].mxu0 %vm2018_vm3, %v18273_v28 }
 0x5f9   : > { %2191 = vmatprep.mubr.f32.mxu0 %v21546_v0 }
 0x5fc   : > { %13988 = vmatmul.mubr.msk.f32.gmra.mrb[76].mxu0 %vm2018_vm3, %v18287_v34 }
 0x5fd   : > { %2197 = vmatprep.mubr.f32.mxu0 %v21546_v0 }
 0x600   : > { %13989 = vmatmul.mubr.msk.f32.gmra.mrb[78].mxu0 %vm2018_vm3, %v18285_v32 }
 0x601   : > { %2203 = vmatprep.mubr.f32.mxu0 %v21546_v0 }
 0x604   : > { %13990 = vmatmul.mubr.msk.f32.gmra.mrb[80].mxu0 %vm2018_vm3, %v18298_v38 }
 0x605   : > { %2209 = vmatprep.mubr.f32.mxu0 %v21546_v0 }
 0x608   : > { %13991 = vmatmul.mubr.msk.f32.gmra.mrb[82].mxu0 %vm2018_vm3, %v18294_v36 }
 0x609   : > { %2215 = vmatprep.mubr.f32.mxu0 %v21546_v0 }
 0x60c   : > { %13992 = vmatmul.mubr.msk.f32.gmra.mrb[84].mxu0 %vm2018_vm3, %v18309_v42 }
 0x60d   : > { %2221 = vmatprep.mubr.f32.mxu0 %v21546_v0 }
 0x610   : > { %13993 = vmatmul.mubr.msk.f32.gmra.mrb[86].mxu0 %vm2018_vm3, %v18305_v40 }
 0x611   : > { %15591 = vmatprep.mubr.msk.f32.mxu0 %vm17774_vm4, %v21546_v0 }
 0x6a7   : > { %v2133_v47 = vpop.f32.mrb[56].mxu0 }
 0x6a8   : > { %v2135_v50 = vpop.f32.mrb[57].mxu0  ;;  %v18361_v51 = vpop.f32.mrb[40].mxu1  ;;  %v18370_v56 = vadd.f32 %v2133_v47, %v18359_v49 }
 0x6a9   : > { %v2136_v52 = vadd.f32 %v2135_v50, %v18355_v46  ;;  %v18364_v53 = vpop.f32.mrb[41].mxu1 }
 0x6ab   : > { %v2139_v55 = vpop.f32.mrb[58].mxu0  ;;  %15565 = vmatpush3.xpose.msra.mxu1 %v2136_v52 }
 0x6ac   : > { %v2141_v57 = vpop.f32.mrb[59].mxu0  ;;  %v15545_v58 = vpop.f32.mrb[42].mxu1  ;;  %15569 = vmatprep.subr.mxu1 %v21546_v0  ;;  %v18384_v2 = vadd.f32 %v2139_v55, %v18359_v49 }
 0x6ad   : > { %v2142_v59 = vadd.f32 %v2141_v57, %v18355_v46  ;;  %v18375_v60 = vadd.f32 %v15545_v58, %v18367_v54  ;;  %v2304_v61 = vpop.f32.mrb[43].mxu1 }
 0x6ae   : > { %v18378_v62 = vadd.f32 %v2304_v61, %v18367_v54  ;;  %15567 = vmatmul.mubr.f32.vlgmr.msra.gmra.mrb[56].mxu1 %v18370_v56 }
 0x6af   : > { %v2145_v63 = vpop.f32.mrb[60].mxu0  ;;  %15570 = vmatpush3.xpose.msra.mxu1 %v2142_v59  ;;  %15571 = vmatprep.mubr.msk.f32.mxu1 %vm17774_vm4, %v21546_v0 }
 0x6b0   : > { %v2147_v3 = vpop.f32.mrb[61].mxu0  ;;  %v15548_v5 = vpop.f32.mrb[44].mxu1  ;;  %15574 = vmatprep.subr.mxu1 %v21546_v0  ;;  %v18398_v21 = vadd.f32 %v2145_v63, %v18359_v49 }
 0x6b1   : > { %v2148_v9 = vadd.f32 %v2147_v3, %v18355_v46  ;;  %v18389_v10 = vadd.f32 %v15548_v5, %v18367_v54  ;;  %v2314_v14 = vpop.f32.mrb[45].mxu1 }
 0x6b2   : > { %v18392_v15 = vadd.f32 %v2314_v14, %v18367_v54  ;;  %15572 = vmatmul.mubr.f32.vlgmr.msra.gmra.mrb[58].mxu1 %v18384_v2 }
 0x6b3   : > { %v2151_v18 = vpop.f32.mrb[62].mxu0  ;;  %15575 = vmatpush3.xpose.msra.mxu1 %v2148_v9  ;;  %15576 = vmatprep.mubr.msk.f32.mxu1 %vm17774_vm4, %v21546_v0 }
 0x6b4   : > { %v2153_v23 = vpop.f32.mrb[63].mxu0  ;;  %v15551_v29 = vpop.f32.mrb[46].mxu1  ;;  %15579 = vmatprep.subr.mxu1 %v21546_v0  ;;  %v18412_v41 = vadd.f32 %v2151_v18, %v18359_v49 }
 0x6b5   : > { %v2154_v31 = vadd.f32 %v2153_v23, %v18355_v46  ;;  %v18403_v33 = vadd.f32 %v15551_v29, %v18367_v54  ;;  %v2324_v35 = vpop.f32.mrb[47].mxu1 }
 0x6b6   : > { %v18406_v37 = vadd.f32 %v2324_v35, %v18367_v54  ;;  %15577 = vmatmul.mubr.f32.vlgmr.msra.gmra.mrb[60].mxu1 %v18398_v21 }
 0x6b7   : > { %v2157_v39 = vpop.f32.mrb[64].mxu0  ;;  %15580 = vmatpush3.xpose.msra.mxu1 %v2154_v31  ;;  %15581 = vmatprep.mubr.msk.f32.mxu1 %vm17774_vm4, %v21546_v0 }
 0x6b8   : > { %v2159_v45 = vpop.f32.mrb[65].mxu0  ;;  %15584 = vmatprep.subr.mxu1 %v21546_v0  ;;  %v15554_v47 = vpop.f32.mrb[48].mxu1  ;;  %v18426_v58 = vadd.f32 %v2157_v39, %v18359_v49 }
 0x6b9   : > { %v2160_v48 = vadd.f32 %v2159_v45, %v18355_v46  ;;  %v18417_v50 = vadd.f32 %v15554_v47, %v18367_v54  ;;  %v2334_v52 = vpop.f32.mrb[49].mxu1 }
 0x6ba   : > { %15582 = vmatmul.mubr.f32.vlgmr.msra.gmra.mrb[62].mxu1 %v18412_v41  ;;  %v18421_v55 = vadd.f32 %v2334_v52, %v18367_v54 }
 0x6bb   : > { %v2163_v57 = vpop.f32.mrb[66].mxu0  ;;  %15585 = vmatpush3.xpose.msra.mxu1 %v2160_v48  ;;  %15586 = vmatprep.mubr.msk.f32.mxu1 %vm17774_vm4, %v21546_v0 }
 0x6bc   : > { %v2165_v59 = vpop.f32.mrb[67].mxu0  ;;  %15594 = vmatprep.subr.mxu1 %v21546_v0  ;;  %v15557_v61 = vpop.f32.mrb[50].mxu1  ;;  %v18440_v18 = vadd.f32 %v2163_v57, %v18359_v49 }
 0x6bd   : > { %v2166_v63 = vadd.f32 %v2165_v59, %v18355_v46  ;;  %v18431_v3 = vadd.f32 %v15557_v61, %v18367_v54  ;;  %v2344_v5 = vpop.f32.mrb[51].mxu1 }
 0x6be   : > { %15587 = vmatmul.mubr.f32.vlgmr.msra.gmra.mrb[64].mxu1 %v18426_v58  ;;  %v18435_v9 = vadd.f32 %v2344_v5, %v18367_v54 }
 0x6bf   : > { %v2169_v14 = vpop.f32.mrb[68].mxu0  ;;  %15590 = vmatpush3.xpose.msra.mxu0 %v2166_v63  ;;  %15596 = vmatprep.mubr.msk.f32.mxu1 %vm17774_vm4, %v21546_v0 }
 0x6c0   : > { %v2171_v23 = vpop.f32.mrb[69].mxu0  ;;  %15599 = vmatprep.subr.mxu0 %v21546_v0  ;;  %v15560_v29 = vpop.f32.mrb[52].mxu1  ;;  %v18454_v48 = vadd.f32 %v2169_v14, %v18359_v49 }
 0x6c1   : > { %v2172_v31 = vadd.f32 %v2171_v23, %v18355_v46  ;;  %v18445_v35 = vadd.f32 %v15560_v29, %v18367_v54  ;;  %v2354_v39 = vpop.f32.mrb[53].mxu1 }
 0x6c2   : > { %15592 = vmatmul.mubr.f32.vlgmr.msra.gmra.mrb[88].mxu0 %v18440_v18  ;;  %v18449_v45 = vadd.f32 %v2354_v39, %v18367_v54 }
 0x6c3   : > { %v2175_v47 = vpop.f32.mrb[70].mxu0  ;;  %15595 = vmatpush3.xpose.msra.mxu1 %v2172_v31  ;;  %15601 = vmatprep.mubr.msk.f32.mxu0 %vm17774_vm4, %v21546_v0 }
 0x6c4   : > { %v2177_v52 = vpop.f32.mrb[71].mxu0  ;;  %15604 = vmatprep.subr.mxu1 %v21546_v0  ;;  %v15563_v57 = vpop.f32.mrb[54].mxu1  ;;  %v18468_v14 = vadd.f32 %v2175_v47, %v18359_v49 }
 0x6c5   : > { %v2178_v59 = vadd.f32 %v2177_v52, %v18355_v46  ;;  %v18459_v61 = vadd.f32 %v15563_v57, %v18367_v54  ;;  %v2364_v63 = vpop.f32.mrb[55].mxu1 }
 0x6c6   : > { %15597 = vmatmul.mubr.f32.vlgmr.msra.gmra.mrb[66].mxu1 %v18454_v48  ;;  %v18463_v5 = vadd.f32 %v2364_v63, %v18367_v54 }
 0x6c7   : > { %v2181_v23 = vpop.f32.mrb[72].mxu0  ;;  %15600 = vmatpush3.xpose.msra.mxu0 %v2178_v59  ;;  %15606 = vmatprep.mubr.msk.f32.mxu1 %vm17774_vm4, %v21546_v0 }
 0x6c8   : > { %v2183_v29 = vpop.f32.mrb[73].mxu0  ;;  %15609 = vmatprep.subr.mxu0 %v21546_v0  ;;  %v18476_v52 = vadd.f32 %v2181_v23, %v18359_v49 }
 0x6c9   : > { %v2184_v31 = vadd.f32 %v2183_v29, %v18355_v46 }
 0x6ca   : > { %15602 = vmatmul.mubr.f32.vlgmr.msra.gmra.mrb[90].mxu0 %v18468_v14 }
 0x6cb   : > { %v2187_v39 = vpop.f32.mrb[74].mxu0  ;;  %15605 = vmatpush3.xpose.msra.mxu1 %v2184_v31  ;;  %15611 = vmatprep.mubr.msk.f32.mxu0 %vm17774_vm4, %v21546_v0 }
 0x6cc   : > { %v2189_v57 = vpop.f32.mrb[75].mxu0  ;;  %15614 = vmatprep.subr.mxu1 %v21546_v0  ;;  %v18484_v63 = vadd.f32 %v2187_v39, %v18359_v49 }
 0x6cd   : > { %v2190_v47 = vadd.f32 %v2189_v57, %v18355_v46 }
 0x6ce   : > { %15607 = vmatmul.mubr.f32.vlgmr.msra.gmra.mrb[68].mxu1 %v18476_v52 }
 0x6cf   : > { %v2193_v59 = vpop.f32.mrb[76].mxu0  ;;  %15610 = vmatpush3.xpose.msra.mxu0 %v2190_v47  ;;  %15616 = vmatprep.mubr.msk.f32.mxu1 %vm17774_vm4, %v21546_v0 }
 0x6d0   : > { %v2195_v29 = vpop.f32.mrb[77].mxu0  ;;  %15619 = vmatprep.subr.mxu0 %v21546_v0  ;;  %v18492_v57 = vadd.f32 %v2193_v59, %v18359_v49 }
 0x6d1   : > { %v2196_v23 = vadd.f32 %v2195_v29, %v18355_v46 }
 0x6d2   : > { %15612 = vmatmul.mubr.f32.vlgmr.msra.gmra.mrb[92].mxu0 %v18484_v63 }
 0x6d3   : > { %v2199_v31 = vpop.f32.mrb[78].mxu0  ;;  %15615 = vmatpush3.xpose.msra.mxu1 %v2196_v23  ;;  %15621 = vmatprep.mubr.msk.f32.mxu0 %vm17774_vm4, %v21546_v0 }
 0x6d4   : > { %v2201_v47 = vpop.f32.mrb[79].mxu0  ;;  %15624 = vmatprep.subr.mxu1 %v21546_v0  ;;  %v18500_v29 = vadd.f32 %v2199_v31, %v18359_v49 }
 0x6d5   : > { %v2202_v39 = vadd.f32 %v2201_v47, %v18355_v46 }
 0x6d6   : > { %15617 = vmatmul.mubr.f32.vlgmr.msra.gmra.mrb[70].mxu1 %v18492_v57 }
 0x6d7   : > { %v2205_v8 = vpop.f32.mrb[80].mxu0  ;;  %15620 = vmatpush3.xpose.msra.mxu0 %v2202_v39  ;;  %15626 = vmatprep.mubr.msk.f32.mxu1 %vm17774_vm4, %v21546_v0 }
 0x6d8   : > { %v2207_v23 = vpop.f32.mrb[81].mxu0  ;;  %15629 = vmatprep.subr.mxu0 %v21546_v0  ;;  %v18508_v47 = vadd.f32 %v2205_v8, %v18359_v49 }
 0x6d9   : > { %v2208_v59 = vadd.f32 %v2207_v23, %v18355_v46 }
 0x6da   : > { %15622 = vmatmul.mubr.f32.vlgmr.msra.gmra.mrb[94].mxu0 %v18500_v29 }
 0x6db   : > { %v2211_v44 = vpop.f32.mrb[82].mxu0  ;;  %15625 = vmatpush3.xpose.msra.mxu1 %v2208_v59  ;;  %15631 = vmatprep.mubr.msk.f32.mxu0 %vm17774_vm4, %v21546_v0 }
 0x6dc   : > { %v2213_v39 = vpop.f32.mrb[83].mxu0  ;;  %15634 = vmatprep.subr.mxu1 %v21546_v0  ;;  %v18516_v23 = vadd.f32 %v2211_v44, %v18359_v49  ;;  %v2295_v44 = vadd.f32 %v18364_v53, %v18367_v54 }
 0x6dd   : > { %v2214_v31 = vadd.f32 %v2213_v39, %v18355_v46 }
 0x6de   : > { %15627 = vmatmul.mubr.f32.vlgmr.msra.gmra.mrb[72].mxu1 %v18508_v47 }
 0x6df   : > { %v2217_v42 = vpop.f32.mrb[84].mxu0  ;;  %15630 = vmatpush3.xpose.msra.mxu0 %v2214_v31  ;;  %15636 = vmatprep.mubr.msk.f32.mxu1 %vm17774_vm4, %v21546_v0 }
 0x6e0   : > { %v2219_v59 = vpop.f32.mrb[85].mxu0  ;;  %15639 = vmatprep.subr.mxu0 %v21546_v0  ;;  %v18524_v39 = vadd.f32 %v2217_v42, %v18359_v49  ;;  %v2300_v42 = vadd.f32 %v18361_v51, %v18367_v54 }
 0x6e1   : > { %v2220_v8 = vadd.f32 %v2219_v59, %v18355_v46 }
 0x6e2   : > { %15632 = vmatmul.mubr.f32.vlgmr.msra.gmra.mrb[96].mxu0 %v18516_v23 }
 0x6e3   : > { %v2223_v40 = vpop.f32.mrb[86].mxu0  ;;  %15635 = vmatpush3.xpose.msra.mxu1 %v2220_v8  ;;  %15641 = vmatprep.mubr.msk.f32.mxu0 %vm17774_vm4, %v21546_v0 }
 0x6e4   : > { %v2225_v31 = vpop.f32.mrb[87].mxu0  ;;  %15644 = vmatprep.subr.mxu1 %v21546_v0  ;;  %v18532_v59 = vadd.f32 %v2223_v40, %v18359_v49 }
 0x6e5   : > { %v2226_v38 = vadd.f32 %v2225_v31, %v18355_v46 }
 0x6e6   : > { %15637 = vmatmul.mubr.f32.vlgmr.msra.gmra.mrb[74].mxu1 %v18524_v39 }
 0x6e7   : > { %15640 = vmatpush3.xpose.msra.mxu0 %v2226_v38  ;;  %15645 = vmatpush3.msra.mxu1 %v2295_v44 }
 0x6e8   : > { %15649 = vmatprep.subr.mxu0 %v21546_v0  ;;  %15646 = vmatprep.mubr.msk.f32.mxu1 %vm17774_vm4, %v21546_v0 }
 0x6e9   : > { %15654 = vmatprep.subr.mxu1 %v21546_v0 }
 0x6ea   : > { %15642 = vmatmul.mubr.f32.vlgmr.msra.gmra.mrb[98].mxu0 %v18532_v59 }
 0x6eb   : > { %15650 = vmatpush3.msra.mxu0 %v2300_v42  ;;  %15651 = vmatprep.mubr.msk.f32.mxu0 %vm17774_vm4, %v21546_v0 }
 0x6ec   : > { %15659 = vmatprep.subr.mxu0 %v21546_v0 }
 0x781   : > { %v2439_v38 = vpop.f32.mrb[56].mxu1 }
 0x782   : > { %v15568_v40 = vpop.f32.mrb[57].mxu1  ;;  %v18544_v46 = vmul.f32 0.088388346, %v2439_v38 }
 0x784   : > { %v3510_v49 = vsel %vm3509_vm5, %v18544_v46, -inf }
 0x785   : > { %3511 = vmax.xlane.f32.xlu0 %v3510_v49  ;;  %v2509_v51 = vpop.f32.mrb[58].mxu1 }
 0x786   : > { %v15573_v53 = vpop.f32.mrb[59].mxu1  ;;  %v18548_v54 = vmul.f32 0.088388346, %v2509_v51 }
 0x788   : > { %v3513_v8 = vsel %vm3509_vm5, %v18548_v54, -inf }
 0x789   : > { %3514 = vmax.xlane.f32.xlu0 %v3513_v8  ;;  %v2579_v31 = vpop.f32.mrb[60].mxu1 }
 0x78a   : > { %v15578_v44 = vpop.f32.mrb[61].mxu1  ;;  %v18552_v42 = vmul.f32 0.088388346, %v2579_v31 }
 0x78c   : > { %v3516_v38 = vsel %vm3509_vm5, %v18552_v42, -inf }
 0x78d   : > { %3517 = vmax.xlane.f32.xlu1 %v3516_v38  ;;  %v2649_v40 = vpop.f32.mrb[62].mxu1 }
 0x78e   : > { %v15583_v0 = vpop.f32.mrb[63].mxu1  ;;  %v18556_v36 = vmul.f32 0.088388346, %v2649_v40 }
 0x790   : > { %v3519_v49 = vsel %vm3509_vm5, %v18556_v36, -inf }
 0x791   : > { %3520 = vmax.xlane.f32.xlu1 %v3519_v49  ;;  %v2719_v51 = vpop.f32.mrb[64].mxu1 }
 0x792   : > { %v15588_v53 = vpop.f32.mrb[65].mxu1  ;;  %v18560_v34 = vmul.f32 0.088388346, %v2719_v51 }
 0x794   : > { %v3522_v8 = vsel %vm3509_vm5, %v18560_v34, -inf }
 0x795   : > { %v2789_v31 = vpop.f32.mrb[88].mxu0  ;;  %3523 = vmax.xlane.f32.xlu0 %v3522_v8 }
 0x796   : > { %v18564_v44 = vmul.f32 0.088388346, %v2789_v31  ;;  %v15593_v38 = vpop.f32.mrb[89].mxu0 }
 0x798   : > { %v3525_v0 = vsel %vm3509_vm5, %v18564_v44, -inf }
 0x799   : > { %3526 = vmax.xlane.f32.xlu1 %v3525_v0  ;;  %v2859_v40 = vpop.f32.mrb[66].mxu1 }
 0x79a   : > { %v15598_v32 = vpop.f32.mrb[67].mxu1  ;;  %v18568_v30 = vmul.f32 0.088388346, %v2859_v40 }
 0x79c   : > { %v3528_v49 = vsel %vm3509_vm5, %v18568_v30, -inf }
 0x79d   : > { %v2929_v51 = vpop.f32.mrb[90].mxu0  ;;  %3529 = vmax.xlane.f32.xlu0 %v3528_v49 }
 0x79e   : > { %v18572_v53 = vmul.f32 0.088388346, %v2929_v51  ;;  %v15603_v28 = vpop.f32.mrb[91].mxu0 }
 0x7a0   : > { %v3531_v8 = vsel %vm3509_vm5, %v18572_v53, -inf }
 0x7a1   : > { %3532 = vmax.xlane.f32.xlu1 %v3531_v8  ;;  %v2999_v31 = vpop.f32.mrb[68].mxu1 }
 0x7a2   : > { %v15608_v38 = vpop.f32.mrb[69].mxu1  ;;  %v18576_v22 = vmul.f32 0.088388346, %v2999_v31 }
 0x7a4   : > { %v3534_v32 = vsel %vm3509_vm5, %v18576_v22, -inf }
 0x7a5   : > { %v3069_v0 = vpop.f32.mrb[92].mxu0  ;;  %3535 = vmax.xlane.f32.xlu0 %v3534_v32 }
 0x7a6   : > { %v18580_v40 = vmul.f32 0.088388346, %v3069_v0  ;;  %v15613_v20 = vpop.f32.mrb[93].mxu0 }
 0x7a8   : > { %v3537_v49 = vsel %vm3509_vm5, %v18580_v40, -inf }
 0x7a9   : > { %3538 = vmax.xlane.f32.xlu1 %v3537_v49  ;;  %v3139_v28 = vpop.f32.mrb[70].mxu1 }
 0x7aa   : > { %v18584_v51 = vmul.f32 0.088388346, %v3139_v28  ;;  %v15618_v8 = vpop.f32.mrb[71].mxu1 }
 0x7ac   : > { %v3540_v31 = vsel %vm3509_vm5, %v18584_v51, -inf }
 0x7ad   : > { %v3209_v38 = vpop.f32.mrb[94].mxu0  ;;  %3541 = vmax.xlane.f32.xlu0 %v3540_v31 }
 0x7ae   : > { %v18588_v16 = vmul.f32 0.088388346, %v3209_v38  ;;  %v15623_v17 = vpop.f32.mrb[95].mxu0 }
 0x7b0   : > { %v3543_v32 = vsel %vm3509_vm5, %v18588_v16, -inf }
 0x7b1   : > { %3544 = vmax.xlane.f32.xlu1 %v3543_v32  ;;  %v3279_v20 = vpop.f32.mrb[72].mxu1 }
 0x7b2   : > { %v18592_v0 = vmul.f32 0.088388346, %v3279_v20  ;;  %v15628_v49 = vpop.f32.mrb[73].mxu1 }
 0x7b4   : > { %v3546_v28 = vsel %vm3509_vm5, %v18592_v0, -inf }
 0x7b5   : > { %v3349_v8 = vpop.f32.mrb[96].mxu0  ;;  %3547 = vmax.xlane.f32.xlu0 %v3546_v28 }
 0x7b6   : > { %v18596_v11 = vmul.f32 0.088388346, %v3349_v8  ;;  %v15633_v12 = vpop.f32.mrb[97].mxu0 }
 0x7b8   : > { %v3549_v31 = vsel %vm3509_vm5, %v18596_v11, -inf }
 0x7b9   : > { %3550 = vmax.xlane.f32.xlu1 %v3549_v31  ;;  %v3419_v17 = vpop.f32.mrb[74].mxu1 }
 0x7ba   : > { %v18600_v38 = vmul.f32 0.088388346, %v3419_v17  ;;  %v15638_v32 = vpop.f32.mrb[75].mxu1 }
 0x7bc   : > { %v3552_v20 = vsel %vm3509_vm5, %v18600_v38, -inf }
 0x7bd   : > { %v3489_v49 = vpop.f32.mrb[98].mxu0  ;;  %3553 = vmax.xlane.f32.xlu0 %v3552_v20 }
 0x7be   : > { %v18604_v6 = vmul.f32 0.088388346, %v3489_v49  ;;  %v15643_v7 = vpop.f32.mrb[99].mxu0 }
 0x7c0   : > { %v3555_v28 = vsel %vm3509_vm5, %v18604_v6, -inf }
 0x7c1   : > { %3556 = vmax.xlane.f32.xlu1 %v3555_v28 }
 0x812   : > { %v3512_v12 = vpop.xlane.xlu0 %3511 }
 0x813   : > { %v3558_v8 = vsub.f32 %v18544_v46, %v3512_v12 }
 0x815   : > { %v3574_v31 = vmul.f32 1.442695, %v3558_v8 }
 0x816   : > { %v3515_v43 = vpop.xlane.xlu0 %3514 }
 0x817   : > { %17185 = vpow2.f32 %v3574_v31  ;;  %v3559_v17 = vsub.f32 %v18548_v54, %v3515_v43 }
 0x819   : > { %v3576_v32 = vmul.f32 1.442695, %v3559_v17 }
 0x81a   : > { %v3518_v1 = vpop.xlane.xlu1 %3517 }
 0x81b   : > { %17187 = vpow2.f32 %v3576_v32  ;;  %v3560_v20 = vsub.f32 %v18552_v42, %v3518_v1 }
 0x81d   : > { %v3578_v49 = vmul.f32 1.442695, %v3560_v20 }
 0x81e   : > { %v3521_v4 = vpop.xlane.xlu1 %3520 }
 0x81f   : > { %17189 = vpow2.f32 %v3578_v49  ;;  %v3561_v7 = vsub.f32 %v18556_v36, %v3521_v4 }
 0x821   : > { %v18612_v13 = vpop.eup %17185  ;;  %v3580_v28 = vmul.f32 1.442695, %v3561_v7 }
 0x822   : > { %v3524_v19 = vpop.xlane.xlu0 %3523  ;;  %v3606_v46 = vsel %vm3509_vm5, %v18612_v13, 0.0 }
 0x823   : > { %17191 = vpow2.f32 %v3580_v28  ;;  %v3562_v43 = vsub.f32 %v18560_v34, %v3524_v19  ;;  %3607 = vadd.xlane.f32.xlu0 %v3606_v46 }
 0x825   : > { %v18617_v54 = vpop.eup %17187  ;;  %v3582_v12 = vmul.f32 1.442695, %v3562_v43 }
 0x826   : > { %v3527_v1 = vpop.xlane.xlu1 %3526  ;;  %v3609_v42 = vsel %vm3509_vm5, %v18617_v54, 0.0 }
 0x827   : > { %17193 = vpow2.f32 %v3582_v12  ;;  %v3563_v4 = vsub.f32 %v18564_v44, %v3527_v1  ;;  %3610 = vadd.xlane.f32.xlu1 %v3609_v42 }
 0x829   : > { %v18622_v36 = vpop.eup %17189  ;;  %v3584_v8 = vmul.f32 1.442695, %v3563_v4 }
 0x82a   : > { %v3530_v31 = vpop.xlane.xlu0 %3529  ;;  %v3612_v17 = vsel %vm3509_vm5, %v18622_v36, 0.0 }
 0x82b   : > { %17195 = vpow2.f32 %v3584_v8  ;;  %v3564_v19 = vsub.f32 %v18568_v30, %v3530_v31  ;;  %3613 = vadd.xlane.f32.xlu0 %v3612_v17 }
 0x82d   : > { %v18627_v34 = vpop.eup %17191  ;;  %v3586_v32 = vmul.f32 1.442695, %v3564_v19 }
 0x82e   : > { %v3533_v20 = vpop.xlane.xlu1 %3532  ;;  %v3615_v49 = vsel %vm3509_vm5, %v18627_v34, 0.0 }
 0x82f   : > { %17197 = vpow2.f32 %v3586_v32  ;;  %v3565_v44 = vsub.f32 %v18572_v53, %v3533_v20  ;;  %3616 = vadd.xlane.f32.xlu1 %v3615_v49 }
 0x831   : > { %v18632_v7 = vpop.eup %17193  ;;  %v3588_v28 = vmul.f32 1.442695, %v3565_v44 }
 0x832   : > { %v3536_v46 = vpop.xlane.xlu0 %3535  ;;  %v3618_v43 = vsel %vm3509_vm5, %v18632_v7, 0.0 }
 0x833   : > { %17199 = vpow2.f32 %v3588_v28  ;;  %v3566_v30 = vsub.f32 %v18576_v22, %v3536_v46  ;;  %3619 = vadd.xlane.f32.xlu0 %v3618_v43 }
 0x835   : > { %v18637_v12 = vpop.eup %17195  ;;  %v3590_v1 = vmul.f32 1.442695, %v3566_v30 }
 0x836   : > { %v3539_v42 = vpop.xlane.xlu1 %3538  ;;  %v3621_v4 = vsel %vm3509_vm5, %v18637_v12, 0.0 }
 0x837   : > { %17201 = vpow2.f32 %v3590_v1  ;;  %v3567_v53 = vsub.f32 %v18580_v40, %v3539_v42  ;;  %3622 = vadd.xlane.f32.xlu1 %v3621_v4 }
 0x839   : > { %v18642_v8 = vpop.eup %17197  ;;  %v3592_v31 = vmul.f32 1.442695, %v3567_v53 }
 0x83a   : > { %v3542_v17 = vpop.xlane.xlu0 %3541  ;;  %v3624_v19 = vsel %vm3509_vm5, %v18642_v8, 0.0 }
 0x83b   : > { %17203 = vpow2.f32 %v3592_v31  ;;  %v3568_v22 = vsub.f32 %v18584_v51, %v3542_v17  ;;  %3625 = vadd.xlane.f32.xlu0 %v3624_v19 }
 0x83d   : > { %v18647_v32 = vpop.eup %17199  ;;  %v3594_v20 = vmul.f32 1.442695, %v3568_v22 }
 0x83e   : > { %v3545_v49 = vpop.xlane.xlu1 %3544  ;;  %v3627_v44 = vsel %vm3509_vm5, %v18647_v32, 0.0 }
 0x83f   : > { %17205 = vpow2.f32 %v3594_v20  ;;  %v3569_v40 = vsub.f32 %v18588_v16, %v3545_v49  ;;  %3628 = vadd.xlane.f32.xlu1 %v3627_v44 }
 0x841   : > { %v18652_v28 = vpop.eup %17201  ;;  %v3596_v46 = vmul.f32 1.442695, %v3569_v40 }
 0x842   : > { %v3548_v43 = vpop.xlane.xlu0 %3547  ;;  %v3630_v30 = vsel %vm3509_vm5, %v18652_v28, 0.0 }
 0x843   : > { %17207 = vpow2.f32 %v3596_v46  ;;  %v3570_v51 = vsub.f32 %v18592_v0, %v3548_v43  ;;  %3631 = vadd.xlane.f32.xlu0 %v3630_v30 }
 0x845   : > { %v18657_v1 = vpop.eup %17203  ;;  %v3598_v42 = vmul.f32 1.442695, %v3570_v51 }
 0x846   : > { %v3551_v4 = vpop.xlane.xlu1 %3550  ;;  %v3633_v53 = vsel %vm3509_vm5, %v18657_v1, 0.0 }
 0x847   : > { %17209 = vpow2.f32 %v3598_v42  ;;  %v3571_v16 = vsub.f32 %v18596_v11, %v3551_v4  ;;  %3634 = vadd.xlane.f32.xlu1 %v3633_v53 }
 0x849   : > { %v18662_v31 = vpop.eup %17205  ;;  %v3600_v17 = vmul.f32 1.442695, %v3571_v16 }
 0x84a   : > { %v3554_v19 = vpop.xlane.xlu0 %3553  ;;  %v3636_v22 = vsel %vm3509_vm5, %v18662_v31, 0.0 }
 0x84b   : > { %17211 = vpow2.f32 %v3600_v17  ;;  %v3572_v0 = vsub.f32 %v18600_v38, %v3554_v19  ;;  %3637 = vadd.xlane.f32.xlu0 %v3636_v22 }
 0x84d   : > { %v18667_v20 = vpop.eup %17207  ;;  %v3602_v49 = vmul.f32 1.442695, %v3572_v0 }
 0x84e   : > { %v3557_v44 = vpop.xlane.xlu1 %3556  ;;  %v3639_v40 = vsel %vm3509_vm5, %v18667_v20, 0.0 }
 0x84f   : > { %17213 = vpow2.f32 %v3602_v49  ;;  %v3573_v11 = vsub.f32 %v18604_v6, %v3557_v44  ;;  %3640 = vadd.xlane.f32.xlu1 %v3639_v40  ;;  %v21613_v40 = vmov 0.0  }
 0x851   : > { %v18672_v46 = vpop.eup %17209  ;;  %v3604_v43 = vmul.f32 1.442695, %v3573_v11 }
 0x852   : > { %v3642_v30 = vsel %vm3509_vm5, %v18672_v46, 0.0 }
 0x853   : > { %17215 = vpow2.f32 %v3604_v43  ;;  %3643 = vadd.xlane.f32.xlu0 %v3642_v30 }
 0x855   : > { %v18676_v38 = vpop.eup %17211 }
 0x856   : > { %v3645_v51 = vsel %vm3509_vm5, %v18676_v38, 0.0 }
 0x857   : > { %3646 = vadd.xlane.f32.xlu1 %v3645_v51 }
 0x859   : > { %v18680_v42 = vpop.eup %17213 }
 0x85a   : > { %v3648_v6 = vsel %vm3509_vm5, %v18680_v42, 0.0 }
 0x85b   : > { %3649 = vadd.xlane.f32.xlu0 %v3648_v6 }
 0x85d   : > { %v18684_v4 = vpop.eup %17215 }
 0x85e   : > { %v3651_v53 = vsel %vm3509_vm5, %v18684_v4, 0.0 }
 0x85f   : > { %3652 = vadd.xlane.f32.xlu1 %v3651_v53 }
 0x8b0   : > { %v3608_v16 = vpop.xlane.xlu0 %3607 }
 0x8b1   : > { %17217 = vrcp.f32 %v3608_v16 }
 0x8b4   : > { %v3611_v17 = vpop.xlane.xlu1 %3610 }
 0x8b5   : > { %17219 = vrcp.f32 %v3611_v17 }
 0x8b8   : > { %v3614_v19 = vpop.xlane.xlu0 %3613 }
 0x8b9   : > { %17221 = vrcp.f32 %v3614_v19 }
 0x8bb   : > { %v17218_v22 = vpop.eup %17217 }
 0x8bc   : > { %v3617_v0 = vpop.xlane.xlu1 %3616  ;;  %v3655_v49 = vmul.f32 %v17218_v22, %v18612_v13 }
 0x8bd   : > { %17223 = vrcp.f32 %v3617_v0 }
 0x8be   : > { %15647 = vmatmul.mubr.msk.f32.vlgmr.msra.gmra.mrb[76].mxu1 %vm3509_vm5, %v3655_v49 }
 0x8bf   : > { %v17220_v44 = vpop.eup %17219  ;;  %15655 = vmatpush3.msra.mxu1 %v18378_v62  ;;  %15656 = vmatprep.mubr.msk.f32.mxu1 %vm17774_vm4, %v21613_v40 }
 0x8c0   : > { %v3620_v11 = vpop.xlane.xlu0 %3619  ;;  %v3657_v43 = vmul.f32 %v17220_v44, %v18617_v54  ;;  %15664 = vmatprep.subr.mxu1 %v21613_v40 }
 0x8c1   : > { %17225 = vrcp.f32 %v3620_v11 }
 0x8c2   : > { %15652 = vmatmul.mubr.msk.f32.vlgmr.msra.gmra.mrb[100].mxu0 %vm3509_vm5, %v3657_v43 }
 0x8c3   : > { %v17222_v30 = vpop.eup %17221  ;;  %15660 = vmatpush3.msra.mxu0 %v18375_v60  ;;  %15661 = vmatprep.mubr.msk.f32.mxu0 %vm17774_vm4, %v21613_v40 }
 0x8c4   : > { %v3623_v13 = vpop.xlane.xlu1 %3622  ;;  %v3659_v62 = vmul.f32 %v17222_v30, %v18622_v36  ;;  %15669 = vmatprep.subr.mxu0 %v21613_v40 }
 0x8c5   : > { %17227 = vrcp.f32 %v3623_v13 }
 0x8c6   : > { %15657 = vmatmul.mubr.msk.f32.vlgmr.msra.gmra.mrb[78].mxu1 %vm3509_vm5, %v3659_v62 }
 0x8c7   : > { %v17224_v54 = vpop.eup %17223  ;;  %15665 = vmatpush3.msra.mxu1 %v18392_v15  ;;  %15666 = vmatprep.mubr.msk.f32.mxu1 %vm17774_vm4, %v21613_v40 }
 0x8c8   : > { %v3626_v51 = vpop.xlane.xlu0 %3625  ;;  %v3661_v60 = vmul.f32 %v17224_v54, %v18627_v34  ;;  %15674 = vmatprep.subr.mxu1 %v21613_v40 }
 0x8c9   : > { %17229 = vrcp.f32 %v3626_v51 }
 0x8ca   : > { %15662 = vmatmul.mubr.msk.f32.vlgmr.msra.gmra.mrb[102].mxu0 %vm3509_vm5, %v3661_v60 }
 0x8cb   : > { %v17226_v36 = vpop.eup %17225  ;;  %15670 = vmatpush3.msra.mxu0 %v18389_v10  ;;  %15671 = vmatprep.mubr.msk.f32.mxu0 %vm17774_vm4, %v21613_v40 }
 0x8cc   : > { %v3629_v6 = vpop.xlane.xlu1 %3628  ;;  %v3663_v15 = vmul.f32 %v17226_v36, %v18632_v7  ;;  %15679 = vmatprep.subr.mxu0 %v21613_v40 }
 0x8cd   : > { %17231 = vrcp.f32 %v3629_v6 }
 0x8ce   : > { %15667 = vmatmul.mubr.msk.f32.vlgmr.msra.gmra.mrb[80].mxu1 %vm3509_vm5, %v3663_v15 }
 0x8cf   : > { %v17228_v34 = vpop.eup %17227  ;;  %15675 = vmatpush3.msra.mxu1 %v18406_v37  ;;  %15676 = vmatprep.mubr.msk.f32.mxu1 %vm17774_vm4, %v21613_v40 }
 0x8d0   : > { %v3632_v53 = vpop.xlane.xlu0 %3631  ;;  %v3665_v10 = vmul.f32 %v17228_v34, %v18637_v12  ;;  %15684 = vmatprep.subr.mxu1 %v21613_v40 }
 0x8d1   : > { %17233 = vrcp.f32 %v3632_v53 }
 0x8d2   : > { %15672 = vmatmul.mubr.msk.f32.vlgmr.msra.gmra.mrb[104].mxu0 %vm3509_vm5, %v3665_v10 }
 0x8d3   : > { %v17230_v7 = vpop.eup %17229  ;;  %15680 = vmatpush3.msra.mxu0 %v18403_v33  ;;  %15681 = vmatprep.mubr.msk.f32.mxu0 %vm17774_vm4, %v21613_v40 }
 0x8d4   : > { %v3635_v16 = vpop.xlane.xlu1 %3634  ;;  %v3667_v37 = vmul.f32 %v17230_v7, %v18642_v8  ;;  %15689 = vmatprep.subr.mxu0 %v21613_v40 }
 0x8d5   : > { %17235 = vrcp.f32 %v3635_v16 }
 0x8d6   : > { %15677 = vmatmul.mubr.msk.f32.vlgmr.msra.gmra.mrb[82].mxu1 %vm3509_vm5, %v3667_v37 }
 0x8d7   : > { %v17232_v12 = vpop.eup %17231  ;;  %15685 = vmatpush3.msra.mxu1 %v18421_v55  ;;  %15686 = vmatprep.mubr.msk.f32.mxu1 %vm17774_vm4, %v21613_v40 }
 0x8d8   : > { %v3638_v17 = vpop.xlane.xlu0 %3637  ;;  %v3669_v33 = vmul.f32 %v17232_v12, %v18647_v32  ;;  %15694 = vmatprep.subr.mxu1 %v21613_v40 }
 0x8d9   : > { %17237 = vrcp.f32 %v3638_v17 }
 0x8da   : > { %15682 = vmatmul.mubr.msk.f32.vlgmr.msra.gmra.mrb[106].mxu0 %vm3509_vm5, %v3669_v33 }
 0x8db   : > { %v17234_v8 = vpop.eup %17233  ;;  %15690 = vmatpush3.msra.mxu0 %v18417_v50  ;;  %15691 = vmatprep.mubr.msk.f32.mxu0 %vm17774_vm4, %v21613_v40 }
 0x8dc   : > { %v3641_v19 = vpop.xlane.xlu1 %3640  ;;  %v3671_v55 = vmul.f32 %v17234_v8, %v18652_v28  ;;  %15699 = vmatprep.subr.mxu0 %v21613_v40 }
 0x8dd   : > { %17239 = vrcp.f32 %v3641_v19 }
 0x8de   : > { %15687 = vmatmul.mubr.msk.f32.vlgmr.msra.gmra.mrb[84].mxu1 %vm3509_vm5, %v3671_v55 }
 0x8df   : > { %v17236_v32 = vpop.eup %17235  ;;  %15695 = vmatpush3.msra.mxu1 %v18435_v9  ;;  %15696 = vmatprep.mubr.msk.f32.mxu1 %vm17774_vm4, %v21613_v40 }
 0x8e0   : > { %v3644_v22 = vpop.xlane.xlu0 %3643  ;;  %v3673_v50 = vmul.f32 %v17236_v32, %v18657_v1  ;;  %15704 = vmatprep.subr.mxu1 %v21613_v40 }
 0x8e1   : > { %17241 = vrcp.f32 %v3644_v22 }
 0x8e2   : > { %15692 = vmatmul.mubr.msk.f32.vlgmr.msra.gmra.mrb[108].mxu0 %vm3509_vm5, %v3673_v50 }
 0x8e3   : > { %v17238_v28 = vpop.eup %17237  ;;  %15700 = vmatpush3.msra.mxu0 %v18431_v3  ;;  %15701 = vmatprep.mubr.msk.f32.mxu0 %vm17774_vm4, %v21613_v40 }
 0x8e4   : > { %v3647_v0 = vpop.xlane.xlu1 %3646  ;;  %v3675_v9 = vmul.f32 %v17238_v28, %v18662_v31  ;;  %15709 = vmatprep.subr.mxu0 %v21613_v40 }
 0x8e5   : > { %17243 = vrcp.f32 %v3647_v0 }
 0x8e6   : > { %15697 = vmatmul.mubr.msk.f32.vlgmr.msra.gmra.mrb[86].mxu1 %vm3509_vm5, %v3675_v9 }
 0x8e7   : > { %v17240_v1 = vpop.eup %17239  ;;  %15705 = vmatpush3.msra.mxu1 %v18449_v45  ;;  %15706 = vmatprep.mubr.msk.f32.mxu1 %vm17774_vm4, %v21613_v40 }
 0x8e8   : > { %v3650_v49 = vpop.xlane.xlu0 %3649  ;;  %v3677_v3 = vmul.f32 %v17240_v1, %v18667_v20  ;;  %15714 = vmatprep.subr.mxu1 %v21613_v40 }
 0x8e9   : > { %17245 = vrcp.f32 %v3650_v49 }
 0x8ea   : > { %15702 = vmatmul.mubr.msk.f32.vlgmr.msra.gmra.mrb[110].mxu0 %vm3509_vm5, %v3677_v3 }
 0x8eb   : > { %v17242_v31 = vpop.eup %17241  ;;  %15710 = vmatpush3.msra.mxu0 %v18445_v35  ;;  %15711 = vmatprep.mubr.msk.f32.mxu0 %vm17774_vm4, %v21613_v40 }
 0x8ec   : > { %v3653_v44 = vpop.xlane.xlu1 %3652  ;;  %v3679_v45 = vmul.f32 %v17242_v31, %v18672_v46  ;;  %15719 = vmatprep.subr.mxu0 %v21613_v40 }
 0x8ed   : > { %17247 = vrcp.f32 %v3653_v44  ;;  %v17049_v44 = vld [vmem:[#allocation7 + $0x4] ss:$8 sps:$4 sm:$0xff]  }
 0x8ee   : > { %15707 = vmatmul.mubr.msk.f32.vlgmr.msra.gmra.mrb[88].mxu1 %vm3509_vm5, %v3679_v45  ;;  %v17052_v45 = vld [vmem:[#allocation7 + $0x14] ss:$8 sps:$4 sm:$0xff]  }
 0x8ef   : > { %v17244_v20 = vpop.eup %17243  ;;  %15715 = vmatpush3.msra.mxu1 %v18463_v5  ;;  %15716 = vmatprep.mubr.msk.f32.mxu1 %vm17774_vm4, %v21613_v40 }
 0x8f0   : > { %v3681_v11 = vmul.f32 %v17244_v20, %v18676_v38  ;;  %16421 = vmatprep.subr.bf16.mxu1 %v17049_v44  ;;  %v17054_v20 = vld [vmem:[#allocation7 + $0x10] ss:$8 sps:$4 sm:$0xff]  }
 0x8f2   : > { %15712 = vmatmul.mubr.msk.f32.vlgmr.msra.gmra.mrb[112].mxu0 %vm3509_vm5, %v3681_v11  ;;  %v17055_v11 = vld [vmem:[#allocation7 + $0x24] ss:$8 sps:$4 sm:$0xff]  }
 0x8f3   : > { %v17246_v35 = vpop.eup %17245  ;;  %15720 = vmatpush3.msra.mxu0 %v18459_v61  ;;  %15721 = vmatprep.mubr.msk.f32.mxu0 %vm17774_vm4, %v21613_v40 }
 0x8f4   : > { %v3683_v46 = vmul.f32 %v17246_v35, %v18680_v42  ;;  %v17058_v35 = vld [vmem:[#allocation7 + $0x34] ss:$8 sps:$4 sm:$0xff]  }
 0x8f6   : > { %15717 = vmatmul.mubr.msk.f32.vlgmr.msra.gmra.mrb[90].mxu1 %vm3509_vm5, %v3683_v46  ;;  %v17060_v46 = vld [vmem:[#allocation7 + $0x30] ss:$8 sps:$4 sm:$0xff]  }
 0x8f7   : > { %v17248_v43 = vpop.eup %17247  ;;  %5135 = vmatprep.mubr.f32.mxu1 %v21613_v40 }
 0x8f8   : > { %v3685_v5 = vmul.f32 %v17248_v43, %v18684_v4 }
 0x8fa   : > { %15722 = vmatmul.mubr.msk.f32.vlgmr.msra.gmra.mrb[114].mxu0 %vm3509_vm5, %v3685_v5 }
 0x991   : > { %v3755_v38 = vpop.f32.mrb[76].mxu1 }
 0x992   : > { %v18776_v30 = vadd.f32 %v3755_v38, %v18370_v56  ;;  %v15648_v13 = vpop.f32.mrb[77].mxu1 }
 0x994   : > { %4854 = vadd.xlane.f32.xlu0 %v18776_v30 }
 0x995   : > { %v3828_v61 = vpop.f32.mrb[100].mxu0 }
 0x996   : > { %v18780_v62 = vadd.f32 %v3828_v61, %v18384_v2  ;;  %v15653_v42 = vpop.f32.mrb[101].mxu0 }
 0x998   : > { %4856 = vadd.xlane.f32.xlu1 %v18780_v62 }
 0x999   : > { %v3901_v54 = vpop.f32.mrb[78].mxu1 }
 0x99a   : > { %v18784_v51 = vadd.f32 %v3901_v54, %v18398_v21  ;;  %v15658_v4 = vpop.f32.mrb[79].mxu1 }
 0x99c   : > { %4858 = vadd.xlane.f32.xlu0 %v18784_v51 }
 0x99d   : > { %v3974_v60 = vpop.f32.mrb[102].mxu0 }
 0x99e   : > { %v18788_v56 = vadd.f32 %v3974_v60, %v18412_v41  ;;  %v15663_v36 = vpop.f32.mrb[103].mxu0 }
 0x9a0   : > { %4860 = vadd.xlane.f32.xlu1 %v18788_v56 }
 0x9a1   : > { %v4047_v6 = vpop.f32.mrb[80].mxu1 }
 0x9a2   : > { %v18792_v2 = vadd.f32 %v4047_v6, %v18426_v58  ;;  %v15668_v15 = vpop.f32.mrb[81].mxu1 }
 0x9a4   : > { %4862 = vadd.xlane.f32.xlu0 %v18792_v2 }
 0x9a5   : > { %v4120_v34 = vpop.f32.mrb[104].mxu0 }
 0x9a6   : > { %v18796_v21 = vadd.f32 %v4120_v34, %v18440_v18  ;;  %v15673_v53 = vpop.f32.mrb[105].mxu0 }
 0x9a8   : > { %4864 = vadd.xlane.f32.xlu1 %v18796_v21 }
 0x9a9   : > { %v4193_v10 = vpop.f32.mrb[82].mxu1 }
 0x9aa   : > { %v18800_v41 = vadd.f32 %v4193_v10, %v18454_v48  ;;  %v15678_v7 = vpop.f32.mrb[83].mxu1 }
 0x9ac   : > { %4866 = vadd.xlane.f32.xlu0 %v18800_v41 }
 0x9ad   : > { %v4266_v16 = vpop.f32.mrb[106].mxu0 }
 0x9ae   : > { %v18804_v58 = vadd.f32 %v4266_v16, %v18468_v14  ;;  %v15683_v37 = vpop.f32.mrb[107].mxu0 }
 0x9b0   : > { %4868 = vadd.xlane.f32.xlu1 %v18804_v58 }
 0x9b1   : > { %v4339_v12 = vpop.f32.mrb[84].mxu1 }
 0x9b2   : > { %v18808_v18 = vadd.f32 %v4339_v12, %v18476_v52  ;;  %v15688_v17 = vpop.f32.mrb[85].mxu1  ;;  %v17061_v12 = vld [vmem:[#allocation7 + $0x44] ss:$8 sps:$4 sm:$0xff]  }
 0x9b3   : > { %v17063_v17 = vld [vmem:[#allocation7 + $0x40] ss:$8 sps:$4 sm:$0xff]  }
 0x9b4   : > { %4870 = vadd.xlane.f32.xlu0 %v18808_v18 }
 0x9b5   : > { %v4412_v33 = vpop.f32.mrb[108].mxu0 }
 0x9b6   : > { %v18812_v48 = vadd.f32 %v4412_v33, %v18484_v63  ;;  %v15693_v8 = vpop.f32.mrb[109].mxu0 }
 0x9b8   : > { %4872 = vadd.xlane.f32.xlu1 %v18812_v48 }
 0x9b9   : > { %v4485_v19 = vpop.f32.mrb[86].mxu1 }
 0x9ba   : > { %v18816_v14 = vadd.f32 %v4485_v19, %v18492_v57  ;;  %v15698_v55 = vpop.f32.mrb[87].mxu1 }
 0x9bb   : > { %v17066_v55 = vld [vmem:[#allocation7 + $0x50] ss:$8 sps:$4 sm:$0xff]  }
 0x9bc   : > { %4874 = vadd.xlane.f32.xlu0 %v18816_v14 }
 0x9bd   : > { %v4558_v32 = vpop.f32.mrb[110].mxu0 }
 0x9be   : > { %v18820_v52 = vadd.f32 %v4558_v32, %v18500_v29  ;;  %v15703_v22 = vpop.f32.mrb[111].mxu0 }
 0x9c0   : > { %4876 = vadd.xlane.f32.xlu1 %v18820_v52 }
 0x9c1   : > { %v4631_v50 = vpop.f32.mrb[88].mxu1 }
 0x9c2   : > { %v18824_v63 = vadd.f32 %v4631_v50, %v18508_v47  ;;  %v15708_v28 = vpop.f32.mrb[89].mxu1 }
 0x9c3   : > { %v17067_v28 = vld [vmem:[#allocation7 + $0x64] ss:$8 sps:$4 sm:$0xff]  }
 0x9c4   : > { %4878 = vadd.xlane.f32.xlu0 %v18824_v63 }
 0x9c5   : > { %v4704_v0 = vpop.f32.mrb[112].mxu0 }
 0x9c6   : > { %v18828_v57 = vadd.f32 %v4704_v0, %v18516_v23  ;;  %v15713_v9 = vpop.f32.mrb[113].mxu0  ;;  %v17051_v23 = vld [vmem:[#allocation7] ss:$8 sps:$4 sm:$0xff]  }
 0x9c7   : > { %16423 = vmatpush1.bf16.msra.mxu1 %v17051_v23  ;;  %v17069_v0 = vld [vmem:[#allocation7 + $0x60] ss:$8 sps:$4 sm:$0xff]  }
 0x9c8   : > { %4880 = vadd.xlane.f32.xlu1 %v18828_v57  ;;  %16425 = vmatprep.subr.bf16.mxu1 %v17052_v45 }
 0x9c9   : > { %v4777_v1 = vpop.f32.mrb[90].mxu1 }
 0x9ca   : > { %v18832_v29 = vadd.f32 %v4777_v1, %v18524_v39  ;;  %v15718_v49 = vpop.f32.mrb[91].mxu1  ;;  %v17057_v39 = vld [vmem:[#allocation7 + $0x20] ss:$8 sps:$4 sm:$0xff]  }
 0x9cb   : > { %16427 = vmatpush1.bf16.msra.mxu1 %v17054_v20 }
 0x9cc   : > { %4882 = vadd.xlane.f32.xlu0 %v18832_v29  ;;  %16429 = vmatprep.subr.bf16.mxu1 %v17055_v11 }
 0x9cd   : > { %v4850_v3 = vpop.f32.mrb[114].mxu0 }
 0x9ce   : > { %v18836_v47 = vadd.f32 %v4850_v3, %v18532_v59  ;;  %v15723_v31 = vpop.f32.mrb[115].mxu0  ;;  %v17070_v3 = vld [vmem:[#allocation7 + $0x74] ss:$8 sps:$4 sm:$0xff]  }
 0x9cf   : > { %16431 = vmatpush1.bf16.msra.mxu1 %v17057_v39  ;;  %v17072_v31 = vld [vmem:[#allocation7 + $0x70] ss:$8 sps:$4 sm:$0xff]  }
 0x9d0   : > { %4884 = vadd.xlane.f32.xlu1 %v18836_v47  ;;  %16433 = vmatprep.subr.bf16.mxu1 %v17058_v35 }
 0x9d3   : > { %16435 = vmatpush1.bf16.msra.mxu1 %v17060_v46 }
 0x9d4   : > { %16437 = vmatprep.subr.bf16.mxu1 %v17061_v12  ;;  %v14499_v12 = vld [vmem:[#allocation9 + $0x48] sm:$0xff]  }
 0x9d7   : > { %16439 = vmatpush1.bf16.msra.mxu1 %v17063_v17  ;;  %v14500_v17 = vld [vmem:[#allocation9 + $0x50] sm:$0xff]  }
 0xa21   : > { %v4855_v59 = vpop.xlane.xlu0 %4854 }
 0xa22   : > { %v4887_v43 = vmul.f32 0.0078125, %v4855_v59 }
 0xa24   : > { %v18840_v5 = vsub.f32 %v18776_v30, %v4887_v43 }
 0xa25   : > { %v4857_v38 = vpop.xlane.xlu1 %4856 }
 0xa26   : > { %v4888_v13 = vmul.f32 0.0078125, %v4857_v38  ;;  %v4919_v61 = vmul.f32 %v18840_v5, %v18840_v5 }
 0xa28   : > { %4935 = vadd.xlane.f32.xlu0 %v4919_v61  ;;  %v18845_v42 = vsub.f32 %v18780_v62, %v4888_v13 }
 0xa29   : > { %v4859_v54 = vpop.xlane.xlu0 %4858 }
 0xa2a   : > { %v4889_v4 = vmul.f32 0.0078125, %v4859_v54  ;;  %v4920_v60 = vmul.f32 %v18845_v42, %v18845_v42 }
 0xa2c   : > { %4937 = vadd.xlane.f32.xlu1 %v4920_v60  ;;  %v18850_v36 = vsub.f32 %v18784_v51, %v4889_v4 }
 0xa2d   : > { %v4861_v30 = vpop.xlane.xlu1 %4860 }
 0xa2e   : > { %v4890_v6 = vmul.f32 0.0078125, %v4861_v30  ;;  %v4921_v15 = vmul.f32 %v18850_v36, %v18850_v36 }
 0xa30   : > { %4939 = vadd.xlane.f32.xlu0 %v4921_v15  ;;  %v18855_v34 = vsub.f32 %v18788_v56, %v4890_v6 }
 0xa31   : > { %v4863_v62 = vpop.xlane.xlu0 %4862 }
 0xa32   : > { %v4891_v53 = vmul.f32 0.0078125, %v4863_v62  ;;  %v4922_v10 = vmul.f32 %v18855_v34, %v18855_v34 }
 0xa34   : > { %4941 = vadd.xlane.f32.xlu1 %v4922_v10  ;;  %v18860_v7 = vsub.f32 %v18792_v2, %v4891_v53  ;;  %v17064_v2 = vld [vmem:[#allocation7 + $0x54] ss:$8 sps:$4 sm:$0xff]  }
 0xa35   : > { %v4865_v51 = vpop.xlane.xlu1 %4864  ;;  %16441 = vmatprep.subr.bf16.mxu1 %v17064_v2  ;;  %v14494_v2 = vld [vmem:[#allocation9 + $0x20] sm:$0xff]  }
 0xa36   : > { %v4892_v16 = vmul.f32 0.0078125, %v4865_v51  ;;  %v4923_v37 = vmul.f32 %v18860_v7, %v18860_v7  ;;  %16443 = vmatpush1.bf16.msra.mxu1 %v17066_v55  ;;  %v14503_v55 = vld [vmem:[#allocation9 + $0x68] sm:$0xff]  }
 0xa37   : > { %16445 = vmatprep.subr.bf16.mxu1 %v17067_v28 }
 0xa38   : > { %4943 = vadd.xlane.f32.xlu0 %v4923_v37  ;;  %v18865_v56 = vsub.f32 %v18796_v21, %v4892_v16  ;;  %v14498_v16 = vld [vmem:[#allocation9 + $0x40] sm:$0xff]  }
 0xa39   : > { %v4867_v33 = vpop.xlane.xlu0 %4866  ;;  %v14189_v37 = vld [vmem:[#allocation9] sm:$0xff]   ;;  %16453 = vmatprep.subr.bf16.mxu0 %v14498_v16 }
 0xa3a   : > { %v4893_v8 = vmul.f32 0.0078125, %v4867_v33  ;;  %v4924_v19 = vmul.f32 %v18865_v56, %v18865_v56  ;;  %16447 = vmatpush1.bf16.msra.mxu1 %v17069_v0  ;;  %16455 = vmatpush3.bf16.msra.mxu0 %v14189_v37  ;;  %v14492_v33 = vld [vmem:[#allocation9 + $0x10] sm:$0xff]  }
 0xa3b   : > { %16449 = vmatprep.subr.bf16.mxu1 %v17070_v3  ;;  %16457 = vmatprep.subr.bf16.mxu0 %v14499_v12 }
 0xa3c   : > { %4945 = vadd.xlane.f32.xlu1 %v4924_v19  ;;  %v18870_v32 = vsub.f32 %v18800_v41, %v4893_v8  ;;  %v14501_v8 = vld [vmem:[#allocation9 + $0x58] sm:$0xff]   ;;  %v14502_v19 = vld [vmem:[#allocation9 + $0x60] sm:$0xff]  }
 0xa3d   : > { %v4869_v22 = vpop.xlane.xlu1 %4868 }
 0xa3e   : > { %v4894_v50 = vmul.f32 0.0078125, %v4869_v22  ;;  %v4925_v21 = vmul.f32 %v18870_v32, %v18870_v32  ;;  %16451 = vmatpush1.bf16.msra.mxu1 %v17072_v31  ;;  %v14495_v22 = vld [vmem:[#allocation9 + $0x28] sm:$0xff]  }
 0xa40   : > { %4947 = vadd.xlane.f32.xlu0 %v4925_v21  ;;  %v18875_v9 = vsub.f32 %v18804_v58, %v4894_v50  ;;  %v14504_v50 = vld [vmem:[#allocation9 + $0x70] sm:$0xff]  }
 0xa41   : > { %v4871_v1 = vpop.xlane.xlu0 %4870 }
 0xa42   : > { %v4895_v49 = vmul.f32 0.0078125, %v4871_v1  ;;  %v4926_v41 = vmul.f32 %v18875_v9, %v18875_v9 }
 0xa44   : > { %4949 = vadd.xlane.f32.xlu1 %v4926_v41  ;;  %v18880_v44 = vsub.f32 %v18808_v18, %v4895_v49 }
 0xa45   : > { %v4873_v23 = vpop.xlane.xlu1 %4872 }
 0xa46   : > { %v4896_v45 = vmul.f32 0.0078125, %v4873_v23  ;;  %v4927_v58 = vmul.f32 %v18880_v44, %v18880_v44 }
 0xa48   : > { %4951 = vadd.xlane.f32.xlu0 %v4927_v58  ;;  %v18885_v20 = vsub.f32 %v18812_v48, %v4896_v45 }
 0xa49   : > { %v4875_v11 = vpop.xlane.xlu0 %4874 }
 0xa4a   : > { %v4897_v39 = vmul.f32 0.0078125, %v4875_v11  ;;  %v4928_v35 = vmul.f32 %v18885_v20, %v18885_v20 }
 0xa4c   : > { %4953 = vadd.xlane.f32.xlu1 %v4928_v35  ;;  %v18890_v18 = vsub.f32 %v18816_v14, %v4897_v39 }
 0xa4d   : > { %v4877_v46 = vpop.xlane.xlu1 %4876 }
 0xa4e   : > { %v4898_v59 = vmul.f32 0.0078125, %v4877_v46  ;;  %v4929_v43 = vmul.f32 %v18890_v18, %v18890_v18 }
 0xa50   : > { %4955 = vadd.xlane.f32.xlu0 %v4929_v43  ;;  %v18895_v38 = vsub.f32 %v18820_v52, %v4898_v59 }
 0xa51   : > { %v4879_v48 = vpop.xlane.xlu0 %4878 }
 0xa52   : > { %v4899_v13 = vmul.f32 0.0078125, %v4879_v48  ;;  %v4930_v61 = vmul.f32 %v18895_v38, %v18895_v38 }
 0xa54   : > { %4957 = vadd.xlane.f32.xlu1 %v4930_v61  ;;  %v18900_v54 = vsub.f32 %v18824_v63, %v4899_v13 }
 0xa55   : > { %v4881_v14 = vpop.xlane.xlu1 %4880 }
 0xa56   : > { %v4900_v4 = vmul.f32 0.0078125, %v4881_v14  ;;  %v4931_v60 = vmul.f32 %v18900_v54, %v18900_v54 }
 0xa58   : > { %4959 = vadd.xlane.f32.xlu0 %v4931_v60  ;;  %v18905_v30 = vsub.f32 %v18828_v57, %v4900_v4 }
 0xa59   : > { %v4883_v52 = vpop.xlane.xlu0 %4882 }
 0xa5a   : > { %v4901_v6 = vmul.f32 0.0078125, %v4883_v52  ;;  %v4932_v15 = vmul.f32 %v18905_v30, %v18905_v30 }
 0xa5c   : > { %4961 = vadd.xlane.f32.xlu1 %v4932_v15  ;;  %v18910_v62 = vsub.f32 %v18832_v29, %v4901_v6  ;;  %v14491_v29 = vld [vmem:[#allocation9 + $0x8] sm:$0xff]  }
 0xa5d   : > { %v4885_v63 = vpop.xlane.xlu1 %4884  ;;  %16459 = vmatpush3.bf16.msra.mxu0 %v14491_v29 }
 0xa5e   : > { %v4902_v53 = vmul.f32 0.0078125, %v4885_v63  ;;  %v4933_v10 = vmul.f32 %v18910_v62, %v18910_v62  ;;  %16461 = vmatprep.subr.bf16.mxu0 %v14500_v17 }
 0xa60   : > { %4963 = vadd.xlane.f32.xlu0 %v4933_v10  ;;  %v18915_v51 = vsub.f32 %v18836_v47, %v4902_v53  ;;  %v14493_v47 = vld [vmem:[#allocation9 + $0x18] sm:$0xff]  }
 0xa61   : > { %16463 = vmatpush3.bf16.msra.mxu0 %v14492_v33 }
 0xa62   : > { %v4934_v57 = vmul.f32 %v18915_v51, %v18915_v51  ;;  %16465 = vmatprep.subr.bf16.mxu0 %v14501_v8 }
 0xa64   : > { %4965 = vadd.xlane.f32.xlu1 %v4934_v57 }
 0xa65   : > { %16467 = vmatpush3.bf16.msra.mxu0 %v14493_v47 }
 0xa66   : > { %16469 = vmatprep.subr.bf16.mxu0 %v14502_v19 }
 0xa69   : > { %16471 = vmatpush3.bf16.msra.mxu0 %v14494_v2 }
 0xa6a   : > { %16473 = vmatprep.subr.bf16.mxu0 %v14503_v55 }
 0xa6d   : > { %16475 = vmatpush3.bf16.msra.mxu0 %v14495_v22 }
 0xa6e   : > { %16477 = vmatprep.subr.bf16.mxu0 %v14504_v50 }
 0xab5   : > { %v4936_v21 = vpop.xlane.xlu0 %4935 }
 0xab6   : > { %v4967_v28 = vmul.f32 0.0078125, %v4936_v21 }
 0xab8   : > { %v4983_v0 = vadd.f32 1e-05, %v4967_v28 }
 0xab9   : > { %v4938_v1 = vpop.xlane.xlu1 %4937 }
 0xaba   : > { %17249 = vrsqrt.f32 %v4983_v0  ;;  %v4968_v49 = vmul.f32 0.0078125, %v4938_v1 }
 0xabc   : > { %v4984_v41 = vadd.f32 1e-05, %v4968_v49 }
 0xabd   : > { %v4940_v3 = vpop.xlane.xlu0 %4939 }
 0xabe   : > { %17251 = vrsqrt.f32 %v4984_v41  ;;  %v4969_v31 = vmul.f32 0.0078125, %v4940_v3 }
 0xac0   : > { %v4985_v23 = vadd.f32 1e-05, %v4969_v31 }
 0xac1   : > { %v4942_v45 = vpop.xlane.xlu1 %4941 }
 0xac2   : > { %17253 = vrsqrt.f32 %v4985_v23  ;;  %v4970_v58 = vmul.f32 0.0078125, %v4942_v45 }
 0xac4   : > { %v17250_v11 = vpop.eup %17249  ;;  %v4986_v39 = vadd.f32 1e-05, %v4970_v58 }
 0xac5   : > { %v4944_v35 = vpop.xlane.xlu0 %4943  ;;  %v18920_v46 = vmul.f32 %v17250_v11, %v18840_v5 }
 0xac6   : > { %17255 = vrsqrt.f32 %v4986_v39  ;;  %v4971_v59 = vmul.f32 0.0078125, %v4944_v35 }
 0xac7   : > { %5136 = vmatmul.mubr.f32.vlgmr.msra.gmra.mrb[92].mxu1 %v18920_v46 }
 0xac8   : > { %v17252_v43 = vpop.eup %17251  ;;  %v4987_v48 = vadd.f32 1e-05, %v4971_v59  ;;  %5141 = vmatprep.mubr.f32.mxu1 %v21613_v40 }
 0xac9   : > { %v4946_v13 = vpop.xlane.xlu1 %4945  ;;  %v18925_v61 = vmul.f32 %v17252_v43, %v18845_v42 }
 0xaca   : > { %17257 = vrsqrt.f32 %v4987_v48  ;;  %v4972_v14 = vmul.f32 0.0078125, %v4946_v13 }
 0xacb   : > { %5142 = vmatmul.mubr.f32.gmra.mrb[94].mxu1 %v18925_v61 }
 0xacc   : > { %v17254_v4 = vpop.eup %17253  ;;  %v4988_v60 = vadd.f32 1e-05, %v4972_v14  ;;  %5147 = vmatprep.mubr.f32.mxu1 %v21613_v40 }
 0xacd   : > { %v4948_v5 = vpop.xlane.xlu0 %4947  ;;  %v18930_v52 = vmul.f32 %v17254_v4, %v18850_v36 }
 0xace   : > { %17259 = vrsqrt.f32 %v4988_v60  ;;  %v4973_v6 = vmul.f32 0.0078125, %v4948_v5 }
 0xacf   : > { %5148 = vmatmul.mubr.f32.gmra.mrb[96].mxu1 %v18930_v52 }
 0xad0   : > { %v17256_v15 = vpop.eup %17255  ;;  %v4989_v63 = vadd.f32 1e-05, %v4973_v6  ;;  %5153 = vmatprep.mubr.f32.mxu1 %v21613_v40 }
 0xad1   : > { %v4950_v42 = vpop.xlane.xlu1 %4949  ;;  %v18935_v53 = vmul.f32 %v17256_v15, %v18855_v34 }
 0xad2   : > { %17261 = vrsqrt.f32 %v4989_v63  ;;  %v4974_v10 = vmul.f32 0.0078125, %v4950_v42  ;;  %v14505_v63 = vld [vmem:[#allocation9 + $0x78] sm:$0xff]  }
 0xad3   : > { %5154 = vmatmul.mubr.f32.gmra.mrb[98].mxu1 %v18935_v53  ;;  %v14497_v42 = vld [vmem:[#allocation9 + $0x38] sm:$0xff]  }
 0xad4   : > { %v17258_v57 = vpop.eup %17257  ;;  %v4990_v16 = vadd.f32 1e-05, %v4974_v10  ;;  %5159 = vmatprep.mubr.f32.mxu1 %v21613_v40 }
 0xad5   : > { %v4952_v36 = vpop.xlane.xlu0 %4951  ;;  %v18940_v37 = vmul.f32 %v17258_v57, %v18860_v7 }
 0xad6   : > { %17263 = vrsqrt.f32 %v4990_v16  ;;  %v4975_v12 = vmul.f32 0.0078125, %v4952_v36 }
 0xad7   : > { %5160 = vmatmul.mubr.f32.gmra.mrb[100].mxu1 %v18940_v37 }
 0xad8   : > { %v17260_v29 = vpop.eup %17259  ;;  %v4991_v17 = vadd.f32 1e-05, %v4975_v12  ;;  %5165 = vmatprep.mubr.f32.mxu1 %v21613_v40 }
 0xad9   : > { %v4954_v34 = vpop.xlane.xlu1 %4953  ;;  %v18945_v33 = vmul.f32 %v17260_v29, %v18865_v56 }
 0xada   : > { %17265 = vrsqrt.f32 %v4991_v17  ;;  %v4976_v8 = vmul.f32 0.0078125, %v4954_v34 }
 0xadb   : > { %5166 = vmatmul.mubr.f32.gmra.mrb[102].mxu1 %v18945_v33 }
 0xadc   : > { %v17262_v47 = vpop.eup %17261  ;;  %v4992_v19 = vadd.f32 1e-05, %v4976_v8  ;;  %5171 = vmatprep.mubr.f32.mxu1 %v21613_v40 }
 0xadd   : > { %v4956_v7 = vpop.xlane.xlu0 %4955  ;;  %v18950_v2 = vmul.f32 %v17262_v47, %v18870_v32 }
 0xade   : > { %17267 = vrsqrt.f32 %v4992_v19  ;;  %v4977_v55 = vmul.f32 0.0078125, %v4956_v7 }
 0xadf   : > { %5172 = vmatmul.mubr.f32.gmra.mrb[104].mxu1 %v18950_v2 }
 0xae0   : > { %v17264_v22 = vpop.eup %17263  ;;  %v4993_v50 = vadd.f32 1e-05, %v4977_v55  ;;  %5177 = vmatprep.mubr.f32.mxu1 %v21613_v40 }
 0xae1   : > { %v4958_v56 = vpop.xlane.xlu1 %4957  ;;  %v18955_v21 = vmul.f32 %v17264_v22, %v18875_v9 }
 0xae2   : > { %17269 = vrsqrt.f32 %v4993_v50  ;;  %v4978_v28 = vmul.f32 0.0078125, %v4958_v56 }
 0xae3   : > { %5178 = vmatmul.mubr.f32.gmra.mrb[106].mxu1 %v18955_v21 }
 0xae4   : > { %v17266_v0 = vpop.eup %17265  ;;  %v4994_v1 = vadd.f32 1e-05, %v4978_v28  ;;  %5183 = vmatprep.mubr.f32.mxu1 %v21613_v40 }
 0xae5   : > { %v4960_v32 = vpop.xlane.xlu0 %4959  ;;  %v18960_v49 = vmul.f32 %v17266_v0, %v18880_v44 }
 0xae6   : > { %17271 = vrsqrt.f32 %v4994_v1  ;;  %v4979_v41 = vmul.f32 0.0078125, %v4960_v32 }
 0xae7   : > { %5184 = vmatmul.mubr.f32.gmra.mrb[108].mxu1 %v18960_v49 }
 0xae8   : > { %v17268_v3 = vpop.eup %17267  ;;  %v4995_v31 = vadd.f32 1e-05, %v4979_v41  ;;  %5189 = vmatprep.mubr.f32.mxu1 %v21613_v40 }
 0xae9   : > { %v4962_v9 = vpop.xlane.xlu1 %4961  ;;  %v18965_v23 = vmul.f32 %v17268_v3, %v18885_v20 }
 0xaea   : > { %17273 = vrsqrt.f32 %v4995_v31  ;;  %v4980_v45 = vmul.f32 0.0078125, %v4962_v9 }
 0xaeb   : > { %5190 = vmatmul.mubr.f32.gmra.mrb[110].mxu1 %v18965_v23 }
 0xaec   : > { %v17270_v58 = vpop.eup %17269  ;;  %v4996_v11 = vadd.f32 1e-05, %v4980_v45  ;;  %5195 = vmatprep.mubr.f32.mxu1 %v21613_v40 }
 0xaed   : > { %v4964_v44 = vpop.xlane.xlu0 %4963  ;;  %v18970_v39 = vmul.f32 %v17270_v58, %v18890_v18 }
 0xaee   : > { %17275 = vrsqrt.f32 %v4996_v11  ;;  %v4981_v35 = vmul.f32 0.0078125, %v4964_v44 }
 0xaef   : > { %5196 = vmatmul.mubr.f32.gmra.mrb[112].mxu1 %v18970_v39 }
 0xaf0   : > { %v17272_v59 = vpop.eup %17271  ;;  %v4997_v43 = vadd.f32 1e-05, %v4981_v35  ;;  %5201 = vmatprep.mubr.f32.mxu1 %v21613_v40 }
 0xaf1   : > { %v4966_v20 = vpop.xlane.xlu1 %4965  ;;  %v18975_v48 = vmul.f32 %v17272_v59, %v18895_v38 }
 0xaf2   : > { %17277 = vrsqrt.f32 %v4997_v43  ;;  %v4982_v13 = vmul.f32 0.0078125, %v4966_v20 }
 0xaf3   : > { %5202 = vmatmul.mubr.f32.gmra.mrb[114].mxu1 %v18975_v48 }
 0xaf4   : > { %v17274_v14 = vpop.eup %17273  ;;  %v4998_v4 = vadd.f32 1e-05, %v4982_v13  ;;  %5207 = vmatprep.mubr.f32.mxu1 %v21613_v40 }
 0xaf5   : > { %v18980_v18 = vmul.f32 %v17274_v14, %v18900_v54 }
 0xaf6   : > { %17279 = vrsqrt.f32 %v4998_v4 }
 0xaf7   : > { %5208 = vmatmul.mubr.f32.gmra.mrb[116].mxu1 %v18980_v18 }
 0xaf8   : > { %v17276_v60 = vpop.eup %17275  ;;  %5213 = vmatprep.mubr.f32.mxu1 %v21613_v40 }
 0xaf9   : > { %v18985_v38 = vmul.f32 %v17276_v60, %v18905_v30  ;;  %v14496_v30 = vld [vmem:[#allocation9 + $0x30] sm:$0xff]  }
 0xafa   : > { %16479 = vmatpush3.bf16.msra.mxu0 %v14496_v30 }
 0xafb   : > { %5214 = vmatmul.mubr.f32.gmra.mrb[118].mxu1 %v18985_v38  ;;  %16481 = vmatprep.subr.bf16.mxu0 %v14505_v63 }
 0xafc   : > { %v17278_v5 = vpop.eup %17277  ;;  %5219 = vmatprep.mubr.f32.mxu1 %v21613_v40 }
 0xafd   : > { %v18990_v6 = vmul.f32 %v17278_v5, %v18910_v62  ;;  %v19000_v62 = vsub.s32 7, %v18078_v24 }
 0xafe   : > { %16483 = vmatpush3.bf16.msra.mxu0 %v14497_v42 }
 0xaff   : > { %5220 = vmatmul.mubr.f32.gmra.mrb[120].mxu1 %v18990_v6  ;;  %21614 = vst [vmem:[#allocation38_spill] sm:$0xff] %v19000_v62  ;;  %v19004_v10 = vrot.slane %v18086_v26, %v19000_v62 }
 0xb00   : > { %v17280_v54 = vpop.eup %17279  ;;  %5225 = vmatprep.mubr.f32.mxu1 %v21613_v40 }
 0xb01   : > { %v18995_v15 = vmul.f32 %v17280_v54, %v18915_v51  ;;  %v21615_v51 = vunpack.c.h.bf16 %v18083_v25 }
 0xb03   : > { %5226 = vmatmul.mubr.f32.gmra.mrb[122].mxu1 %v18995_v15  ;;  %v19009_v57 = vrot.slane %v21615_v51, %v19000_v62 }
 0xb04   : > { %5841 = vmatprep.mubr.f32.mxu1 %v21613_v40 }
 0xb9a   : > { %v5137_v16 = vpop.f32.mrb[92].mxu1 }
 0xb9b   : > { %v5138_v36 = vadd.f32 %v5137_v16, %v19004_v10  ;;  %v5139_v12 = vpop.f32.mrb[93].mxu1 }
 0xb9c   : > { %v5140_v29 = vadd.f32 %v5139_v12, %v19009_v57 }
 0xb9d   : > { %v5232_v8 = vmax.f32 %v5138_v36, 0.0 }
 0xb9e   : > { %v5233_v17 = vmax.f32 %v5140_v29, 0.0  ;;  %v5143_v34 = vpop.f32.mrb[94].mxu1 }
 0xb9f   : > { %v5144_v47 = vadd.f32 %v5143_v34, %v19004_v10  ;;  %v5145_v19 = vpop.f32.mrb[95].mxu1 }
 0xba0   : > { %v5146_v26 = vadd.f32 %v5145_v19, %v19009_v57  ;;  %5364 = vmatprep.mubr.f32.mxu0 %v5233_v17 }
 0xba1   : > { %5365 = vmatmul.mubr.f32.vlgmr.msra.gmra.mrb[116].mxu0 %v5232_v8  ;;  %v5234_v55 = vmax.f32 %v5144_v47, 0.0 }
 0xba2   : > { %v5235_v7 = vmax.f32 %v5146_v26, 0.0  ;;  %v5149_v25 = vpop.f32.mrb[96].mxu1 }
 0xba3   : > { %v5150_v22 = vadd.f32 %v5149_v25, %v19004_v10  ;;  %v5151_v50 = vpop.f32.mrb[97].mxu1 }
 0xba4   : > { %v5152_v56 = vadd.f32 %v5151_v50, %v19009_v57  ;;  %5369 = vmatprep.mubr.f32.mxu0 %v5235_v7 }
 0xba5   : > { %5370 = vmatmul.mubr.f32.gmra.mrb[118].mxu0 %v5234_v55  ;;  %v5236_v1 = vmax.f32 %v5150_v22, 0.0 }
 0xba6   : > { %v5237_v28 = vmax.f32 %v5152_v56, 0.0  ;;  %v5155_v0 = vpop.f32.mrb[98].mxu1 }
 0xba7   : > { %v5156_v32 = vadd.f32 %v5155_v0, %v19004_v10  ;;  %v5157_v41 = vpop.f32.mrb[99].mxu1 }
 0xba8   : > { %v5158_v3 = vadd.f32 %v5157_v41, %v19009_v57  ;;  %5374 = vmatprep.mubr.f32.mxu0 %v5237_v28 }
 0xba9   : > { %5375 = vmatmul.mubr.f32.gmra.mrb[120].mxu0 %v5236_v1  ;;  %v5238_v45 = vmax.f32 %v5156_v32, 0.0 }
 0xbaa   : > { %v5239_v31 = vmax.f32 %v5158_v3, 0.0  ;;  %v5161_v9 = vpop.f32.mrb[100].mxu1 }
 0xbab   : > { %v5162_v58 = vadd.f32 %v5161_v9, %v19004_v10  ;;  %v5163_v11 = vpop.f32.mrb[101].mxu1 }
 0xbac   : > { %v5164_v44 = vadd.f32 %v5163_v11, %v19009_v57  ;;  %5379 = vmatprep.mubr.f32.mxu0 %v5239_v31 }
 0xbad   : > { %5380 = vmatmul.mubr.f32.gmra.mrb[122].mxu0 %v5238_v45  ;;  %v5240_v43 = vmax.f32 %v5162_v58, 0.0 }
 0xbae   : > { %v5241_v35 = vmax.f32 %v5164_v44, 0.0  ;;  %v5167_v59 = vpop.f32.mrb[102].mxu1 }
 0xbaf   : > { %v5168_v20 = vadd.f32 %v5167_v59, %v19004_v10  ;;  %v5169_v13 = vpop.f32.mrb[103].mxu1 }
 0xbb0   : > { %v5170_v14 = vadd.f32 %v5169_v13, %v19009_v57  ;;  %5384 = vmatprep.mubr.f32.mxu0 %v5241_v35 }
 0xbb1   : > { %5385 = vmatmul.mubr.f32.gmra.mrb[124].mxu0 %v5240_v43  ;;  %v5242_v5 = vmax.f32 %v5168_v20, 0.0 }
 0xbb2   : > { %v5243_v4 = vmax.f32 %v5170_v14, 0.0  ;;  %v5173_v60 = vpop.f32.mrb[104].mxu1 }
 0xbb3   : > { %v5174_v54 = vadd.f32 %v5173_v60, %v19004_v10  ;;  %v5175_v30 = vpop.f32.mrb[105].mxu1 }
 0xbb4   : > { %v5176_v63 = vadd.f32 %v5175_v30, %v19009_v57  ;;  %5389 = vmatprep.mubr.f32.mxu0 %v5243_v4 }
 0xbb5   : > { %5390 = vmatmul.mubr.f32.gmra.mrb[126].mxu0 %v5242_v5  ;;  %v5244_v16 = vmax.f32 %v5174_v54, 0.0 }
 0xbb6   : > { %v5245_v42 = vmax.f32 %v5176_v63, 0.0  ;;  %v5179_v51 = vpop.f32.mrb[106].mxu1 }
 0xbb7   : > { %v5180_v36 = vadd.f32 %v5179_v51, %v19004_v10  ;;  %v5181_v12 = vpop.f32.mrb[107].mxu1 }
 0xbb8   : > { %v5182_v29 = vadd.f32 %v5181_v12, %v19009_v57  ;;  %5394 = vmatprep.mubr.f32.mxu0 %v5245_v42 }
 0xbb9   : > { %5395 = vmatmul.mubr.f32.gmra.mrb[128].mxu0 %v5244_v16  ;;  %v5246_v8 = vmax.f32 %v5180_v36, 0.0 }
 0xbba   : > { %v5247_v17 = vmax.f32 %v5182_v29, 0.0  ;;  %v5185_v34 = vpop.f32.mrb[108].mxu1 }
 0xbbb   : > { %v5186_v47 = vadd.f32 %v5185_v34, %v19004_v10  ;;  %v5187_v19 = vpop.f32.mrb[109].mxu1 }
 0xbbc   : > { %v5188_v26 = vadd.f32 %v5187_v19, %v19009_v57  ;;  %5399 = vmatprep.mubr.f32.mxu0 %v5247_v17 }
 0xbbd   : > { %5400 = vmatmul.mubr.f32.gmra.mrb[130].mxu0 %v5246_v8  ;;  %v5248_v55 = vmax.f32 %v5186_v47, 0.0 }
 0xbbe   : > { %v5249_v7 = vmax.f32 %v5188_v26, 0.0  ;;  %v5191_v25 = vpop.f32.mrb[110].mxu1 }
 0xbbf   : > { %v5192_v22 = vadd.f32 %v5191_v25, %v19004_v10  ;;  %v5193_v50 = vpop.f32.mrb[111].mxu1 }
 0xbc0   : > { %v5194_v56 = vadd.f32 %v5193_v50, %v19009_v57  ;;  %5404 = vmatprep.mubr.f32.mxu0 %v5249_v7 }
 0xbc1   : > { %5405 = vmatmul.mubr.f32.gmra.mrb[132].mxu0 %v5248_v55  ;;  %v5250_v1 = vmax.f32 %v5192_v22, 0.0  ;;  %v19046_v55 = vld [vmem:[%s21529_s13 + $0xc] sm:$0xff] }
 0xbc2   : > { %v5251_v28 = vmax.f32 %v5194_v56, 0.0  ;;  %v5197_v0 = vpop.f32.mrb[112].mxu1  ;;  %v19049_v22 = vunpack.c.l.bf16 %v19046_v55 }
 0xbc3   : > { %v5198_v32 = vadd.f32 %v5197_v0, %v19004_v10  ;;  %v5199_v41 = vpop.f32.mrb[113].mxu1 }
 0xbc4   : > { %v5200_v3 = vadd.f32 %v5199_v41, %v19009_v57  ;;  %5409 = vmatprep.mubr.f32.mxu0 %v5251_v28 }
 0xbc5   : > { %5410 = vmatmul.mubr.f32.gmra.mrb[134].mxu0 %v5250_v1  ;;  %v5252_v45 = vmax.f32 %v5198_v32, 0.0 }
 0xbc6   : > { %v5253_v31 = vmax.f32 %v5200_v3, 0.0  ;;  %v5203_v9 = vpop.f32.mrb[114].mxu1 }
 0xbc7   : > { %v5204_v58 = vadd.f32 %v5203_v9, %v19004_v10  ;;  %v5205_v11 = vpop.f32.mrb[115].mxu1 }
 0xbc8   : > { %v5206_v44 = vadd.f32 %v5205_v11, %v19009_v57  ;;  %5414 = vmatprep.mubr.f32.mxu0 %v5253_v31 }
 0xbc9   : > { %5415 = vmatmul.mubr.f32.gmra.mrb[136].mxu0 %v5252_v45  ;;  %v5254_v43 = vmax.f32 %v5204_v58, 0.0 }
 0xbca   : > { %v5255_v35 = vmax.f32 %v5206_v44, 0.0  ;;  %v5209_v59 = vpop.f32.mrb[116].mxu1 }
 0xbcb   : > { %v5210_v20 = vadd.f32 %v5209_v59, %v19004_v10  ;;  %v5211_v13 = vpop.f32.mrb[117].mxu1 }
 0xbcc   : > { %v5212_v14 = vadd.f32 %v5211_v13, %v19009_v57  ;;  %5419 = vmatprep.mubr.f32.mxu0 %v5255_v35 }
 0xbcd   : > { %5420 = vmatmul.mubr.f32.gmra.mrb[138].mxu0 %v5254_v43  ;;  %v5256_v5 = vmax.f32 %v5210_v20, 0.0 }
 0xbce   : > { %v5257_v4 = vmax.f32 %v5212_v14, 0.0  ;;  %v5215_v60 = vpop.f32.mrb[118].mxu1 }
 0xbcf   : > { %v5216_v54 = vadd.f32 %v5215_v60, %v19004_v10  ;;  %v5217_v30 = vpop.f32.mrb[119].mxu1 }
 0xbd0   : > { %v5218_v63 = vadd.f32 %v5217_v30, %v19009_v57  ;;  %5424 = vmatprep.mubr.f32.mxu0 %v5257_v4 }
 0xbd1   : > { %5425 = vmatmul.mubr.f32.gmra.mrb[140].mxu0 %v5256_v5  ;;  %v5258_v16 = vmax.f32 %v5216_v54, 0.0 }
 0xbd2   : > { %v5259_v42 = vmax.f32 %v5218_v63, 0.0  ;;  %v5221_v51 = vpop.f32.mrb[120].mxu1 }
 0xbd3   : > { %v5222_v36 = vadd.f32 %v5221_v51, %v19004_v10  ;;  %v5223_v12 = vpop.f32.mrb[121].mxu1 }
 0xbd4   : > { %v5224_v29 = vadd.f32 %v5223_v12, %v19009_v57  ;;  %5429 = vmatprep.mubr.f32.mxu0 %v5259_v42 }
 0xbd5   : > { %5430 = vmatmul.mubr.f32.gmra.mrb[142].mxu0 %v5258_v16  ;;  %v5260_v8 = vmax.f32 %v5222_v36, 0.0 }
 0xbd6   : > { %v5261_v17 = vmax.f32 %v5224_v29, 0.0  ;;  %v5227_v34 = vpop.f32.mrb[122].mxu1 }
 0xbd7   : > { %v5228_v47 = vadd.f32 %v5227_v34, %v19004_v10  ;;  %v5229_v19 = vpop.f32.mrb[123].mxu1  ;;  %v19053_v10 = vrot.slane %v19049_v22, %v18089_v27 }
 0xbd8   : > { %v5230_v26 = vadd.f32 %v5229_v19, %v19009_v57  ;;  %5434 = vmatprep.mubr.f32.mxu0 %v5261_v17 }
 0xbd9   : > { %5435 = vmatmul.mubr.f32.gmra.mrb[144].mxu0 %v5260_v8  ;;  %v5262_v25 = vmax.f32 %v5228_v47, 0.0 }
 0xbda   : > { %v5263_v7 = vmax.f32 %v5230_v26, 0.0 }
 0xbdc   : > { %5439 = vmatprep.mubr.f32.mxu0 %v5263_v7 }
 0xbdd   : > { %5440 = vmatmul.mubr.f32.gmra.mrb[146].mxu0 %v5262_v25 }
 0xc74   : > { %v14810_v50 = vpop.f32.mrb[116].mxu0 }
 0xc75   : > { %v14811_v57 = vpop.f32.mrb[117].mxu0 }
 0xc76   : > { %v14812_v56 = vadd.f32 %v14811_v57, %v14810_v50 }
 0xc78   : > { %v5367_v28 = vadd.f32 %v14812_v56, %v19053_v10  ;;  %v14813_v0 = vpop.f32.mrb[118].mxu0 }
 0xc79   : > { %v14814_v1 = vpop.f32.mrb[119].mxu0 }
 0xc7a   : > { %v14815_v32 = vadd.f32 %v14814_v1, %v14813_v0  ;;  %v19057_v41 = vadd.f32 %v5367_v28, %v18920_v46 }
 0xc7c   : > { %v5372_v3 = vadd.f32 %v14815_v32, %v19053_v10  ;;  %v14816_v31 = vpop.f32.mrb[120].mxu0  ;;  %5461 = vadd.xlane.f32.xlu0 %v19057_v41 }
 0xc7d   : > { %v14817_v9 = vpop.f32.mrb[121].mxu0 }
 0xc7e   : > { %v14818_v45 = vadd.f32 %v14817_v9, %v14816_v31  ;;  %v19062_v58 = vadd.f32 %v5372_v3, %v18925_v61 }
 0xc80   : > { %v5377_v11 = vadd.f32 %v14818_v45, %v19053_v10  ;;  %v14819_v44 = vpop.f32.mrb[122].mxu0  ;;  %5463 = vadd.xlane.f32.xlu1 %v19062_v58 }
 0xc81   : > { %v14820_v35 = vpop.f32.mrb[123].mxu0 }
 0xc82   : > { %v14821_v59 = vadd.f32 %v14820_v35, %v14819_v44  ;;  %v19067_v46 = vadd.f32 %v5377_v11, %v18930_v52 }
 0xc84   : > { %v5382_v43 = vadd.f32 %v14821_v59, %v19053_v10  ;;  %v14822_v20 = vpop.f32.mrb[124].mxu0  ;;  %5465 = vadd.xlane.f32.xlu0 %v19067_v46 }
 0xc85   : > { %v14823_v13 = vpop.f32.mrb[125].mxu0 }
 0xc86   : > { %v14824_v14 = vadd.f32 %v14823_v13, %v14822_v20  ;;  %v19072_v61 = vadd.f32 %v5382_v43, %v18935_v53 }
 0xc88   : > { %v5387_v4 = vadd.f32 %v14824_v14, %v19053_v10  ;;  %v14825_v60 = vpop.f32.mrb[126].mxu0  ;;  %5467 = vadd.xlane.f32.xlu1 %v19072_v61 }
 0xc89   : > { %v14826_v5 = vpop.f32.mrb[127].mxu0 }
 0xc8a   : > { %v14827_v54 = vadd.f32 %v14826_v5, %v14825_v60  ;;  %v19077_v52 = vadd.f32 %v5387_v4, %v18940_v37 }
 0xc8c   : > { %v5392_v30 = vadd.f32 %v14827_v54, %v19053_v10  ;;  %v14828_v63 = vpop.f32.mrb[128].mxu0  ;;  %5469 = vadd.xlane.f32.xlu0 %v19077_v52 }
 0xc8d   : > { %v14829_v42 = vpop.f32.mrb[129].mxu0 }
 0xc8e   : > { %v14830_v51 = vadd.f32 %v14829_v42, %v14828_v63  ;;  %v19082_v53 = vadd.f32 %v5392_v30, %v18945_v33 }
 0xc90   : > { %v5397_v16 = vadd.f32 %v14830_v51, %v19053_v10  ;;  %v14831_v36 = vpop.f32.mrb[130].mxu0  ;;  %5471 = vadd.xlane.f32.xlu1 %v19082_v53  ;;  %v17075_v51 = vld [vmem:[%s21523_s7] ss:$12 sps:$4 sm:$0xff]  }
 0xc91   : > { %v14832_v12 = vpop.f32.mrb[131].mxu0 }
 0xc92   : > { %v14833_v29 = vadd.f32 %v14832_v12, %v14831_v36  ;;  %v19087_v37 = vadd.f32 %v5397_v16, %v18950_v2  ;;  %v17078_v16 = vld [vmem:[%s21523_s7 + $0x18] ss:$12 sps:$4 sm:$0xff]   ;;  %v17080_v36 = vld [vmem:[%s21523_s7 + $0x34] ss:$12 sps:$4 sm:$0xff]  }
 0xc93   : > { %v17087_v12 = vld [vmem:[%s21523_s7 + $0x38] ss:$12 sps:$4 sm:$0xff]  }
 0xc94   : > { %v5402_v17 = vadd.f32 %v14833_v29, %v19053_v10  ;;  %v14834_v34 = vpop.f32.mrb[132].mxu0  ;;  %5473 = vadd.xlane.f32.xlu0 %v19087_v37  ;;  %v17082_v29 = vld [vmem:[%s21523_s7 + $0x30] ss:$12 sps:$4 sm:$0xff]  }
 0xc95   : > { %v14835_v8 = vpop.f32.mrb[133].mxu0 }
 0xc96   : > { %v14836_v47 = vadd.f32 %v14835_v8, %v14834_v34  ;;  %v19092_v33 = vadd.f32 %v5402_v17, %v18955_v21  ;;  %v17084_v17 = vld [vmem:[%s21523_s7 + $0x4c] ss:$12 sps:$4 sm:$0xff]   ;;  %v17086_v34 = vld [vmem:[%s21523_s7 + $0x48] ss:$12 sps:$4 sm:$0xff]  }
 0xc98   : > { %v5407_v19 = vadd.f32 %v14836_v47, %v19053_v10  ;;  %v14837_v26 = vpop.f32.mrb[134].mxu0  ;;  %5475 = vadd.xlane.f32.xlu1 %v19092_v33 }
 0xc99   : > { %v14838_v7 = vpop.f32.mrb[135].mxu0 }
 0xc9a   : > { %v14839_v25 = vadd.f32 %v14838_v7, %v14837_v26  ;;  %v19097_v2 = vadd.f32 %v5407_v19, %v18960_v49 }
 0xc9c   : > { %v5412_v50 = vadd.f32 %v14839_v25, %v19053_v10  ;;  %v14840_v57 = vpop.f32.mrb[136].mxu0  ;;  %5477 = vadd.xlane.f32.xlu0 %v19097_v2 }
 0xc9d   : > { %v14841_v56 = vpop.f32.mrb[137].mxu0 }
 0xc9e   : > { %v14842_v28 = vadd.f32 %v14841_v56, %v14840_v57  ;;  %v19102_v21 = vadd.f32 %v5412_v50, %v18965_v23 }
 0xca0   : > { %v5417_v0 = vadd.f32 %v14842_v28, %v19053_v10  ;;  %v14843_v1 = vpop.f32.mrb[138].mxu0  ;;  %5479 = vadd.xlane.f32.xlu1 %v19102_v21 }
 0xca1   : > { %v14844_v32 = vpop.f32.mrb[139].mxu0 }
 0xca2   : > { %v14845_v3 = vadd.f32 %v14844_v32, %v14843_v1  ;;  %v19107_v49 = vadd.f32 %v5417_v0, %v18970_v39 }
 0xca4   : > { %v5422_v31 = vadd.f32 %v14845_v3, %v19053_v10  ;;  %v14846_v9 = vpop.f32.mrb[140].mxu0  ;;  %5481 = vadd.xlane.f32.xlu0 %v19107_v49 }
 0xca5   : > { %v14847_v45 = vpop.f32.mrb[141].mxu0 }
 0xca6   : > { %v14848_v11 = vadd.f32 %v14847_v45, %v14846_v9  ;;  %v19112_v23 = vadd.f32 %v5422_v31, %v18975_v48 }
 0xca8   : > { %v5427_v44 = vadd.f32 %v14848_v11, %v19053_v10  ;;  %v14849_v35 = vpop.f32.mrb[142].mxu0  ;;  %5483 = vadd.xlane.f32.xlu1 %v19112_v23 }
 0xca9   : > { %v14850_v59 = vpop.f32.mrb[143].mxu0 }
 0xcaa   : > { %v14851_v43 = vadd.f32 %v14850_v59, %v14849_v35  ;;  %v19117_v39 = vadd.f32 %v5427_v44, %v18980_v18  ;;  %v17088_v35 = vld [vmem:[%s21523_s7 + $0x64] ss:$12 sps:$4 sm:$0xff]   ;;  %v17090_v59 = vld [vmem:[%s21523_s7 + $0x60] ss:$12 sps:$4 sm:$0xff]  }
 0xcac   : > { %v5432_v20 = vadd.f32 %v14851_v43, %v19053_v10  ;;  %v14852_v13 = vpop.f32.mrb[144].mxu0  ;;  %5485 = vadd.xlane.f32.xlu0 %v19117_v39 }
 0xcad   : > { %v14853_v14 = vpop.f32.mrb[145].mxu0 }
 0xcae   : > { %v14854_v4 = vadd.f32 %v14853_v14, %v14852_v13  ;;  %v19122_v48 = vadd.f32 %v5432_v20, %v18985_v38  ;;  %v17073_v38 = vld [vmem:[%s21523_s7 + $0x4] ss:$12 sps:$4 sm:$0xff]   ;;  %v17092_v14 = vld [vmem:[%s21523_s7 + $0x7c] ss:$12 sps:$4 sm:$0xff]  }
 0xcaf   : > { %16485 = vmatprep.subr.bf16.mxu1 %v17073_v38  ;;  %v17099_v38 = vld [vmem:[%s21523_s7 + $0x80] ss:$12 sps:$4 sm:$0xff]  }
 0xcb0   : > { %v5437_v60 = vadd.f32 %v14854_v4, %v19053_v10  ;;  %v14855_v5 = vpop.f32.mrb[146].mxu0  ;;  %5487 = vadd.xlane.f32.xlu1 %v19122_v48  ;;  %16487 = vmatpush1.bf16.msra.mxu1 %v17075_v51  ;;  %v17095_v4 = vld [vmem:[%s21523_s7 + $0x68] ss:$12 sps:$4 sm:$0xff]  }
 0xcb1   : > { %v14856_v54 = vpop.f32.mrb[147].mxu0 }
 0xcb2   : > { %v14857_v30 = vadd.f32 %v14856_v54, %v14855_v5  ;;  %v19127_v18 = vadd.f32 %v5437_v60, %v18990_v6  ;;  %v17076_v6 = vld [vmem:[%s21523_s7 + $0x1c] ss:$12 sps:$4 sm:$0xff]  }
 0xcb3   : > { %16489 = vmatprep.subr.bf16.mxu1 %v17076_v6 }
 0xcb4   : > { %v5442_v63 = vadd.f32 %v14857_v30, %v19053_v10  ;;  %5489 = vadd.xlane.f32.xlu0 %v19127_v18  ;;  %v17079_v10 = vld [vmem:[%s21523_s7 + $0x8] ss:$12 sps:$4 sm:$0xff]   ;;  %16491 = vmatpush1.bf16.msra.mxu1 %v17078_v16  ;;  %v17100_v16 = vld [vmem:[%s21523_s7 + $0xac] ss:$12 sps:$4 sm:$0xff]  }
 0xcb5   : > { %16517 = vmatprep.subr.bf16.mxu0 %v17079_v10  ;;  %16493 = vmatprep.subr.bf16.mxu1 %v17080_v36  ;;  %v17103_v36 = vld [vmem:[%s21523_s7 + $0x98] ss:$12 sps:$4 sm:$0xff]  }
 0xcb6   : > { %v19132_v42 = vadd.f32 %v5442_v63, %v18995_v15  ;;  %v17083_v15 = vld [vmem:[%s21523_s7 + $0x20] ss:$12 sps:$4 sm:$0xff]   ;;  %16519 = vmatpush3.bf16.msra.mxu0 %v17079_v10 }
 0xcb7   : > { %16521 = vmatprep.subr.bf16.mxu0 %v17083_v15  ;;  %v17096_v63 = vld [vmem:[%s21523_s7 + $0x94] ss:$12 sps:$4 sm:$0xff]  }
 0xcb8   : > { %5491 = vadd.xlane.f32.xlu1 %v19132_v42  ;;  %16495 = vmatpush1.bf16.msra.mxu1 %v17082_v29 }
 0xcb9   : > { %16497 = vmatprep.subr.bf16.mxu1 %v17084_v17 }
 0xcba   : > { %16523 = vmatpush3.bf16.msra.mxu0 %v17083_v15 }
 0xcbb   : > { %16525 = vmatprep.subr.bf16.mxu0 %v17087_v12 }
 0xcbc   : > { %16499 = vmatpush1.bf16.msra.mxu1 %v17086_v34 }
 0xcbd   : > { %16501 = vmatprep.subr.bf16.mxu1 %v17088_v35 }
 0xcbe   : > { %16527 = vmatpush3.bf16.msra.mxu0 %v17087_v12 }
 0xcc0   : > { %16503 = vmatpush1.bf16.msra.mxu1 %v17090_v59 }
 0xcc1   : > { %16505 = vmatprep.subr.bf16.mxu1 %v17092_v14 }
 0xd09   : > { %v5462_v8 = vpop.xlane.xlu0 %5461 }
 0xd0a   : > { %v5493_v47 = vmul.f32 0.0078125, %v5462_v8  ;;  %v17104_v8 = vld [vmem:[%s21523_s7 + $0xb0] ss:$12 sps:$4 sm:$0xff]  }
 0xd0c   : > { %v19169_v19 = vsub.f32 %v19057_v41, %v5493_v47 }
 0xd0d   : > { %v5464_v26 = vpop.xlane.xlu1 %5463 }
 0xd0e   : > { %v5494_v7 = vmul.f32 0.0078125, %v5464_v26  ;;  %v5525_v25 = vmul.f32 %v19169_v19, %v19169_v19 }
 0xd10   : > { %5541 = vadd.xlane.f32.xlu0 %v5525_v25  ;;  %v19174_v50 = vsub.f32 %v19062_v58, %v5494_v7 }
 0xd11   : > { %v5466_v57 = vpop.xlane.xlu0 %5465 }
 0xd12   : > { %v5495_v56 = vmul.f32 0.0078125, %v5466_v57  ;;  %v5526_v28 = vmul.f32 %v19174_v50, %v19174_v50 }
 0xd14   : > { %5543 = vadd.xlane.f32.xlu1 %v5526_v28  ;;  %v19179_v0 = vsub.f32 %v19067_v46, %v5495_v56 }
 0xd15   : > { %v5468_v41 = vpop.xlane.xlu1 %5467 }
 0xd16   : > { %v5496_v1 = vmul.f32 0.0078125, %v5468_v41  ;;  %v5527_v32 = vmul.f32 %v19179_v0, %v19179_v0 }
 0xd18   : > { %5545 = vadd.xlane.f32.xlu0 %v5527_v32  ;;  %v19184_v3 = vsub.f32 %v19072_v61, %v5496_v1  ;;  %v17091_v61 = vld [vmem:[%s21523_s7 + $0x50] ss:$12 sps:$4 sm:$0xff]  }
 0xd19   : > { %v5470_v58 = vpop.xlane.xlu0 %5469  ;;  %16529 = vmatprep.subr.bf16.mxu0 %v17091_v61 }
 0xd1a   : > { %v5497_v31 = vmul.f32 0.0078125, %v5470_v58  ;;  %v5528_v9 = vmul.f32 %v19184_v3, %v19184_v3  ;;  %16531 = vmatpush3.bf16.msra.mxu0 %v17091_v61 }
 0xd1b   : > { %16533 = vmatprep.subr.bf16.mxu0 %v17095_v4 }
 0xd1c   : > { %5547 = vadd.xlane.f32.xlu1 %v5528_v9  ;;  %v19189_v45 = vsub.f32 %v19077_v52, %v5497_v31 }
 0xd1d   : > { %v5472_v46 = vpop.xlane.xlu1 %5471 }
 0xd1e   : > { %v5498_v11 = vmul.f32 0.0078125, %v5472_v46  ;;  %v5529_v44 = vmul.f32 %v19189_v45, %v19189_v45  ;;  %16535 = vmatpush3.bf16.msra.mxu0 %v17095_v4 }
 0xd1f   : > { %16537 = vmatprep.subr.bf16.mxu0 %v17099_v38 }
 0xd20   : > { %5549 = vadd.xlane.f32.xlu0 %v5529_v44  ;;  %v19203_v52 = vsub.f32 %v19082_v53, %v5498_v11  ;;  %v17094_v53 = vld [vmem:[%s21523_s7 + $0x78] ss:$12 sps:$4 sm:$0xff]  }
 0xd21   : > { %v5474_v43 = vpop.xlane.xlu0 %5473  ;;  %16507 = vmatpush1.bf16.msra.mxu1 %v17094_v53 }
 0xd22   : > { %v5499_v20 = vmul.f32 0.0078125, %v5474_v43  ;;  %v5530_v13 = vmul.f32 %v19203_v52, %v19203_v52  ;;  %16509 = vmatprep.subr.bf16.mxu1 %v17096_v63  ;;  %16539 = vmatpush3.bf16.msra.mxu0 %v17099_v38 }
 0xd23   : > { %16541 = vmatprep.subr.bf16.mxu0 %v17103_v36 }
 0xd24   : > { %5551 = vadd.xlane.f32.xlu1 %v5530_v13  ;;  %v19217_v60 = vsub.f32 %v19087_v37, %v5499_v20  ;;  %v17098_v37 = vld [vmem:[%s21523_s7 + $0x90] ss:$12 sps:$4 sm:$0xff]  }
 0xd25   : > { %v5476_v5 = vpop.xlane.xlu1 %5475  ;;  %16511 = vmatpush1.bf16.msra.mxu1 %v17098_v37 }
 0xd26   : > { %v5500_v54 = vmul.f32 0.0078125, %v5476_v5  ;;  %v5531_v30 = vmul.f32 %v19217_v60, %v19217_v60  ;;  %16513 = vmatprep.subr.bf16.mxu1 %v17100_v16  ;;  %16543 = vmatpush3.bf16.msra.mxu0 %v17103_v36 }
 0xd27   : > { %16545 = vmatprep.subr.bf16.mxu0 %v17104_v8 }
 0xd28   : > { %5553 = vadd.xlane.f32.xlu0 %v5531_v30  ;;  %v19231_v51 = vsub.f32 %v19092_v33, %v5500_v54  ;;  %v17102_v33 = vld [vmem:[%s21523_s7 + $0xa8] ss:$12 sps:$4 sm:$0xff]  }
 0xd29   : > { %v5478_v6 = vpop.xlane.xlu0 %5477  ;;  %16515 = vmatpush1.bf16.msra.mxu1 %v17102_v33 }
 0xd2a   : > { %v5501_v10 = vmul.f32 0.0078125, %v5478_v6  ;;  %v5532_v15 = vmul.f32 %v19231_v51, %v19231_v51  ;;  %15820 = vmatprep.subr.mxu1 %v21613_v40  ;;  %16547 = vmatpush3.bf16.msra.mxu0 %v17104_v8 }
 0xd2b   : > { %15780 = vmatprep.subr.mxu0 %v21613_v40 }
 0xd2c   : > { %5555 = vadd.xlane.f32.xlu1 %v5532_v15  ;;  %v19245_v12 = vsub.f32 %v19097_v2, %v5501_v10 }
 0xd2d   : > { %v5480_v29 = vpop.xlane.xlu1 %5479 }
 0xd2e   : > { %v5502_v17 = vmul.f32 0.0078125, %v5480_v29  ;;  %v5533_v34 = vmul.f32 %v19245_v12, %v19245_v12 }
 0xd30   : > { %5557 = vadd.xlane.f32.xlu0 %v5533_v34  ;;  %v19254_v47 = vsub.f32 %v19102_v21, %v5502_v17 }
 0xd31   : > { %v5482_v2 = vpop.xlane.xlu0 %5481 }
 0xd32   : > { %v5503_v26 = vmul.f32 0.0078125, %v5482_v2  ;;  %v5534_v7 = vmul.f32 %v19254_v47, %v19254_v47 }
 0xd34   : > { %5559 = vadd.xlane.f32.xlu1 %v5534_v7  ;;  %v19260_v25 = vsub.f32 %v19107_v49, %v5503_v26 }
 0xd35   : > { %v5484_v57 = vpop.xlane.xlu1 %5483 }
 0xd36   : > { %v5504_v56 = vmul.f32 0.0078125, %v5484_v57  ;;  %v5535_v28 = vmul.f32 %v19260_v25, %v19260_v25 }
 0xd38   : > { %5561 = vadd.xlane.f32.xlu0 %v5535_v28  ;;  %v19265_v21 = vsub.f32 %v19112_v23, %v5504_v56 }
 0xd39   : > { %v5486_v41 = vpop.xlane.xlu0 %5485 }
 0xd3a   : > { %v5505_v1 = vmul.f32 0.0078125, %v5486_v41  ;;  %v5536_v32 = vmul.f32 %v19265_v21, %v19265_v21 }
 0xd3c   : > { %5563 = vadd.xlane.f32.xlu1 %v5536_v32  ;;  %v19270_v58 = vsub.f32 %v19117_v39, %v5505_v1 }
 0xd3d   : > { %v5488_v49 = vpop.xlane.xlu1 %5487 }
 0xd3e   : > { %v5506_v31 = vmul.f32 0.0078125, %v5488_v49  ;;  %v5537_v9 = vmul.f32 %v19270_v58, %v19270_v58 }
 0xd40   : > { %5565 = vadd.xlane.f32.xlu0 %v5537_v9  ;;  %v19275_v46 = vsub.f32 %v19122_v48, %v5506_v31 }
 0xd41   : > { %v5490_v23 = vpop.xlane.xlu0 %5489 }
 0xd42   : > { %v5507_v11 = vmul.f32 0.0078125, %v5490_v23  ;;  %v5538_v44 = vmul.f32 %v19275_v46, %v19275_v46 }
 0xd44   : > { %5567 = vadd.xlane.f32.xlu1 %v5538_v44  ;;  %v19280_v35 = vsub.f32 %v19127_v18, %v5507_v11 }
 0xd45   : > { %v5492_v39 = vpop.xlane.xlu1 %5491 }
 0xd46   : > { %v5508_v61 = vmul.f32 0.0078125, %v5492_v39  ;;  %v5539_v59 = vmul.f32 %v19280_v35, %v19280_v35 }
 0xd48   : > { %5569 = vadd.xlane.f32.xlu0 %v5539_v59  ;;  %v19285_v43 = vsub.f32 %v19132_v42, %v5508_v61 }
 0xd4a   : > { %v5540_v48 = vmul.f32 %v19285_v43, %v19285_v43 }
 0xd4c   : > { %5571 = vadd.xlane.f32.xlu1 %v5540_v48 }
 0xd9d   : > { %v5542_v20 = vpop.xlane.xlu0 %5541 }
 0xd9e   : > { %v5573_v13 = vmul.f32 0.0078125, %v5542_v20 }
 0xda0   : > { %v5589_v14 = vadd.f32 1e-05, %v5573_v13 }
 0xda1   : > { %v5544_v4 = vpop.xlane.xlu1 %5543 }
 0xda2   : > { %17281 = vrsqrt.f32 %v5589_v14  ;;  %v5574_v18 = vmul.f32 0.0078125, %v5544_v4 }
 0xda4   : > { %v5590_v53 = vadd.f32 1e-05, %v5574_v18 }
 0xda5   : > { %v5546_v5 = vpop.xlane.xlu0 %5545 }
 0xda6   : > { %17283 = vrsqrt.f32 %v5590_v53  ;;  %v5575_v54 = vmul.f32 0.0078125, %v5546_v5 }
 0xda8   : > { %v5591_v30 = vadd.f32 1e-05, %v5575_v54 }
 0xda9   : > { %v5548_v63 = vpop.xlane.xlu1 %5547 }
 0xdaa   : > { %17285 = vrsqrt.f32 %v5591_v30  ;;  %v5576_v38 = vmul.f32 0.0078125, %v5548_v63 }
 0xdac   : > { %v17282_v42 = vpop.eup %17281  ;;  %v5592_v37 = vadd.f32 1e-05, %v5576_v38 }
 0xdad   : > { %v5550_v6 = vpop.xlane.xlu0 %5549  ;;  %v5621_v10 = vmul.f32 %v17282_v42, %v19169_v19 }
 0xdae   : > { %17287 = vrsqrt.f32 %v5592_v37  ;;  %v5577_v15 = vmul.f32 0.0078125, %v5550_v6 }
 0xdaf   : > { %5842 = vmatmul.mubr.f32.vlgmr.msra.gmra.mrb[124].mxu1 %v5621_v10  ;;  %15756 = vmatprep.mubr.f32.mxu0 %v5621_v10 }
 0xdb0   : > { %v17284_v16 = vpop.eup %17283  ;;  %v5593_v36 = vadd.f32 1e-05, %v5577_v15  ;;  %5847 = vmatprep.mubr.f32.mxu1 %v21613_v40 }
 0xdb1   : > { %v5552_v33 = vpop.xlane.xlu1 %5551  ;;  %v5622_v29 = vmul.f32 %v17284_v16, %v19174_v50 }
 0xdb2   : > { %17289 = vrsqrt.f32 %v5593_v36  ;;  %v5578_v17 = vmul.f32 0.0078125, %v5552_v33 }
 0xdb3   : > { %5848 = vmatmul.mubr.f32.gmra.mrb[126].mxu1 %v5622_v29  ;;  %15757 = vmatmul.mubr.f32.vlgmr.msra.gmra.mrb[148].mxu0 %v5622_v29 }
 0xdb4   : > { %v17286_v34 = vpop.eup %17285  ;;  %v5594_v8 = vadd.f32 1e-05, %v5578_v17  ;;  %5853 = vmatprep.mubr.f32.mxu1 %v21613_v40 }
 0xdb5   : > { %v5554_v19 = vpop.xlane.xlu0 %5553  ;;  %v5623_v2 = vmul.f32 %v17286_v34, %v19179_v0 }
 0xdb6   : > { %17291 = vrsqrt.f32 %v5594_v8  ;;  %v5579_v26 = vmul.f32 0.0078125, %v5554_v19 }
 0xdb7   : > { %5854 = vmatmul.mubr.f32.gmra.mrb[128].mxu1 %v5623_v2  ;;  %15759 = vmatprep.mubr.f32.mxu0 %v5623_v2 }
 0xdb8   : > { %v17288_v7 = vpop.eup %17287  ;;  %v5595_v57 = vadd.f32 1e-05, %v5579_v26  ;;  %5859 = vmatprep.mubr.f32.mxu1 %v21613_v40  ;;  %v21616_v26 = vld [vmem:[#allocation17_spill] sm:$0xff] }
 0xdb9   : > { %v5556_v50 = vpop.xlane.xlu1 %5555  ;;  %v5624_v56 = vmul.f32 %v17288_v7, %v19184_v3 }
 0xdba   : > { %17293 = vrsqrt.f32 %v5595_v57  ;;  %v5580_v28 = vmul.f32 0.0078125, %v5556_v50  ;;  %v19333_v57 = vrot.slane %v19049_v22, %v21616_v26 }
 0xdbb   : > { %5860 = vmatmul.mubr.f32.gmra.mrb[130].mxu1 %v5624_v56  ;;  %15760 = vmatmul.mubr.f32.gmra.mrb[150].mxu0 %v5624_v56 }
 0xdbc   : > { %v17290_v41 = vpop.eup %17289  ;;  %v5596_v1 = vadd.f32 1e-05, %v5580_v28  ;;  %5865 = vmatprep.mubr.f32.mxu1 %v21613_v40  ;;  %v19339_v28 = vld [vmem:[%s21529_s13 + $0x14] sm:$0xf] }
 0xdbd   : > { %v5558_v0 = vpop.xlane.xlu0 %5557  ;;  %v5625_v32 = vmul.f32 %v17290_v41, %v19189_v45  ;;  %21617 = vst [vmem:[#allocation39_spill] sm:$0xff] %v19339_v28 }
 0xdbe   : > { %17295 = vrsqrt.f32 %v5596_v1  ;;  %v5581_v49 = vmul.f32 0.0078125, %v5558_v0 }
 0xdbf   : > { %5866 = vmatmul.mubr.f32.gmra.mrb[132].mxu1 %v5625_v32  ;;  %15762 = vmatprep.mubr.f32.mxu0 %v5625_v32 }
 0xdc0   : > { %v17292_v31 = vpop.eup %17291  ;;  %v5597_v9 = vadd.f32 1e-05, %v5581_v49  ;;  %5871 = vmatprep.mubr.f32.mxu1 %v21613_v40  ;;  %v21570_v49 = vunpack.c.l.bf16 %v19339_v28 }
 0xdc1   : > { %v5560_v3 = vpop.xlane.xlu1 %5559  ;;  %v5626_v23 = vmul.f32 %v17292_v31, %v19203_v52 }
 0xdc2   : > { %17297 = vrsqrt.f32 %v5597_v9  ;;  %v5582_v11 = vmul.f32 0.0078125, %v5560_v3 }
 0xdc3   : > { %5872 = vmatmul.mubr.f32.gmra.mrb[134].mxu1 %v5626_v23  ;;  %15763 = vmatmul.mubr.f32.gmra.mrb[152].mxu0 %v5626_v23 }
 0xdc4   : > { %v17294_v44 = vpop.eup %17293  ;;  %v5598_v39 = vadd.f32 1e-05, %v5582_v11  ;;  %5877 = vmatprep.mubr.f32.mxu1 %v21613_v40  ;;  %v19362_v11 = vrot.slane %v21570_v49, %v21616_v26 }
 0xdc5   : > { %v5562_v45 = vpop.xlane.xlu0 %5561  ;;  %v5627_v61 = vmul.f32 %v17294_v44, %v19217_v60 }
 0xdc6   : > { %17299 = vrsqrt.f32 %v5598_v39  ;;  %v5583_v59 = vmul.f32 0.0078125, %v5562_v45 }
 0xdc7   : > { %5878 = vmatmul.mubr.f32.gmra.mrb[136].mxu1 %v5627_v61  ;;  %15765 = vmatprep.mubr.f32.mxu0 %v5627_v61 }
 0xdc8   : > { %v17296_v48 = vpop.eup %17295  ;;  %v5599_v20 = vadd.f32 1e-05, %v5583_v59  ;;  %5883 = vmatprep.mubr.f32.mxu1 %v21613_v40 }
 0xdc9   : > { %v5564_v52 = vpop.xlane.xlu1 %5563  ;;  %v5628_v13 = vmul.f32 %v17296_v48, %v19231_v51 }
 0xdca   : > { %17301 = vrsqrt.f32 %v5599_v20  ;;  %v5584_v14 = vmul.f32 0.0078125, %v5564_v52 }
 0xdcb   : > { %5884 = vmatmul.mubr.f32.gmra.mrb[138].mxu1 %v5628_v13  ;;  %15766 = vmatmul.mubr.f32.gmra.mrb[154].mxu0 %v5628_v13 }
 0xdcc   : > { %v17298_v4 = vpop.eup %17297  ;;  %v5600_v18 = vadd.f32 1e-05, %v5584_v14  ;;  %5889 = vmatprep.mubr.f32.mxu1 %v21613_v40 }
 0xdcd   : > { %v5566_v60 = vpop.xlane.xlu0 %5565  ;;  %v5629_v53 = vmul.f32 %v17298_v4, %v19245_v12 }
 0xdce   : > { %17303 = vrsqrt.f32 %v5600_v18  ;;  %v5585_v5 = vmul.f32 0.0078125, %v5566_v60 }
 0xdcf   : > { %5890 = vmatmul.mubr.f32.gmra.mrb[140].mxu1 %v5629_v53  ;;  %15768 = vmatprep.mubr.f32.mxu0 %v5629_v53 }
 0xdd0   : > { %v17300_v54 = vpop.eup %17299  ;;  %v5601_v30 = vadd.f32 1e-05, %v5585_v5  ;;  %5895 = vmatprep.mubr.f32.mxu1 %v21613_v40 }
 0xdd1   : > { %v5568_v51 = vpop.xlane.xlu1 %5567  ;;  %v5630_v63 = vmul.f32 %v17300_v54, %v19254_v47 }
 0xdd2   : > { %17305 = vrsqrt.f32 %v5601_v30  ;;  %v5586_v38 = vmul.f32 0.0078125, %v5568_v51 }
 0xdd3   : > { %5896 = vmatmul.mubr.f32.gmra.mrb[142].mxu1 %v5630_v63  ;;  %15769 = vmatmul.mubr.f32.gmra.mrb[156].mxu0 %v5630_v63 }
 0xdd4   : > { %v17302_v42 = vpop.eup %17301  ;;  %v5602_v37 = vadd.f32 1e-05, %v5586_v38  ;;  %5901 = vmatprep.mubr.f32.mxu1 %v21613_v40 }
 0xdd5   : > { %v5570_v12 = vpop.xlane.xlu0 %5569  ;;  %v5631_v6 = vmul.f32 %v17302_v42, %v19260_v25 }
 0xdd6   : > { %17307 = vrsqrt.f32 %v5602_v37  ;;  %v5587_v10 = vmul.f32 0.0078125, %v5570_v12 }
 0xdd7   : > { %5902 = vmatmul.mubr.f32.gmra.mrb[144].mxu1 %v5631_v6  ;;  %15771 = vmatprep.mubr.f32.mxu0 %v5631_v6 }
 0xdd8   : > { %v17304_v15 = vpop.eup %17303  ;;  %v5603_v16 = vadd.f32 1e-05, %v5587_v10  ;;  %5907 = vmatprep.mubr.f32.mxu1 %v21613_v40 }
 0xdd9   : > { %v5572_v47 = vpop.xlane.xlu1 %5571  ;;  %v5632_v36 = vmul.f32 %v17304_v15, %v19265_v21 }
 0xdda   : > { %17309 = vrsqrt.f32 %v5603_v16  ;;  %v5588_v33 = vmul.f32 0.0078125, %v5572_v47 }
 0xddb   : > { %5908 = vmatmul.mubr.f32.gmra.mrb[146].mxu1 %v5632_v36  ;;  %15772 = vmatmul.mubr.f32.gmra.mrb[158].mxu0 %v5632_v36 }
 0xddc   : > { %v17306_v29 = vpop.eup %17305  ;;  %v5604_v17 = vadd.f32 1e-05, %v5588_v33  ;;  %5913 = vmatprep.mubr.f32.mxu1 %v21613_v40 }
 0xddd   : > { %v5633_v25 = vmul.f32 %v17306_v29, %v19270_v58 }
 0xdde   : > { %17311 = vrsqrt.f32 %v5604_v17 }
 0xddf   : > { %5914 = vmatmul.mubr.f32.gmra.mrb[148].mxu1 %v5633_v25  ;;  %15774 = vmatprep.mubr.f32.mxu0 %v5633_v25 }
 0xde0   : > { %v17308_v34 = vpop.eup %17307  ;;  %5919 = vmatprep.mubr.f32.mxu1 %v21613_v40 }
 0xde1   : > { %v5634_v8 = vmul.f32 %v17308_v34, %v19275_v46  ;;  %v19325_v46 = vunpack.c.h.bf16 %v19046_v55 }
 0xde3   : > { %5920 = vmatmul.mubr.f32.gmra.mrb[150].mxu1 %v5634_v8  ;;  %15775 = vmatmul.mubr.f32.gmra.mrb[160].mxu0 %v5634_v8 }
 0xde4   : > { %v17310_v21 = vpop.eup %17309  ;;  %5925 = vmatprep.mubr.f32.mxu1 %v21613_v40 }
 0xde5   : > { %v5635_v19 = vmul.f32 %v17310_v21, %v19280_v35  ;;  %v19329_v35 = vrot.slane %v19325_v46, %v21616_v26 }
 0xde7   : > { %5926 = vmatmul.mubr.f32.gmra.mrb[152].mxu1 %v5635_v19  ;;  %15777 = vmatprep.mubr.f32.mxu0 %v5635_v19 }
 0xde8   : > { %v17312_v2 = vpop.eup %17311  ;;  %5931 = vmatprep.mubr.f32.mxu1 %v21613_v40 }
 0xde9   : > { %v5636_v58 = vmul.f32 %v17312_v2, %v19285_v43 }
 0xdeb   : > { %5932 = vmatmul.mubr.f32.gmra.mrb[154].mxu1 %v5636_v58  ;;  %15778 = vmatmul.mubr.f32.gmra.mrb[162].mxu0 %v5636_v58 }
 0xdec   : > { %15782 = vmatprep.mubr.msk.f32.mxu0 %vm17774_vm4, %v21613_v40  ;;  %15822 = vmatprep.mubr.msk.f32.mxu1 %vm17774_vm4, %v21613_v40 }
 0xe82   : > { %v5843_v7 = vpop.f32.mrb[124].mxu1 }
 0xe83   : > { %v5845_v43 = vpop.f32.mrb[125].mxu1  ;;  %v19344_v41 = vadd.f32 %v5843_v7, %v19333_v57 }
 0xe84   : > { %v5846_v50 = vadd.f32 %v5845_v43, %v19329_v35 }
 0xe86   : > { %v5849_v56 = vpop.f32.mrb[126].mxu1  ;;  %v19341_v55 = vpop.f32.mrb[148].mxu0  ;;  %15781 = vmatpush3.xpose.msra.mxu0 %v5846_v50 }
 0xe87   : > { %v5851_v1 = vpop.f32.mrb[127].mxu1  ;;  %v19346_v0 = vpop.f32.mrb[149].mxu0  ;;  %15785 = vmatprep.subr.mxu0 %v21613_v40  ;;  %v19355_v9 = vadd.f32 %v5849_v56, %v19333_v57 }
 0xe88   : > { %v5852_v32 = vadd.f32 %v5851_v1, %v19329_v35 }
 0xe89   : > { %15783 = vmatmul.mubr.f32.vlgmr.msra.gmra.mrb[164].mxu0 %v19344_v41 }
 0xe8a   : > { %v5855_v31 = vpop.f32.mrb[128].mxu1  ;;  %15786 = vmatpush3.xpose.msra.mxu0 %v5852_v32  ;;  %15787 = vmatprep.mubr.msk.f32.mxu0 %vm17774_vm4, %v21613_v40 }
 0xe8b   : > { %v5857_v3 = vpop.f32.mrb[129].mxu1  ;;  %15790 = vmatprep.subr.mxu0 %v21613_v40  ;;  %v19368_v45 = vadd.f32 %v5855_v31, %v19333_v57 }
 0xe8c   : > { %v5858_v23 = vadd.f32 %v5857_v3, %v19329_v35 }
 0xe8d   : > { %15788 = vmatmul.mubr.f32.vlgmr.msra.gmra.mrb[166].mxu0 %v19355_v9 }
 0xe8e   : > { %v5861_v44 = vpop.f32.mrb[130].mxu1  ;;  %v15761_v39 = vpop.f32.mrb[150].mxu0  ;;  %15791 = vmatpush3.xpose.msra.mxu0 %v5858_v23  ;;  %15792 = vmatprep.mubr.msk.f32.mxu0 %vm17774_vm4, %v21613_v40 }
 0xe8f   : > { %v19371_v61 = vadd.f32 %v15761_v39, %v19362_v11  ;;  %v5863_v59 = vpop.f32.mrb[131].mxu1  ;;  %v6014_v48 = vpop.f32.mrb[151].mxu0  ;;  %15795 = vmatprep.subr.mxu0 %v21613_v40  ;;  %v19382_v14 = vadd.f32 %v5861_v44, %v19333_v57 }
 0xe90   : > { %v5864_v20 = vadd.f32 %v5863_v59, %v19329_v35  ;;  %v19376_v52 = vadd.f32 %v6014_v48, %v19362_v11 }
 0xe91   : > { %15793 = vmatmul.mubr.f32.vlgmr.msra.gmra.mrb[168].mxu0 %v19368_v45 }
 0xe92   : > { %v5867_v13 = vpop.f32.mrb[132].mxu1  ;;  %15796 = vmatpush3.xpose.msra.mxu0 %v5864_v20  ;;  %15797 = vmatprep.mubr.msk.f32.mxu0 %vm17774_vm4, %v21613_v40 }
 0xe93   : > { %v5869_v4 = vpop.f32.mrb[133].mxu1  ;;  %15800 = vmatprep.subr.mxu0 %v21613_v40  ;;  %v19390_v5 = vadd.f32 %v5867_v13, %v19333_v57 }
 0xe94   : > { %v5870_v18 = vadd.f32 %v5869_v4, %v19329_v35 }
 0xe95   : > { %15798 = vmatmul.mubr.f32.vlgmr.msra.gmra.mrb[170].mxu0 %v19382_v14 }
 0xe96   : > { %v5873_v60 = vpop.f32.mrb[134].mxu1  ;;  %v15764_v53 = vpop.f32.mrb[152].mxu0  ;;  %15801 = vmatpush3.xpose.msra.mxu0 %v5870_v18  ;;  %15802 = vmatprep.mubr.msk.f32.mxu0 %vm17774_vm4, %v21613_v40 }
 0xe97   : > { %v19393_v54 = vadd.f32 %v15764_v53, %v19362_v11  ;;  %v5875_v30 = vpop.f32.mrb[135].mxu1  ;;  %v6024_v51 = vpop.f32.mrb[153].mxu0  ;;  %15805 = vmatprep.subr.mxu0 %v21613_v40  ;;  %v19404_v37 = vadd.f32 %v5873_v60, %v19333_v57 }
 0xe98   : > { %v5876_v63 = vadd.f32 %v5875_v30, %v19329_v35  ;;  %v19398_v38 = vadd.f32 %v6024_v51, %v19362_v11 }
 0xe99   : > { %15803 = vmatmul.mubr.f32.vlgmr.msra.gmra.mrb[172].mxu0 %v19390_v5 }
 0xe9a   : > { %v5879_v42 = vpop.f32.mrb[136].mxu1  ;;  %15806 = vmatpush3.xpose.msra.mxu0 %v5876_v63  ;;  %15807 = vmatprep.mubr.msk.f32.mxu0 %vm17774_vm4, %v21613_v40 }
 0xe9b   : > { %v5881_v12 = vpop.f32.mrb[137].mxu1  ;;  %15810 = vmatprep.subr.mxu0 %v21613_v40  ;;  %v19412_v16 = vadd.f32 %v5879_v42, %v19333_v57 }
 0xe9c   : > { %v5882_v6 = vadd.f32 %v5881_v12, %v19329_v35 }
 0xe9d   : > { %15808 = vmatmul.mubr.f32.vlgmr.msra.gmra.mrb[174].mxu0 %v19404_v37 }
 0xe9e   : > { %v5885_v10 = vpop.f32.mrb[138].mxu1  ;;  %v15767_v15 = vpop.f32.mrb[154].mxu0  ;;  %15811 = vmatpush3.xpose.msra.mxu0 %v5882_v6  ;;  %15812 = vmatprep.mubr.msk.f32.mxu0 %vm17774_vm4, %v21613_v40 }
 0xe9f   : > { %v19415_v47 = vadd.f32 %v15767_v15, %v19362_v11  ;;  %v5887_v36 = vpop.f32.mrb[139].mxu1  ;;  %v6034_v33 = vpop.f32.mrb[155].mxu0  ;;  %15815 = vmatprep.subr.mxu0 %v21613_v40  ;;  %v19426_v34 = vadd.f32 %v5885_v10, %v19333_v57 }
 0xea0   : > { %v5888_v29 = vadd.f32 %v5887_v36, %v19329_v35  ;;  %v19420_v17 = vadd.f32 %v6034_v33, %v19362_v11 }
 0xea1   : > { %15813 = vmatmul.mubr.f32.vlgmr.msra.gmra.mrb[176].mxu0 %v19412_v16 }
 0xea2   : > { %v5891_v25 = vpop.f32.mrb[140].mxu1  ;;  %15816 = vmatpush3.xpose.msra.mxu0 %v5888_v29  ;;  %15817 = vmatprep.mubr.msk.f32.mxu0 %vm17774_vm4, %v21613_v40 }
 0xea3   : > { %v5893_v8 = vpop.f32.mrb[141].mxu1  ;;  %15825 = vmatprep.subr.mxu0 %v21613_v40  ;;  %v19434_v58 = vadd.f32 %v5891_v25, %v19333_v57 }
 0xea4   : > { %v5894_v21 = vadd.f32 %v5893_v8, %v19329_v35 }
 0xea5   : > { %15818 = vmatmul.mubr.f32.vlgmr.msra.gmra.mrb[178].mxu0 %v19426_v34 }
 0xea6   : > { %v5897_v19 = vpop.f32.mrb[142].mxu1  ;;  %v15770_v2 = vpop.f32.mrb[156].mxu0  ;;  %15821 = vmatpush3.xpose.msra.mxu1 %v5894_v21  ;;  %15827 = vmatprep.mubr.msk.f32.mxu0 %vm17774_vm4, %v21613_v40 }
 0xea7   : > { %v19437_v7 = vadd.f32 %v15770_v2, %v19362_v11  ;;  %v5899_v43 = vpop.f32.mrb[143].mxu1  ;;  %v6044_v50 = vpop.f32.mrb[157].mxu0  ;;  %15830 = vmatprep.subr.mxu1 %v21613_v40  ;;  %v19448_v31 = vadd.f32 %v5897_v19, %v19333_v57 }
 0xea8   : > { %v5900_v56 = vadd.f32 %v5899_v43, %v19329_v35  ;;  %v19442_v1 = vadd.f32 %v6044_v50, %v19362_v11 }
 0xea9   : > { %15823 = vmatmul.mubr.f32.vlgmr.msra.gmra.mrb[156].mxu1 %v19434_v58 }
 0xeaa   : > { %v5903_v32 = vpop.f32.mrb[144].mxu1  ;;  %15826 = vmatpush3.xpose.msra.mxu0 %v5900_v56  ;;  %15832 = vmatprep.mubr.msk.f32.mxu1 %vm17774_vm4, %v21613_v40 }
 0xeab   : > { %v5905_v3 = vpop.f32.mrb[145].mxu1  ;;  %15835 = vmatprep.subr.mxu0 %v21613_v40  ;;  %v19456_v59 = vadd.f32 %v5903_v32, %v19333_v57 }
 0xeac   : > { %v5906_v23 = vadd.f32 %v5905_v3, %v19329_v35  ;;  %v6005_v3 = vadd.f32 %v19346_v0, %v19362_v11  ;;  %v6010_v0 = vadd.f32 %v19341_v55, %v19362_v11 }
 0xead   : > { %15828 = vmatmul.mubr.f32.vlgmr.msra.gmra.mrb[180].mxu0 %v19448_v31 }
 0xeae   : > { %v5909_v44 = vpop.f32.mrb[146].mxu1  ;;  %v15773_v39 = vpop.f32.mrb[158].mxu0  ;;  %15831 = vmatpush3.xpose.msra.mxu1 %v5906_v23  ;;  %15837 = vmatprep.mubr.msk.f32.mxu0 %vm17774_vm4, %v21613_v40 }
 0xeaf   : > { %v19459_v48 = vadd.f32 %v15773_v39, %v19362_v11  ;;  %v5911_v20 = vpop.f32.mrb[147].mxu1  ;;  %v6054_v13 = vpop.f32.mrb[159].mxu0  ;;  %15840 = vmatprep.subr.mxu1 %v21613_v40  ;;  %v19470_v53 = vadd.f32 %v5909_v44, %v19333_v57 }
 0xeb0   : > { %v5912_v4 = vadd.f32 %v5911_v20, %v19329_v35  ;;  %v19464_v18 = vadd.f32 %v6054_v13, %v19362_v11 }
 0xeb1   : > { %15833 = vmatmul.mubr.f32.vlgmr.msra.gmra.mrb[158].mxu1 %v19456_v59 }
 0xeb2   : > { %v5915_v60 = vpop.f32.mrb[148].mxu1  ;;  %15836 = vmatpush3.xpose.msra.mxu0 %v5912_v4  ;;  %15842 = vmatprep.mubr.msk.f32.mxu1 %vm17774_vm4, %v21613_v40 }
 0xeb3   : > { %v5917_v30 = vpop.f32.mrb[149].mxu1  ;;  %15845 = vmatprep.subr.mxu0 %v21613_v40  ;;  %v19478_v12 = vadd.f32 %v5915_v60, %v19333_v57 }
 0xeb4   : > { %v5918_v51 = vadd.f32 %v5917_v30, %v19329_v35 }
 0xeb5   : > { %15838 = vmatmul.mubr.f32.vlgmr.msra.gmra.mrb[182].mxu0 %v19470_v53 }
 0xeb6   : > { %v5921_v63 = vpop.f32.mrb[150].mxu1  ;;  %v15776_v42 = vpop.f32.mrb[160].mxu0  ;;  %15841 = vmatpush3.xpose.msra.mxu1 %v5918_v51  ;;  %15847 = vmatprep.mubr.msk.f32.mxu0 %vm17774_vm4, %v21613_v40 }
 0xeb7   : > { %v19481_v6 = vadd.f32 %v15776_v42, %v19362_v11  ;;  %v5923_v10 = vpop.f32.mrb[151].mxu1  ;;  %v6064_v15 = vpop.f32.mrb[161].mxu0  ;;  %15850 = vmatprep.subr.mxu1 %v21613_v40  ;;  %v19492_v25 = vadd.f32 %v5921_v63, %v19333_v57 }
 0xeb8   : > { %v5924_v36 = vadd.f32 %v5923_v10, %v19329_v35  ;;  %v19486_v33 = vadd.f32 %v6064_v15, %v19362_v11 }
 0xeb9   : > { %15843 = vmatmul.mubr.f32.vlgmr.msra.gmra.mrb[160].mxu1 %v19478_v12 }
 0xeba   : > { %v5927_v29 = vpop.f32.mrb[152].mxu1  ;;  %15846 = vmatpush3.xpose.msra.mxu0 %v5924_v36  ;;  %15852 = vmatprep.mubr.msk.f32.mxu1 %vm17774_vm4, %v21613_v40 }
 0xebb   : > { %v5929_v8 = vpop.f32.mrb[153].mxu1  ;;  %15855 = vmatprep.subr.mxu0 %v21613_v40  ;;  %v19500_v43 = vadd.f32 %v5927_v29, %v19333_v57 }
 0xebc   : > { %v5930_v21 = vadd.f32 %v5929_v8, %v19329_v35 }
 0xebd   : > { %15848 = vmatmul.mubr.f32.vlgmr.msra.gmra.mrb[184].mxu0 %v19492_v25 }
 0xebe   : > { %v5933_v19 = vpop.f32.mrb[154].mxu1  ;;  %v15779_v2 = vpop.f32.mrb[162].mxu0  ;;  %15851 = vmatpush3.xpose.msra.mxu1 %v5930_v21  ;;  %15857 = vmatprep.mubr.msk.f32.mxu0 %vm17774_vm4, %v21613_v40 }
 0xebf   : > { %v19503_v50 = vadd.f32 %v15779_v2, %v19362_v11  ;;  %v5935_v56 = vpop.f32.mrb[155].mxu1  ;;  %v6074_v32 = vpop.f32.mrb[163].mxu0  ;;  %15860 = vmatprep.subr.mxu1 %v21613_v40  ;;  %v19514_v39 = vadd.f32 %v5933_v19, %v19333_v57 }
 0xec0   : > { %v5936_v23 = vadd.f32 %v5935_v56, %v19329_v35  ;;  %v19510_v44 = vadd.f32 %v6074_v32, %v19362_v11 }
 0xec1   : > { %15853 = vmatmul.mubr.f32.vlgmr.msra.gmra.mrb[162].mxu1 %v19500_v43 }
 0xec2   : > { %15856 = vmatpush3.xpose.msra.mxu0 %v5936_v23  ;;  %15861 = vmatpush3.msra.mxu1 %v6005_v3 }
 0xec3   : > { %15865 = vmatprep.subr.mxu0 %v21613_v40  ;;  %15862 = vmatprep.mubr.msk.f32.mxu1 %vm17774_vm4, %v21613_v40 }
 0xec4   : > { %15870 = vmatprep.subr.mxu1 %v21613_v40 }
 0xec5   : > { %15858 = vmatmul.mubr.f32.vlgmr.msra.gmra.mrb[186].mxu0 %v19514_v39 }
 0xec6   : > { %15866 = vmatpush3.msra.mxu0 %v6010_v0  ;;  %15867 = vmatprep.mubr.msk.f32.mxu0 %vm17774_vm4, %v21613_v40 }
 0xec7   : > { %15875 = vmatprep.subr.mxu0 %v21613_v40 }
 0xf5c   : > { %v6149_v35 = vpop.f32.mrb[164].mxu0 }
 0xf5d   : > { %v19526_v57 = vmul.f32 0.088388346, %v6149_v35  ;;  %v15784_v20 = vpop.f32.mrb[165].mxu0 }
 0xf5f   : > { %v7219_v13 = vsel %vm3509_vm5, %v19526_v57, -inf }
 0xf60   : > { %7220 = vmax.xlane.f32.xlu0 %v7219_v13  ;;  %v6219_v4 = vpop.f32.mrb[166].mxu0 }
 0xf61   : > { %v19530_v55 = vmul.f32 0.088388346, %v6219_v4  ;;  %v15789_v11 = vpop.f32.mrb[167].mxu0 }
 0xf63   : > { %v7222_v60 = vsel %vm3509_vm5, %v19530_v55, -inf }
 0xf64   : > { %7223 = vmax.xlane.f32.xlu1 %v7222_v60  ;;  %v6289_v30 = vpop.f32.mrb[168].mxu0 }
 0xf65   : > { %v19534_v51 = vmul.f32 0.088388346, %v6289_v30  ;;  %v15794_v63 = vpop.f32.mrb[169].mxu0 }
 0xf67   : > { %v7225_v42 = vsel %vm3509_vm5, %v19534_v51, -inf }
 0xf68   : > { %7226 = vmax.xlane.f32.xlu0 %v7225_v42  ;;  %v6359_v10 = vpop.f32.mrb[170].mxu0 }
 0xf69   : > { %v19538_v15 = vmul.f32 0.088388346, %v6359_v10  ;;  %v15799_v36 = vpop.f32.mrb[171].mxu0 }
 0xf6b   : > { %v7228_v29 = vsel %vm3509_vm5, %v19538_v15, -inf }
 0xf6c   : > { %7229 = vmax.xlane.f32.xlu1 %v7228_v29  ;;  %v6429_v8 = vpop.f32.mrb[172].mxu0 }
 0xf6d   : > { %v19542_v21 = vmul.f32 0.088388346, %v6429_v8  ;;  %v15804_v19 = vpop.f32.mrb[173].mxu0 }
 0xf6f   : > { %v7231_v2 = vsel %vm3509_vm5, %v19542_v21, -inf }
 0xf70   : > { %7232 = vmax.xlane.f32.xlu0 %v7231_v2  ;;  %v6499_v56 = vpop.f32.mrb[174].mxu0 }
 0xf71   : > { %v19546_v32 = vmul.f32 0.088388346, %v6499_v56  ;;  %v15809_v3 = vpop.f32.mrb[175].mxu0 }
 0xf73   : > { %v7234_v23 = vsel %vm3509_vm5, %v19546_v32, -inf }
 0xf74   : > { %7235 = vmax.xlane.f32.xlu1 %v7234_v23  ;;  %v6569_v0 = vpop.f32.mrb[176].mxu0 }
 0xf75   : > { %v19550_v35 = vmul.f32 0.088388346, %v6569_v0  ;;  %v15814_v20 = vpop.f32.mrb[177].mxu0 }
 0xf77   : > { %v7237_v13 = vsel %vm3509_vm5, %v19550_v35, -inf }
 0xf78   : > { %7238 = vmax.xlane.f32.xlu0 %v7237_v13  ;;  %v6639_v4 = vpop.f32.mrb[178].mxu0 }
 0xf79   : > { %v19554_v11 = vmul.f32 0.088388346, %v6639_v4  ;;  %v15819_v60 = vpop.f32.mrb[179].mxu0 }
 0xf7b   : > { %v7240_v30 = vsel %vm3509_vm5, %v19554_v11, -inf }
 0xf7c   : > { %7241 = vmax.xlane.f32.xlu1 %v7240_v30  ;;  %v6709_v63 = vpop.f32.mrb[156].mxu1 }
 0xf7d   : > { %v19558_v42 = vmul.f32 0.088388346, %v6709_v63  ;;  %v15824_v10 = vpop.f32.mrb[157].mxu1 }
 0xf7f   : > { %v7243_v36 = vsel %vm3509_vm5, %v19558_v42, -inf }
 0xf80   : > { %v6779_v29 = vpop.f32.mrb[180].mxu0  ;;  %7244 = vmax.xlane.f32.xlu0 %v7243_v36 }
 0xf81   : > { %v19562_v8 = vmul.f32 0.088388346, %v6779_v29  ;;  %v15829_v19 = vpop.f32.mrb[181].mxu0 }
 0xf83   : > { %v7246_v2 = vsel %vm3509_vm5, %v19562_v8, -inf }
 0xf84   : > { %7247 = vmax.xlane.f32.xlu1 %v7246_v2  ;;  %v6849_v56 = vpop.f32.mrb[158].mxu1 }
 0xf85   : > { %v19566_v3 = vmul.f32 0.088388346, %v6849_v56  ;;  %v15834_v23 = vpop.f32.mrb[159].mxu1 }
 0xf87   : > { %v7249_v0 = vsel %vm3509_vm5, %v19566_v3, -inf }
 0xf88   : > { %v6919_v20 = vpop.f32.mrb[182].mxu0  ;;  %7250 = vmax.xlane.f32.xlu0 %v7249_v0 }
 0xf89   : > { %v19570_v13 = vmul.f32 0.088388346, %v6919_v20  ;;  %v15839_v4 = vpop.f32.mrb[183].mxu0 }
 0xf8b   : > { %v7252_v60 = vsel %vm3509_vm5, %v19570_v13, -inf }
 0xf8c   : > { %7253 = vmax.xlane.f32.xlu1 %v7252_v60  ;;  %v6989_v30 = vpop.f32.mrb[160].mxu1 }
 0xf8d   : > { %v19574_v63 = vmul.f32 0.088388346, %v6989_v30  ;;  %v15844_v10 = vpop.f32.mrb[161].mxu1 }
 0xf8f   : > { %v7255_v36 = vsel %vm3509_vm5, %v19574_v63, -inf }
 0xf90   : > { %v7059_v29 = vpop.f32.mrb[184].mxu0  ;;  %7256 = vmax.xlane.f32.xlu0 %v7255_v36 }
 0xf91   : > { %v19578_v19 = vmul.f32 0.088388346, %v7059_v29  ;;  %v15849_v2 = vpop.f32.mrb[185].mxu0 }
 0xf93   : > { %v7258_v56 = vsel %vm3509_vm5, %v19578_v19, -inf }
 0xf94   : > { %7259 = vmax.xlane.f32.xlu1 %v7258_v56  ;;  %v7129_v23 = vpop.f32.mrb[162].mxu1 }
 0xf95   : > { %v19582_v0 = vmul.f32 0.088388346, %v7129_v23  ;;  %v15854_v20 = vpop.f32.mrb[163].mxu1 }
 0xf97   : > { %v7261_v4 = vsel %vm3509_vm5, %v19582_v0, -inf }
 0xf98   : > { %v7199_v60 = vpop.f32.mrb[186].mxu0  ;;  %7262 = vmax.xlane.f32.xlu0 %v7261_v4 }
 0xf99   : > { %v19586_v30 = vmul.f32 0.088388346, %v7199_v60  ;;  %v15859_v10 = vpop.f32.mrb[187].mxu0 }
 0xf9b   : > { %v7264_v36 = vsel %vm3509_vm5, %v19586_v30, -inf }
 0xf9c   : > { %7265 = vmax.xlane.f32.xlu1 %v7264_v36 }
 0xfed   : > { %v7221_v29 = vpop.xlane.xlu0 %7220 }
 0xfee   : > { %v7267_v2 = vsub.f32 %v19526_v57, %v7221_v29 }
 0xff0   : > { %v7283_v56 = vmul.f32 1.442695, %v7267_v2 }
 0xff1   : > { %v7224_v49 = vpop.xlane.xlu1 %7223 }
 0xff2   : > { %17313 = vpow2.f32 %v7283_v56  ;;  %v7268_v23 = vsub.f32 %v19530_v55, %v7224_v49 }
 0xff4   : > { %v7285_v20 = vmul.f32 1.442695, %v7268_v23 }
 0xff5   : > { %v7227_v26 = vpop.xlane.xlu0 %7226 }
 0xff6   : > { %17315 = vpow2.f32 %v7285_v20  ;;  %v7269_v4 = vsub.f32 %v19534_v51, %v7227_v26 }
 0xff8   : > { %v7287_v60 = vmul.f32 1.442695, %v7269_v4 }
 0xff9   : > { %v7230_v27 = vpop.xlane.xlu1 %7229 }
 0xffa   : > { %17317 = vpow2.f32 %v7287_v60  ;;  %v7270_v10 = vsub.f32 %v19538_v15, %v7230_v27 }
 0xffc   : > { %v19594_v62 = vpop.eup %17313  ;;  %v7289_v36 = vmul.f32 1.442695, %v7270_v10 }
 0xffd   : > { %v7233_v28 = vpop.xlane.xlu0 %7232  ;;  %v7315_v57 = vsel %vm3509_vm5, %v19594_v62, 0.0 }
 0xffe   : > { %17319 = vpow2.f32 %v7289_v36  ;;  %v7271_v49 = vsub.f32 %v19542_v21, %v7233_v28  ;;  %7316 = vadd.xlane.f32.xlu0 %v7315_v57 }
0x1000   : > { %v19599_v55 = vpop.eup %17315  ;;  %v7291_v29 = vmul.f32 1.442695, %v7271_v49 }
0x1001   : > { %v7236_v26 = vpop.xlane.xlu1 %7235  ;;  %v7318_v51 = vsel %vm3509_vm5, %v19599_v55, 0.0 }
0x1002   : > { %17321 = vpow2.f32 %v7291_v29  ;;  %v7272_v27 = vsub.f32 %v19546_v32, %v7236_v26  ;;  %7319 = vadd.xlane.f32.xlu1 %v7318_v51 }
0x1004   : > { %v19604_v15 = vpop.eup %17317  ;;  %v7293_v2 = vmul.f32 1.442695, %v7272_v27 }
0x1005   : > { %v7239_v56 = vpop.xlane.xlu0 %7238  ;;  %v7321_v23 = vsel %vm3509_vm5, %v19604_v15, 0.0 }
0x1006   : > { %17323 = vpow2.f32 %v7293_v2  ;;  %v7273_v28 = vsub.f32 %v19550_v35, %v7239_v56  ;;  %7322 = vadd.xlane.f32.xlu0 %v7321_v23 }
0x1008   : > { %v19609_v21 = vpop.eup %17319  ;;  %v7295_v20 = vmul.f32 1.442695, %v7273_v28 }
0x1009   : > { %v7242_v4 = vpop.xlane.xlu1 %7241  ;;  %v7324_v60 = vsel %vm3509_vm5, %v19609_v21, 0.0 }
0x100a   : > { %17325 = vpow2.f32 %v7295_v20  ;;  %v7274_v32 = vsub.f32 %v19554_v11, %v7242_v4  ;;  %7325 = vadd.xlane.f32.xlu1 %v7324_v60 }
0x100c   : > { %v19614_v10 = vpop.eup %17321  ;;  %v7297_v36 = vmul.f32 1.442695, %v7274_v32 }
0x100d   : > { %v7245_v57 = vpop.xlane.xlu0 %7244  ;;  %v7327_v49 = vsel %vm3509_vm5, %v19614_v10, 0.0 }
0x100e   : > { %17327 = vpow2.f32 %v7297_v36  ;;  %v7275_v35 = vsub.f32 %v19558_v42, %v7245_v57  ;;  %7328 = vadd.xlane.f32.xlu0 %v7327_v49 }
0x1010   : > { %v19619_v29 = vpop.eup %17323  ;;  %v7299_v26 = vmul.f32 1.442695, %v7275_v35 }
0x1011   : > { %v7248_v51 = vpop.xlane.xlu1 %7247  ;;  %v7330_v27 = vsel %vm3509_vm5, %v19619_v29, 0.0 }
0x1012   : > { %17329 = vpow2.f32 %v7299_v26  ;;  %v7276_v11 = vsub.f32 %v19562_v8, %v7248_v51  ;;  %7331 = vadd.xlane.f32.xlu1 %v7330_v27 }
0x1014   : > { %v19624_v2 = vpop.eup %17325  ;;  %v7301_v56 = vmul.f32 1.442695, %v7276_v11 }
0x1015   : > { %v7251_v23 = vpop.xlane.xlu0 %7250  ;;  %v7333_v28 = vsel %vm3509_vm5, %v19624_v2, 0.0 }
0x1016   : > { %17331 = vpow2.f32 %v7301_v56  ;;  %v7277_v42 = vsub.f32 %v19566_v3, %v7251_v23  ;;  %7334 = vadd.xlane.f32.xlu0 %v7333_v28 }
0x1018   : > { %v19629_v20 = vpop.eup %17327  ;;  %v7303_v4 = vmul.f32 1.442695, %v7277_v42 }
0x1019   : > { %v7254_v60 = vpop.xlane.xlu1 %7253  ;;  %v7336_v32 = vsel %vm3509_vm5, %v19629_v20, 0.0 }
0x101a   : > { %17333 = vpow2.f32 %v7303_v4  ;;  %v7278_v8 = vsub.f32 %v19570_v13, %v7254_v60  ;;  %7337 = vadd.xlane.f32.xlu1 %v7336_v32 }
0x101c   : > { %v19634_v36 = vpop.eup %17329  ;;  %v7305_v57 = vmul.f32 1.442695, %v7278_v8 }
0x101d   : > { %v7257_v49 = vpop.xlane.xlu0 %7256  ;;  %v7339_v35 = vsel %vm3509_vm5, %v19634_v36, 0.0 }
0x101e   : > { %17335 = vpow2.f32 %v7305_v57  ;;  %v7279_v3 = vsub.f32 %v19574_v63, %v7257_v49  ;;  %7340 = vadd.xlane.f32.xlu0 %v7339_v35 }
0x1020   : > { %v19639_v26 = vpop.eup %17331  ;;  %v7307_v51 = vmul.f32 1.442695, %v7279_v3 }
0x1021   : > { %v7260_v27 = vpop.xlane.xlu1 %7259  ;;  %v7342_v11 = vsel %vm3509_vm5, %v19639_v26, 0.0 }
0x1022   : > { %17337 = vpow2.f32 %v7307_v51  ;;  %v7280_v13 = vsub.f32 %v19578_v19, %v7260_v27  ;;  %7343 = vadd.xlane.f32.xlu1 %v7342_v11 }
0x1024   : > { %v19644_v56 = vpop.eup %17333  ;;  %v7309_v23 = vmul.f32 1.442695, %v7280_v13 }
0x1025   : > { %v7263_v28 = vpop.xlane.xlu0 %7262  ;;  %v7345_v42 = vsel %vm3509_vm5, %v19644_v56, 0.0 }
0x1026   : > { %17339 = vpow2.f32 %v7309_v23  ;;  %v7281_v63 = vsub.f32 %v19582_v0, %v7263_v28  ;;  %7346 = vadd.xlane.f32.xlu0 %v7345_v42 }
0x1028   : > { %v19649_v4 = vpop.eup %17335  ;;  %v7311_v60 = vmul.f32 1.442695, %v7281_v63 }
0x1029   : > { %v7266_v32 = vpop.xlane.xlu1 %7265  ;;  %v7348_v8 = vsel %vm3509_vm5, %v19649_v4, 0.0 }
0x102a   : > { %17341 = vpow2.f32 %v7311_v60  ;;  %v7282_v19 = vsub.f32 %v19586_v30, %v7266_v32  ;;  %7349 = vadd.xlane.f32.xlu1 %v7348_v8 }
0x102c   : > { %v19654_v57 = vpop.eup %17337  ;;  %v7313_v49 = vmul.f32 1.442695, %v7282_v19 }
0x102d   : > { %v7351_v35 = vsel %vm3509_vm5, %v19654_v57, 0.0 }
0x102e   : > { %17343 = vpow2.f32 %v7313_v49  ;;  %7352 = vadd.xlane.f32.xlu0 %v7351_v35 }
0x1030   : > { %v19658_v0 = vpop.eup %17339 }
0x1031   : > { %v7354_v3 = vsel %vm3509_vm5, %v19658_v0, 0.0 }
0x1032   : > { %7355 = vadd.xlane.f32.xlu1 %v7354_v3 }
0x1034   : > { %v19662_v51 = vpop.eup %17341 }
0x1035   : > { %v7357_v30 = vsel %vm3509_vm5, %v19662_v51, 0.0 }
0x1036   : > { %7358 = vadd.xlane.f32.xlu0 %v7357_v30 }
0x1038   : > { %v19666_v27 = vpop.eup %17343 }
0x1039   : > { %v7360_v11 = vsel %vm3509_vm5, %v19666_v27, 0.0 }
0x103a   : > { %7361 = vadd.xlane.f32.xlu1 %v7360_v11 }
0x108b   : > { %v7317_v13 = vpop.xlane.xlu0 %7316 }
0x108c   : > { %17345 = vrcp.f32 %v7317_v13 }
0x108f   : > { %v7320_v23 = vpop.xlane.xlu1 %7319 }
0x1090   : > { %17347 = vrcp.f32 %v7320_v23 }
0x1093   : > { %v7323_v28 = vpop.xlane.xlu0 %7322 }
0x1094   : > { %17349 = vrcp.f32 %v7323_v28 }
0x1096   : > { %v17346_v42 = vpop.eup %17345 }
0x1097   : > { %v7326_v63 = vpop.xlane.xlu1 %7325  ;;  %v7364_v60 = vmul.f32 %v17346_v42, %v19594_v62 }
0x1098   : > { %17351 = vrcp.f32 %v7326_v63 }
0x1099   : > { %15863 = vmatmul.mubr.msk.f32.vlgmr.msra.gmra.mrb[164].mxu1 %vm3509_vm5, %v7364_v60 }
0x109a   : > { %v17348_v32 = vpop.eup %17347  ;;  %15871 = vmatpush3.msra.mxu1 %v19376_v52  ;;  %15872 = vmatprep.mubr.msk.f32.mxu1 %vm17774_vm4, %v21613_v40 }
0x109b   : > { %v7329_v8 = vpop.xlane.xlu0 %7328  ;;  %v7366_v19 = vmul.f32 %v17348_v32, %v19599_v55  ;;  %15880 = vmatprep.subr.mxu1 %v21613_v40 }
0x109c   : > { %17353 = vrcp.f32 %v7329_v8 }
0x109d   : > { %15868 = vmatmul.mubr.msk.f32.vlgmr.msra.gmra.mrb[188].mxu0 %vm3509_vm5, %v7366_v19 }
0x109e   : > { %v17350_v49 = vpop.eup %17349  ;;  %15876 = vmatpush3.msra.mxu0 %v19371_v61  ;;  %15877 = vmatprep.mubr.msk.f32.mxu0 %vm17774_vm4, %v21613_v40 }
0x109f   : > { %v7332_v62 = vpop.xlane.xlu1 %7331  ;;  %v7368_v52 = vmul.f32 %v17350_v49, %v19604_v15  ;;  %15885 = vmatprep.subr.mxu0 %v21613_v40 }
0x10a0   : > { %17355 = vrcp.f32 %v7332_v62 }
0x10a1   : > { %15873 = vmatmul.mubr.msk.f32.vlgmr.msra.gmra.mrb[166].mxu1 %vm3509_vm5, %v7368_v52 }
0x10a2   : > { %v17352_v55 = vpop.eup %17351  ;;  %15881 = vmatpush3.msra.mxu1 %v19398_v38  ;;  %15882 = vmatprep.mubr.msk.f32.mxu1 %vm17774_vm4, %v21613_v40 }
0x10a3   : > { %v7335_v35 = vpop.xlane.xlu0 %7334  ;;  %v7370_v61 = vmul.f32 %v17352_v55, %v19609_v21  ;;  %15890 = vmatprep.subr.mxu1 %v21613_v40 }
0x10a4   : > { %17357 = vrcp.f32 %v7335_v35 }
0x10a5   : > { %15878 = vmatmul.mubr.msk.f32.vlgmr.msra.gmra.mrb[190].mxu0 %vm3509_vm5, %v7370_v61 }
0x10a6   : > { %v17354_v15 = vpop.eup %17353  ;;  %15886 = vmatpush3.msra.mxu0 %v19393_v54  ;;  %15887 = vmatprep.mubr.msk.f32.mxu0 %vm17774_vm4, %v21613_v40 }
0x10a7   : > { %v7338_v3 = vpop.xlane.xlu1 %7337  ;;  %v7372_v38 = vmul.f32 %v17354_v15, %v19614_v10  ;;  %15895 = vmatprep.subr.mxu0 %v21613_v40 }
0x10a8   : > { %17359 = vrcp.f32 %v7338_v3 }
0x10a9   : > { %15883 = vmatmul.mubr.msk.f32.vlgmr.msra.gmra.mrb[168].mxu1 %vm3509_vm5, %v7372_v38 }
0x10aa   : > { %v17356_v21 = vpop.eup %17355  ;;  %15891 = vmatpush3.msra.mxu1 %v19420_v17  ;;  %15892 = vmatprep.mubr.msk.f32.mxu1 %vm17774_vm4, %v21613_v40 }
0x10ab   : > { %v7341_v30 = vpop.xlane.xlu0 %7340  ;;  %v7374_v54 = vmul.f32 %v17356_v21, %v19619_v29  ;;  %15900 = vmatprep.subr.mxu1 %v21613_v40 }
0x10ac   : > { %17361 = vrcp.f32 %v7341_v30 }
0x10ad   : > { %15888 = vmatmul.mubr.msk.f32.vlgmr.msra.gmra.mrb[192].mxu0 %vm3509_vm5, %v7374_v54 }
0x10ae   : > { %v17358_v10 = vpop.eup %17357  ;;  %15896 = vmatpush3.msra.mxu0 %v19415_v47  ;;  %15897 = vmatprep.mubr.msk.f32.mxu0 %vm17774_vm4, %v21613_v40 }
0x10af   : > { %v7344_v11 = vpop.xlane.xlu1 %7343  ;;  %v7376_v17 = vmul.f32 %v17358_v10, %v19624_v2  ;;  %15905 = vmatprep.subr.mxu0 %v21613_v40 }
0x10b0   : > { %17363 = vrcp.f32 %v7344_v11 }
0x10b1   : > { %15893 = vmatmul.mubr.msk.f32.vlgmr.msra.gmra.mrb[170].mxu1 %vm3509_vm5, %v7376_v17 }
0x10b2   : > { %v17360_v29 = vpop.eup %17359  ;;  %15901 = vmatpush3.msra.mxu1 %v19442_v1  ;;  %15902 = vmatprep.mubr.msk.f32.mxu1 %vm17774_vm4, %v21613_v40 }
0x10b3   : > { %v7347_v13 = vpop.xlane.xlu0 %7346  ;;  %v7378_v47 = vmul.f32 %v17360_v29, %v19629_v20  ;;  %15910 = vmatprep.subr.mxu1 %v21613_v40 }
0x10b4   : > { %17365 = vrcp.f32 %v7347_v13 }
0x10b5   : > { %15898 = vmatmul.mubr.msk.f32.vlgmr.msra.gmra.mrb[194].mxu0 %vm3509_vm5, %v7378_v47 }
0x10b6   : > { %v17362_v2 = vpop.eup %17361  ;;  %15906 = vmatpush3.msra.mxu0 %v19437_v7  ;;  %15907 = vmatprep.mubr.msk.f32.mxu0 %vm17774_vm4, %v21613_v40 }
0x10b7   : > { %v7350_v23 = vpop.xlane.xlu1 %7349  ;;  %v7380_v1 = vmul.f32 %v17362_v2, %v19634_v36  ;;  %15915 = vmatprep.subr.mxu0 %v21613_v40 }
0x10b8   : > { %17367 = vrcp.f32 %v7350_v23 }
0x10b9   : > { %15903 = vmatmul.mubr.msk.f32.vlgmr.msra.gmra.mrb[172].mxu1 %vm3509_vm5, %v7380_v1 }
0x10ba   : > { %v17364_v20 = vpop.eup %17363  ;;  %15911 = vmatpush3.msra.mxu1 %v19464_v18  ;;  %15912 = vmatprep.mubr.msk.f32.mxu1 %vm17774_vm4, %v21613_v40 }
0x10bb   : > { %v7353_v28 = vpop.xlane.xlu0 %7352  ;;  %v7382_v7 = vmul.f32 %v17364_v20, %v19639_v26  ;;  %15920 = vmatprep.subr.mxu1 %v21613_v40 }
0x10bc   : > { %17369 = vrcp.f32 %v7353_v28 }
0x10bd   : > { %15908 = vmatmul.mubr.msk.f32.vlgmr.msra.gmra.mrb[196].mxu0 %vm3509_vm5, %v7382_v7 }
0x10be   : > { %v17366_v36 = vpop.eup %17365  ;;  %15916 = vmatpush3.msra.mxu0 %v19459_v48  ;;  %15917 = vmatprep.mubr.msk.f32.mxu0 %vm17774_vm4, %v21613_v40 }
0x10bf   : > { %v7356_v42 = vpop.xlane.xlu1 %7355  ;;  %v7384_v18 = vmul.f32 %v17366_v36, %v19644_v56  ;;  %15925 = vmatprep.subr.mxu0 %v21613_v40 }
0x10c0   : > { %17371 = vrcp.f32 %v7356_v42 }
0x10c1   : > { %15913 = vmatmul.mubr.msk.f32.vlgmr.msra.gmra.mrb[174].mxu1 %vm3509_vm5, %v7384_v18 }
0x10c2   : > { %v17368_v26 = vpop.eup %17367  ;;  %15921 = vmatpush3.msra.mxu1 %v19486_v33  ;;  %15922 = vmatprep.mubr.msk.f32.mxu1 %vm17774_vm4, %v21613_v40 }
0x10c3   : > { %v7359_v63 = vpop.xlane.xlu0 %7358  ;;  %v7386_v48 = vmul.f32 %v17368_v26, %v19649_v4  ;;  %15930 = vmatprep.subr.mxu1 %v21613_v40 }
0x10c4   : > { %17373 = vrcp.f32 %v7359_v63 }
0x10c5   : > { %15918 = vmatmul.mubr.msk.f32.vlgmr.msra.gmra.mrb[198].mxu0 %vm3509_vm5, %v7386_v48 }
0x10c6   : > { %v17370_v56 = vpop.eup %17369  ;;  %15926 = vmatpush3.msra.mxu0 %v19481_v6  ;;  %15927 = vmatprep.mubr.msk.f32.mxu0 %vm17774_vm4, %v21613_v40 }
0x10c7   : > { %v7362_v60 = vpop.xlane.xlu1 %7361  ;;  %v7388_v33 = vmul.f32 %v17370_v56, %v19654_v57  ;;  %15935 = vmatprep.subr.mxu0 %v21613_v40  ;;  %v17107_v56 = vld [vmem:[%s21524_s8] ss:$8 sps:$4 sm:$0xff]  }
0x10c8   : > { %17375 = vrcp.f32 %v7362_v60  ;;  %v17111_v60 = vld [vmem:[%s21524_s8 + $0x24] ss:$8 sps:$4 sm:$0xff]  }
0x10c9   : > { %15923 = vmatmul.mubr.msk.f32.vlgmr.msra.gmra.mrb[176].mxu1 %vm3509_vm5, %v7388_v33  ;;  %v17113_v33 = vld [vmem:[%s21524_s8 + $0x20] ss:$8 sps:$4 sm:$0xff]  }
0x10ca   : > { %v17372_v4 = vpop.eup %17371  ;;  %15931 = vmatpush3.msra.mxu1 %v19510_v44  ;;  %15932 = vmatprep.mubr.msk.f32.mxu1 %vm17774_vm4, %v21613_v40 }
0x10cb   : > { %v7390_v32 = vmul.f32 %v17372_v4, %v19658_v0  ;;  %v17114_v4 = vld [vmem:[%s21524_s8 + $0x34] ss:$8 sps:$4 sm:$0xff]  }
0x10cd   : > { %15928 = vmatmul.mubr.msk.f32.vlgmr.msra.gmra.mrb[200].mxu0 %vm3509_vm5, %v7390_v32  ;;  %v17116_v32 = vld [vmem:[%s21524_s8 + $0x30] ss:$8 sps:$4 sm:$0xff]  }
0x10ce   : > { %v17374_v6 = vpop.eup %17373  ;;  %15936 = vmatpush3.msra.mxu0 %v19503_v50  ;;  %15937 = vmatprep.mubr.msk.f32.mxu0 %vm17774_vm4, %v21613_v40 }
0x10cf   : > { %v7392_v57 = vmul.f32 %v17374_v6, %v19662_v51 }
0x10d1   : > { %15933 = vmatmul.mubr.msk.f32.vlgmr.msra.gmra.mrb[178].mxu1 %vm3509_vm5, %v7392_v57 }
0x10d2   : > { %v17376_v8 = vpop.eup %17375  ;;  %8843 = vmatprep.mubr.f32.mxu1 %v21613_v40 }
0x10d3   : > { %v7394_v44 = vmul.f32 %v17376_v8, %v19666_v27 }
0x10d5   : > { %15938 = vmatmul.mubr.msk.f32.vlgmr.msra.gmra.mrb[202].mxu0 %vm3509_vm5, %v7394_v44 }
0x116c   : > { %v7464_v0 = vpop.f32.mrb[164].mxu1 }
0x116d   : > { %v19758_v19 = vadd.f32 %v7464_v0, %v19344_v41  ;;  %v15864_v49 = vpop.f32.mrb[165].mxu1 }
0x116f   : > { %8563 = vadd.xlane.f32.xlu0 %v19758_v19 }
0x1170   : > { %v7537_v50 = vpop.f32.mrb[188].mxu0 }
0x1171   : > { %v19762_v62 = vadd.f32 %v7537_v50, %v19355_v9  ;;  %v15869_v51 = vpop.f32.mrb[189].mxu0 }
0x1173   : > { %8565 = vadd.xlane.f32.xlu1 %v19762_v62 }
0x1174   : > { %v7610_v52 = vpop.f32.mrb[166].mxu1 }
0x1175   : > { %v19766_v55 = vadd.f32 %v7610_v52, %v19368_v45  ;;  %v15874_v27 = vpop.f32.mrb[167].mxu1 }
0x1177   : > { %8567 = vadd.xlane.f32.xlu0 %v19766_v55 }
0x1178   : > { %v7683_v35 = vpop.f32.mrb[190].mxu0 }
0x1179   : > { %v19770_v41 = vadd.f32 %v7683_v35, %v19382_v14  ;;  %v15879_v61 = vpop.f32.mrb[191].mxu0 }
0x117b   : > { %8569 = vadd.xlane.f32.xlu1 %v19770_v41 }
0x117c   : > { %v7756_v15 = vpop.f32.mrb[168].mxu1 }
0x117d   : > { %v19774_v9 = vadd.f32 %v7756_v15, %v19390_v5  ;;  %v15884_v3 = vpop.f32.mrb[169].mxu1 }
0x117f   : > { %8571 = vadd.xlane.f32.xlu0 %v19774_v9 }
0x1180   : > { %v7829_v38 = vpop.f32.mrb[192].mxu0 }
0x1181   : > { %v19778_v45 = vadd.f32 %v7829_v38, %v19404_v37  ;;  %v15889_v21 = vpop.f32.mrb[193].mxu0 }
0x1183   : > { %8573 = vadd.xlane.f32.xlu1 %v19778_v45 }
0x1184   : > { %v7902_v30 = vpop.f32.mrb[170].mxu1 }
0x1185   : > { %v19782_v14 = vadd.f32 %v7902_v30, %v19412_v16  ;;  %v15894_v54 = vpop.f32.mrb[171].mxu1 }
0x1187   : > { %8575 = vadd.xlane.f32.xlu0 %v19782_v14 }
0x1188   : > { %v7975_v10 = vpop.f32.mrb[194].mxu0 }
0x1189   : > { %v19786_v5 = vadd.f32 %v7975_v10, %v19426_v34  ;;  %v15899_v11 = vpop.f32.mrb[195].mxu0 }
0x118a   : > { %v17119_v11 = vld [vmem:[%s21524_s8 + $0x40] ss:$8 sps:$4 sm:$0xff]  }
0x118b   : > { %8577 = vadd.xlane.f32.xlu1 %v19786_v5 }
0x118c   : > { %v8048_v17 = vpop.f32.mrb[172].mxu1 }
0x118d   : > { %v19790_v37 = vadd.f32 %v8048_v17, %v19434_v58  ;;  %v15904_v29 = vpop.f32.mrb[173].mxu1 }
0x118f   : > { %8579 = vadd.xlane.f32.xlu0 %v19790_v37 }
0x1190   : > { %v8121_v13 = vpop.f32.mrb[196].mxu0 }
0x1191   : > { %v19794_v16 = vadd.f32 %v8121_v13, %v19448_v31  ;;  %v15909_v47 = vpop.f32.mrb[197].mxu0 }
0x1192   : > { %v17120_v47 = vld [vmem:[%s21524_s8 + $0x54] ss:$8 sps:$4 sm:$0xff]  }
0x1193   : > { %8581 = vadd.xlane.f32.xlu1 %v19794_v16 }
0x1194   : > { %v8194_v2 = vpop.f32.mrb[174].mxu1 }
0x1195   : > { %v19798_v34 = vadd.f32 %v8194_v2, %v19456_v59  ;;  %v15914_v23 = vpop.f32.mrb[175].mxu1  ;;  %v17122_v2 = vld [vmem:[%s21524_s8 + $0x50] ss:$8 sps:$4 sm:$0xff]  }
0x1197   : > { %8583 = vadd.xlane.f32.xlu0 %v19798_v34 }
0x1198   : > { %v8267_v1 = vpop.f32.mrb[198].mxu0 }
0x1199   : > { %v19802_v58 = vadd.f32 %v8267_v1, %v19470_v53  ;;  %v15919_v20 = vpop.f32.mrb[199].mxu0 }
0x119b   : > { %8585 = vadd.xlane.f32.xlu1 %v19802_v58 }
0x119c   : > { %v8340_v28 = vpop.f32.mrb[176].mxu1 }
0x119d   : > { %v19806_v31 = vadd.f32 %v8340_v28, %v19478_v12  ;;  %v15924_v7 = vpop.f32.mrb[177].mxu1  ;;  %v17123_v28 = vld [vmem:[%s21524_s8 + $0x64] ss:$8 sps:$4 sm:$0xff]  }
0x119e   : > { %v17125_v7 = vld [vmem:[%s21524_s8 + $0x60] ss:$8 sps:$4 sm:$0xff]  }
0x119f   : > { %8587 = vadd.xlane.f32.xlu0 %v19806_v31 }
0x11a0   : > { %v8413_v36 = vpop.f32.mrb[200].mxu0 }
0x11a1   : > { %v19810_v59 = vadd.f32 %v8413_v36, %v19492_v25  ;;  %v15929_v42 = vpop.f32.mrb[201].mxu0  ;;  %v17105_v25 = vld [vmem:[%s21524_s8 + $0x4] ss:$8 sps:$4 sm:$0xff]  }
0x11a2   : > { %16549 = vmatprep.subr.bf16.mxu1 %v17105_v25 }
0x11a3   : > { %8589 = vadd.xlane.f32.xlu1 %v19810_v59  ;;  %16551 = vmatpush1.bf16.msra.mxu1 %v17107_v56 }
0x11a4   : > { %v8486_v18 = vpop.f32.mrb[178].mxu1 }
0x11a5   : > { %v19814_v53 = vadd.f32 %v8486_v18, %v19500_v43  ;;  %v15934_v26 = vpop.f32.mrb[179].mxu1  ;;  %v17108_v43 = vld [vmem:[%s21524_s8 + $0x14] ss:$8 sps:$4 sm:$0xff]  }
0x11a6   : > { %16553 = vmatprep.subr.bf16.mxu1 %v17108_v43  ;;  %v17126_v26 = vld [vmem:[%s21524_s8 + $0x74] ss:$8 sps:$4 sm:$0xff]  }
0x11a7   : > { %8591 = vadd.xlane.f32.xlu0 %v19814_v53 }
0x11a8   : > { %v8559_v63 = vpop.f32.mrb[202].mxu0 }
0x11a9   : > { %v19818_v12 = vadd.f32 %v8559_v63, %v19514_v39  ;;  %v15939_v48 = vpop.f32.mrb[203].mxu0  ;;  %v17110_v39 = vld [vmem:[%s21524_s8 + $0x10] ss:$8 sps:$4 sm:$0xff]  }
0x11aa   : > { %16555 = vmatpush1.bf16.msra.mxu1 %v17110_v39  ;;  %v17128_v63 = vld [vmem:[%s21524_s8 + $0x70] ss:$8 sps:$4 sm:$0xff]  }
0x11ab   : > { %8593 = vadd.xlane.f32.xlu1 %v19818_v12  ;;  %16557 = vmatprep.subr.bf16.mxu1 %v17111_v60 }
0x11ae   : > { %16559 = vmatpush1.bf16.msra.mxu1 %v17113_v33 }
0x11af   : > { %16561 = vmatprep.subr.bf16.mxu1 %v17114_v4 }
0x11b2   : > { %16563 = vmatpush1.bf16.msra.mxu1 %v17116_v32 }
0x11fc   : > { %v8564_v6 = vpop.xlane.xlu0 %8563 }
0x11fd   : > { %v8595_v57 = vmul.f32 0.0078125, %v8564_v6 }
0x11ff   : > { %v19846_v8 = vsub.f32 %v19758_v19, %v8595_v57 }
0x1200   : > { %v8566_v44 = vpop.xlane.xlu1 %8565 }
0x1201   : > { %v8596_v0 = vmul.f32 0.0078125, %v8566_v44  ;;  %v8627_v49 = vmul.f32 %v19846_v8, %v19846_v8 }
0x1203   : > { %v19851_v50 = vsub.f32 %v19762_v62, %v8596_v0  ;;  %8643 = vadd.xlane.f32.xlu0 %v8627_v49 }
0x1204   : > { %v8568_v51 = vpop.xlane.xlu0 %8567 }
0x1205   : > { %v8597_v52 = vmul.f32 0.0078125, %v8568_v51  ;;  %v8628_v27 = vmul.f32 %v19851_v50, %v19851_v50 }
0x1207   : > { %v19856_v35 = vsub.f32 %v19766_v55, %v8597_v52  ;;  %8645 = vadd.xlane.f32.xlu1 %v8628_v27 }
0x1208   : > { %v8570_v19 = vpop.xlane.xlu1 %8569 }
0x1209   : > { %v8598_v61 = vmul.f32 0.0078125, %v8570_v19  ;;  %v8629_v15 = vmul.f32 %v19856_v35, %v19856_v35 }
0x120b   : > { %v19861_v3 = vsub.f32 %v19770_v41, %v8598_v61  ;;  %8647 = vadd.xlane.f32.xlu0 %v8629_v15  ;;  %v17117_v41 = vld [vmem:[%s21524_s8 + $0x44] ss:$8 sps:$4 sm:$0xff]  }
0x120c   : > { %v8572_v62 = vpop.xlane.xlu0 %8571  ;;  %16565 = vmatprep.subr.bf16.mxu1 %v17117_v41  ;;  %v14515_v41 = vld [vmem:[#allocation10 + $0x50] sm:$0xff]  }
0x120d   : > { %v8599_v38 = vmul.f32 0.0078125, %v8572_v62  ;;  %v8630_v21 = vmul.f32 %v19861_v3, %v19861_v3  ;;  %16567 = vmatpush1.bf16.msra.mxu1 %v17119_v11  ;;  %v14507_v11 = vld [vmem:[#allocation10 + $0x10] sm:$0xff]  }
0x120e   : > { %16569 = vmatprep.subr.bf16.mxu1 %v17120_v47  ;;  %v14518_v47 = vld [vmem:[#allocation10 + $0x68] sm:$0xff]  }
0x120f   : > { %v19866_v30 = vsub.f32 %v19774_v9, %v8599_v38  ;;  %8649 = vadd.xlane.f32.xlu1 %v8630_v21 }
0x1210   : > { %v8574_v55 = vpop.xlane.xlu1 %8573 }
0x1211   : > { %v8600_v54 = vmul.f32 0.0078125, %v8574_v55  ;;  %v8631_v10 = vmul.f32 %v19866_v30, %v19866_v30  ;;  %16571 = vmatpush1.bf16.msra.mxu1 %v17122_v2  ;;  %v14513_v55 = vld [vmem:[#allocation10 + $0x40] sm:$0xff]   ;;  %v14510_v2 = vld [vmem:[#allocation10 + $0x28] sm:$0xff]  }
0x1212   : > { %16573 = vmatprep.subr.bf16.mxu1 %v17123_v28  ;;  %16581 = vmatprep.subr.bf16.mxu0 %v14513_v55 }
0x1213   : > { %v19877_v17 = vsub.f32 %v19778_v45, %v8600_v54  ;;  %8651 = vadd.xlane.f32.xlu0 %v8631_v10  ;;  %v14253_v54 = vld [vmem:[#allocation10] sm:$0xff]   ;;  %v14514_v10 = vld [vmem:[#allocation10 + $0x48] sm:$0xff]  }
0x1214   : > { %v8576_v9 = vpop.xlane.xlu0 %8575  ;;  %16583 = vmatpush3.bf16.msra.mxu0 %v14253_v54 }
0x1215   : > { %v8601_v29 = vmul.f32 0.0078125, %v8576_v9  ;;  %v8632_v13 = vmul.f32 %v19877_v17, %v19877_v17  ;;  %16575 = vmatpush1.bf16.msra.mxu1 %v17125_v7  ;;  %16585 = vmatprep.subr.bf16.mxu0 %v14514_v10  ;;  %v14516_v9 = vld [vmem:[#allocation10 + $0x58] sm:$0xff]  }
0x1216   : > { %16577 = vmatprep.subr.bf16.mxu1 %v17126_v26 }
0x1217   : > { %v19888_v23 = vsub.f32 %v19782_v14, %v8601_v29  ;;  %8653 = vadd.xlane.f32.xlu1 %v8632_v13  ;;  %v14517_v29 = vld [vmem:[#allocation10 + $0x60] sm:$0xff]  }
0x1218   : > { %v8578_v45 = vpop.xlane.xlu1 %8577  ;;  %v14509_v13 = vld [vmem:[#allocation10 + $0x20] sm:$0xff]  }
0x1219   : > { %v8602_v1 = vmul.f32 0.0078125, %v8578_v45  ;;  %v8633_v20 = vmul.f32 %v19888_v23, %v19888_v23  ;;  %16579 = vmatpush1.bf16.msra.mxu1 %v17128_v63  ;;  %v14519_v45 = vld [vmem:[#allocation10 + $0x70] sm:$0xff]  }
0x121b   : > { %v19899_v36 = vsub.f32 %v19786_v5, %v8602_v1  ;;  %8655 = vadd.xlane.f32.xlu0 %v8633_v20 }
0x121c   : > { %v8580_v14 = vpop.xlane.xlu0 %8579 }
0x121d   : > { %v8603_v42 = vmul.f32 0.0078125, %v8580_v14  ;;  %v8634_v18 = vmul.f32 %v19899_v36, %v19899_v36 }
0x121f   : > { %v19910_v48 = vsub.f32 %v19790_v37, %v8603_v42  ;;  %8657 = vadd.xlane.f32.xlu1 %v8634_v18 }
0x1220   : > { %v8582_v5 = vpop.xlane.xlu1 %8581 }
0x1221   : > { %v8604_v25 = vmul.f32 0.0078125, %v8582_v5  ;;  %v8635_v56 = vmul.f32 %v19910_v48, %v19910_v48 }
0x1223   : > { %v19915_v43 = vsub.f32 %v19794_v16, %v8604_v25  ;;  %8659 = vadd.xlane.f32.xlu0 %v8635_v56 }
0x1224   : > { %v8584_v39 = vpop.xlane.xlu0 %8583 }
0x1225   : > { %v8605_v60 = vmul.f32 0.0078125, %v8584_v39  ;;  %v8636_v33 = vmul.f32 %v19915_v43, %v19915_v43 }
0x1227   : > { %v19920_v37 = vsub.f32 %v19798_v34, %v8605_v60  ;;  %8661 = vadd.xlane.f32.xlu1 %v8636_v33 }
0x1228   : > { %v8586_v4 = vpop.xlane.xlu1 %8585 }
0x1229   : > { %v8606_v32 = vmul.f32 0.0078125, %v8586_v4  ;;  %v8637_v6 = vmul.f32 %v19920_v37, %v19920_v37 }
0x122b   : > { %v19925_v57 = vsub.f32 %v19802_v58, %v8606_v32  ;;  %8663 = vadd.xlane.f32.xlu0 %v8637_v6 }
0x122c   : > { %v8588_v16 = vpop.xlane.xlu0 %8587 }
0x122d   : > { %v8607_v44 = vmul.f32 0.0078125, %v8588_v16  ;;  %v8638_v0 = vmul.f32 %v19925_v57, %v19925_v57 }
0x122f   : > { %v19930_v49 = vsub.f32 %v19806_v31, %v8607_v44  ;;  %8665 = vadd.xlane.f32.xlu1 %v8638_v0 }
0x1230   : > { %v8590_v34 = vpop.xlane.xlu1 %8589 }
0x1231   : > { %v8608_v51 = vmul.f32 0.0078125, %v8590_v34  ;;  %v8639_v52 = vmul.f32 %v19930_v49, %v19930_v49 }
0x1233   : > { %v19935_v27 = vsub.f32 %v19810_v59, %v8608_v51  ;;  %8667 = vadd.xlane.f32.xlu0 %v8639_v52 }
0x1234   : > { %v8592_v58 = vpop.xlane.xlu0 %8591 }
0x1235   : > { %v8609_v19 = vmul.f32 0.0078125, %v8592_v58  ;;  %v8640_v61 = vmul.f32 %v19935_v27, %v19935_v27 }
0x1237   : > { %v19940_v15 = vsub.f32 %v19814_v53, %v8609_v19  ;;  %8669 = vadd.xlane.f32.xlu1 %v8640_v61  ;;  %v14506_v53 = vld [vmem:[#allocation10 + $0x8] sm:$0xff]  }
0x1238   : > { %v8594_v31 = vpop.xlane.xlu1 %8593  ;;  %16587 = vmatpush3.bf16.msra.mxu0 %v14506_v53 }
0x1239   : > { %v8610_v62 = vmul.f32 0.0078125, %v8594_v31  ;;  %v8641_v38 = vmul.f32 %v19940_v15, %v19940_v15  ;;  %16589 = vmatprep.subr.bf16.mxu0 %v14515_v41 }
0x123b   : > { %v19945_v21 = vsub.f32 %v19818_v12, %v8610_v62  ;;  %8671 = vadd.xlane.f32.xlu0 %v8641_v38  ;;  %v14508_v12 = vld [vmem:[#allocation10 + $0x18] sm:$0xff]  }
0x123c   : > { %16591 = vmatpush3.bf16.msra.mxu0 %v14507_v11 }
0x123d   : > { %v8642_v59 = vmul.f32 %v19945_v21, %v19945_v21  ;;  %16593 = vmatprep.subr.bf16.mxu0 %v14516_v9 }
0x123f   : > { %8673 = vadd.xlane.f32.xlu1 %v8642_v59 }
0x1240   : > { %16595 = vmatpush3.bf16.msra.mxu0 %v14508_v12 }
0x1241   : > { %16597 = vmatprep.subr.bf16.mxu0 %v14517_v29 }
0x1244   : > { %16599 = vmatpush3.bf16.msra.mxu0 %v14509_v13 }
0x1245   : > { %16601 = vmatprep.subr.bf16.mxu0 %v14518_v47 }
0x1248   : > { %16603 = vmatpush3.bf16.msra.mxu0 %v14510_v2 }
0x1249   : > { %16605 = vmatprep.subr.bf16.mxu0 %v14519_v45 }
0x1290   : > { %v8644_v1 = vpop.xlane.xlu0 %8643 }
0x1291   : > { %v8675_v20 = vmul.f32 0.0078125, %v8644_v1 }
0x1293   : > { %v8691_v28 = vadd.f32 1e-05, %v8675_v20 }
0x1294   : > { %v8646_v7 = vpop.xlane.xlu1 %8645 }
0x1295   : > { %17377 = vrsqrt.f32 %v8691_v28  ;;  %v8676_v14 = vmul.f32 0.0078125, %v8646_v7 }
0x1297   : > { %v8692_v42 = vadd.f32 1e-05, %v8676_v14 }
0x1298   : > { %v8648_v18 = vpop.xlane.xlu0 %8647 }
0x1299   : > { %17379 = vrsqrt.f32 %v8692_v42  ;;  %v8677_v26 = vmul.f32 0.0078125, %v8648_v18 }
0x129b   : > { %v8693_v63 = vadd.f32 1e-05, %v8677_v26 }
0x129c   : > { %v8650_v5 = vpop.xlane.xlu1 %8649 }
0x129d   : > { %17381 = vrsqrt.f32 %v8693_v63  ;;  %v8678_v25 = vmul.f32 0.0078125, %v8650_v5 }
0x129f   : > { %v17378_v56 = vpop.eup %17377  ;;  %v8694_v39 = vadd.f32 1e-05, %v8678_v25 }
0x12a0   : > { %v8652_v60 = vpop.xlane.xlu0 %8651  ;;  %v19950_v33 = vmul.f32 %v17378_v56, %v19846_v8 }
0x12a1   : > { %17383 = vrsqrt.f32 %v8694_v39  ;;  %v8679_v4 = vmul.f32 0.0078125, %v8652_v60 }
0x12a2   : > { %8844 = vmatmul.mubr.f32.vlgmr.msra.gmra.mrb[180].mxu1 %v19950_v33 }
0x12a3   : > { %v17380_v32 = vpop.eup %17379  ;;  %v8695_v6 = vadd.f32 1e-05, %v8679_v4  ;;  %8849 = vmatprep.mubr.f32.mxu1 %v21613_v40 }
0x12a4   : > { %v8654_v16 = vpop.xlane.xlu1 %8653  ;;  %v19955_v44 = vmul.f32 %v17380_v32, %v19851_v50 }
0x12a5   : > { %17385 = vrsqrt.f32 %v8695_v6  ;;  %v8680_v0 = vmul.f32 0.0078125, %v8654_v16 }
0x12a6   : > { %8850 = vmatmul.mubr.f32.gmra.mrb[182].mxu1 %v19955_v44 }
0x12a7   : > { %v17382_v34 = vpop.eup %17381  ;;  %v8696_v51 = vadd.f32 1e-05, %v8680_v0  ;;  %8855 = vmatprep.mubr.f32.mxu1 %v21613_v40 }
0x12a8   : > { %v8656_v8 = vpop.xlane.xlu0 %8655  ;;  %v19960_v52 = vmul.f32 %v17382_v34, %v19856_v35 }
0x12a9   : > { %17387 = vrsqrt.f32 %v8696_v51  ;;  %v8681_v58 = vmul.f32 0.0078125, %v8656_v8 }
0x12aa   : > { %8856 = vmatmul.mubr.f32.gmra.mrb[184].mxu1 %v19960_v52 }
0x12ab   : > { %v17384_v19 = vpop.eup %17383  ;;  %v8697_v61 = vadd.f32 1e-05, %v8681_v58  ;;  %8861 = vmatprep.mubr.f32.mxu1 %v21613_v40 }
0x12ac   : > { %v8658_v50 = vpop.xlane.xlu1 %8657  ;;  %v19965_v31 = vmul.f32 %v17384_v19, %v19861_v3  ;;  %v14520_v19 = vld [vmem:[#allocation10 + $0x78] sm:$0xff]  }
0x12ad   : > { %17389 = vrsqrt.f32 %v8697_v61  ;;  %v8682_v62 = vmul.f32 0.0078125, %v8658_v50  ;;  %v14512_v61 = vld [vmem:[#allocation10 + $0x38] sm:$0xff]  }
0x12ae   : > { %8862 = vmatmul.mubr.f32.gmra.mrb[186].mxu1 %v19965_v31 }
0x12af   : > { %v17386_v38 = vpop.eup %17385  ;;  %v8698_v59 = vadd.f32 1e-05, %v8682_v62  ;;  %8867 = vmatprep.mubr.f32.mxu1 %v21613_v40 }
0x12b0   : > { %v8660_v35 = vpop.xlane.xlu0 %8659  ;;  %v19970_v55 = vmul.f32 %v17386_v38, %v19866_v30 }
0x12b1   : > { %17391 = vrsqrt.f32 %v8698_v59  ;;  %v8683_v54 = vmul.f32 0.0078125, %v8660_v35 }
0x12b2   : > { %8868 = vmatmul.mubr.f32.gmra.mrb[188].mxu1 %v19970_v55 }
0x12b3   : > { %v17388_v10 = vpop.eup %17387  ;;  %v8699_v53 = vadd.f32 1e-05, %v8683_v54  ;;  %8873 = vmatprep.mubr.f32.mxu1 %v21613_v40 }
0x12b4   : > { %v8662_v3 = vpop.xlane.xlu1 %8661  ;;  %v19975_v41 = vmul.f32 %v17388_v10, %v19877_v17 }
0x12b5   : > { %17393 = vrsqrt.f32 %v8699_v53  ;;  %v8684_v11 = vmul.f32 0.0078125, %v8662_v3 }
0x12b6   : > { %8874 = vmatmul.mubr.f32.gmra.mrb[190].mxu1 %v19975_v41 }
0x12b7   : > { %v17390_v9 = vpop.eup %17389  ;;  %v8700_v12 = vadd.f32 1e-05, %v8684_v11  ;;  %8879 = vmatprep.mubr.f32.mxu1 %v21613_v40 }
0x12b8   : > { %v8664_v30 = vpop.xlane.xlu0 %8663  ;;  %v19980_v29 = vmul.f32 %v17390_v9, %v19888_v23 }
0x12b9   : > { %17395 = vrsqrt.f32 %v8700_v12  ;;  %v8685_v13 = vmul.f32 0.0078125, %v8664_v30 }
0x12ba   : > { %8880 = vmatmul.mubr.f32.gmra.mrb[192].mxu1 %v19980_v29 }
0x12bb   : > { %v17392_v47 = vpop.eup %17391  ;;  %v8701_v2 = vadd.f32 1e-05, %v8685_v13  ;;  %8885 = vmatprep.mubr.f32.mxu1 %v21613_v40 }
0x12bc   : > { %v8666_v17 = vpop.xlane.xlu1 %8665  ;;  %v19985_v45 = vmul.f32 %v17392_v47, %v19899_v36 }
0x12bd   : > { %17397 = vrsqrt.f32 %v8701_v2  ;;  %v8686_v1 = vmul.f32 0.0078125, %v8666_v17 }
0x12be   : > { %8886 = vmatmul.mubr.f32.gmra.mrb[194].mxu1 %v19985_v45 }
0x12bf   : > { %v17394_v20 = vpop.eup %17393  ;;  %v8702_v28 = vadd.f32 1e-05, %v8686_v1  ;;  %8891 = vmatprep.mubr.f32.mxu1 %v21613_v40 }
0x12c0   : > { %v8668_v23 = vpop.xlane.xlu0 %8667  ;;  %v19990_v7 = vmul.f32 %v17394_v20, %v19910_v48 }
0x12c1   : > { %17399 = vrsqrt.f32 %v8702_v28  ;;  %v8687_v14 = vmul.f32 0.0078125, %v8668_v23 }
0x12c2   : > { %8892 = vmatmul.mubr.f32.gmra.mrb[196].mxu1 %v19990_v7 }
0x12c3   : > { %v17396_v42 = vpop.eup %17395  ;;  %v8703_v18 = vadd.f32 1e-05, %v8687_v14  ;;  %8897 = vmatprep.mubr.f32.mxu1 %v21613_v40 }
0x12c4   : > { %v8670_v36 = vpop.xlane.xlu1 %8669  ;;  %v19995_v26 = vmul.f32 %v17396_v42, %v19915_v43 }
0x12c5   : > { %17401 = vrsqrt.f32 %v8703_v18  ;;  %v8688_v63 = vmul.f32 0.0078125, %v8670_v36 }
0x12c6   : > { %8898 = vmatmul.mubr.f32.gmra.mrb[198].mxu1 %v19995_v26 }
0x12c7   : > { %v17398_v5 = vpop.eup %17397  ;;  %v8704_v25 = vadd.f32 1e-05, %v8688_v63  ;;  %8903 = vmatprep.mubr.f32.mxu1 %v21613_v40 }
0x12c8   : > { %v8672_v48 = vpop.xlane.xlu0 %8671  ;;  %v20000_v56 = vmul.f32 %v17398_v5, %v19920_v37 }
0x12c9   : > { %17403 = vrsqrt.f32 %v8704_v25  ;;  %v8689_v39 = vmul.f32 0.0078125, %v8672_v48 }
0x12ca   : > { %8904 = vmatmul.mubr.f32.gmra.mrb[200].mxu1 %v20000_v56 }
0x12cb   : > { %v17400_v60 = vpop.eup %17399  ;;  %v8705_v4 = vadd.f32 1e-05, %v8689_v39  ;;  %8909 = vmatprep.mubr.f32.mxu1 %v21613_v40 }
0x12cc   : > { %v8674_v43 = vpop.xlane.xlu1 %8673  ;;  %v20005_v32 = vmul.f32 %v17400_v60, %v19925_v57 }
0x12cd   : > { %17405 = vrsqrt.f32 %v8705_v4  ;;  %v8690_v6 = vmul.f32 0.0078125, %v8674_v43 }
0x12ce   : > { %8910 = vmatmul.mubr.f32.gmra.mrb[202].mxu1 %v20005_v32 }
0x12cf   : > { %v17402_v16 = vpop.eup %17401  ;;  %v8706_v0 = vadd.f32 1e-05, %v8690_v6  ;;  %8915 = vmatprep.mubr.f32.mxu1 %v21613_v40 }
0x12d0   : > { %v20010_v37 = vmul.f32 %v17402_v16, %v19930_v49 }
0x12d1   : > { %17407 = vrsqrt.f32 %v8706_v0 }
0x12d2   : > { %8916 = vmatmul.mubr.f32.gmra.mrb[204].mxu1 %v20010_v37 }
0x12d3   : > { %v17404_v34 = vpop.eup %17403  ;;  %8921 = vmatprep.mubr.f32.mxu1 %v21613_v40 }
0x12d4   : > { %v20015_v57 = vmul.f32 %v17404_v34, %v19935_v27  ;;  %v14511_v27 = vld [vmem:[#allocation10 + $0x30] sm:$0xff]  }
0x12d5   : > { %16607 = vmatpush3.bf16.msra.mxu0 %v14511_v27 }
0x12d6   : > { %8922 = vmatmul.mubr.f32.gmra.mrb[206].mxu1 %v20015_v57  ;;  %16609 = vmatprep.subr.bf16.mxu0 %v14520_v19 }
0x12d7   : > { %v17406_v51 = vpop.eup %17405  ;;  %8927 = vmatprep.mubr.f32.mxu1 %v21613_v40 }
0x12d8   : > { %v20020_v8 = vmul.f32 %v17406_v51, %v19940_v15  ;;  %v21618_v15 = vld [vmem:[#allocation18_spill] sm:$0xff] }
0x12d9   : > { %16611 = vmatpush3.bf16.msra.mxu0 %v14512_v61  ;;  %v20031_v50 = vrot.slane %v19049_v22, %v21618_v15  ;;  %v20035_v62 = vrot.slane %v19325_v46, %v21618_v15 }
0x12da   : > { %8928 = vmatmul.mubr.f32.gmra.mrb[208].mxu1 %v20020_v8 }
0x12db   : > { %v17408_v49 = vpop.eup %17407  ;;  %8933 = vmatprep.mubr.f32.mxu1 %v21613_v40 }
0x12dc   : > { %v20025_v58 = vmul.f32 %v17408_v49, %v19945_v21 }
0x12de   : > { %8934 = vmatmul.mubr.f32.gmra.mrb[210].mxu1 %v20025_v58 }
0x12df   : > { %9552 = vmatprep.mubr.f32.mxu1 %v21613_v40 }
0x1375   : > { %v8845_v21 = vpop.f32.mrb[180].mxu1 }
0x1376   : > { %v8846_v38 = vadd.f32 %v8845_v21, %v20031_v50  ;;  %v8847_v59 = vpop.f32.mrb[181].mxu1 }
0x1377   : > { %v8848_v35 = vadd.f32 %v8847_v59, %v20035_v62 }
0x1378   : > { %v8940_v53 = vmax.f32 %v8846_v38, 0.0 }
0x1379   : > { %v8941_v54 = vmax.f32 %v8848_v35, 0.0  ;;  %v8851_v10 = vpop.f32.mrb[182].mxu1 }
0x137a   : > { %v8852_v3 = vadd.f32 %v8851_v10, %v20031_v50  ;;  %v8853_v11 = vpop.f32.mrb[183].mxu1 }
0x137b   : > { %v8854_v9 = vadd.f32 %v8853_v11, %v20035_v62  ;;  %9072 = vmatprep.mubr.f32.mxu0 %v8941_v54 }
0x137c   : > { %9073 = vmatmul.mubr.f32.vlgmr.msra.gmra.mrb[204].mxu0 %v8940_v53  ;;  %v8942_v13 = vmax.f32 %v8852_v3, 0.0 }
0x137d   : > { %v8943_v12 = vmax.f32 %v8854_v9, 0.0  ;;  %v8857_v30 = vpop.f32.mrb[184].mxu1 }
0x137e   : > { %v8858_v47 = vadd.f32 %v8857_v30, %v20031_v50  ;;  %v8859_v2 = vpop.f32.mrb[185].mxu1 }
0x137f   : > { %v8860_v17 = vadd.f32 %v8859_v2, %v20035_v62  ;;  %9077 = vmatprep.mubr.f32.mxu0 %v8943_v12 }
0x1380   : > { %9078 = vmatmul.mubr.f32.gmra.mrb[206].mxu0 %v8942_v13  ;;  %v8944_v28 = vmax.f32 %v8858_v47, 0.0 }
0x1381   : > { %v8945_v1 = vmax.f32 %v8860_v17, 0.0  ;;  %v8863_v20 = vpop.f32.mrb[186].mxu1 }
0x1382   : > { %v8864_v23 = vadd.f32 %v8863_v20, %v20031_v50  ;;  %v8865_v14 = vpop.f32.mrb[187].mxu1 }
0x1383   : > { %v8866_v42 = vadd.f32 %v8865_v14, %v20035_v62  ;;  %9082 = vmatprep.mubr.f32.mxu0 %v8945_v1 }
0x1384   : > { %9083 = vmatmul.mubr.f32.gmra.mrb[208].mxu0 %v8944_v28  ;;  %v8946_v63 = vmax.f32 %v8864_v23, 0.0 }
0x1385   : > { %v8947_v18 = vmax.f32 %v8866_v42, 0.0  ;;  %v8869_v36 = vpop.f32.mrb[188].mxu1 }
0x1386   : > { %v8870_v5 = vadd.f32 %v8869_v36, %v20031_v50  ;;  %v8871_v25 = vpop.f32.mrb[189].mxu1 }
0x1387   : > { %v8872_v48 = vadd.f32 %v8871_v25, %v20035_v62  ;;  %9087 = vmatprep.mubr.f32.mxu0 %v8947_v18 }
0x1388   : > { %9088 = vmatmul.mubr.f32.gmra.mrb[210].mxu0 %v8946_v63  ;;  %v8948_v4 = vmax.f32 %v8870_v5, 0.0 }
0x1389   : > { %v8949_v39 = vmax.f32 %v8872_v48, 0.0  ;;  %v8875_v60 = vpop.f32.mrb[190].mxu1 }
0x138a   : > { %v8876_v43 = vadd.f32 %v8875_v60, %v20031_v50  ;;  %v8877_v6 = vpop.f32.mrb[191].mxu1 }
0x138b   : > { %v8878_v16 = vadd.f32 %v8877_v6, %v20035_v62  ;;  %9092 = vmatprep.mubr.f32.mxu0 %v8949_v39 }
0x138c   : > { %9093 = vmatmul.mubr.f32.gmra.mrb[212].mxu0 %v8948_v4  ;;  %v8950_v51 = vmax.f32 %v8876_v43, 0.0 }
0x138d   : > { %v8951_v0 = vmax.f32 %v8878_v16, 0.0  ;;  %v8881_v34 = vpop.f32.mrb[192].mxu1 }
0x138e   : > { %v8882_v49 = vadd.f32 %v8881_v34, %v20031_v50  ;;  %v8883_v27 = vpop.f32.mrb[193].mxu1 }
0x138f   : > { %v8884_v19 = vadd.f32 %v8883_v27, %v20035_v62  ;;  %9097 = vmatprep.mubr.f32.mxu0 %v8951_v0 }
0x1390   : > { %9098 = vmatmul.mubr.f32.gmra.mrb[214].mxu0 %v8950_v51  ;;  %v8952_v21 = vmax.f32 %v8882_v49, 0.0 }
0x1391   : > { %v8953_v61 = vmax.f32 %v8884_v19, 0.0  ;;  %v8887_v15 = vpop.f32.mrb[194].mxu1 }
0x1392   : > { %v8888_v38 = vadd.f32 %v8887_v15, %v20031_v50  ;;  %v8889_v59 = vpop.f32.mrb[195].mxu1 }
0x1393   : > { %v8890_v35 = vadd.f32 %v8889_v59, %v20035_v62  ;;  %9102 = vmatprep.mubr.f32.mxu0 %v8953_v61 }
0x1394   : > { %9103 = vmatmul.mubr.f32.gmra.mrb[216].mxu0 %v8952_v21  ;;  %v8954_v53 = vmax.f32 %v8888_v38, 0.0 }
0x1395   : > { %v8955_v54 = vmax.f32 %v8890_v35, 0.0  ;;  %v8893_v10 = vpop.f32.mrb[196].mxu1 }
0x1396   : > { %v8894_v3 = vadd.f32 %v8893_v10, %v20031_v50  ;;  %v8895_v11 = vpop.f32.mrb[197].mxu1 }
0x1397   : > { %v8896_v9 = vadd.f32 %v8895_v11, %v20035_v62  ;;  %9107 = vmatprep.mubr.f32.mxu0 %v8955_v54 }
0x1398   : > { %9108 = vmatmul.mubr.f32.gmra.mrb[218].mxu0 %v8954_v53  ;;  %v8956_v13 = vmax.f32 %v8894_v3, 0.0 }
0x1399   : > { %v8957_v12 = vmax.f32 %v8896_v9, 0.0  ;;  %v8899_v30 = vpop.f32.mrb[198].mxu1 }
0x139a   : > { %v8900_v47 = vadd.f32 %v8899_v30, %v20031_v50  ;;  %v8901_v2 = vpop.f32.mrb[199].mxu1 }
0x139b   : > { %v8902_v17 = vadd.f32 %v8901_v2, %v20035_v62  ;;  %9112 = vmatprep.mubr.f32.mxu0 %v8957_v12 }
0x139c   : > { %9113 = vmatmul.mubr.f32.gmra.mrb[220].mxu0 %v8956_v13  ;;  %v8958_v28 = vmax.f32 %v8900_v47, 0.0  ;;  %v21619_v47 = vsub.s32 3, %v18078_v24 }
0x139d   : > { %v8959_v1 = vmax.f32 %v8902_v17, 0.0  ;;  %v8905_v20 = vpop.f32.mrb[200].mxu1 }
0x139e   : > { %v8906_v23 = vadd.f32 %v8905_v20, %v20031_v50  ;;  %v8907_v14 = vpop.f32.mrb[201].mxu1  ;;  %v20072_v2 = vrot.slane %v19049_v22, %v21619_v47 }
0x139f   : > { %v8908_v42 = vadd.f32 %v8907_v14, %v20035_v62  ;;  %9117 = vmatprep.mubr.f32.mxu0 %v8959_v1 }
0x13a0   : > { %9118 = vmatmul.mubr.f32.gmra.mrb[222].mxu0 %v8958_v28  ;;  %v8960_v63 = vmax.f32 %v8906_v23, 0.0 }
0x13a1   : > { %v8961_v18 = vmax.f32 %v8908_v42, 0.0  ;;  %v8911_v36 = vpop.f32.mrb[202].mxu1 }
0x13a2   : > { %v8912_v5 = vadd.f32 %v8911_v36, %v20031_v50  ;;  %v8913_v25 = vpop.f32.mrb[203].mxu1 }
0x13a3   : > { %v8914_v48 = vadd.f32 %v8913_v25, %v20035_v62  ;;  %9122 = vmatprep.mubr.f32.mxu0 %v8961_v18 }
0x13a4   : > { %9123 = vmatmul.mubr.f32.gmra.mrb[224].mxu0 %v8960_v63  ;;  %v8962_v4 = vmax.f32 %v8912_v5, 0.0 }
0x13a5   : > { %v8963_v39 = vmax.f32 %v8914_v48, 0.0  ;;  %v8917_v60 = vpop.f32.mrb[204].mxu1 }
0x13a6   : > { %v8918_v43 = vadd.f32 %v8917_v60, %v20031_v50  ;;  %v8919_v6 = vpop.f32.mrb[205].mxu1 }
0x13a7   : > { %v8920_v16 = vadd.f32 %v8919_v6, %v20035_v62  ;;  %9127 = vmatprep.mubr.f32.mxu0 %v8963_v39 }
0x13a8   : > { %9128 = vmatmul.mubr.f32.gmra.mrb[226].mxu0 %v8962_v4  ;;  %v8964_v51 = vmax.f32 %v8918_v43, 0.0 }
0x13a9   : > { %v8965_v0 = vmax.f32 %v8920_v16, 0.0  ;;  %v8923_v34 = vpop.f32.mrb[206].mxu1 }
0x13aa   : > { %v8924_v49 = vadd.f32 %v8923_v34, %v20031_v50  ;;  %v8925_v27 = vpop.f32.mrb[207].mxu1 }
0x13ab   : > { %v8926_v19 = vadd.f32 %v8925_v27, %v20035_v62  ;;  %9132 = vmatprep.mubr.f32.mxu0 %v8965_v0 }
0x13ac   : > { %9133 = vmatmul.mubr.f32.gmra.mrb[228].mxu0 %v8964_v51  ;;  %v8966_v21 = vmax.f32 %v8924_v49, 0.0 }
0x13ad   : > { %v8967_v61 = vmax.f32 %v8926_v19, 0.0  ;;  %v8929_v15 = vpop.f32.mrb[208].mxu1 }
0x13ae   : > { %v8930_v38 = vadd.f32 %v8929_v15, %v20031_v50  ;;  %v8931_v59 = vpop.f32.mrb[209].mxu1 }
0x13af   : > { %v8932_v35 = vadd.f32 %v8931_v59, %v20035_v62  ;;  %9137 = vmatprep.mubr.f32.mxu0 %v8967_v61 }
0x13b0   : > { %9138 = vmatmul.mubr.f32.gmra.mrb[230].mxu0 %v8966_v21  ;;  %v8968_v53 = vmax.f32 %v8930_v38, 0.0 }
0x13b1   : > { %v8969_v54 = vmax.f32 %v8932_v35, 0.0  ;;  %v8935_v10 = vpop.f32.mrb[210].mxu1 }
0x13b2   : > { %v8936_v3 = vadd.f32 %v8935_v10, %v20031_v50  ;;  %v8937_v11 = vpop.f32.mrb[211].mxu1 }
0x13b3   : > { %v8938_v9 = vadd.f32 %v8937_v11, %v20035_v62  ;;  %9142 = vmatprep.mubr.f32.mxu0 %v8969_v54 }
0x13b4   : > { %9143 = vmatmul.mubr.f32.gmra.mrb[232].mxu0 %v8968_v53  ;;  %v8970_v30 = vmax.f32 %v8936_v3, 0.0 }
0x13b5   : > { %v8971_v12 = vmax.f32 %v8938_v9, 0.0 }
0x13b7   : > { %9147 = vmatprep.mubr.f32.mxu0 %v8971_v12 }
0x13b8   : > { %9148 = vmatmul.mubr.f32.gmra.mrb[234].mxu0 %v8970_v30 }
0x144f   : > { %v14986_v13 = vpop.f32.mrb[204].mxu0 }
0x1450   : > { %v14987_v17 = vpop.f32.mrb[205].mxu0 }
0x1451   : > { %v14988_v1 = vadd.f32 %v14987_v17, %v14986_v13 }
0x1453   : > { %v9075_v20 = vadd.f32 %v14988_v1, %v20072_v2  ;;  %v14989_v50 = vpop.f32.mrb[206].mxu0 }
0x1454   : > { %v14990_v28 = vpop.f32.mrb[207].mxu0 }
0x1455   : > { %v14991_v23 = vadd.f32 %v14990_v28, %v14989_v50  ;;  %v20076_v62 = vadd.f32 %v9075_v20, %v19950_v33 }
0x1457   : > { %v9080_v14 = vadd.f32 %v14991_v23, %v20072_v2  ;;  %v14992_v42 = vpop.f32.mrb[208].mxu0  ;;  %9169 = vadd.xlane.f32.xlu0 %v20076_v62 }
0x1458   : > { %v14993_v18 = vpop.f32.mrb[209].mxu0 }
0x1459   : > { %v14994_v24 = vadd.f32 %v14993_v18, %v14992_v42  ;;  %v20081_v36 = vadd.f32 %v9080_v14, %v19955_v44 }
0x145b   : > { %v9085_v63 = vadd.f32 %v14994_v24, %v20072_v2  ;;  %v14995_v5 = vpop.f32.mrb[210].mxu0  ;;  %9171 = vadd.xlane.f32.xlu1 %v20081_v36 }
0x145c   : > { %v14996_v25 = vpop.f32.mrb[211].mxu0 }
0x145d   : > { %v14997_v48 = vadd.f32 %v14996_v25, %v14995_v5  ;;  %v20086_v33 = vadd.f32 %v9085_v63, %v19960_v52 }
0x145f   : > { %v9090_v39 = vadd.f32 %v14997_v48, %v20072_v2  ;;  %v14998_v60 = vpop.f32.mrb[212].mxu0  ;;  %9173 = vadd.xlane.f32.xlu0 %v20086_v33 }
0x1460   : > { %v14999_v4 = vpop.f32.mrb[213].mxu0 }
0x1461   : > { %v15000_v43 = vadd.f32 %v14999_v4, %v14998_v60  ;;  %v20091_v44 = vadd.f32 %v9090_v39, %v19965_v31 }
0x1463   : > { %v9095_v6 = vadd.f32 %v15000_v43, %v20072_v2  ;;  %v15001_v16 = vpop.f32.mrb[214].mxu0  ;;  %9175 = vadd.xlane.f32.xlu1 %v20091_v44 }
0x1464   : > { %v15002_v0 = vpop.f32.mrb[215].mxu0 }
0x1465   : > { %v15003_v34 = vadd.f32 %v15002_v0, %v15001_v16  ;;  %v20096_v52 = vadd.f32 %v9095_v6, %v19970_v55 }
0x1467   : > { %v9100_v51 = vadd.f32 %v15003_v34, %v20072_v2  ;;  %v15004_v49 = vpop.f32.mrb[216].mxu0  ;;  %9177 = vadd.xlane.f32.xlu0 %v20096_v52 }
0x1468   : > { %v15005_v27 = vpop.f32.mrb[217].mxu0 }
0x1469   : > { %v15006_v19 = vadd.f32 %v15005_v27, %v15004_v49  ;;  %v20101_v31 = vadd.f32 %v9100_v51, %v19975_v41  ;;  %v17131_v51 = vld [vmem:[%s21523_s7 + $0xc0] ss:$12 sps:$4 sm:$0xff]   ;;  %v17134_v49 = vld [vmem:[%s21523_s7 + $0xd8] ss:$12 sps:$4 sm:$0xff]  }
0x146a   : > { %v17136_v27 = vld [vmem:[%s21523_s7 + $0xf4] ss:$12 sps:$4 sm:$0xff]  }
0x146b   : > { %v9105_v61 = vadd.f32 %v15006_v19, %v20072_v2  ;;  %v15007_v15 = vpop.f32.mrb[218].mxu0  ;;  %9179 = vadd.xlane.f32.xlu1 %v20101_v31  ;;  %v17143_v19 = vld [vmem:[%s21523_s7 + $0xf8] ss:$12 sps:$4 sm:$0xff]  }
0x146c   : > { %v15008_v21 = vpop.f32.mrb[219].mxu0 }
0x146d   : > { %v15009_v38 = vadd.f32 %v15008_v21, %v15007_v15  ;;  %v20106_v55 = vadd.f32 %v9105_v61, %v19980_v29  ;;  %v17138_v61 = vld [vmem:[%s21523_s7 + $0xf0] ss:$12 sps:$4 sm:$0xff]   ;;  %v17140_v15 = vld [vmem:[%s21523_s7 + $0x10c] ss:$12 sps:$4 sm:$0xff]   ;;  %v17142_v21 = vld [vmem:[%s21523_s7 + $0x108] ss:$12 sps:$4 sm:$0xff]  }
0x146f   : > { %v9110_v59 = vadd.f32 %v15009_v38, %v20072_v2  ;;  %v15010_v35 = vpop.f32.mrb[220].mxu0  ;;  %9181 = vadd.xlane.f32.xlu0 %v20106_v55 }
0x1470   : > { %v15011_v54 = vpop.f32.mrb[221].mxu0 }
0x1471   : > { %v15012_v10 = vadd.f32 %v15011_v54, %v15010_v35  ;;  %v20111_v41 = vadd.f32 %v9110_v59, %v19985_v45 }
0x1473   : > { %v9115_v53 = vadd.f32 %v15012_v10, %v20072_v2  ;;  %v15013_v3 = vpop.f32.mrb[222].mxu0  ;;  %9183 = vadd.xlane.f32.xlu1 %v20111_v41 }
0x1474   : > { %v15014_v11 = vpop.f32.mrb[223].mxu0 }
0x1475   : > { %v15015_v9 = vadd.f32 %v15014_v11, %v15013_v3  ;;  %v20116_v29 = vadd.f32 %v9115_v53, %v19990_v7 }
0x1477   : > { %v9120_v12 = vadd.f32 %v15015_v9, %v20072_v2  ;;  %v15016_v30 = vpop.f32.mrb[224].mxu0  ;;  %9185 = vadd.xlane.f32.xlu0 %v20116_v29 }
0x1478   : > { %v15017_v13 = vpop.f32.mrb[225].mxu0 }
0x1479   : > { %v15018_v47 = vadd.f32 %v15017_v13, %v15016_v30  ;;  %v20121_v45 = vadd.f32 %v9120_v12, %v19995_v26 }
0x147b   : > { %v9125_v17 = vadd.f32 %v15018_v47, %v20072_v2  ;;  %v15019_v1 = vpop.f32.mrb[226].mxu0  ;;  %9187 = vadd.xlane.f32.xlu1 %v20121_v45 }
0x147c   : > { %v15020_v20 = vpop.f32.mrb[227].mxu0 }
0x147d   : > { %v15021_v50 = vadd.f32 %v15020_v20, %v15019_v1  ;;  %v20126_v7 = vadd.f32 %v9125_v17, %v20000_v56 }
0x147f   : > { %v9130_v28 = vadd.f32 %v15021_v50, %v20072_v2  ;;  %v15022_v23 = vpop.f32.mrb[228].mxu0  ;;  %9189 = vadd.xlane.f32.xlu0 %v20126_v7 }
0x1480   : > { %v15023_v14 = vpop.f32.mrb[229].mxu0 }
0x1481   : > { %v15024_v42 = vadd.f32 %v15023_v14, %v15022_v23  ;;  %v20131_v26 = vadd.f32 %v9130_v28, %v20005_v32  ;;  %v17147_v14 = vld [vmem:[%s21523_s7 + $0x110] ss:$12 sps:$4 sm:$0xff]  }
0x1483   : > { %v9135_v18 = vadd.f32 %v15024_v42, %v20072_v2  ;;  %v15025_v24 = vpop.f32.mrb[230].mxu0  ;;  %9191 = vadd.xlane.f32.xlu1 %v20131_v26  ;;  %v17146_v42 = vld [vmem:[%s21523_s7 + $0x120] ss:$12 sps:$4 sm:$0xff]  }
0x1484   : > { %v15026_v63 = vpop.f32.mrb[231].mxu0 }
0x1485   : > { %v15027_v5 = vadd.f32 %v15026_v63, %v15025_v24  ;;  %v20136_v56 = vadd.f32 %v9135_v18, %v20010_v37 }
0x1487   : > { %v9140_v25 = vadd.f32 %v15027_v5, %v20072_v2  ;;  %v15028_v48 = vpop.f32.mrb[232].mxu0  ;;  %9193 = vadd.xlane.f32.xlu0 %v20136_v56  ;;  %v17148_v5 = vld [vmem:[%s21523_s7 + $0x13c] ss:$12 sps:$4 sm:$0xff]  }
0x1488   : > { %v15029_v39 = vpop.f32.mrb[233].mxu0 }
0x1489   : > { %v15030_v60 = vadd.f32 %v15029_v39, %v15028_v48  ;;  %v20141_v32 = vadd.f32 %v9140_v25, %v20015_v57  ;;  %v17129_v57 = vld [vmem:[%s21523_s7 + $0xc4] ss:$12 sps:$4 sm:$0xff]   ;;  %v17151_v25 = vld [vmem:[%s21523_s7 + $0x128] ss:$12 sps:$4 sm:$0xff]  }
0x148a   : > { %16613 = vmatprep.subr.bf16.mxu1 %v17129_v57 }
0x148b   : > { %v9145_v4 = vadd.f32 %v15030_v60, %v20072_v2  ;;  %v15031_v43 = vpop.f32.mrb[234].mxu0  ;;  %9195 = vadd.xlane.f32.xlu1 %v20141_v32  ;;  %16615 = vmatpush1.bf16.msra.mxu1 %v17131_v51 }
0x148c   : > { %v15032_v6 = vpop.f32.mrb[235].mxu0 }
0x148d   : > { %v15033_v16 = vadd.f32 %v15032_v6, %v15031_v43  ;;  %v20146_v37 = vadd.f32 %v9145_v4, %v20020_v8  ;;  %v17132_v8 = vld [vmem:[%s21523_s7 + $0xdc] ss:$12 sps:$4 sm:$0xff]   ;;  %v17152_v43 = vld [vmem:[%s21523_s7 + $0x154] ss:$12 sps:$4 sm:$0xff]  }
0x148e   : > { %16617 = vmatprep.subr.bf16.mxu1 %v17132_v8  ;;  %v17155_v6 = vld [vmem:[%s21523_s7 + $0x140] ss:$12 sps:$4 sm:$0xff]  }
0x148f   : > { %v9150_v0 = vadd.f32 %v15033_v16, %v20072_v2  ;;  %9197 = vadd.xlane.f32.xlu0 %v20146_v37  ;;  %v17135_v2 = vld [vmem:[%s21523_s7 + $0xc8] ss:$12 sps:$4 sm:$0xff]   ;;  %16619 = vmatpush1.bf16.msra.mxu1 %v17134_v49  ;;  %v17156_v8 = vld [vmem:[%s21523_s7 + $0x16c] ss:$12 sps:$4 sm:$0xff]  }
0x1490   : > { %16645 = vmatprep.subr.bf16.mxu0 %v17135_v2  ;;  %16621 = vmatprep.subr.bf16.mxu1 %v17136_v27 }
0x1491   : > { %v20151_v34 = vadd.f32 %v9150_v0, %v20025_v58  ;;  %v17139_v58 = vld [vmem:[%s21523_s7 + $0xe0] ss:$12 sps:$4 sm:$0xff]   ;;  %16647 = vmatpush3.bf16.msra.mxu0 %v17135_v2  ;;  %v17159_v2 = vld [vmem:[%s21523_s7 + $0x158] ss:$12 sps:$4 sm:$0xff]  }
0x1492   : > { %16649 = vmatprep.subr.bf16.mxu0 %v17139_v58 }
0x1493   : > { %9199 = vadd.xlane.f32.xlu1 %v20151_v34  ;;  %16623 = vmatpush1.bf16.msra.mxu1 %v17138_v61  ;;  %v17160_v61 = vld [vmem:[%s21523_s7 + $0x170] ss:$12 sps:$4 sm:$0xff]  }
0x1494   : > { %16625 = vmatprep.subr.bf16.mxu1 %v17140_v15 }
0x1495   : > { %16651 = vmatpush3.bf16.msra.mxu0 %v17139_v58 }
0x1496   : > { %16653 = vmatprep.subr.bf16.mxu0 %v17143_v19 }
0x1497   : > { %16627 = vmatpush1.bf16.msra.mxu1 %v17142_v21 }
0x1499   : > { %16655 = vmatpush3.bf16.msra.mxu0 %v17143_v19 }
0x149a   : > { %16657 = vmatprep.subr.bf16.mxu0 %v17147_v14 }
0x149d   : > { %16659 = vmatpush3.bf16.msra.mxu0 %v17147_v14 }
0x149e   : > { %16661 = vmatprep.subr.bf16.mxu0 %v17151_v25 }
0x14a1   : > { %16663 = vmatpush3.bf16.msra.mxu0 %v17151_v25 }
0x14a2   : > { %16665 = vmatprep.subr.bf16.mxu0 %v17155_v6 }
0x14a5   : > { %16667 = vmatpush3.bf16.msra.mxu0 %v17155_v6 }
0x14a6   : > { %16669 = vmatprep.subr.bf16.mxu0 %v17159_v2 }
0x14a9   : > { %16671 = vmatpush3.bf16.msra.mxu0 %v17159_v2 }
0x14aa   : > { %16673 = vmatprep.subr.bf16.mxu0 %v17160_v61 }
0x14ad   : > { %16675 = vmatpush3.bf16.msra.mxu0 %v17160_v61 }
0x14ae   : > { %15996 = vmatprep.subr.mxu0 %v21613_v40 }
0x14e4   : > { %v9170_v38 = vpop.xlane.xlu0 %9169 }
0x14e5   : > { %v9201_v59 = vmul.f32 0.0078125, %v9170_v38 }
0x14e7   : > { %v20188_v35 = vsub.f32 %v20076_v62, %v9201_v59 }
0x14e8   : > { %v9172_v54 = vpop.xlane.xlu1 %9171 }
0x14e9   : > { %v9202_v10 = vmul.f32 0.0078125, %v9172_v54  ;;  %v9233_v53 = vmul.f32 %v20188_v35, %v20188_v35 }
0x14eb   : > { %v20193_v3 = vsub.f32 %v20081_v36, %v9202_v10  ;;  %9249 = vadd.xlane.f32.xlu0 %v9233_v53 }
0x14ec   : > { %v9174_v11 = vpop.xlane.xlu0 %9173 }
0x14ed   : > { %v9203_v9 = vmul.f32 0.0078125, %v9174_v11  ;;  %v9234_v12 = vmul.f32 %v20193_v3, %v20193_v3 }
0x14ef   : > { %v20198_v30 = vsub.f32 %v20086_v33, %v9203_v9  ;;  %9251 = vadd.xlane.f32.xlu1 %v9234_v12 }
0x14f0   : > { %v9176_v62 = vpop.xlane.xlu1 %9175 }
0x14f1   : > { %v9204_v13 = vmul.f32 0.0078125, %v9176_v62  ;;  %v9235_v47 = vmul.f32 %v20198_v30, %v20198_v30 }
0x14f3   : > { %v20203_v17 = vsub.f32 %v20091_v44, %v9204_v13  ;;  %9253 = vadd.xlane.f32.xlu0 %v9235_v47  ;;  %v17144_v44 = vld [vmem:[%s21523_s7 + $0x124] ss:$12 sps:$4 sm:$0xff]  }
0x14f4   : > { %v9178_v36 = vpop.xlane.xlu0 %9177  ;;  %16629 = vmatprep.subr.bf16.mxu1 %v17144_v44 }
0x14f5   : > { %v9205_v1 = vmul.f32 0.0078125, %v9178_v36  ;;  %v9236_v20 = vmul.f32 %v20203_v17, %v20203_v17  ;;  %16631 = vmatpush1.bf16.msra.mxu1 %v17146_v42 }
0x14f6   : > { %16633 = vmatprep.subr.bf16.mxu1 %v17148_v5 }
0x14f7   : > { %v20208_v50 = vsub.f32 %v20096_v52, %v9205_v1  ;;  %9255 = vadd.xlane.f32.xlu1 %v9236_v20 }
0x14f8   : > { %v9180_v33 = vpop.xlane.xlu1 %9179 }
0x14f9   : > { %v9206_v28 = vmul.f32 0.0078125, %v9180_v33  ;;  %v9237_v23 = vmul.f32 %v20208_v50, %v20208_v50 }
0x14fb   : > { %v20222_v52 = vsub.f32 %v20101_v31, %v9206_v28  ;;  %9257 = vadd.xlane.f32.xlu0 %v9237_v23  ;;  %v17150_v31 = vld [vmem:[%s21523_s7 + $0x138] ss:$12 sps:$4 sm:$0xff]  }
0x14fc   : > { %v9182_v18 = vpop.xlane.xlu0 %9181  ;;  %16635 = vmatpush1.bf16.msra.mxu1 %v17150_v31 }
0x14fd   : > { %v9207_v24 = vmul.f32 0.0078125, %v9182_v18  ;;  %v9238_v63 = vmul.f32 %v20222_v52, %v20222_v52  ;;  %16637 = vmatprep.subr.bf16.mxu1 %v17152_v43 }
0x14ff   : > { %v20236_v48 = vsub.f32 %v20106_v55, %v9207_v24  ;;  %9259 = vadd.xlane.f32.xlu1 %v9238_v63  ;;  %v17154_v55 = vld [vmem:[%s21523_s7 + $0x150] ss:$12 sps:$4 sm:$0xff]  }
0x1500   : > { %v9184_v39 = vpop.xlane.xlu1 %9183  ;;  %16639 = vmatpush1.bf16.msra.mxu1 %v17154_v55 }
0x1501   : > { %v9208_v60 = vmul.f32 0.0078125, %v9184_v39  ;;  %v9239_v4 = vmul.f32 %v20236_v48, %v20236_v48  ;;  %16641 = vmatprep.subr.bf16.mxu1 %v17156_v8 }
0x1503   : > { %v20250_v16 = vsub.f32 %v20111_v41, %v9208_v60  ;;  %9261 = vadd.xlane.f32.xlu0 %v9239_v4  ;;  %v17158_v41 = vld [vmem:[%s21523_s7 + $0x168] ss:$12 sps:$4 sm:$0xff]  }
0x1504   : > { %v9186_v0 = vpop.xlane.xlu0 %9185  ;;  %16643 = vmatpush1.bf16.msra.mxu1 %v17158_v41 }
0x1505   : > { %v9209_v57 = vmul.f32 0.0078125, %v9186_v0  ;;  %v9240_v51 = vmul.f32 %v20250_v16, %v20250_v16  ;;  %16036 = vmatprep.subr.mxu1 %v21613_v40 }
0x1507   : > { %v20264_v58 = vsub.f32 %v20116_v29, %v9209_v57  ;;  %9263 = vadd.xlane.f32.xlu1 %v9240_v51 }
0x1508   : > { %v9188_v49 = vpop.xlane.xlu1 %9187 }
0x1509   : > { %v9210_v27 = vmul.f32 0.0078125, %v9188_v49  ;;  %v9241_v19 = vmul.f32 %v20264_v58, %v20264_v58 }
0x150b   : > { %v20273_v15 = vsub.f32 %v20121_v45, %v9210_v27  ;;  %9265 = vadd.xlane.f32.xlu0 %v9241_v19 }
0x150c   : > { %v9190_v29 = vpop.xlane.xlu0 %9189 }
0x150d   : > { %v9211_v21 = vmul.f32 0.0078125, %v9190_v29  ;;  %v9242_v38 = vmul.f32 %v20273_v15, %v20273_v15 }
0x150f   : > { %v20279_v59 = vsub.f32 %v20126_v7, %v9211_v21  ;;  %9267 = vadd.xlane.f32.xlu1 %v9242_v38 }
0x1510   : > { %v9192_v54 = vpop.xlane.xlu1 %9191 }
0x1511   : > { %v9212_v10 = vmul.f32 0.0078125, %v9192_v54  ;;  %v9243_v45 = vmul.f32 %v20279_v59, %v20279_v59 }
0x1513   : > { %v20284_v53 = vsub.f32 %v20131_v26, %v9212_v10  ;;  %9269 = vadd.xlane.f32.xlu0 %v9243_v45 }
0x1514   : > { %v9194_v11 = vpop.xlane.xlu0 %9193 }
0x1515   : > { %v9213_v9 = vmul.f32 0.0078125, %v9194_v11  ;;  %v9244_v12 = vmul.f32 %v20284_v53, %v20284_v53 }
0x1517   : > { %v20289_v62 = vsub.f32 %v20136_v56, %v9213_v9  ;;  %9271 = vadd.xlane.f32.xlu1 %v9244_v12 }
0x1518   : > { %v9196_v7 = vpop.xlane.xlu1 %9195 }
0x1519   : > { %v9214_v13 = vmul.f32 0.0078125, %v9196_v7  ;;  %v9245_v47 = vmul.f32 %v20289_v62, %v20289_v62 }
0x151b   : > { %v20294_v36 = vsub.f32 %v20141_v32, %v9214_v13  ;;  %9273 = vadd.xlane.f32.xlu0 %v9245_v47 }
0x151c   : > { %v9198_v26 = vpop.xlane.xlu0 %9197 }
0x151d   : > { %v9215_v1 = vmul.f32 0.0078125, %v9198_v26  ;;  %v9246_v20 = vmul.f32 %v20294_v36, %v20294_v36 }
0x151f   : > { %v20299_v33 = vsub.f32 %v20146_v37, %v9215_v1  ;;  %9275 = vadd.xlane.f32.xlu1 %v9246_v20 }
0x1520   : > { %v9200_v56 = vpop.xlane.xlu1 %9199 }
0x1521   : > { %v9216_v28 = vmul.f32 0.0078125, %v9200_v56  ;;  %v9247_v23 = vmul.f32 %v20299_v33, %v20299_v33 }
0x1523   : > { %v20304_v44 = vsub.f32 %v20151_v34, %v9216_v28  ;;  %9277 = vadd.xlane.f32.xlu0 %v9247_v23 }
0x1525   : > { %v9248_v32 = vmul.f32 %v20304_v44, %v20304_v44 }
0x1527   : > { %9279 = vadd.xlane.f32.xlu1 %v9248_v32 }
0x1578   : > { %v9250_v14 = vpop.xlane.xlu0 %9249 }
0x1579   : > { %v9281_v42 = vmul.f32 0.0078125, %v9250_v14 }
0x157b   : > { %v9297_v18 = vadd.f32 1e-05, %v9281_v42 }
0x157c   : > { %v9252_v24 = vpop.xlane.xlu1 %9251 }
0x157d   : > { %17409 = vrsqrt.f32 %v9297_v18  ;;  %v9282_v37 = vmul.f32 0.0078125, %v9252_v24 }
0x157f   : > { %v9298_v63 = vadd.f32 1e-05, %v9282_v37 }
0x1580   : > { %v9254_v5 = vpop.xlane.xlu0 %9253 }
0x1581   : > { %17411 = vrsqrt.f32 %v9298_v63  ;;  %v9283_v25 = vmul.f32 0.0078125, %v9254_v5 }
0x1583   : > { %v9299_v31 = vadd.f32 1e-05, %v9283_v25 }
0x1584   : > { %v9256_v39 = vpop.xlane.xlu1 %9255 }
0x1585   : > { %17413 = vrsqrt.f32 %v9299_v31  ;;  %v9284_v34 = vmul.f32 0.0078125, %v9256_v39 }
0x1587   : > { %v17410_v60 = vpop.eup %17409  ;;  %v9300_v4 = vadd.f32 1e-05, %v9284_v34 }
0x1588   : > { %v9258_v43 = vpop.xlane.xlu0 %9257  ;;  %v9329_v6 = vmul.f32 %v17410_v60, %v20188_v35 }
0x1589   : > { %17415 = vrsqrt.f32 %v9300_v4  ;;  %v9285_v55 = vmul.f32 0.0078125, %v9258_v43 }
0x158a   : > { %9553 = vmatmul.mubr.f32.vlgmr.msra.gmra.mrb[212].mxu1 %v9329_v6  ;;  %15972 = vmatprep.mubr.f32.mxu0 %v9329_v6 }
0x158b   : > { %v17412_v0 = vpop.eup %17411  ;;  %v9301_v57 = vadd.f32 1e-05, %v9285_v55  ;;  %9558 = vmatprep.mubr.f32.mxu1 %v21613_v40 }
0x158c   : > { %v9260_v51 = vpop.xlane.xlu1 %9259  ;;  %v9330_v8 = vmul.f32 %v17412_v0, %v20193_v3 }
0x158d   : > { %17417 = vrsqrt.f32 %v9301_v57  ;;  %v9286_v2 = vmul.f32 0.0078125, %v9260_v51 }
0x158e   : > { %9559 = vmatmul.mubr.f32.gmra.mrb[214].mxu1 %v9330_v8  ;;  %15973 = vmatmul.mubr.f32.vlgmr.msra.gmra.mrb[236].mxu0 %v9330_v8 }
0x158f   : > { %v17414_v41 = vpop.eup %17413  ;;  %v9302_v49 = vadd.f32 1e-05, %v9286_v2  ;;  %9564 = vmatprep.mubr.f32.mxu1 %v21613_v40 }
0x1590   : > { %v9262_v35 = vpop.xlane.xlu0 %9261  ;;  %v9331_v27 = vmul.f32 %v17414_v41, %v20198_v30 }
0x1591   : > { %17419 = vrsqrt.f32 %v9302_v49  ;;  %v9287_v19 = vmul.f32 0.0078125, %v9262_v35 }
0x1592   : > { %9565 = vmatmul.mubr.f32.gmra.mrb[216].mxu1 %v9331_v27  ;;  %15975 = vmatprep.mubr.f32.mxu0 %v9331_v27 }
0x1593   : > { %v17416_v61 = vpop.eup %17415  ;;  %v9303_v29 = vadd.f32 1e-05, %v9287_v19  ;;  %9570 = vmatprep.mubr.f32.mxu1 %v21613_v40 }
0x1594   : > { %v9264_v3 = vpop.xlane.xlu1 %9263  ;;  %v9332_v21 = vmul.f32 %v17416_v61, %v20203_v17 }
0x1595   : > { %17421 = vrsqrt.f32 %v9303_v29  ;;  %v9288_v38 = vmul.f32 0.0078125, %v9264_v3 }
0x1596   : > { %9571 = vmatmul.mubr.f32.gmra.mrb[218].mxu1 %v9332_v21  ;;  %15976 = vmatmul.mubr.f32.gmra.mrb[238].mxu0 %v9332_v21 }
0x1597   : > { %v17418_v54 = vpop.eup %17417  ;;  %v9304_v10 = vadd.f32 1e-05, %v9288_v38  ;;  %9576 = vmatprep.mubr.f32.mxu1 %v21613_v40 }
0x1598   : > { %v9266_v30 = vpop.xlane.xlu0 %9265  ;;  %v9333_v45 = vmul.f32 %v17418_v54, %v20208_v50 }
0x1599   : > { %17423 = vrsqrt.f32 %v9304_v10  ;;  %v9289_v11 = vmul.f32 0.0078125, %v9266_v30 }
0x159a   : > { %9577 = vmatmul.mubr.f32.gmra.mrb[220].mxu1 %v9333_v45  ;;  %15978 = vmatprep.mubr.f32.mxu0 %v9333_v45 }
0x159b   : > { %v17420_v9 = vpop.eup %17419  ;;  %v9305_v12 = vadd.f32 1e-05, %v9289_v11  ;;  %9582 = vmatprep.mubr.f32.mxu1 %v21613_v40  ;;  %v21621_v11 = vld [vmem:[#allocation39_spill] sm:$0xff] }
0x159c   : > { %v9268_v17 = vpop.xlane.xlu1 %9267  ;;  %v9334_v7 = vmul.f32 %v17420_v9, %v20222_v52  ;;  %v21622_v9 = vunpack.c.l.bf16 %v21621_v11 }
0x159d   : > { %17425 = vrsqrt.f32 %v9305_v12  ;;  %v9290_v13 = vmul.f32 0.0078125, %v9268_v17 }
0x159e   : > { %9583 = vmatmul.mubr.f32.gmra.mrb[222].mxu1 %v9334_v7  ;;  %15979 = vmatmul.mubr.f32.gmra.mrb[240].mxu0 %v9334_v7 }
0x159f   : > { %v17422_v47 = vpop.eup %17421  ;;  %v9306_v26 = vadd.f32 1e-05, %v9290_v13  ;;  %9588 = vmatprep.mubr.f32.mxu1 %v21613_v40 }
0x15a0   : > { %v9270_v50 = vpop.xlane.xlu0 %9269  ;;  %v9335_v1 = vmul.f32 %v17422_v47, %v20236_v48 }
0x15a1   : > { %17427 = vrsqrt.f32 %v9306_v26  ;;  %v9291_v20 = vmul.f32 0.0078125, %v9270_v50 }
0x15a2   : > { %9589 = vmatmul.mubr.f32.gmra.mrb[224].mxu1 %v9335_v1  ;;  %15981 = vmatprep.mubr.f32.mxu0 %v9335_v1 }
0x15a3   : > { %v17424_v56 = vpop.eup %17423  ;;  %v9307_v28 = vadd.f32 1e-05, %v9291_v20  ;;  %9594 = vmatprep.mubr.f32.mxu1 %v21613_v40 }
0x15a4   : > { %v9272_v52 = vpop.xlane.xlu1 %9271  ;;  %v9336_v23 = vmul.f32 %v17424_v56, %v20250_v16 }
0x15a5   : > { %17429 = vrsqrt.f32 %v9307_v28  ;;  %v9292_v32 = vmul.f32 0.0078125, %v9272_v52 }
0x15a6   : > { %9595 = vmatmul.mubr.f32.gmra.mrb[226].mxu1 %v9336_v23  ;;  %15982 = vmatmul.mubr.f32.gmra.mrb[242].mxu0 %v9336_v23 }
0x15a7   : > { %v17426_v14 = vpop.eup %17425  ;;  %v9308_v42 = vadd.f32 1e-05, %v9292_v32  ;;  %9600 = vmatprep.mubr.f32.mxu1 %v21613_v40 }
0x15a8   : > { %v9274_v48 = vpop.xlane.xlu0 %9273  ;;  %v9337_v18 = vmul.f32 %v17426_v14, %v20264_v58 }
0x15a9   : > { %17431 = vrsqrt.f32 %v9308_v42  ;;  %v9293_v24 = vmul.f32 0.0078125, %v9274_v48 }
0x15aa   : > { %9601 = vmatmul.mubr.f32.gmra.mrb[228].mxu1 %v9337_v18  ;;  %15984 = vmatprep.mubr.f32.mxu0 %v9337_v18 }
0x15ab   : > { %v17428_v37 = vpop.eup %17427  ;;  %v9309_v63 = vadd.f32 1e-05, %v9293_v24  ;;  %9606 = vmatprep.mubr.f32.mxu1 %v21613_v40 }
0x15ac   : > { %v9276_v16 = vpop.xlane.xlu1 %9275  ;;  %v9338_v5 = vmul.f32 %v17428_v37, %v20273_v15 }
0x15ad   : > { %17433 = vrsqrt.f32 %v9309_v63  ;;  %v9294_v25 = vmul.f32 0.0078125, %v9276_v16 }
0x15ae   : > { %9607 = vmatmul.mubr.f32.gmra.mrb[230].mxu1 %v9338_v5  ;;  %15985 = vmatmul.mubr.f32.gmra.mrb[244].mxu0 %v9338_v5 }
0x15af   : > { %v17430_v31 = vpop.eup %17429  ;;  %v9310_v39 = vadd.f32 1e-05, %v9294_v25  ;;  %9612 = vmatprep.mubr.f32.mxu1 %v21613_v40 }
0x15b0   : > { %v9278_v58 = vpop.xlane.xlu0 %9277  ;;  %v9339_v34 = vmul.f32 %v17430_v31, %v20279_v59 }
0x15b1   : > { %17435 = vrsqrt.f32 %v9310_v39  ;;  %v9295_v60 = vmul.f32 0.0078125, %v9278_v58 }
0x15b2   : > { %9613 = vmatmul.mubr.f32.gmra.mrb[232].mxu1 %v9339_v34  ;;  %15987 = vmatprep.mubr.f32.mxu0 %v9339_v34 }
0x15b3   : > { %v17432_v4 = vpop.eup %17431  ;;  %v9311_v43 = vadd.f32 1e-05, %v9295_v60  ;;  %9618 = vmatprep.mubr.f32.mxu1 %v21613_v40 }
0x15b4   : > { %v9280_v15 = vpop.xlane.xlu1 %9279  ;;  %v9340_v6 = vmul.f32 %v17432_v4, %v20284_v53 }
0x15b5   : > { %17437 = vrsqrt.f32 %v9311_v43  ;;  %v9296_v55 = vmul.f32 0.0078125, %v9280_v15 }
0x15b6   : > { %9619 = vmatmul.mubr.f32.gmra.mrb[234].mxu1 %v9340_v6  ;;  %15988 = vmatmul.mubr.f32.gmra.mrb[246].mxu0 %v9340_v6 }
0x15b7   : > { %v17434_v0 = vpop.eup %17433  ;;  %v9312_v57 = vadd.f32 1e-05, %v9296_v55  ;;  %9624 = vmatprep.mubr.f32.mxu1 %v21613_v40 }
0x15b8   : > { %v9341_v59 = vmul.f32 %v17434_v0, %v20289_v62 }
0x15b9   : > { %17439 = vrsqrt.f32 %v9312_v57 }
0x15ba   : > { %9625 = vmatmul.mubr.f32.gmra.mrb[236].mxu1 %v9341_v59  ;;  %15990 = vmatprep.mubr.f32.mxu0 %v9341_v59 }
0x15bb   : > { %v17436_v51 = vpop.eup %17435  ;;  %9630 = vmatprep.mubr.f32.mxu1 %v21613_v40 }
0x15bc   : > { %v9342_v8 = vmul.f32 %v17436_v51, %v20294_v36  ;;  %v21620_v36 = vld [vmem:[#allocation19_spill] sm:$0xff] }
0x15bd   : > { %v20345_v49 = vrot.slane %v19325_v46, %v21620_v36  ;;  %v20349_v35 = vrot.slane %v19049_v22, %v21620_v36  ;;  %v20372_v12 = vrot.slane %v21622_v9, %v21620_v36 }
0x15be   : > { %9631 = vmatmul.mubr.f32.gmra.mrb[238].mxu1 %v9342_v8  ;;  %15991 = vmatmul.mubr.f32.gmra.mrb[248].mxu0 %v9342_v8 }
0x15bf   : > { %v17438_v53 = vpop.eup %17437  ;;  %9636 = vmatprep.mubr.f32.mxu1 %v21613_v40 }
0x15c0   : > { %v9343_v2 = vmul.f32 %v17438_v53, %v20299_v33 }
0x15c2   : > { %9637 = vmatmul.mubr.f32.gmra.mrb[240].mxu1 %v9343_v2  ;;  %15993 = vmatprep.mubr.f32.mxu0 %v9343_v2 }
0x15c3   : > { %v17440_v41 = vpop.eup %17439  ;;  %9642 = vmatprep.mubr.f32.mxu1 %v21613_v40 }
0x15c4   : > { %v9344_v62 = vmul.f32 %v17440_v41, %v20304_v44 }
0x15c6   : > { %9643 = vmatmul.mubr.f32.gmra.mrb[242].mxu1 %v9344_v62  ;;  %15994 = vmatmul.mubr.f32.gmra.mrb[250].mxu0 %v9344_v62 }
0x15c7   : > { %15998 = vmatprep.mubr.msk.f32.mxu0 %vm17774_vm4, %v21613_v40  ;;  %16038 = vmatprep.mubr.msk.f32.mxu1 %vm17774_vm4, %v21613_v40 }
0x165d   : > { %v9554_v33 = vpop.f32.mrb[212].mxu1 }
0x165e   : > { %v9556_v27 = vpop.f32.mrb[213].mxu1  ;;  %v20355_v29 = vadd.f32 %v9554_v33, %v20349_v35 }
0x165f   : > { %v9557_v44 = vadd.f32 %v9556_v27, %v20345_v49 }
0x1661   : > { %v9560_v19 = vpop.f32.mrb[214].mxu1  ;;  %v20352_v61 = vpop.f32.mrb[236].mxu0  ;;  %15997 = vmatpush3.xpose.msra.mxu0 %v9557_v44 }
0x1662   : > { %v9562_v3 = vpop.f32.mrb[215].mxu1  ;;  %v20357_v21 = vpop.f32.mrb[237].mxu0  ;;  %16001 = vmatprep.subr.mxu0 %v21613_v40  ;;  %v20365_v10 = vadd.f32 %v9560_v19, %v20349_v35 }
0x1663   : > { %v9563_v38 = vadd.f32 %v9562_v3, %v20345_v49 }
0x1664   : > { %15999 = vmatmul.mubr.f32.vlgmr.msra.gmra.mrb[252].mxu0 %v20355_v29 }
0x1665   : > { %v9566_v54 = vpop.f32.mrb[216].mxu1  ;;  %16002 = vmatpush3.xpose.msra.mxu0 %v9563_v38  ;;  %16003 = vmatprep.mubr.msk.f32.mxu0 %vm17774_vm4, %v21613_v40 }
0x1666   : > { %v9568_v30 = vpop.f32.mrb[217].mxu1  ;;  %16006 = vmatprep.subr.mxu0 %v21613_v40  ;;  %v20378_v13 = vadd.f32 %v9566_v54, %v20349_v35 }
0x1667   : > { %v9569_v45 = vadd.f32 %v9568_v30, %v20345_v49 }
0x1668   : > { %16004 = vmatmul.mubr.f32.vlgmr.msra.gmra.mrb[254].mxu0 %v20365_v10 }
0x1669   : > { %v9572_v17 = vpop.f32.mrb[218].mxu1  ;;  %v15977_v7 = vpop.f32.mrb[238].mxu0  ;;  %16007 = vmatpush3.xpose.msra.mxu0 %v9569_v45  ;;  %16008 = vmatprep.mubr.msk.f32.mxu0 %vm17774_vm4, %v21613_v40 }
0x166a   : > { %v20381_v47 = vadd.f32 %v15977_v7, %v20372_v12  ;;  %v9574_v26 = vpop.f32.mrb[219].mxu1  ;;  %v9725_v50 = vpop.f32.mrb[239].mxu0  ;;  %16011 = vmatprep.subr.mxu0 %v21613_v40  ;;  %v20392_v28 = vadd.f32 %v9572_v17, %v20349_v35 }
0x166b   : > { %v9575_v1 = vadd.f32 %v9574_v26, %v20345_v49  ;;  %v20386_v20 = vadd.f32 %v9725_v50, %v20372_v12 }
0x166c   : > { %16009 = vmatmul.mubr.f32.vlgmr.msra.gmra.mrb[0].mxu0 %v20378_v13 }
0x166d   : > { %v9578_v56 = vpop.f32.mrb[220].mxu1  ;;  %16012 = vmatpush3.xpose.msra.mxu0 %v9575_v1  ;;  %16013 = vmatprep.mubr.msk.f32.mxu0 %vm17774_vm4, %v21613_v40 }
0x166e   : > { %v9580_v52 = vpop.f32.mrb[221].mxu1  ;;  %16016 = vmatprep.subr.mxu0 %v21613_v40  ;;  %v20400_v42 = vadd.f32 %v9578_v56, %v20349_v35 }
0x166f   : > { %v9581_v23 = vadd.f32 %v9580_v52, %v20345_v49 }
0x1670   : > { %16014 = vmatmul.mubr.f32.vlgmr.msra.gmra.mrb[2].mxu0 %v20392_v28 }
0x1671   : > { %v9584_v32 = vpop.f32.mrb[222].mxu1  ;;  %v15980_v14 = vpop.f32.mrb[240].mxu0  ;;  %16017 = vmatpush3.xpose.msra.mxu0 %v9581_v23  ;;  %16018 = vmatprep.mubr.msk.f32.mxu0 %vm17774_vm4, %v21613_v40 }
0x1672   : > { %v20403_v48 = vadd.f32 %v15980_v14, %v20372_v12  ;;  %v9586_v18 = vpop.f32.mrb[223].mxu1  ;;  %v9735_v24 = vpop.f32.mrb[241].mxu0  ;;  %16021 = vmatprep.subr.mxu0 %v21613_v40  ;;  %v20414_v5 = vadd.f32 %v9584_v32, %v20349_v35 }
0x1673   : > { %v9587_v37 = vadd.f32 %v9586_v18, %v20345_v49  ;;  %v20408_v63 = vadd.f32 %v9735_v24, %v20372_v12 }
0x1674   : > { %16019 = vmatmul.mubr.f32.vlgmr.msra.gmra.mrb[4].mxu0 %v20400_v42 }
0x1675   : > { %v9590_v16 = vpop.f32.mrb[224].mxu1  ;;  %16022 = vmatpush3.xpose.msra.mxu0 %v9587_v37  ;;  %16023 = vmatprep.mubr.msk.f32.mxu0 %vm17774_vm4, %v21613_v40 }
0x1676   : > { %v9592_v25 = vpop.f32.mrb[225].mxu1  ;;  %16026 = vmatprep.subr.mxu0 %v21613_v40  ;;  %v20422_v34 = vadd.f32 %v9590_v16, %v20349_v35 }
0x1677   : > { %v9593_v31 = vadd.f32 %v9592_v25, %v20345_v49 }
0x1678   : > { %16024 = vmatmul.mubr.f32.vlgmr.msra.gmra.mrb[6].mxu0 %v20414_v5 }
0x1679   : > { %v9596_v39 = vpop.f32.mrb[226].mxu1  ;;  %v15983_v58 = vpop.f32.mrb[242].mxu0  ;;  %16027 = vmatpush3.xpose.msra.mxu0 %v9593_v31  ;;  %16028 = vmatprep.mubr.msk.f32.mxu0 %vm17774_vm4, %v21613_v40 }
0x167a   : > { %v20425_v60 = vadd.f32 %v15983_v58, %v20372_v12  ;;  %v9598_v4 = vpop.f32.mrb[227].mxu1  ;;  %v9745_v43 = vpop.f32.mrb[243].mxu0  ;;  %16031 = vmatprep.subr.mxu0 %v21613_v40  ;;  %v20436_v0 = vadd.f32 %v9596_v39, %v20349_v35 }
0x167b   : > { %v9599_v15 = vadd.f32 %v9598_v4, %v20345_v49  ;;  %v20430_v6 = vadd.f32 %v9745_v43, %v20372_v12 }
0x167c   : > { %16029 = vmatmul.mubr.f32.vlgmr.msra.gmra.mrb[8].mxu0 %v20422_v34 }
0x167d   : > { %v9602_v55 = vpop.f32.mrb[228].mxu1  ;;  %16032 = vmatpush3.xpose.msra.mxu0 %v9599_v15  ;;  %16033 = vmatprep.mubr.msk.f32.mxu0 %vm17774_vm4, %v21613_v40 }
0x167e   : > { %v9604_v57 = vpop.f32.mrb[229].mxu1  ;;  %16041 = vmatprep.subr.mxu0 %v21613_v40  ;;  %v20444_v53 = vadd.f32 %v9602_v55, %v20349_v35 }
0x167f   : > { %v9605_v59 = vadd.f32 %v9604_v57, %v20345_v49 }
0x1680   : > { %16034 = vmatmul.mubr.f32.vlgmr.msra.gmra.mrb[10].mxu0 %v20436_v0 }
0x1681   : > { %v9608_v51 = vpop.f32.mrb[230].mxu1  ;;  %v15986_v8 = vpop.f32.mrb[244].mxu0  ;;  %16037 = vmatpush3.xpose.msra.mxu1 %v9605_v59  ;;  %16043 = vmatprep.mubr.msk.f32.mxu0 %vm17774_vm4, %v21613_v40 }
0x1682   : > { %v20447_v2 = vadd.f32 %v15986_v8, %v20372_v12  ;;  %v9610_v41 = vpop.f32.mrb[231].mxu1  ;;  %v9755_v62 = vpop.f32.mrb[245].mxu0  ;;  %16046 = vmatprep.subr.mxu1 %v21613_v40  ;;  %v20458_v44 = vadd.f32 %v9608_v51, %v20349_v35  ;;  %v9716_v51 = vadd.f32 %v20357_v21, %v20372_v12  ;;  %v9721_v21 = vadd.f32 %v20352_v61, %v20372_v12 }
0x1683   : > { %v9611_v36 = vadd.f32 %v9610_v41, %v20345_v49  ;;  %v20452_v33 = vadd.f32 %v9755_v62, %v20372_v12 }
0x1684   : > { %16039 = vmatmul.mubr.f32.vlgmr.msra.gmra.mrb[244].mxu1 %v20444_v53 }
0x1685   : > { %v9614_v27 = vpop.f32.mrb[232].mxu1  ;;  %16042 = vmatpush3.xpose.msra.mxu0 %v9611_v36  ;;  %16048 = vmatprep.mubr.msk.f32.mxu1 %vm17774_vm4, %v21613_v40 }
0x1686   : > { %v9616_v19 = vpop.f32.mrb[233].mxu1  ;;  %16051 = vmatprep.subr.mxu0 %v21613_v40  ;;  %v20466_v30 = vadd.f32 %v9614_v27, %v20349_v35 }
0x1687   : > { %v9617_v3 = vadd.f32 %v9616_v19, %v20345_v49 }
0x1688   : > { %16044 = vmatmul.mubr.f32.vlgmr.msra.gmra.mrb[12].mxu0 %v20458_v44 }
0x1689   : > { %v9620_v38 = vpop.f32.mrb[234].mxu1  ;;  %v15989_v54 = vpop.f32.mrb[246].mxu0  ;;  %16047 = vmatpush3.xpose.msra.mxu1 %v9617_v3  ;;  %16053 = vmatprep.mubr.msk.f32.mxu0 %vm17774_vm4, %v21613_v40 }
0x168a   : > { %v20469_v45 = vadd.f32 %v15989_v54, %v20372_v12  ;;  %v9622_v11 = vpop.f32.mrb[235].mxu1  ;;  %v9765_v9 = vpop.f32.mrb[247].mxu0  ;;  %16056 = vmatprep.subr.mxu1 %v21613_v40  ;;  %v20480_v50 = vadd.f32 %v9620_v38, %v20349_v35 }
0x168b   : > { %v9623_v17 = vadd.f32 %v9622_v11, %v20345_v49  ;;  %v20474_v7 = vadd.f32 %v9765_v9, %v20372_v12 }
0x168c   : > { %16049 = vmatmul.mubr.f32.vlgmr.msra.gmra.mrb[246].mxu1 %v20466_v30 }
0x168d   : > { %v9626_v26 = vpop.f32.mrb[236].mxu1  ;;  %16052 = vmatpush3.xpose.msra.mxu0 %v9623_v17  ;;  %16058 = vmatprep.mubr.msk.f32.mxu1 %vm17774_vm4, %v21613_v40 }
0x168e   : > { %v9628_v1 = vpop.f32.mrb[237].mxu1  ;;  %16061 = vmatprep.subr.mxu0 %v21613_v40  ;;  %v20488_v32 = vadd.f32 %v9626_v26, %v20349_v35 }
0x168f   : > { %v9629_v56 = vadd.f32 %v9628_v1, %v20345_v49 }
0x1690   : > { %16054 = vmatmul.mubr.f32.vlgmr.msra.gmra.mrb[14].mxu0 %v20480_v50 }
0x1691   : > { %v9632_v52 = vpop.f32.mrb[238].mxu1  ;;  %v15992_v23 = vpop.f32.mrb[248].mxu0  ;;  %16057 = vmatpush3.xpose.msra.mxu1 %v9629_v56  ;;  %16063 = vmatprep.mubr.msk.f32.mxu0 %vm17774_vm4, %v21613_v40 }
0x1692   : > { %v20491_v14 = vadd.f32 %v15992_v23, %v20372_v12  ;;  %v9634_v18 = vpop.f32.mrb[239].mxu1  ;;  %v9775_v24 = vpop.f32.mrb[249].mxu0  ;;  %16066 = vmatprep.subr.mxu1 %v21613_v40  ;;  %v20502_v31 = vadd.f32 %v9632_v52, %v20349_v35 }
0x1693   : > { %v9635_v37 = vadd.f32 %v9634_v18, %v20345_v49  ;;  %v20496_v16 = vadd.f32 %v9775_v24, %v20372_v12 }
0x1694   : > { %16059 = vmatmul.mubr.f32.vlgmr.msra.gmra.mrb[248].mxu1 %v20488_v32 }
0x1695   : > { %v9638_v25 = vpop.f32.mrb[240].mxu1  ;;  %16062 = vmatpush3.xpose.msra.mxu0 %v9635_v37  ;;  %16068 = vmatprep.mubr.msk.f32.mxu1 %vm17774_vm4, %v21613_v40 }
0x1696   : > { %v9640_v39 = vpop.f32.mrb[241].mxu1  ;;  %16071 = vmatprep.subr.mxu0 %v21613_v40  ;;  %v20510_v15 = vadd.f32 %v9638_v25, %v20349_v35 }
0x1697   : > { %v9641_v58 = vadd.f32 %v9640_v39, %v20345_v49 }
0x1698   : > { %16064 = vmatmul.mubr.f32.vlgmr.msra.gmra.mrb[16].mxu0 %v20502_v31 }
0x1699   : > { %v9644_v4 = vpop.f32.mrb[242].mxu1  ;;  %v15995_v43 = vpop.f32.mrb[250].mxu0  ;;  %16067 = vmatpush3.xpose.msra.mxu1 %v9641_v58  ;;  %16073 = vmatprep.mubr.msk.f32.mxu0 %vm17774_vm4, %v21613_v40 }
0x169a   : > { %v20513_v55 = vadd.f32 %v15995_v43, %v20372_v12  ;;  %v9646_v57 = vpop.f32.mrb[243].mxu1  ;;  %v9785_v59 = vpop.f32.mrb[251].mxu0  ;;  %16076 = vmatprep.subr.mxu1 %v21613_v40  ;;  %v20524_v62 = vadd.f32 %v9644_v4, %v20349_v35 }
0x169b   : > { %v9647_v8 = vadd.f32 %v9646_v57, %v20345_v49  ;;  %v20520_v41 = vadd.f32 %v9785_v59, %v20372_v12 }
0x169c   : > { %16069 = vmatmul.mubr.f32.vlgmr.msra.gmra.mrb[250].mxu1 %v20510_v15 }
0x169d   : > { %16072 = vmatpush3.xpose.msra.mxu0 %v9647_v8  ;;  %16077 = vmatpush3.msra.mxu1 %v9716_v51 }
0x169e   : > { %16081 = vmatprep.subr.mxu0 %v21613_v40  ;;  %16078 = vmatprep.mubr.msk.f32.mxu1 %vm17774_vm4, %v21613_v40 }
0x169f   : > { %16086 = vmatprep.subr.mxu1 %v21613_v40 }
0x16a0   : > { %16074 = vmatmul.mubr.f32.vlgmr.msra.gmra.mrb[18].mxu0 %v20524_v62 }
0x16a1   : > { %16082 = vmatpush3.msra.mxu0 %v9721_v21  ;;  %16083 = vmatprep.mubr.msk.f32.mxu0 %vm17774_vm4, %v21613_v40 }
0x16a2   : > { %16091 = vmatprep.subr.mxu0 %v21613_v40 }
0x1737   : > { %v9860_v49 = vpop.f32.mrb[252].mxu0 }
0x1738   : > { %v20536_v35 = vmul.f32 0.088388346, %v9860_v49  ;;  %v16000_v36 = vpop.f32.mrb[253].mxu0 }
0x173a   : > { %v10930_v27 = vsel %vm3509_vm5, %v20536_v35, -inf }
0x173b   : > { %10931 = vmax.xlane.f32.xlu0 %v10930_v27  ;;  %v9930_v19 = vpop.f32.mrb[254].mxu0 }
0x173c   : > { %v20540_v61 = vmul.f32 0.088388346, %v9930_v19  ;;  %v16005_v12 = vpop.f32.mrb[255].mxu0 }
0x173e   : > { %v10933_v3 = vsel %vm3509_vm5, %v20540_v61, -inf }
0x173f   : > { %10934 = vmax.xlane.f32.xlu1 %v10933_v3  ;;  %v10000_v38 = vpop.f32.mrb[0].mxu0 }
0x1740   : > { %v20544_v54 = vmul.f32 0.088388346, %v10000_v38  ;;  %v16010_v11 = vpop.f32.mrb[1].mxu0 }
0x1742   : > { %v10936_v9 = vsel %vm3509_vm5, %v20544_v54, -inf }
0x1743   : > { %10937 = vmax.xlane.f32.xlu0 %v10936_v9  ;;  %v10070_v17 = vpop.f32.mrb[2].mxu0 }
0x1744   : > { %v20548_v26 = vmul.f32 0.088388346, %v10070_v17  ;;  %v16015_v1 = vpop.f32.mrb[3].mxu0 }
0x1746   : > { %v10939_v56 = vsel %vm3509_vm5, %v20548_v26, -inf }
0x1747   : > { %10940 = vmax.xlane.f32.xlu1 %v10939_v56  ;;  %v10140_v52 = vpop.f32.mrb[4].mxu0 }
0x1748   : > { %v20552_v23 = vmul.f32 0.088388346, %v10140_v52  ;;  %v16020_v18 = vpop.f32.mrb[5].mxu0 }
0x174a   : > { %v10942_v24 = vsel %vm3509_vm5, %v20552_v23, -inf }
0x174b   : > { %10943 = vmax.xlane.f32.xlu0 %v10942_v24  ;;  %v10210_v37 = vpop.f32.mrb[6].mxu0 }
0x174c   : > { %v20556_v25 = vmul.f32 0.088388346, %v10210_v37  ;;  %v16025_v39 = vpop.f32.mrb[7].mxu0 }
0x174e   : > { %v10945_v58 = vsel %vm3509_vm5, %v20556_v25, -inf }
0x174f   : > { %10946 = vmax.xlane.f32.xlu1 %v10945_v58  ;;  %v10280_v4 = vpop.f32.mrb[8].mxu0 }
0x1750   : > { %v20560_v43 = vmul.f32 0.088388346, %v10280_v4  ;;  %v16030_v57 = vpop.f32.mrb[9].mxu0 }
0x1752   : > { %v10948_v59 = vsel %vm3509_vm5, %v20560_v43, -inf }
0x1753   : > { %10949 = vmax.xlane.f32.xlu0 %v10948_v59  ;;  %v10350_v51 = vpop.f32.mrb[10].mxu0 }
0x1754   : > { %v20564_v8 = vmul.f32 0.088388346, %v10350_v51  ;;  %v16035_v21 = vpop.f32.mrb[11].mxu0 }
0x1756   : > { %v10951_v49 = vsel %vm3509_vm5, %v20564_v8, -inf }
0x1757   : > { %10952 = vmax.xlane.f32.xlu1 %v10951_v49  ;;  %v10420_v36 = vpop.f32.mrb[244].mxu1 }
0x1758   : > { %v20568_v27 = vmul.f32 0.088388346, %v10420_v36  ;;  %v16040_v19 = vpop.f32.mrb[245].mxu1 }
0x175a   : > { %v10954_v12 = vsel %vm3509_vm5, %v20568_v27, -inf }
0x175b   : > { %v10490_v3 = vpop.f32.mrb[12].mxu0  ;;  %10955 = vmax.xlane.f32.xlu0 %v10954_v12 }
0x175c   : > { %v20572_v38 = vmul.f32 0.088388346, %v10490_v3  ;;  %v16045_v11 = vpop.f32.mrb[13].mxu0 }
0x175e   : > { %v10957_v9 = vsel %vm3509_vm5, %v20572_v38, -inf }
0x175f   : > { %10958 = vmax.xlane.f32.xlu1 %v10957_v9  ;;  %v10560_v17 = vpop.f32.mrb[246].mxu1 }
0x1760   : > { %v20576_v1 = vmul.f32 0.088388346, %v10560_v17  ;;  %v16050_v56 = vpop.f32.mrb[247].mxu1 }
0x1762   : > { %v10960_v52 = vsel %vm3509_vm5, %v20576_v1, -inf }
0x1763   : > { %v10630_v18 = vpop.f32.mrb[14].mxu0  ;;  %10961 = vmax.xlane.f32.xlu0 %v10960_v52 }
0x1764   : > { %v20580_v24 = vmul.f32 0.088388346, %v10630_v18  ;;  %v16055_v37 = vpop.f32.mrb[15].mxu0 }
0x1766   : > { %v10963_v39 = vsel %vm3509_vm5, %v20580_v24, -inf }
0x1767   : > { %10964 = vmax.xlane.f32.xlu1 %v10963_v39  ;;  %v10700_v58 = vpop.f32.mrb[248].mxu1 }
0x1768   : > { %v20584_v4 = vmul.f32 0.088388346, %v10700_v58  ;;  %v16060_v57 = vpop.f32.mrb[249].mxu1 }
0x176a   : > { %v10966_v59 = vsel %vm3509_vm5, %v20584_v4, -inf }
0x176b   : > { %v10770_v51 = vpop.f32.mrb[16].mxu0  ;;  %10967 = vmax.xlane.f32.xlu0 %v10966_v59 }
0x176c   : > { %v20588_v21 = vmul.f32 0.088388346, %v10770_v51  ;;  %v16065_v49 = vpop.f32.mrb[17].mxu0 }
0x176e   : > { %v10969_v36 = vsel %vm3509_vm5, %v20588_v21, -inf }
0x176f   : > { %10970 = vmax.xlane.f32.xlu1 %v10969_v36  ;;  %v10840_v19 = vpop.f32.mrb[250].mxu1 }
0x1770   : > { %v20592_v12 = vmul.f32 0.088388346, %v10840_v19  ;;  %v16070_v3 = vpop.f32.mrb[251].mxu1 }
0x1772   : > { %v10972_v11 = vsel %vm3509_vm5, %v20592_v12, -inf }
0x1773   : > { %v10910_v9 = vpop.f32.mrb[18].mxu0  ;;  %10973 = vmax.xlane.f32.xlu0 %v10972_v11 }
0x1774   : > { %v20596_v17 = vmul.f32 0.088388346, %v10910_v9  ;;  %v16075_v56 = vpop.f32.mrb[19].mxu0 }
0x1776   : > { %v10975_v52 = vsel %vm3509_vm5, %v20596_v17, -inf }
0x1777   : > { %10976 = vmax.xlane.f32.xlu1 %v10975_v52 }
0x17c8   : > { %v10932_v18 = vpop.xlane.xlu0 %10931 }
0x17c9   : > { %v10978_v37 = vsub.f32 %v20536_v35, %v10932_v18 }
0x17cb   : > { %v10994_v39 = vmul.f32 1.442695, %v10978_v37 }
0x17cc   : > { %v10935_v58 = vpop.xlane.xlu1 %10934 }
0x17cd   : > { %17441 = vpow2.f32 %v10994_v39  ;;  %v10979_v57 = vsub.f32 %v20540_v61, %v10935_v58 }
0x17cf   : > { %v10996_v59 = vmul.f32 1.442695, %v10979_v57 }
0x17d0   : > { %v10938_v51 = vpop.xlane.xlu0 %10937 }
0x17d1   : > { %17443 = vpow2.f32 %v10996_v59  ;;  %v10980_v49 = vsub.f32 %v20544_v54, %v10938_v51 }
0x17d3   : > { %v10998_v36 = vmul.f32 1.442695, %v10980_v49 }
0x17d4   : > { %v10941_v19 = vpop.xlane.xlu1 %10940 }
0x17d5   : > { %17445 = vpow2.f32 %v10998_v36  ;;  %v10981_v3 = vsub.f32 %v20548_v26, %v10941_v19 }
0x17d7   : > { %v20604_v11 = vpop.eup %17441  ;;  %v11000_v9 = vmul.f32 1.442695, %v10981_v3 }
0x17d8   : > { %v10944_v56 = vpop.xlane.xlu0 %10943  ;;  %v11026_v35 = vsel %vm3509_vm5, %v20604_v11, 0.0 }
0x17d9   : > { %17447 = vpow2.f32 %v11000_v9  ;;  %v10982_v61 = vsub.f32 %v20552_v23, %v10944_v56  ;;  %11027 = vadd.xlane.f32.xlu0 %v11026_v35 }
0x17db   : > { %v20609_v52 = vpop.eup %17443  ;;  %v11002_v18 = vmul.f32 1.442695, %v10982_v61 }
0x17dc   : > { %v10947_v54 = vpop.xlane.xlu1 %10946  ;;  %v11029_v37 = vsel %vm3509_vm5, %v20609_v52, 0.0 }
0x17dd   : > { %17449 = vpow2.f32 %v11002_v18  ;;  %v10983_v26 = vsub.f32 %v20556_v25, %v10947_v54  ;;  %11030 = vadd.xlane.f32.xlu1 %v11029_v37 }
0x17df   : > { %v20614_v39 = vpop.eup %17445  ;;  %v11004_v58 = vmul.f32 1.442695, %v10983_v26 }
0x17e0   : > { %v10950_v57 = vpop.xlane.xlu0 %10949  ;;  %v11032_v59 = vsel %vm3509_vm5, %v20614_v39, 0.0 }
0x17e1   : > { %17451 = vpow2.f32 %v11004_v58  ;;  %v10984_v23 = vsub.f32 %v20560_v43, %v10950_v57  ;;  %11033 = vadd.xlane.f32.xlu0 %v11032_v59 }
0x17e3   : > { %v20619_v51 = vpop.eup %17447  ;;  %v11006_v49 = vmul.f32 1.442695, %v10984_v23 }
0x17e4   : > { %v10953_v36 = vpop.xlane.xlu1 %10952  ;;  %v11035_v19 = vsel %vm3509_vm5, %v20619_v51, 0.0 }
0x17e5   : > { %17453 = vpow2.f32 %v11006_v49  ;;  %v10985_v25 = vsub.f32 %v20564_v8, %v10953_v36  ;;  %11036 = vadd.xlane.f32.xlu1 %v11035_v19 }
0x17e7   : > { %v20624_v3 = vpop.eup %17449  ;;  %v11008_v9 = vmul.f32 1.442695, %v10985_v25 }
0x17e8   : > { %v10956_v56 = vpop.xlane.xlu0 %10955  ;;  %v11038_v35 = vsel %vm3509_vm5, %v20624_v3, 0.0 }
0x17e9   : > { %17455 = vpow2.f32 %v11008_v9  ;;  %v10986_v43 = vsub.f32 %v20568_v27, %v10956_v56  ;;  %11039 = vadd.xlane.f32.xlu0 %v11038_v35 }
0x17eb   : > { %v20629_v61 = vpop.eup %17451  ;;  %v11010_v18 = vmul.f32 1.442695, %v10986_v43 }
0x17ec   : > { %v10959_v54 = vpop.xlane.xlu1 %10958  ;;  %v11041_v37 = vsel %vm3509_vm5, %v20629_v61, 0.0 }
0x17ed   : > { %17457 = vpow2.f32 %v11010_v18  ;;  %v10987_v8 = vsub.f32 %v20572_v38, %v10959_v54  ;;  %11042 = vadd.xlane.f32.xlu1 %v11041_v37 }
0x17ef   : > { %v20634_v26 = vpop.eup %17453  ;;  %v11012_v58 = vmul.f32 1.442695, %v10987_v8 }
0x17f0   : > { %v10962_v57 = vpop.xlane.xlu0 %10961  ;;  %v11044_v59 = vsel %vm3509_vm5, %v20634_v26, 0.0 }
0x17f1   : > { %17459 = vpow2.f32 %v11012_v58  ;;  %v10988_v27 = vsub.f32 %v20576_v1, %v10962_v57  ;;  %11045 = vadd.xlane.f32.xlu0 %v11044_v59 }
0x17f3   : > { %v20639_v23 = vpop.eup %17455  ;;  %v11014_v49 = vmul.f32 1.442695, %v10988_v27 }
0x17f4   : > { %v10965_v36 = vpop.xlane.xlu1 %10964  ;;  %v11047_v19 = vsel %vm3509_vm5, %v20639_v23, 0.0 }
0x17f5   : > { %17461 = vpow2.f32 %v11014_v49  ;;  %v10989_v38 = vsub.f32 %v20580_v24, %v10965_v36  ;;  %11048 = vadd.xlane.f32.xlu1 %v11047_v19 }
0x17f7   : > { %v20644_v25 = vpop.eup %17457  ;;  %v11016_v9 = vmul.f32 1.442695, %v10989_v38 }
0x17f8   : > { %v10968_v56 = vpop.xlane.xlu0 %10967  ;;  %v11050_v35 = vsel %vm3509_vm5, %v20644_v25, 0.0 }
0x17f9   : > { %17463 = vpow2.f32 %v11016_v9  ;;  %v10990_v1 = vsub.f32 %v20584_v4, %v10968_v56  ;;  %11051 = vadd.xlane.f32.xlu0 %v11050_v35 }
0x17fb   : > { %v20649_v43 = vpop.eup %17459  ;;  %v11018_v18 = vmul.f32 1.442695, %v10990_v1 }
0x17fc   : > { %v10971_v54 = vpop.xlane.xlu1 %10970  ;;  %v11053_v37 = vsel %vm3509_vm5, %v20649_v43, 0.0 }
0x17fd   : > { %17465 = vpow2.f32 %v11018_v18  ;;  %v10991_v24 = vsub.f32 %v20588_v21, %v10971_v54  ;;  %11054 = vadd.xlane.f32.xlu1 %v11053_v37 }
0x17ff   : > { %v20654_v8 = vpop.eup %17461  ;;  %v11020_v58 = vmul.f32 1.442695, %v10991_v24 }
0x1800   : > { %v10974_v57 = vpop.xlane.xlu0 %10973  ;;  %v11056_v59 = vsel %vm3509_vm5, %v20654_v8, 0.0 }
0x1801   : > { %17467 = vpow2.f32 %v11020_v58  ;;  %v10992_v4 = vsub.f32 %v20592_v12, %v10974_v57  ;;  %11057 = vadd.xlane.f32.xlu0 %v11056_v59 }
0x1803   : > { %v20659_v27 = vpop.eup %17463  ;;  %v11022_v49 = vmul.f32 1.442695, %v10992_v4 }
0x1804   : > { %v10977_v36 = vpop.xlane.xlu1 %10976  ;;  %v11059_v19 = vsel %vm3509_vm5, %v20659_v27, 0.0 }
0x1805   : > { %17469 = vpow2.f32 %v11022_v49  ;;  %v10993_v21 = vsub.f32 %v20596_v17, %v10977_v36  ;;  %11060 = vadd.xlane.f32.xlu1 %v11059_v19 }
0x1807   : > { %v20664_v38 = vpop.eup %17465  ;;  %v11024_v9 = vmul.f32 1.442695, %v10993_v21 }
0x1808   : > { %v11062_v56 = vsel %vm3509_vm5, %v20664_v38, 0.0 }
0x1809   : > { %17471 = vpow2.f32 %v11024_v9  ;;  %11063 = vadd.xlane.f32.xlu0 %v11062_v56 }
0x180b   : > { %v20668_v12 = vpop.eup %17467 }
0x180c   : > { %v11065_v35 = vsel %vm3509_vm5, %v20668_v12, 0.0 }
0x180d   : > { %11066 = vadd.xlane.f32.xlu1 %v11065_v35 }
0x180f   : > { %v20672_v1 = vpop.eup %17469 }
0x1810   : > { %v11068_v17 = vsel %vm3509_vm5, %v20672_v1, 0.0 }
0x1811   : > { %11069 = vadd.xlane.f32.xlu0 %v11068_v17 }
0x1813   : > { %v20676_v18 = vpop.eup %17471 }
0x1814   : > { %v11071_v54 = vsel %vm3509_vm5, %v20676_v18, 0.0 }
0x1815   : > { %11072 = vadd.xlane.f32.xlu1 %v11071_v54 }
0x1866   : > { %v11028_v37 = vpop.xlane.xlu0 %11027 }
0x1867   : > { %17473 = vrcp.f32 %v11028_v37 }
0x186a   : > { %v11031_v24 = vpop.xlane.xlu1 %11030 }
0x186b   : > { %17475 = vrcp.f32 %v11031_v24 }
0x186e   : > { %v11034_v58 = vpop.xlane.xlu0 %11033 }
0x186f   : > { %17477 = vrcp.f32 %v11034_v58 }
0x1871   : > { %v17474_v57 = vpop.eup %17473 }
0x1872   : > { %v11075_v59 = vmul.f32 %v17474_v57, %v20604_v11  ;;  %v11037_v4 = vpop.xlane.xlu1 %11036 }
0x1873   : > { %17479 = vrcp.f32 %v11037_v4 }
0x1874   : > { %16079 = vmatmul.mubr.msk.f32.vlgmr.msra.gmra.mrb[252].mxu1 %vm3509_vm5, %v11075_v59 }
0x1875   : > { %v17476_v49 = vpop.eup %17475  ;;  %16087 = vmatpush3.msra.mxu1 %v20386_v20  ;;  %16088 = vmatprep.mubr.msk.f32.mxu1 %vm17774_vm4, %v21613_v40 }
0x1876   : > { %v11077_v36 = vmul.f32 %v17476_v49, %v20609_v52  ;;  %v11040_v19 = vpop.xlane.xlu0 %11039  ;;  %16096 = vmatprep.subr.mxu1 %v21613_v40 }
0x1877   : > { %17481 = vrcp.f32 %v11040_v19 }
0x1878   : > { %16084 = vmatmul.mubr.msk.f32.vlgmr.msra.gmra.mrb[20].mxu0 %vm3509_vm5, %v11077_v36 }
0x1879   : > { %v17478_v21 = vpop.eup %17477  ;;  %16092 = vmatpush3.msra.mxu0 %v20381_v47  ;;  %16093 = vmatprep.mubr.msk.f32.mxu0 %vm17774_vm4, %v21613_v40 }
0x187a   : > { %v11079_v11 = vmul.f32 %v17478_v21, %v20614_v39  ;;  %v11043_v20 = vpop.xlane.xlu1 %11042  ;;  %16101 = vmatprep.subr.mxu0 %v21613_v40 }
0x187b   : > { %17483 = vrcp.f32 %v11043_v20 }
0x187c   : > { %16089 = vmatmul.mubr.msk.f32.vlgmr.msra.gmra.mrb[254].mxu1 %vm3509_vm5, %v11079_v11 }
0x187d   : > { %v17480_v52 = vpop.eup %17479  ;;  %16097 = vmatpush3.msra.mxu1 %v20408_v63  ;;  %16098 = vmatprep.mubr.msk.f32.mxu1 %vm17774_vm4, %v21613_v40 }
0x187e   : > { %v11081_v9 = vmul.f32 %v17480_v52, %v20619_v51  ;;  %v11046_v47 = vpop.xlane.xlu0 %11045  ;;  %16106 = vmatprep.subr.mxu1 %v21613_v40 }
0x187f   : > { %17485 = vrcp.f32 %v11046_v47 }
0x1880   : > { %16094 = vmatmul.mubr.msk.f32.vlgmr.msra.gmra.mrb[22].mxu0 %vm3509_vm5, %v11081_v9 }
0x1881   : > { %v17482_v39 = vpop.eup %17481  ;;  %16102 = vmatpush3.msra.mxu0 %v20403_v48  ;;  %16103 = vmatprep.mubr.msk.f32.mxu0 %vm17774_vm4, %v21613_v40 }
0x1882   : > { %v11083_v56 = vmul.f32 %v17482_v39, %v20624_v3  ;;  %v11049_v63 = vpop.xlane.xlu1 %11048  ;;  %16111 = vmatprep.subr.mxu0 %v21613_v40 }
0x1883   : > { %17487 = vrcp.f32 %v11049_v63 }
0x1884   : > { %16099 = vmatmul.mubr.msk.f32.vlgmr.msra.gmra.mrb[0].mxu1 %vm3509_vm5, %v11083_v56 }
0x1885   : > { %v17484_v51 = vpop.eup %17483  ;;  %16107 = vmatpush3.msra.mxu1 %v20430_v6  ;;  %16108 = vmatprep.mubr.msk.f32.mxu1 %vm17774_vm4, %v21613_v40 }
0x1886   : > { %v11085_v35 = vmul.f32 %v17484_v51, %v20629_v61  ;;  %v11052_v48 = vpop.xlane.xlu0 %11051  ;;  %16116 = vmatprep.subr.mxu1 %v21613_v40 }
0x1887   : > { %17489 = vrcp.f32 %v11052_v48 }
0x1888   : > { %16104 = vmatmul.mubr.msk.f32.vlgmr.msra.gmra.mrb[24].mxu0 %vm3509_vm5, %v11085_v35 }
0x1889   : > { %v17486_v3 = vpop.eup %17485  ;;  %16112 = vmatpush3.msra.mxu0 %v20425_v60  ;;  %16113 = vmatprep.mubr.msk.f32.mxu0 %vm17774_vm4, %v21613_v40 }
0x188a   : > { %v11087_v17 = vmul.f32 %v17486_v3, %v20634_v26  ;;  %v11055_v6 = vpop.xlane.xlu1 %11054  ;;  %16121 = vmatprep.subr.mxu0 %v21613_v40 }
0x188b   : > { %17491 = vrcp.f32 %v11055_v6 }
0x188c   : > { %16109 = vmatmul.mubr.msk.f32.vlgmr.msra.gmra.mrb[2].mxu1 %vm3509_vm5, %v11087_v17 }
0x188d   : > { %v17488_v61 = vpop.eup %17487  ;;  %16117 = vmatpush3.msra.mxu1 %v20452_v33  ;;  %16118 = vmatprep.mubr.msk.f32.mxu1 %vm17774_vm4, %v21613_v40 }
0x188e   : > { %v11089_v54 = vmul.f32 %v17488_v61, %v20639_v23  ;;  %v11058_v60 = vpop.xlane.xlu0 %11057  ;;  %16126 = vmatprep.subr.mxu1 %v21613_v40 }
0x188f   : > { %17493 = vrcp.f32 %v11058_v60 }
0x1890   : > { %16114 = vmatmul.mubr.msk.f32.vlgmr.msra.gmra.mrb[26].mxu0 %vm3509_vm5, %v11089_v54 }
0x1891   : > { %v17490_v26 = vpop.eup %17489  ;;  %16122 = vmatpush3.msra.mxu0 %v20447_v2  ;;  %16123 = vmatprep.mubr.msk.f32.mxu0 %vm17774_vm4, %v21613_v40 }
0x1892   : > { %v11091_v37 = vmul.f32 %v17490_v26, %v20644_v25  ;;  %v11061_v33 = vpop.xlane.xlu1 %11060  ;;  %16131 = vmatprep.subr.mxu0 %v21613_v40 }
0x1893   : > { %17495 = vrcp.f32 %v11061_v33 }
0x1894   : > { %16119 = vmatmul.mubr.msk.f32.vlgmr.msra.gmra.mrb[4].mxu1 %vm3509_vm5, %v11091_v37 }
0x1895   : > { %v17492_v23 = vpop.eup %17491  ;;  %16127 = vmatpush3.msra.mxu1 %v20474_v7  ;;  %16128 = vmatprep.mubr.msk.f32.mxu1 %vm17774_vm4, %v21613_v40 }
0x1896   : > { %v11093_v24 = vmul.f32 %v17492_v23, %v20649_v43  ;;  %v11064_v2 = vpop.xlane.xlu0 %11063  ;;  %16136 = vmatprep.subr.mxu1 %v21613_v40 }
0x1897   : > { %17497 = vrcp.f32 %v11064_v2 }
0x1898   : > { %16124 = vmatmul.mubr.msk.f32.vlgmr.msra.gmra.mrb[28].mxu0 %vm3509_vm5, %v11093_v24 }
0x1899   : > { %v17494_v25 = vpop.eup %17493  ;;  %16132 = vmatpush3.msra.mxu0 %v20469_v45  ;;  %16133 = vmatprep.mubr.msk.f32.mxu0 %vm17774_vm4, %v21613_v40 }
0x189a   : > { %v11095_v58 = vmul.f32 %v17494_v25, %v20654_v8  ;;  %v11067_v7 = vpop.xlane.xlu1 %11066  ;;  %16141 = vmatprep.subr.mxu0 %v21613_v40 }
0x189b   : > { %17499 = vrcp.f32 %v11067_v7 }
0x189c   : > { %16129 = vmatmul.mubr.msk.f32.vlgmr.msra.gmra.mrb[6].mxu1 %vm3509_vm5, %v11095_v58 }
0x189d   : > { %v17496_v43 = vpop.eup %17495  ;;  %16137 = vmatpush3.msra.mxu1 %v20496_v16  ;;  %16138 = vmatprep.mubr.msk.f32.mxu1 %vm17774_vm4, %v21613_v40 }
0x189e   : > { %v11097_v57 = vmul.f32 %v17496_v43, %v20659_v27  ;;  %v11070_v45 = vpop.xlane.xlu0 %11069  ;;  %16146 = vmatprep.subr.mxu1 %v21613_v40 }
0x189f   : > { %17501 = vrcp.f32 %v11070_v45  ;;  %v17163_v45 = vld [vmem:[%s21524_s8 + $0x80] ss:$8 sps:$4 sm:$0xff]  }
0x18a0   : > { %16134 = vmatmul.mubr.msk.f32.vlgmr.msra.gmra.mrb[30].mxu0 %vm3509_vm5, %v11097_v57 }
0x18a1   : > { %v17498_v8 = vpop.eup %17497  ;;  %16142 = vmatpush3.msra.mxu0 %v20491_v14  ;;  %16143 = vmatprep.mubr.msk.f32.mxu0 %vm17774_vm4, %v21613_v40 }
0x18a2   : > { %v11099_v59 = vmul.f32 %v17498_v8, %v20664_v38  ;;  %v11073_v16 = vpop.xlane.xlu1 %11072  ;;  %16151 = vmatprep.subr.mxu0 %v21613_v40  ;;  %v17167_v8 = vld [vmem:[%s21524_s8 + $0xa4] ss:$8 sps:$4 sm:$0xff]  }
0x18a3   : > { %17503 = vrcp.f32 %v11073_v16  ;;  %v17170_v16 = vld [vmem:[%s21524_s8 + $0xb4] ss:$8 sps:$4 sm:$0xff]  }
0x18a4   : > { %16139 = vmatmul.mubr.msk.f32.vlgmr.msra.gmra.mrb[8].mxu1 %vm3509_vm5, %v11099_v59  ;;  %v17169_v59 = vld [vmem:[%s21524_s8 + $0xa0] ss:$8 sps:$4 sm:$0xff]  }
0x18a5   : > { %v17500_v27 = vpop.eup %17499  ;;  %16147 = vmatpush3.msra.mxu1 %v20520_v41  ;;  %16148 = vmatprep.mubr.msk.f32.mxu1 %vm17774_vm4, %v21613_v40 }
0x18a6   : > { %v11101_v4 = vmul.f32 %v17500_v27, %v20668_v12  ;;  %v17172_v27 = vld [vmem:[%s21524_s8 + $0xb0] ss:$8 sps:$4 sm:$0xff]  }
0x18a8   : > { %16144 = vmatmul.mubr.msk.f32.vlgmr.msra.gmra.mrb[32].mxu0 %vm3509_vm5, %v11101_v4 }
0x18a9   : > { %v17502_v14 = vpop.eup %17501  ;;  %16152 = vmatpush3.msra.mxu0 %v20513_v55  ;;  %16153 = vmatprep.mubr.msk.f32.mxu0 %vm17774_vm4, %v21613_v40 }
0x18aa   : > { %v11103_v38 = vmul.f32 %v17502_v14, %v20672_v1 }
0x18ac   : > { %16149 = vmatmul.mubr.msk.f32.vlgmr.msra.gmra.mrb[10].mxu1 %vm3509_vm5, %v11103_v38 }
0x18ad   : > { %v17504_v49 = vpop.eup %17503  ;;  %12554 = vmatprep.mubr.f32.mxu1 %v21613_v40 }
0x18ae   : > { %v11105_v41 = vmul.f32 %v17504_v49, %v20676_v18 }
0x18b0   : > { %16154 = vmatmul.mubr.msk.f32.vlgmr.msra.gmra.mrb[34].mxu0 %vm3509_vm5, %v11105_v41 }
0x1947   : > { %v11175_v12 = vpop.f32.mrb[252].mxu1 }
0x1948   : > { %v20768_v36 = vadd.f32 %v11175_v12, %v20355_v29  ;;  %v16080_v19 = vpop.f32.mrb[253].mxu1 }
0x194a   : > { %12274 = vadd.xlane.f32.xlu0 %v20768_v36 }
0x194b   : > { %v11248_v55 = vpop.f32.mrb[20].mxu0 }
0x194c   : > { %v20772_v21 = vadd.f32 %v11248_v55, %v20365_v10  ;;  %v16085_v1 = vpop.f32.mrb[21].mxu0 }
0x194e   : > { %12276 = vadd.xlane.f32.xlu1 %v20772_v21 }
0x194f   : > { %v11321_v11 = vpop.f32.mrb[254].mxu1 }
0x1950   : > { %v20776_v20 = vadd.f32 %v11321_v11, %v20378_v13  ;;  %v16090_v18 = vpop.f32.mrb[255].mxu1 }
0x1952   : > { %12278 = vadd.xlane.f32.xlu0 %v20776_v20 }
0x1953   : > { %v11394_v52 = vpop.f32.mrb[22].mxu0 }
0x1954   : > { %v20780_v29 = vadd.f32 %v11394_v52, %v20392_v28  ;;  %v16095_v9 = vpop.f32.mrb[23].mxu0 }
0x1956   : > { %12280 = vadd.xlane.f32.xlu1 %v20780_v29 }
0x1957   : > { %v11467_v47 = vpop.f32.mrb[0].mxu1 }
0x1958   : > { %v20784_v10 = vadd.f32 %v11467_v47, %v20400_v42  ;;  %v16100_v39 = vpop.f32.mrb[1].mxu1 }
0x195a   : > { %12282 = vadd.xlane.f32.xlu0 %v20784_v10 }
0x195b   : > { %v11540_v56 = vpop.f32.mrb[24].mxu0 }
0x195c   : > { %v20788_v13 = vadd.f32 %v11540_v56, %v20414_v5  ;;  %v16105_v63 = vpop.f32.mrb[25].mxu0 }
0x195e   : > { %12284 = vadd.xlane.f32.xlu1 %v20788_v13 }
0x195f   : > { %v11613_v51 = vpop.f32.mrb[2].mxu1 }
0x1960   : > { %v20792_v28 = vadd.f32 %v11613_v51, %v20422_v34  ;;  %v16110_v35 = vpop.f32.mrb[3].mxu1 }
0x1962   : > { %12286 = vadd.xlane.f32.xlu0 %v20792_v28 }
0x1963   : > { %v11686_v48 = vpop.f32.mrb[26].mxu0 }
0x1964   : > { %v20796_v42 = vadd.f32 %v11686_v48, %v20436_v0  ;;  %v16115_v3 = vpop.f32.mrb[27].mxu0  ;;  %v17175_v48 = vld [vmem:[%s21524_s8 + $0xc0] ss:$8 sps:$4 sm:$0xff]  }
0x1966   : > { %12288 = vadd.xlane.f32.xlu1 %v20796_v42 }
0x1967   : > { %v11759_v17 = vpop.f32.mrb[4].mxu1 }
0x1968   : > { %v20800_v5 = vadd.f32 %v11759_v17, %v20444_v53  ;;  %v16120_v6 = vpop.f32.mrb[5].mxu1 }
0x196a   : > { %12290 = vadd.xlane.f32.xlu0 %v20800_v5 }
0x196b   : > { %v11832_v61 = vpop.f32.mrb[28].mxu0 }
0x196c   : > { %v20804_v34 = vadd.f32 %v11832_v61, %v20458_v44  ;;  %v16125_v54 = vpop.f32.mrb[29].mxu0  ;;  %v17176_v61 = vld [vmem:[%s21524_s8 + $0xd4] ss:$8 sps:$4 sm:$0xff]  }
0x196d   : > { %v17178_v54 = vld [vmem:[%s21524_s8 + $0xd0] ss:$8 sps:$4 sm:$0xff]  }
0x196e   : > { %12292 = vadd.xlane.f32.xlu1 %v20804_v34 }
0x196f   : > { %v11905_v60 = vpop.f32.mrb[6].mxu1 }
0x1970   : > { %v20808_v0 = vadd.f32 %v11905_v60, %v20466_v30  ;;  %v16130_v26 = vpop.f32.mrb[7].mxu1 }
0x1972   : > { %12294 = vadd.xlane.f32.xlu0 %v20808_v0 }
0x1973   : > { %v11978_v37 = vpop.f32.mrb[30].mxu0 }
0x1974   : > { %v20812_v53 = vadd.f32 %v11978_v37, %v20480_v50  ;;  %v16135_v33 = vpop.f32.mrb[31].mxu0 }
0x1975   : > { %v17179_v33 = vld [vmem:[%s21524_s8 + $0xe4] ss:$8 sps:$4 sm:$0xff]  }
0x1976   : > { %12296 = vadd.xlane.f32.xlu1 %v20812_v53 }
0x1977   : > { %v12051_v23 = vpop.f32.mrb[8].mxu1 }
0x1978   : > { %v20816_v44 = vadd.f32 %v12051_v23, %v20488_v32  ;;  %v16140_v24 = vpop.f32.mrb[9].mxu1  ;;  %v17181_v23 = vld [vmem:[%s21524_s8 + $0xe0] ss:$8 sps:$4 sm:$0xff]  }
0x197a   : > { %12298 = vadd.xlane.f32.xlu0 %v20816_v44 }
0x197b   : > { %v12124_v2 = vpop.f32.mrb[32].mxu0 }
0x197c   : > { %v20820_v30 = vadd.f32 %v12124_v2, %v20502_v31  ;;  %v16145_v25 = vpop.f32.mrb[33].mxu0  ;;  %v17161_v31 = vld [vmem:[%s21524_s8 + $0x84] ss:$8 sps:$4 sm:$0xff]  }
0x197d   : > { %16677 = vmatprep.subr.bf16.mxu1 %v17161_v31 }
0x197e   : > { %12300 = vadd.xlane.f32.xlu1 %v20820_v30  ;;  %16679 = vmatpush1.bf16.msra.mxu1 %v17163_v45 }
0x197f   : > { %v12197_v58 = vpop.f32.mrb[10].mxu1 }
0x1980   : > { %v20824_v50 = vadd.f32 %v12197_v58, %v20510_v15  ;;  %v16150_v7 = vpop.f32.mrb[11].mxu1  ;;  %v17164_v15 = vld [vmem:[%s21524_s8 + $0x94] ss:$8 sps:$4 sm:$0xff]  }
0x1981   : > { %16681 = vmatprep.subr.bf16.mxu1 %v17164_v15  ;;  %v17182_v58 = vld [vmem:[%s21524_s8 + $0xf4] ss:$8 sps:$4 sm:$0xff]   ;;  %v17184_v7 = vld [vmem:[%s21524_s8 + $0xf0] ss:$8 sps:$4 sm:$0xff]  }
0x1982   : > { %12302 = vadd.xlane.f32.xlu0 %v20824_v50 }
0x1983   : > { %v12270_v43 = vpop.f32.mrb[34].mxu0 }
0x1984   : > { %v20828_v32 = vadd.f32 %v12270_v43, %v20524_v62  ;;  %v16155_v57 = vpop.f32.mrb[35].mxu0  ;;  %v17166_v62 = vld [vmem:[%s21524_s8 + $0x90] ss:$8 sps:$4 sm:$0xff]  }
0x1985   : > { %16683 = vmatpush1.bf16.msra.mxu1 %v17166_v62 }
0x1986   : > { %12304 = vadd.xlane.f32.xlu1 %v20828_v32  ;;  %16685 = vmatprep.subr.bf16.mxu1 %v17167_v8 }
0x1989   : > { %16687 = vmatpush1.bf16.msra.mxu1 %v17169_v59 }
0x198a   : > { %16689 = vmatprep.subr.bf16.mxu1 %v17170_v16 }
0x198d   : > { %16691 = vmatpush1.bf16.msra.mxu1 %v17172_v27 }
0x19d7   : > { %v12275_v4 = vpop.xlane.xlu0 %12274 }
0x19d8   : > { %v12306_v14 = vmul.f32 0.0078125, %v12275_v4 }
0x19da   : > { %v20856_v38 = vsub.f32 %v20768_v36, %v12306_v14 }
0x19db   : > { %v12277_v49 = vpop.xlane.xlu1 %12276 }
0x19dc   : > { %v12307_v41 = vmul.f32 0.0078125, %v12277_v49  ;;  %v12338_v12 = vmul.f32 %v20856_v38, %v20856_v38 }
0x19de   : > { %v20861_v19 = vsub.f32 %v20772_v21, %v12307_v41  ;;  %12354 = vadd.xlane.f32.xlu0 %v12338_v12 }
0x19df   : > { %v12279_v55 = vpop.xlane.xlu0 %12278 }
0x19e0   : > { %v12308_v1 = vmul.f32 0.0078125, %v12279_v55  ;;  %v12339_v11 = vmul.f32 %v20861_v19, %v20861_v19 }
0x19e2   : > { %v20866_v18 = vsub.f32 %v20776_v20, %v12308_v1  ;;  %12356 = vadd.xlane.f32.xlu1 %v12339_v11 }
0x19e3   : > { %v12281_v36 = vpop.xlane.xlu1 %12280 }
0x19e4   : > { %v12309_v52 = vmul.f32 0.0078125, %v12281_v36  ;;  %v12340_v9 = vmul.f32 %v20866_v18, %v20866_v18 }
0x19e6   : > { %v20871_v47 = vsub.f32 %v20780_v29, %v12309_v52  ;;  %12358 = vadd.xlane.f32.xlu0 %v12340_v9  ;;  %v17173_v29 = vld [vmem:[%s21524_s8 + $0xc4] ss:$8 sps:$4 sm:$0xff]  }
0x19e7   : > { %v12283_v21 = vpop.xlane.xlu0 %12282  ;;  %16693 = vmatprep.subr.bf16.mxu1 %v17173_v29  ;;  %v14522_v29 = vld [vmem:[#allocation10 + $0x90] sm:$0xff]  }
0x19e8   : > { %v12310_v39 = vmul.f32 0.0078125, %v12283_v21  ;;  %v12341_v56 = vmul.f32 %v20871_v47, %v20871_v47  ;;  %16695 = vmatpush1.bf16.msra.mxu1 %v17175_v48  ;;  %v14531_v48 = vld [vmem:[#allocation10 + $0xd8] sm:$0xff]  }
0x19e9   : > { %16697 = vmatprep.subr.bf16.mxu1 %v17176_v61  ;;  %v14525_v61 = vld [vmem:[#allocation10 + $0xa8] sm:$0xff]  }
0x19ea   : > { %v20876_v63 = vsub.f32 %v20784_v10, %v12310_v39  ;;  %12360 = vadd.xlane.f32.xlu1 %v12341_v56  ;;  %v14528_v56 = vld [vmem:[#allocation10 + $0xc0] sm:$0xff]  }
0x19eb   : > { %v12285_v20 = vpop.xlane.xlu1 %12284  ;;  %16709 = vmatprep.subr.bf16.mxu0 %v14528_v56 }
0x19ec   : > { %v12311_v51 = vmul.f32 0.0078125, %v12285_v20  ;;  %v12342_v35 = vmul.f32 %v20876_v63, %v20876_v63  ;;  %16699 = vmatpush1.bf16.msra.mxu1 %v17178_v54  ;;  %v14317_v20 = vld [vmem:[#allocation10 + $0x80] sm:$0xff]   ;;  %v14534_v54 = vld [vmem:[#allocation10 + $0xf0] sm:$0xff]  }
0x19ed   : > { %16701 = vmatprep.subr.bf16.mxu1 %v17179_v33  ;;  %16711 = vmatpush3.bf16.msra.mxu0 %v14317_v20 }
0x19ee   : > { %v20887_v3 = vsub.f32 %v20788_v13, %v12311_v51  ;;  %12362 = vadd.xlane.f32.xlu0 %v12342_v35  ;;  %v14529_v51 = vld [vmem:[#allocation10 + $0xc8] sm:$0xff]   ;;  %v14530_v35 = vld [vmem:[#allocation10 + $0xd0] sm:$0xff]  }
0x19ef   : > { %v12287_v10 = vpop.xlane.xlu0 %12286  ;;  %16713 = vmatprep.subr.bf16.mxu0 %v14529_v51 }
0x19f0   : > { %v12312_v17 = vmul.f32 0.0078125, %v12287_v10  ;;  %v12343_v6 = vmul.f32 %v20887_v3, %v20887_v3  ;;  %16703 = vmatpush1.bf16.msra.mxu1 %v17181_v23  ;;  %v14532_v10 = vld [vmem:[#allocation10 + $0xe0] sm:$0xff]  }
0x19f1   : > { %16705 = vmatprep.subr.bf16.mxu1 %v17182_v58 }
0x19f2   : > { %v20898_v60 = vsub.f32 %v20792_v28, %v12312_v17  ;;  %12364 = vadd.xlane.f32.xlu1 %v12343_v6  ;;  %v14524_v17 = vld [vmem:[#allocation10 + $0xa0] sm:$0xff]   ;;  %v14533_v6 = vld [vmem:[#allocation10 + $0xe8] sm:$0xff]  }
0x19f3   : > { %v12289_v13 = vpop.xlane.xlu1 %12288 }
0x19f4   : > { %v12313_v26 = vmul.f32 0.0078125, %v12289_v13  ;;  %v12344_v37 = vmul.f32 %v20898_v60, %v20898_v60  ;;  %16707 = vmatpush1.bf16.msra.mxu1 %v17184_v7 }
0x19f6   : > { %v20909_v24 = vsub.f32 %v20796_v42, %v12313_v26  ;;  %12366 = vadd.xlane.f32.xlu0 %v12344_v37 }
0x19f7   : > { %v12291_v28 = vpop.xlane.xlu0 %12290 }
0x19f8   : > { %v12314_v2 = vmul.f32 0.0078125, %v12291_v28  ;;  %v12345_v25 = vmul.f32 %v20909_v24, %v20909_v24 }
0x19fa   : > { %v20920_v43 = vsub.f32 %v20800_v5, %v12314_v2  ;;  %12368 = vadd.xlane.f32.xlu1 %v12345_v25 }
0x19fb   : > { %v12293_v42 = vpop.xlane.xlu1 %12292 }
0x19fc   : > { %v12315_v57 = vmul.f32 0.0078125, %v12293_v42  ;;  %v12346_v31 = vmul.f32 %v20920_v43, %v20920_v43 }
0x19fe   : > { %v20925_v45 = vsub.f32 %v20804_v34, %v12315_v57  ;;  %12370 = vadd.xlane.f32.xlu0 %v12346_v31 }
0x19ff   : > { %v12295_v15 = vpop.xlane.xlu0 %12294 }
0x1a00   : > { %v12316_v62 = vmul.f32 0.0078125, %v12295_v15  ;;  %v12347_v8 = vmul.f32 %v20925_v45, %v20925_v45 }
0x1a02   : > { %v20930_v5 = vsub.f32 %v20808_v0, %v12316_v62  ;;  %12372 = vadd.xlane.f32.xlu1 %v12347_v8 }
0x1a03   : > { %v12297_v59 = vpop.xlane.xlu1 %12296 }
0x1a04   : > { %v12317_v16 = vmul.f32 0.0078125, %v12297_v59  ;;  %v12348_v27 = vmul.f32 %v20930_v5, %v20930_v5 }
0x1a06   : > { %v20935_v4 = vsub.f32 %v20812_v53, %v12317_v16  ;;  %12374 = vadd.xlane.f32.xlu0 %v12348_v27 }
0x1a07   : > { %v12299_v34 = vpop.xlane.xlu0 %12298 }
0x1a08   : > { %v12318_v14 = vmul.f32 0.0078125, %v12299_v34  ;;  %v12349_v49 = vmul.f32 %v20935_v4, %v20935_v4 }
0x1a0a   : > { %v20940_v41 = vsub.f32 %v20816_v44, %v12318_v14  ;;  %12376 = vadd.xlane.f32.xlu1 %v12349_v49 }
0x1a0b   : > { %v12301_v0 = vpop.xlane.xlu1 %12300 }
0x1a0c   : > { %v12319_v12 = vmul.f32 0.0078125, %v12301_v0  ;;  %v12350_v55 = vmul.f32 %v20940_v41, %v20940_v41 }
0x1a0e   : > { %v20945_v1 = vsub.f32 %v20820_v30, %v12319_v12  ;;  %12378 = vadd.xlane.f32.xlu0 %v12350_v55 }
0x1a0f   : > { %v12303_v53 = vpop.xlane.xlu0 %12302 }
0x1a10   : > { %v12320_v11 = vmul.f32 0.0078125, %v12303_v53  ;;  %v12351_v36 = vmul.f32 %v20945_v1, %v20945_v1 }
0x1a12   : > { %v20950_v52 = vsub.f32 %v20824_v50, %v12320_v11  ;;  %12380 = vadd.xlane.f32.xlu1 %v12351_v36  ;;  %v14521_v50 = vld [vmem:[#allocation10 + $0x88] sm:$0xff]  }
0x1a13   : > { %v12305_v44 = vpop.xlane.xlu1 %12304  ;;  %16715 = vmatpush3.bf16.msra.mxu0 %v14521_v50 }
0x1a14   : > { %v12321_v9 = vmul.f32 0.0078125, %v12305_v44  ;;  %v12352_v21 = vmul.f32 %v20950_v52, %v20950_v52  ;;  %16717 = vmatprep.subr.bf16.mxu0 %v14530_v35 }
0x1a16   : > { %v20955_v39 = vsub.f32 %v20828_v32, %v12321_v9  ;;  %12382 = vadd.xlane.f32.xlu0 %v12352_v21  ;;  %v14523_v32 = vld [vmem:[#allocation10 + $0x98] sm:$0xff]  }
0x1a17   : > { %16719 = vmatpush3.bf16.msra.mxu0 %v14522_v29 }
0x1a18   : > { %v12353_v30 = vmul.f32 %v20955_v39, %v20955_v39  ;;  %16721 = vmatprep.subr.bf16.mxu0 %v14531_v48 }
0x1a1a   : > { %12384 = vadd.xlane.f32.xlu1 %v12353_v30 }
0x1a1b   : > { %16723 = vmatpush3.bf16.msra.mxu0 %v14523_v32 }
0x1a1c   : > { %16725 = vmatprep.subr.bf16.mxu0 %v14532_v10 }
0x1a1f   : > { %16727 = vmatpush3.bf16.msra.mxu0 %v14524_v17 }
0x1a20   : > { %16729 = vmatprep.subr.bf16.mxu0 %v14533_v6 }
0x1a23   : > { %16731 = vmatpush3.bf16.msra.mxu0 %v14525_v61 }
0x1a24   : > { %16733 = vmatprep.subr.bf16.mxu0 %v14534_v54 }
0x1a6b   : > { %v12355_v13 = vpop.xlane.xlu0 %12354 }
0x1a6c   : > { %v12386_v26 = vmul.f32 0.0078125, %v12355_v13 }
0x1a6e   : > { %v12402_v37 = vadd.f32 1e-05, %v12386_v26 }
0x1a6f   : > { %v12357_v33 = vpop.xlane.xlu1 %12356 }
0x1a70   : > { %17505 = vrsqrt.f32 %v12402_v37  ;;  %v12387_v23 = vmul.f32 0.0078125, %v12357_v33 }
0x1a72   : > { %v12403_v28 = vadd.f32 1e-05, %v12387_v23 }
0x1a73   : > { %v12359_v2 = vpop.xlane.xlu0 %12358 }
0x1a74   : > { %17507 = vrsqrt.f32 %v12403_v28  ;;  %v12388_v25 = vmul.f32 0.0078125, %v12359_v2 }
0x1a76   : > { %v12404_v58 = vadd.f32 1e-05, %v12388_v25 }
0x1a77   : > { %v12361_v7 = vpop.xlane.xlu1 %12360 }
0x1a78   : > { %17509 = vrsqrt.f32 %v12404_v58  ;;  %v12389_v42 = vmul.f32 0.0078125, %v12361_v7 }
0x1a7a   : > { %v17506_v57 = vpop.eup %17505  ;;  %v12405_v31 = vadd.f32 1e-05, %v12389_v42 }
0x1a7b   : > { %v20960_v15 = vmul.f32 %v17506_v57, %v20856_v38  ;;  %v12363_v62 = vpop.xlane.xlu0 %12362 }
0x1a7c   : > { %17511 = vrsqrt.f32 %v12405_v31  ;;  %v12390_v8 = vmul.f32 0.0078125, %v12363_v62 }
0x1a7d   : > { %12555 = vmatmul.mubr.f32.vlgmr.msra.gmra.mrb[12].mxu1 %v20960_v15 }
0x1a7e   : > { %v17508_v59 = vpop.eup %17507  ;;  %v12406_v16 = vadd.f32 1e-05, %v12390_v8  ;;  %12560 = vmatprep.mubr.f32.mxu1 %v21613_v40 }
0x1a7f   : > { %v12365_v27 = vpop.xlane.xlu1 %12364  ;;  %v20965_v34 = vmul.f32 %v17508_v59, %v20861_v19 }
0x1a80   : > { %17513 = vrsqrt.f32 %v12406_v16  ;;  %v12391_v14 = vmul.f32 0.0078125, %v12365_v27 }
0x1a81   : > { %12561 = vmatmul.mubr.f32.gmra.mrb[14].mxu1 %v20965_v34 }
0x1a82   : > { %v17510_v49 = vpop.eup %17509  ;;  %v12407_v38 = vadd.f32 1e-05, %v12391_v14  ;;  %12566 = vmatprep.mubr.f32.mxu1 %v21613_v40 }
0x1a83   : > { %v12367_v0 = vpop.xlane.xlu0 %12366  ;;  %v20970_v12 = vmul.f32 %v17510_v49, %v20866_v18 }
0x1a84   : > { %17515 = vrsqrt.f32 %v12407_v38  ;;  %v12392_v55 = vmul.f32 0.0078125, %v12367_v0 }
0x1a85   : > { %12567 = vmatmul.mubr.f32.gmra.mrb[16].mxu1 %v20970_v12 }
0x1a86   : > { %v17512_v53 = vpop.eup %17511  ;;  %v12408_v11 = vadd.f32 1e-05, %v12392_v55  ;;  %12572 = vmatprep.mubr.f32.mxu1 %v21613_v40  ;;  %v14535_v55 = vld [vmem:[#allocation10 + $0xf8] sm:$0xff]  }
0x1a87   : > { %v12369_v19 = vpop.xlane.xlu1 %12368  ;;  %v20975_v36 = vmul.f32 %v17512_v53, %v20871_v47  ;;  %v14527_v53 = vld [vmem:[#allocation10 + $0xb8] sm:$0xff]  }
0x1a88   : > { %17517 = vrsqrt.f32 %v12408_v11  ;;  %v12393_v44 = vmul.f32 0.0078125, %v12369_v19  ;;  %v21623_v11 = vld [vmem:[#allocation20_spill] sm:$0xff] }
0x1a89   : > { %12573 = vmatmul.mubr.f32.gmra.mrb[18].mxu1 %v20975_v36  ;;  %v21044_v19 = vrot.slane %v19325_v46, %v21623_v11 }
0x1a8a   : > { %v17514_v9 = vpop.eup %17513  ;;  %v12409_v21 = vadd.f32 1e-05, %v12393_v44  ;;  %12578 = vmatprep.mubr.f32.mxu1 %v21613_v40 }
0x1a8b   : > { %v12371_v18 = vpop.xlane.xlu0 %12370  ;;  %v20980_v30 = vmul.f32 %v17514_v9, %v20876_v63 }
0x1a8c   : > { %17519 = vrsqrt.f32 %v12409_v21  ;;  %v12394_v56 = vmul.f32 0.0078125, %v12371_v18 }
0x1a8d   : > { %12579 = vmatmul.mubr.f32.gmra.mrb[20].mxu1 %v20980_v30 }
0x1a8e   : > { %v17516_v20 = vpop.eup %17515  ;;  %v12410_v51 = vadd.f32 1e-05, %v12394_v56  ;;  %12584 = vmatprep.mubr.f32.mxu1 %v21613_v40 }
0x1a8f   : > { %v12373_v47 = vpop.xlane.xlu1 %12372  ;;  %v20985_v50 = vmul.f32 %v17516_v20, %v20887_v3 }
0x1a90   : > { %17521 = vrsqrt.f32 %v12410_v51  ;;  %v12395_v35 = vmul.f32 0.0078125, %v12373_v47 }
0x1a91   : > { %12585 = vmatmul.mubr.f32.gmra.mrb[22].mxu1 %v20985_v50 }
0x1a92   : > { %v17518_v29 = vpop.eup %17517  ;;  %v12411_v48 = vadd.f32 1e-05, %v12395_v35  ;;  %12590 = vmatprep.mubr.f32.mxu1 %v21613_v40 }
0x1a93   : > { %v12375_v63 = vpop.xlane.xlu0 %12374  ;;  %v20990_v32 = vmul.f32 %v17518_v29, %v20898_v60 }
0x1a94   : > { %17523 = vrsqrt.f32 %v12411_v48  ;;  %v12396_v10 = vmul.f32 0.0078125, %v12375_v63 }
0x1a95   : > { %12591 = vmatmul.mubr.f32.gmra.mrb[24].mxu1 %v20990_v32 }
0x1a96   : > { %v17520_v17 = vpop.eup %17519  ;;  %v12412_v6 = vadd.f32 1e-05, %v12396_v10  ;;  %12596 = vmatprep.mubr.f32.mxu1 %v21613_v40 }
0x1a97   : > { %v12377_v3 = vpop.xlane.xlu1 %12376  ;;  %v20995_v61 = vmul.f32 %v17520_v17, %v20909_v24 }
0x1a98   : > { %17525 = vrsqrt.f32 %v12412_v6  ;;  %v12397_v54 = vmul.f32 0.0078125, %v12377_v3 }
0x1a99   : > { %12597 = vmatmul.mubr.f32.gmra.mrb[26].mxu1 %v20995_v61 }
0x1a9a   : > { %v17522_v13 = vpop.eup %17521  ;;  %v12413_v26 = vadd.f32 1e-05, %v12397_v54  ;;  %12602 = vmatprep.mubr.f32.mxu1 %v21613_v40 }
0x1a9b   : > { %v12379_v60 = vpop.xlane.xlu0 %12378  ;;  %v21000_v37 = vmul.f32 %v17522_v13, %v20920_v43 }
0x1a9c   : > { %17527 = vrsqrt.f32 %v12413_v26  ;;  %v12398_v33 = vmul.f32 0.0078125, %v12379_v60 }
0x1a9d   : > { %12603 = vmatmul.mubr.f32.gmra.mrb[28].mxu1 %v21000_v37 }
0x1a9e   : > { %v17524_v23 = vpop.eup %17523  ;;  %v12414_v28 = vadd.f32 1e-05, %v12398_v33  ;;  %12608 = vmatprep.mubr.f32.mxu1 %v21613_v40 }
0x1a9f   : > { %v12381_v24 = vpop.xlane.xlu1 %12380  ;;  %v21005_v2 = vmul.f32 %v17524_v23, %v20925_v45 }
0x1aa0   : > { %17529 = vrsqrt.f32 %v12414_v28  ;;  %v12399_v25 = vmul.f32 0.0078125, %v12381_v24 }
0x1aa1   : > { %12609 = vmatmul.mubr.f32.gmra.mrb[30].mxu1 %v21005_v2 }
0x1aa2   : > { %v17526_v58 = vpop.eup %17525  ;;  %v12415_v7 = vadd.f32 1e-05, %v12399_v25  ;;  %12614 = vmatprep.mubr.f32.mxu1 %v21613_v40 }
0x1aa3   : > { %v12383_v43 = vpop.xlane.xlu0 %12382  ;;  %v21010_v42 = vmul.f32 %v17526_v58, %v20930_v5 }
0x1aa4   : > { %17531 = vrsqrt.f32 %v12415_v7  ;;  %v12400_v57 = vmul.f32 0.0078125, %v12383_v43 }
0x1aa5   : > { %12615 = vmatmul.mubr.f32.gmra.mrb[32].mxu1 %v21010_v42 }
0x1aa6   : > { %v17528_v31 = vpop.eup %17527  ;;  %v12416_v62 = vadd.f32 1e-05, %v12400_v57  ;;  %12620 = vmatprep.mubr.f32.mxu1 %v21613_v40 }
0x1aa7   : > { %v12385_v45 = vpop.xlane.xlu1 %12384  ;;  %v21015_v8 = vmul.f32 %v17528_v31, %v20935_v4 }
0x1aa8   : > { %17533 = vrsqrt.f32 %v12416_v62  ;;  %v12401_v59 = vmul.f32 0.0078125, %v12385_v45 }
0x1aa9   : > { %12621 = vmatmul.mubr.f32.gmra.mrb[34].mxu1 %v21015_v8 }
0x1aaa   : > { %v17530_v16 = vpop.eup %17529  ;;  %v12417_v27 = vadd.f32 1e-05, %v12401_v59  ;;  %12626 = vmatprep.mubr.f32.mxu1 %v21613_v40 }
0x1aab   : > { %v21020_v5 = vmul.f32 %v17530_v16, %v20940_v41 }
0x1aac   : > { %17535 = vrsqrt.f32 %v12417_v27 }
0x1aad   : > { %12627 = vmatmul.mubr.f32.gmra.mrb[36].mxu1 %v21020_v5 }
0x1aae   : > { %v17532_v14 = vpop.eup %17531  ;;  %12632 = vmatprep.mubr.f32.mxu1 %v21613_v40 }
0x1aaf   : > { %v21025_v4 = vmul.f32 %v17532_v14, %v20945_v1  ;;  %v14526_v1 = vld [vmem:[#allocation10 + $0xb0] sm:$0xff]  }
0x1ab0   : > { %16735 = vmatpush3.bf16.msra.mxu0 %v14526_v1 }
0x1ab1   : > { %12633 = vmatmul.mubr.f32.gmra.mrb[38].mxu1 %v21025_v4  ;;  %16737 = vmatprep.subr.bf16.mxu0 %v14535_v55 }
0x1ab2   : > { %v17534_v49 = vpop.eup %17533  ;;  %12638 = vmatprep.mubr.f32.mxu1 %v21613_v40 }
0x1ab3   : > { %v21030_v38 = vmul.f32 %v17534_v49, %v20950_v52  ;;  %v21040_v52 = vrot.slane %v19049_v22, %v21623_v11 }
0x1ab4   : > { %16739 = vmatpush3.bf16.msra.mxu0 %v14527_v53 }
0x1ab5   : > { %12639 = vmatmul.mubr.f32.gmra.mrb[40].mxu1 %v21030_v38 }
0x1ab6   : > { %v17536_v41 = vpop.eup %17535  ;;  %12644 = vmatprep.mubr.f32.mxu1 %v21613_v40 }
0x1ab7   : > { %v21035_v0 = vmul.f32 %v17536_v41, %v20955_v39 }
0x1ab9   : > { %12645 = vmatmul.mubr.f32.gmra.mrb[42].mxu1 %v21035_v0 }
0x1b50   : > { %v12556_v40 = vpop.f32.mrb[12].mxu1 }
0x1b51   : > { %v12557_v39 = vadd.f32 %v12556_v40, %v21040_v52  ;;  %v12558_v44 = vpop.f32.mrb[13].mxu1 }
0x1b52   : > { %v12559_v9 = vadd.f32 %v12558_v44, %v21044_v19 }
0x1b53   : > { %v12651_v56 = vmax.f32 %v12557_v39, 0.0 }
0x1b54   : > { %v12652_v21 = vmax.f32 %v12559_v9, 0.0  ;;  %v12562_v18 = vpop.f32.mrb[14].mxu1 }
0x1b55   : > { %v12563_v20 = vadd.f32 %v12562_v18, %v21040_v52  ;;  %v12564_v51 = vpop.f32.mrb[15].mxu1 }
0x1b56   : > { %v12565_v47 = vadd.f32 %v12564_v51, %v21044_v19  ;;  %12783 = vmatprep.mubr.f32.mxu0 %v12652_v21 }
0x1b57   : > { %12784 = vmatmul.mubr.f32.vlgmr.msra.gmra.mrb[36].mxu0 %v12651_v56  ;;  %v12653_v46 = vmax.f32 %v12563_v20, 0.0 }
0x1b58   : > { %v12654_v35 = vmax.f32 %v12565_v47, 0.0  ;;  %v12568_v29 = vpop.f32.mrb[16].mxu1 }
0x1b59   : > { %v12569_v48 = vadd.f32 %v12568_v29, %v21040_v52  ;;  %v12570_v63 = vpop.f32.mrb[17].mxu1 }
0x1b5a   : > { %v12571_v10 = vadd.f32 %v12570_v63, %v21044_v19  ;;  %12788 = vmatprep.mubr.f32.mxu0 %v12654_v35 }
0x1b5b   : > { %12789 = vmatmul.mubr.f32.gmra.mrb[38].mxu0 %v12653_v46  ;;  %v12655_v3 = vmax.f32 %v12569_v48, 0.0 }
0x1b5c   : > { %v12656_v17 = vmax.f32 %v12571_v10, 0.0  ;;  %v12574_v6 = vpop.f32.mrb[18].mxu1 }
0x1b5d   : > { %v12575_v54 = vadd.f32 %v12574_v6, %v21040_v52  ;;  %v12576_v13 = vpop.f32.mrb[19].mxu1 }
0x1b5e   : > { %v12577_v26 = vadd.f32 %v12576_v13, %v21044_v19  ;;  %12793 = vmatprep.mubr.f32.mxu0 %v12656_v17 }
0x1b5f   : > { %12794 = vmatmul.mubr.f32.gmra.mrb[40].mxu0 %v12655_v3  ;;  %v12657_v23 = vmax.f32 %v12575_v54, 0.0 }
0x1b60   : > { %v12658_v60 = vmax.f32 %v12577_v26, 0.0  ;;  %v12580_v33 = vpop.f32.mrb[20].mxu1 }
0x1b61   : > { %v12581_v28 = vadd.f32 %v12580_v33, %v21040_v52  ;;  %v12582_v24 = vpop.f32.mrb[21].mxu1 }
0x1b62   : > { %v12583_v25 = vadd.f32 %v12582_v24, %v21044_v19  ;;  %12798 = vmatprep.mubr.f32.mxu0 %v12658_v60 }
0x1b63   : > { %12799 = vmatmul.mubr.f32.gmra.mrb[42].mxu0 %v12657_v23  ;;  %v12659_v43 = vmax.f32 %v12581_v28, 0.0 }
0x1b64   : > { %v12660_v58 = vmax.f32 %v12583_v25, 0.0  ;;  %v12586_v7 = vpop.f32.mrb[22].mxu1 }
0x1b65   : > { %v12587_v57 = vadd.f32 %v12586_v7, %v21040_v52  ;;  %v12588_v31 = vpop.f32.mrb[23].mxu1 }
0x1b66   : > { %v12589_v62 = vadd.f32 %v12588_v31, %v21044_v19  ;;  %12803 = vmatprep.mubr.f32.mxu0 %v12660_v58 }
0x1b67   : > { %12804 = vmatmul.mubr.f32.gmra.mrb[44].mxu0 %v12659_v43  ;;  %v12661_v16 = vmax.f32 %v12587_v57, 0.0 }
0x1b68   : > { %v12662_v45 = vmax.f32 %v12589_v62, 0.0  ;;  %v12592_v59 = vpop.f32.mrb[24].mxu1 }
0x1b69   : > { %v12593_v27 = vadd.f32 %v12592_v59, %v21040_v52  ;;  %v12594_v14 = vpop.f32.mrb[25].mxu1 }
0x1b6a   : > { %v12595_v49 = vadd.f32 %v12594_v14, %v21044_v19  ;;  %12808 = vmatprep.mubr.f32.mxu0 %v12662_v45 }
0x1b6b   : > { %12809 = vmatmul.mubr.f32.gmra.mrb[46].mxu0 %v12661_v16  ;;  %v12663_v55 = vmax.f32 %v12593_v27, 0.0 }
0x1b6c   : > { %v12664_v41 = vmax.f32 %v12595_v49, 0.0  ;;  %v12598_v1 = vpop.f32.mrb[26].mxu1 }
0x1b6d   : > { %v12599_v53 = vadd.f32 %v12598_v1, %v21040_v52  ;;  %v12600_v11 = vpop.f32.mrb[27].mxu1 }
0x1b6e   : > { %v12601_v40 = vadd.f32 %v12600_v11, %v21044_v19  ;;  %12813 = vmatprep.mubr.f32.mxu0 %v12664_v41 }
0x1b6f   : > { %12814 = vmatmul.mubr.f32.gmra.mrb[48].mxu0 %v12663_v55  ;;  %v12665_v9 = vmax.f32 %v12599_v53, 0.0 }
0x1b70   : > { %v12666_v39 = vmax.f32 %v12601_v40, 0.0  ;;  %v12604_v44 = vpop.f32.mrb[28].mxu1 }
0x1b71   : > { %v12605_v21 = vadd.f32 %v12604_v44, %v21040_v52  ;;  %v12606_v18 = vpop.f32.mrb[29].mxu1 }
0x1b72   : > { %v12607_v56 = vadd.f32 %v12606_v18, %v21044_v19  ;;  %12818 = vmatprep.mubr.f32.mxu0 %v12666_v39 }
0x1b73   : > { %12819 = vmatmul.mubr.f32.gmra.mrb[50].mxu0 %v12665_v9  ;;  %v12667_v47 = vmax.f32 %v12605_v21, 0.0 }
0x1b74   : > { %v12668_v20 = vmax.f32 %v12607_v56, 0.0  ;;  %v12610_v51 = vpop.f32.mrb[30].mxu1 }
0x1b75   : > { %v12611_v35 = vadd.f32 %v12610_v51, %v21040_v52  ;;  %v12612_v29 = vpop.f32.mrb[31].mxu1 }
0x1b76   : > { %v12613_v46 = vadd.f32 %v12612_v29, %v21044_v19  ;;  %12823 = vmatprep.mubr.f32.mxu0 %v12668_v20  ;;  %v21624_v20 = vld [vmem:[#allocation37_spill] sm:$0xff] }
0x1b77   : > { %12824 = vmatmul.mubr.f32.gmra.mrb[52].mxu0 %v12667_v47  ;;  %v12669_v10 = vmax.f32 %v12611_v35, 0.0  ;;  %v21080_v51 = vrot.slane %v19049_v22, %v21624_v20 }
0x1b78   : > { %v12670_v48 = vmax.f32 %v12613_v46, 0.0  ;;  %v12616_v63 = vpop.f32.mrb[32].mxu1 }
0x1b79   : > { %v12617_v17 = vadd.f32 %v12616_v63, %v21040_v52  ;;  %v12618_v6 = vpop.f32.mrb[33].mxu1 }
0x1b7a   : > { %v12619_v3 = vadd.f32 %v12618_v6, %v21044_v19  ;;  %12828 = vmatprep.mubr.f32.mxu0 %v12670_v48 }
0x1b7b   : > { %12829 = vmatmul.mubr.f32.gmra.mrb[54].mxu0 %v12669_v10  ;;  %v12671_v26 = vmax.f32 %v12617_v17, 0.0 }
0x1b7c   : > { %v12672_v54 = vmax.f32 %v12619_v3, 0.0  ;;  %v12622_v13 = vpop.f32.mrb[34].mxu1 }
0x1b7d   : > { %v12623_v60 = vadd.f32 %v12622_v13, %v21040_v52  ;;  %v12624_v33 = vpop.f32.mrb[35].mxu1 }
0x1b7e   : > { %v12625_v23 = vadd.f32 %v12624_v33, %v21044_v19  ;;  %12833 = vmatprep.mubr.f32.mxu0 %v12672_v54 }
0x1b7f   : > { %12834 = vmatmul.mubr.f32.gmra.mrb[56].mxu0 %v12671_v26  ;;  %v12673_v25 = vmax.f32 %v12623_v60, 0.0 }
0x1b80   : > { %v12674_v28 = vmax.f32 %v12625_v23, 0.0  ;;  %v12628_v24 = vpop.f32.mrb[36].mxu1 }
0x1b81   : > { %v12629_v58 = vadd.f32 %v12628_v24, %v21040_v52  ;;  %v12630_v7 = vpop.f32.mrb[37].mxu1 }
0x1b82   : > { %v12631_v43 = vadd.f32 %v12630_v7, %v21044_v19  ;;  %12838 = vmatprep.mubr.f32.mxu0 %v12674_v28 }
0x1b83   : > { %12839 = vmatmul.mubr.f32.gmra.mrb[58].mxu0 %v12673_v25  ;;  %v12675_v62 = vmax.f32 %v12629_v58, 0.0 }
0x1b84   : > { %v12676_v57 = vmax.f32 %v12631_v43, 0.0  ;;  %v12634_v31 = vpop.f32.mrb[38].mxu1 }
0x1b85   : > { %v12635_v45 = vadd.f32 %v12634_v31, %v21040_v52  ;;  %v12636_v59 = vpop.f32.mrb[39].mxu1 }
0x1b86   : > { %v12637_v16 = vadd.f32 %v12636_v59, %v21044_v19  ;;  %12843 = vmatprep.mubr.f32.mxu0 %v12676_v57 }
0x1b87   : > { %12844 = vmatmul.mubr.f32.gmra.mrb[60].mxu0 %v12675_v62  ;;  %v12677_v49 = vmax.f32 %v12635_v45, 0.0 }
0x1b88   : > { %v12678_v27 = vmax.f32 %v12637_v16, 0.0  ;;  %v12640_v14 = vpop.f32.mrb[40].mxu1 }
0x1b89   : > { %v12641_v41 = vadd.f32 %v12640_v14, %v21040_v52  ;;  %v12642_v1 = vpop.f32.mrb[41].mxu1 }
0x1b8a   : > { %v12643_v55 = vadd.f32 %v12642_v1, %v21044_v19  ;;  %12848 = vmatprep.mubr.f32.mxu0 %v12678_v27 }
0x1b8b   : > { %12849 = vmatmul.mubr.f32.gmra.mrb[62].mxu0 %v12677_v49  ;;  %v12679_v40 = vmax.f32 %v12641_v41, 0.0 }
0x1b8c   : > { %v12680_v53 = vmax.f32 %v12643_v55, 0.0  ;;  %v12646_v11 = vpop.f32.mrb[42].mxu1 }
0x1b8d   : > { %v12647_v39 = vadd.f32 %v12646_v11, %v21040_v52  ;;  %v12648_v44 = vpop.f32.mrb[43].mxu1 }
0x1b8e   : > { %v12649_v9 = vadd.f32 %v12648_v44, %v21044_v19  ;;  %12853 = vmatprep.mubr.f32.mxu0 %v12680_v53 }
0x1b8f   : > { %12854 = vmatmul.mubr.f32.gmra.mrb[64].mxu0 %v12679_v40  ;;  %v12681_v18 = vmax.f32 %v12647_v39, 0.0 }
0x1b90   : > { %v12682_v21 = vmax.f32 %v12649_v9, 0.0 }
0x1b92   : > { %12858 = vmatprep.mubr.f32.mxu0 %v12682_v21 }
0x1b93   : > { %12859 = vmatmul.mubr.f32.gmra.mrb[66].mxu0 %v12681_v18 }
0x1c2a   : > { %v15162_v56 = vpop.f32.mrb[36].mxu0 }
0x1c2b   : > { %v15163_v47 = vpop.f32.mrb[37].mxu0 }
0x1c2c   : > { %v15164_v35 = vadd.f32 %v15163_v47, %v15162_v56 }
0x1c2e   : > { %v12786_v29 = vadd.f32 %v15164_v35, %v21080_v51  ;;  %v15165_v46 = vpop.f32.mrb[38].mxu0 }
0x1c2f   : > { %v15166_v52 = vpop.f32.mrb[39].mxu0 }
0x1c30   : > { %v15167_v48 = vadd.f32 %v15166_v52, %v15165_v46  ;;  %v21084_v19 = vadd.f32 %v12786_v29, %v20960_v15 }
0x1c32   : > { %v12791_v63 = vadd.f32 %v15167_v48, %v21080_v51  ;;  %v15168_v10 = vpop.f32.mrb[40].mxu0  ;;  %12880 = vadd.xlane.f32.xlu0 %v21084_v19 }
0x1c33   : > { %v15169_v17 = vpop.f32.mrb[41].mxu0 }
0x1c34   : > { %v15170_v6 = vadd.f32 %v15169_v17, %v15168_v10  ;;  %v21089_v3 = vadd.f32 %v12791_v63, %v20965_v34 }
0x1c36   : > { %v12796_v54 = vadd.f32 %v15170_v6, %v21080_v51  ;;  %v15171_v13 = vpop.f32.mrb[42].mxu0  ;;  %12882 = vadd.xlane.f32.xlu1 %v21089_v3 }
0x1c37   : > { %v15172_v26 = vpop.f32.mrb[43].mxu0 }
0x1c38   : > { %v15173_v60 = vadd.f32 %v15172_v26, %v15171_v13  ;;  %v21094_v15 = vadd.f32 %v12796_v54, %v20970_v12 }
0x1c3a   : > { %v12801_v33 = vadd.f32 %v15173_v60, %v21080_v51  ;;  %v15174_v23 = vpop.f32.mrb[44].mxu0  ;;  %12884 = vadd.xlane.f32.xlu0 %v21094_v15 }
0x1c3b   : > { %v15175_v28 = vpop.f32.mrb[45].mxu0 }
0x1c3c   : > { %v15176_v24 = vadd.f32 %v15175_v28, %v15174_v23  ;;  %v21099_v34 = vadd.f32 %v12801_v33, %v20975_v36 }
0x1c3e   : > { %v12806_v25 = vadd.f32 %v15176_v24, %v21080_v51  ;;  %v15177_v58 = vpop.f32.mrb[46].mxu0  ;;  %12886 = vadd.xlane.f32.xlu1 %v21099_v34 }
0x1c3f   : > { %v15178_v7 = vpop.f32.mrb[47].mxu0 }
0x1c40   : > { %v15179_v43 = vadd.f32 %v15178_v7, %v15177_v58  ;;  %v21104_v12 = vadd.f32 %v12806_v25, %v20980_v30  ;;  %v14536_v7 = vld [vmem:[%s21526_s10 + $0x8] sm:$0xff]  }
0x1c42   : > { %v12811_v57 = vadd.f32 %v15179_v43, %v21080_v51  ;;  %v15180_v31 = vpop.f32.mrb[48].mxu0  ;;  %12888 = vadd.xlane.f32.xlu0 %v21104_v12 }
0x1c43   : > { %v15181_v62 = vpop.f32.mrb[49].mxu0 }
0x1c44   : > { %v15182_v45 = vadd.f32 %v15181_v62, %v15180_v31  ;;  %v21109_v36 = vadd.f32 %v12811_v57, %v20985_v50 }
0x1c46   : > { %v12816_v59 = vadd.f32 %v15182_v45, %v21080_v51  ;;  %v15183_v16 = vpop.f32.mrb[50].mxu0  ;;  %12890 = vadd.xlane.f32.xlu1 %v21109_v36 }
0x1c47   : > { %v15184_v27 = vpop.f32.mrb[51].mxu0 }
0x1c48   : > { %v15185_v14 = vadd.f32 %v15184_v27, %v15183_v16  ;;  %v21114_v30 = vadd.f32 %v12816_v59, %v20990_v32 }
0x1c4a   : > { %v12821_v49 = vadd.f32 %v15185_v14, %v21080_v51  ;;  %v15186_v41 = vpop.f32.mrb[52].mxu0  ;;  %12892 = vadd.xlane.f32.xlu0 %v21114_v30 }
0x1c4b   : > { %v15187_v1 = vpop.f32.mrb[53].mxu0 }
0x1c4c   : > { %v15188_v55 = vadd.f32 %v15187_v1, %v15186_v41  ;;  %v21119_v50 = vadd.f32 %v12821_v49, %v20995_v61 }
0x1c4e   : > { %v12826_v53 = vadd.f32 %v15188_v55, %v21080_v51  ;;  %v15189_v11 = vpop.f32.mrb[54].mxu0  ;;  %12894 = vadd.xlane.f32.xlu1 %v21119_v50 }
0x1c4f   : > { %v15190_v40 = vpop.f32.mrb[55].mxu0 }
0x1c50   : > { %v15191_v39 = vadd.f32 %v15190_v40, %v15189_v11  ;;  %v21124_v32 = vadd.f32 %v12826_v53, %v21000_v37 }
0x1c52   : > { %v12831_v44 = vadd.f32 %v15191_v39, %v21080_v51  ;;  %v15192_v9 = vpop.f32.mrb[56].mxu0  ;;  %12896 = vadd.xlane.f32.xlu0 %v21124_v32 }
0x1c53   : > { %v15193_v21 = vpop.f32.mrb[57].mxu0 }
0x1c54   : > { %v15194_v18 = vadd.f32 %v15193_v21, %v15192_v9  ;;  %v21129_v61 = vadd.f32 %v12831_v44, %v21005_v2 }
0x1c56   : > { %v12836_v56 = vadd.f32 %v15194_v18, %v21080_v51  ;;  %v15195_v20 = vpop.f32.mrb[58].mxu0  ;;  %12898 = vadd.xlane.f32.xlu1 %v21129_v61  ;;  %v14539_v18 = vld [vmem:[%s21526_s10 + $0x20] sm:$0xff]  }
0x1c57   : > { %v15196_v47 = vpop.f32.mrb[59].mxu0 }
0x1c58   : > { %v15197_v35 = vadd.f32 %v15196_v47, %v15195_v20  ;;  %v21134_v37 = vadd.f32 %v12836_v56, %v21010_v42 }
0x1c5a   : > { %v12841_v29 = vadd.f32 %v15197_v35, %v21080_v51  ;;  %v15198_v46 = vpop.f32.mrb[60].mxu0  ;;  %12900 = vadd.xlane.f32.xlu0 %v21134_v37  ;;  %v14540_v35 = vld [vmem:[%s21526_s10 + $0x28] sm:$0xff]  }
0x1c5b   : > { %v15199_v52 = vpop.f32.mrb[61].mxu0 }
0x1c5c   : > { %v15200_v48 = vadd.f32 %v15199_v52, %v15198_v46  ;;  %v21139_v2 = vadd.f32 %v12841_v29, %v21015_v8 }
0x1c5e   : > { %v12846_v63 = vadd.f32 %v15200_v48, %v21080_v51  ;;  %v15201_v10 = vpop.f32.mrb[62].mxu0  ;;  %12902 = vadd.xlane.f32.xlu1 %v21139_v2  ;;  %v14541_v48 = vld [vmem:[%s21526_s10 + $0x30] sm:$0xff]  }
0x1c5f   : > { %v15202_v17 = vpop.f32.mrb[63].mxu0 }
0x1c60   : > { %v15203_v6 = vadd.f32 %v15202_v17, %v15201_v10  ;;  %v21144_v42 = vadd.f32 %v12846_v63, %v21020_v5 }
0x1c62   : > { %v12851_v54 = vadd.f32 %v15203_v6, %v21080_v51  ;;  %v15204_v13 = vpop.f32.mrb[64].mxu0  ;;  %12904 = vadd.xlane.f32.xlu0 %v21144_v42  ;;  %v14542_v6 = vld [vmem:[%s21526_s10 + $0x38] sm:$0xff]  }
0x1c63   : > { %v15205_v26 = vpop.f32.mrb[65].mxu0 }
0x1c64   : > { %v15206_v60 = vadd.f32 %v15205_v26, %v15204_v13  ;;  %v21149_v8 = vadd.f32 %v12851_v54, %v21025_v4  ;;  %v14381_v4 = vld [vmem:[%s21526_s10] sm:$0xff]  }
0x1c65   : > { %16741 = vmatprep.subr.bf16.mxu1 %v14381_v4 }
0x1c66   : > { %v12856_v33 = vadd.f32 %v15206_v60, %v21080_v51  ;;  %v15207_v23 = vpop.f32.mrb[66].mxu0  ;;  %12906 = vadd.xlane.f32.xlu1 %v21149_v8  ;;  %16743 = vmatpush3.bf16.msra.mxu1 %v14381_v4 }
0x1c67   : > { %v15208_v28 = vpop.f32.mrb[67].mxu0  ;;  %16745 = vmatprep.subr.bf16.mxu1 %v14536_v7 }
0x1c68   : > { %v15209_v24 = vadd.f32 %v15208_v28, %v15207_v23  ;;  %v21154_v5 = vadd.f32 %v12856_v33, %v21030_v38  ;;  %v14537_v38 = vld [vmem:[%s21526_s10 + $0x10] sm:$0xff]  }
0x1c6a   : > { %v12861_v25 = vadd.f32 %v15209_v24, %v21080_v51  ;;  %12908 = vadd.xlane.f32.xlu0 %v21154_v5  ;;  %16747 = vmatpush3.bf16.msra.mxu1 %v14536_v7 }
0x1c6b   : > { %16749 = vmatprep.subr.bf16.mxu1 %v14537_v38 }
0x1c6c   : > { %v21159_v58 = vadd.f32 %v12861_v25, %v21035_v0 }
0x1c6e   : > { %12910 = vadd.xlane.f32.xlu1 %v21159_v58  ;;  %16751 = vmatpush3.bf16.msra.mxu1 %v14537_v38 }
0x1cbf   : > { %v12881_v0 = vpop.xlane.xlu0 %12880 }
0x1cc0   : > { %v12912_v51 = vmul.f32 0.0078125, %v12881_v0 }
0x1cc2   : > { %v21172_v43 = vsub.f32 %v21084_v19, %v12912_v51 }
0x1cc3   : > { %v12883_v57 = vpop.xlane.xlu1 %12882 }
0x1cc4   : > { %v12913_v31 = vmul.f32 0.0078125, %v12883_v57  ;;  %v12944_v62 = vmul.f32 %v21172_v43, %v21172_v43 }
0x1cc6   : > { %v21177_v45 = vsub.f32 %v21089_v3, %v12913_v31  ;;  %12960 = vadd.xlane.f32.xlu0 %v12944_v62 }
0x1cc7   : > { %v12885_v59 = vpop.xlane.xlu0 %12884 }
0x1cc8   : > { %v12914_v16 = vmul.f32 0.0078125, %v12885_v59  ;;  %v12945_v27 = vmul.f32 %v21177_v45, %v21177_v45 }
0x1cca   : > { %v21182_v14 = vsub.f32 %v21094_v15, %v12914_v16  ;;  %12962 = vadd.xlane.f32.xlu1 %v12945_v27 }
0x1ccb   : > { %v12887_v19 = vpop.xlane.xlu1 %12886 }
0x1ccc   : > { %v12915_v49 = vmul.f32 0.0078125, %v12887_v19  ;;  %v12946_v41 = vmul.f32 %v21182_v14, %v21182_v14  ;;  %v14413_v19 = vld [vmem:[%s21625_s18] sm:$0xff]  }
0x1ccd   : > { %16773 = vmatprep.subr.bf16.mxu0 %v14413_v19 }
0x1cce   : > { %v21187_v1 = vsub.f32 %v21099_v34, %v12915_v49  ;;  %12964 = vadd.xlane.f32.xlu0 %v12946_v41  ;;  %v14538_v34 = vld [vmem:[%s21526_s10 + $0x18] sm:$0xff]   ;;  %16775 = vmatpush3.bf16.msra.mxu0 %v14413_v19  ;;  %v14546_v41 = vld [vmem:[%s21625_s18 + $0x20] sm:$0xff]  }
0x1ccf   : > { %v12889_v3 = vpop.xlane.xlu0 %12888  ;;  %16753 = vmatprep.subr.bf16.mxu1 %v14538_v34  ;;  %v14545_v49 = vld [vmem:[%s21625_s18 + $0x18] sm:$0xff]  }
0x1cd0   : > { %v12916_v55 = vmul.f32 0.0078125, %v12889_v3  ;;  %v12947_v53 = vmul.f32 %v21187_v1, %v21187_v1  ;;  %16755 = vmatpush3.bf16.msra.mxu1 %v14538_v34  ;;  %v14547_v3 = vld [vmem:[%s21625_s18 + $0x28] sm:$0xff]  }
0x1cd1   : > { %16757 = vmatprep.subr.bf16.mxu1 %v14539_v18 }
0x1cd2   : > { %v21192_v11 = vsub.f32 %v21104_v12, %v12916_v55  ;;  %12966 = vadd.xlane.f32.xlu1 %v12947_v53  ;;  %v14548_v55 = vld [vmem:[%s21625_s18 + $0x30] sm:$0xff]  }
0x1cd3   : > { %v12891_v15 = vpop.xlane.xlu1 %12890 }
0x1cd4   : > { %v12917_v40 = vmul.f32 0.0078125, %v12891_v15  ;;  %v12948_v39 = vmul.f32 %v21192_v11, %v21192_v11  ;;  %16759 = vmatpush3.bf16.msra.mxu1 %v14539_v18 }
0x1cd5   : > { %16761 = vmatprep.subr.bf16.mxu1 %v14540_v35 }
0x1cd6   : > { %v21200_v44 = vsub.f32 %v21109_v36, %v12917_v40  ;;  %12968 = vadd.xlane.f32.xlu0 %v12948_v39 }
0x1cd7   : > { %v12893_v9 = vpop.xlane.xlu0 %12892 }
0x1cd8   : > { %v12918_v21 = vmul.f32 0.0078125, %v12893_v9  ;;  %v12949_v12 = vmul.f32 %v21200_v44, %v21200_v44  ;;  %16763 = vmatpush3.bf16.msra.mxu1 %v14540_v35 }
0x1cd9   : > { %16765 = vmatprep.subr.bf16.mxu1 %v14541_v48 }
0x1cda   : > { %v21208_v56 = vsub.f32 %v21114_v30, %v12918_v21  ;;  %12970 = vadd.xlane.f32.xlu1 %v12949_v12 }
0x1cdb   : > { %v12895_v20 = vpop.xlane.xlu1 %12894 }
0x1cdc   : > { %v12919_v36 = vmul.f32 0.0078125, %v12895_v20  ;;  %v12950_v47 = vmul.f32 %v21208_v56, %v21208_v56  ;;  %16767 = vmatpush3.bf16.msra.mxu1 %v14541_v48 }
0x1cdd   : > { %16769 = vmatprep.subr.bf16.mxu1 %v14542_v6 }
0x1cde   : > { %v21216_v29 = vsub.f32 %v21119_v50, %v12919_v36  ;;  %12972 = vadd.xlane.f32.xlu0 %v12950_v47 }
0x1cdf   : > { %v12897_v46 = vpop.xlane.xlu0 %12896 }
0x1ce0   : > { %v12920_v30 = vmul.f32 0.0078125, %v12897_v46  ;;  %v12951_v52 = vmul.f32 %v21216_v29, %v21216_v29  ;;  %16771 = vmatpush3.bf16.msra.mxu1 %v14542_v6 }
0x1ce2   : > { %v21224_v63 = vsub.f32 %v21124_v32, %v12920_v30  ;;  %12974 = vadd.xlane.f32.xlu1 %v12951_v52 }
0x1ce3   : > { %v12899_v10 = vpop.xlane.xlu1 %12898 }
0x1ce4   : > { %v12921_v50 = vmul.f32 0.0078125, %v12899_v10  ;;  %v12952_v17 = vmul.f32 %v21224_v63, %v21224_v63 }
0x1ce6   : > { %v21232_v54 = vsub.f32 %v21129_v61, %v12921_v50  ;;  %12976 = vadd.xlane.f32.xlu0 %v12952_v17 }
0x1ce7   : > { %v12901_v13 = vpop.xlane.xlu0 %12900 }
0x1ce8   : > { %v12922_v32 = vmul.f32 0.0078125, %v12901_v13  ;;  %v12953_v26 = vmul.f32 %v21232_v54, %v21232_v54 }
0x1cea   : > { %v21237_v60 = vsub.f32 %v21134_v37, %v12922_v32  ;;  %12978 = vadd.xlane.f32.xlu1 %v12953_v26 }
0x1ceb   : > { %v12903_v33 = vpop.xlane.xlu1 %12902 }
0x1cec   : > { %v12923_v23 = vmul.f32 0.0078125, %v12903_v33  ;;  %v12954_v28 = vmul.f32 %v21237_v60, %v21237_v60 }
0x1cee   : > { %v21242_v61 = vsub.f32 %v21139_v2, %v12923_v23  ;;  %12980 = vadd.xlane.f32.xlu0 %v12954_v28 }
0x1cef   : > { %v12905_v24 = vpop.xlane.xlu0 %12904 }
0x1cf0   : > { %v12924_v25 = vmul.f32 0.0078125, %v12905_v24  ;;  %v12955_v4 = vmul.f32 %v21242_v61, %v21242_v61 }
0x1cf2   : > { %v21247_v7 = vsub.f32 %v21144_v42, %v12924_v25  ;;  %12982 = vadd.xlane.f32.xlu1 %v12955_v4 }
0x1cf3   : > { %v12907_v37 = vpop.xlane.xlu1 %12906 }
0x1cf4   : > { %v12925_v38 = vmul.f32 0.0078125, %v12907_v37  ;;  %v12956_v0 = vmul.f32 %v21247_v7, %v21247_v7 }
0x1cf6   : > { %v21252_v51 = vsub.f32 %v21149_v8, %v12925_v38  ;;  %12984 = vadd.xlane.f32.xlu0 %v12956_v0 }
0x1cf7   : > { %v12909_v2 = vpop.xlane.xlu0 %12908 }
0x1cf8   : > { %v12926_v57 = vmul.f32 0.0078125, %v12909_v2  ;;  %v12957_v31 = vmul.f32 %v21252_v51, %v21252_v51 }
0x1cfa   : > { %v21257_v62 = vsub.f32 %v21154_v5, %v12926_v57  ;;  %12986 = vadd.xlane.f32.xlu1 %v12957_v31  ;;  %v14543_v5 = vld [vmem:[%s21625_s18 + $0x8] sm:$0xff]  }
0x1cfb   : > { %v12911_v42 = vpop.xlane.xlu1 %12910  ;;  %16777 = vmatprep.subr.bf16.mxu0 %v14543_v5 }
0x1cfc   : > { %v12927_v59 = vmul.f32 0.0078125, %v12911_v42  ;;  %v12958_v16 = vmul.f32 %v21257_v62, %v21257_v62  ;;  %16779 = vmatpush3.bf16.msra.mxu0 %v14543_v5 }
0x1cfe   : > { %v21262_v27 = vsub.f32 %v21159_v58, %v12927_v59  ;;  %12988 = vadd.xlane.f32.xlu0 %v12958_v16  ;;  %v14544_v58 = vld [vmem:[%s21625_s18 + $0x10] sm:$0xff]  }
0x1cff   : > { %16781 = vmatprep.subr.bf16.mxu0 %v14544_v58 }
0x1d00   : > { %v12959_v8 = vmul.f32 %v21262_v27, %v21262_v27  ;;  %16783 = vmatpush3.bf16.msra.mxu0 %v14544_v58 }
0x1d01   : > { %16785 = vmatprep.subr.bf16.mxu0 %v14545_v49 }
0x1d02   : > { %12990 = vadd.xlane.f32.xlu1 %v12959_v8 }
0x1d04   : > { %16787 = vmatpush3.bf16.msra.mxu0 %v14545_v49 }
0x1d05   : > { %16789 = vmatprep.subr.bf16.mxu0 %v14546_v41 }
0x1d08   : > { %16791 = vmatpush3.bf16.msra.mxu0 %v14546_v41 }
0x1d09   : > { %16793 = vmatprep.subr.bf16.mxu0 %v14547_v3 }
0x1d0c   : > { %16795 = vmatpush3.bf16.msra.mxu0 %v14547_v3 }
0x1d0d   : > { %16797 = vmatprep.subr.bf16.mxu0 %v14548_v55 }
0x1d10   : > { %16799 = vmatpush3.bf16.msra.mxu0 %v14548_v55 }
0x1d53   : > { %v12961_v53 = vpop.xlane.xlu0 %12960 }
0x1d54   : > { %v12992_v15 = vmul.f32 0.0078125, %v12961_v53 }
0x1d56   : > { %v13008_v40 = vadd.f32 1e-05, %v12992_v15 }
0x1d57   : > { %v12963_v39 = vpop.xlane.xlu1 %12962 }
0x1d58   : > { %17537 = vrsqrt.f32 %v13008_v40  ;;  %v12993_v34 = vmul.f32 0.0078125, %v12963_v39 }
0x1d5a   : > { %v13009_v9 = vadd.f32 1e-05, %v12993_v34 }
0x1d5b   : > { %v12965_v21 = vpop.xlane.xlu0 %12964 }
0x1d5c   : > { %17539 = vrsqrt.f32 %v13009_v9  ;;  %v12994_v12 = vmul.f32 0.0078125, %v12965_v21 }
0x1d5e   : > { %v13010_v18 = vadd.f32 1e-05, %v12994_v12 }
0x1d5f   : > { %v12967_v20 = vpop.xlane.xlu1 %12966 }
0x1d60   : > { %17541 = vrsqrt.f32 %v13010_v18  ;;  %v12995_v36 = vmul.f32 0.0078125, %v12967_v20 }
0x1d62   : > { %v17538_v47 = vpop.eup %17537  ;;  %v13011_v35 = vadd.f32 1e-05, %v12995_v36 }
0x1d63   : > { %v12969_v46 = vpop.xlane.xlu0 %12968  ;;  %v13040_v30 = vmul.f32 %v17538_v47, %v21172_v43 }
0x1d64   : > { %17543 = vrsqrt.f32 %v13011_v35  ;;  %v12996_v52 = vmul.f32 0.0078125, %v12969_v46 }
0x1d65   : > { %16188 = vmatprep.mubr.f32.mxu1 %v13040_v30 }
0x1d66   : > { %v17540_v48 = vpop.eup %17539  ;;  %v13012_v10 = vadd.f32 1e-05, %v12996_v52 }
0x1d67   : > { %v13041_v50 = vmul.f32 %v17540_v48, %v21177_v45  ;;  %v12971_v17 = vpop.xlane.xlu1 %12970 }
0x1d68   : > { %17545 = vrsqrt.f32 %v13012_v10  ;;  %v12997_v6 = vmul.f32 0.0078125, %v12971_v17 }
0x1d69   : > { %16189 = vmatmul.mubr.f32.vlgmr.msra.gmra.mrb[44].mxu1 %v13041_v50 }
0x1d6a   : > { %v17542_v13 = vpop.eup %17541  ;;  %v13013_v32 = vadd.f32 1e-05, %v12997_v6 }
0x1d6b   : > { %v12973_v26 = vpop.xlane.xlu0 %12972  ;;  %v13042_v33 = vmul.f32 %v17542_v13, %v21182_v14  ;;  %v14549_v13 = vld [vmem:[%s21625_s18 + $0x38] sm:$0xff]  }
0x1d6c   : > { %17547 = vrsqrt.f32 %v13013_v32  ;;  %v12998_v23 = vmul.f32 0.0078125, %v12973_v26  ;;  %16801 = vmatprep.subr.bf16.mxu0 %v14549_v13  ;;  %v14553_v32 = vld [vmem:[%s21626_s24 + $0x20] sm:$0xff]   ;;  %v14554_v26 = vld [vmem:[%s21626_s24 + $0x28] sm:$0xff]  }
0x1d6d   : > { %16191 = vmatprep.mubr.f32.mxu1 %v13042_v33  ;;  %16803 = vmatpush3.bf16.msra.mxu0 %v14549_v13  ;;  %v14555_v33 = vld [vmem:[%s21626_s24 + $0x30] sm:$0xff]  }
0x1d6e   : > { %v17544_v43 = vpop.eup %17543  ;;  %v13014_v28 = vadd.f32 1e-05, %v12998_v23  ;;  %v21627_v23 = vld [vmem:[#allocation38_spill] sm:$0xff] }
0x1d6f   : > { %v12975_v24 = vpop.xlane.xlu1 %12974  ;;  %v13043_v25 = vmul.f32 %v17544_v43, %v21187_v1  ;;  %v13091_v43 = vrot.slane %v19049_v22, %v21627_v23 }
0x1d70   : > { %17549 = vrsqrt.f32 %v13014_v28  ;;  %v12999_v4 = vmul.f32 0.0078125, %v12975_v24 }
0x1d71   : > { %16192 = vmatmul.mubr.f32.gmra.mrb[46].mxu1 %v13043_v25 }
0x1d72   : > { %v17546_v45 = vpop.eup %17545  ;;  %v13015_v37 = vadd.f32 1e-05, %v12999_v4 }
0x1d73   : > { %v12977_v38 = vpop.xlane.xlu0 %12976  ;;  %v13044_v0 = vmul.f32 %v17546_v45, %v21192_v11 }
0x1d74   : > { %17551 = vrsqrt.f32 %v13015_v37  ;;  %v13000_v2 = vmul.f32 0.0078125, %v12977_v38 }
0x1d75   : > { %16194 = vmatprep.mubr.f32.mxu1 %v13044_v0 }
0x1d76   : > { %v17548_v14 = vpop.eup %17547  ;;  %v13016_v57 = vadd.f32 1e-05, %v13000_v2 }
0x1d77   : > { %v12979_v31 = vpop.xlane.xlu1 %12978  ;;  %v13045_v42 = vmul.f32 %v17548_v14, %v21200_v44 }
0x1d78   : > { %17553 = vrsqrt.f32 %v13016_v57  ;;  %v13001_v59 = vmul.f32 0.0078125, %v12979_v31 }
0x1d79   : > { %16195 = vmatmul.mubr.f32.gmra.mrb[48].mxu1 %v13045_v42 }
0x1d7a   : > { %v17550_v1 = vpop.eup %17549  ;;  %v13017_v16 = vadd.f32 1e-05, %v13001_v59 }
0x1d7b   : > { %v12981_v8 = vpop.xlane.xlu0 %12980  ;;  %v13046_v19 = vmul.f32 %v17550_v1, %v21208_v56 }
0x1d7c   : > { %17555 = vrsqrt.f32 %v13017_v16  ;;  %v13002_v5 = vmul.f32 0.0078125, %v12981_v8 }
0x1d7d   : > { %16197 = vmatprep.mubr.f32.mxu1 %v13046_v19 }
0x1d7e   : > { %v17552_v11 = vpop.eup %17551  ;;  %v13018_v58 = vadd.f32 1e-05, %v13002_v5 }
0x1d7f   : > { %v12983_v49 = vpop.xlane.xlu1 %12982  ;;  %v13047_v41 = vmul.f32 %v17552_v11, %v21216_v29 }
0x1d80   : > { %17557 = vrsqrt.f32 %v13018_v58  ;;  %v13003_v3 = vmul.f32 0.0078125, %v12983_v49 }
0x1d81   : > { %16198 = vmatmul.mubr.f32.gmra.mrb[50].mxu1 %v13047_v41 }
0x1d82   : > { %v17554_v44 = vpop.eup %17553  ;;  %v13019_v55 = vadd.f32 1e-05, %v13003_v3 }
0x1d83   : > { %v12985_v53 = vpop.xlane.xlu0 %12984  ;;  %v13048_v15 = vmul.f32 %v17554_v44, %v21224_v63 }
0x1d84   : > { %17559 = vrsqrt.f32 %v13019_v55  ;;  %v13004_v40 = vmul.f32 0.0078125, %v12985_v53 }
0x1d85   : > { %16200 = vmatprep.mubr.f32.mxu1 %v13048_v15 }
0x1d86   : > { %v17556_v56 = vpop.eup %17555  ;;  %v13020_v39 = vadd.f32 1e-05, %v13004_v40 }
0x1d87   : > { %v12987_v34 = vpop.xlane.xlu1 %12986  ;;  %v13049_v9 = vmul.f32 %v17556_v56, %v21232_v54 }
0x1d88   : > { %17561 = vrsqrt.f32 %v13020_v39  ;;  %v13005_v21 = vmul.f32 0.0078125, %v12987_v34 }
0x1d89   : > { %16201 = vmatmul.mubr.f32.gmra.mrb[52].mxu1 %v13049_v9 }
0x1d8a   : > { %v17558_v29 = vpop.eup %17557  ;;  %v13021_v12 = vadd.f32 1e-05, %v13005_v21 }
0x1d8b   : > { %v12989_v18 = vpop.xlane.xlu0 %12988  ;;  %v13050_v20 = vmul.f32 %v17558_v29, %v21237_v60 }
0x1d8c   : > { %17563 = vrsqrt.f32 %v13021_v12  ;;  %v13006_v36 = vmul.f32 0.0078125, %v12989_v18 }
0x1d8d   : > { %16203 = vmatprep.mubr.f32.mxu1 %v13050_v20 }
0x1d8e   : > { %v17560_v63 = vpop.eup %17559  ;;  %v13022_v47 = vadd.f32 1e-05, %v13006_v36 }
0x1d8f   : > { %v12991_v35 = vpop.xlane.xlu1 %12990  ;;  %v13051_v46 = vmul.f32 %v17560_v63, %v21242_v61 }
0x1d90   : > { %17565 = vrsqrt.f32 %v13022_v47  ;;  %v13007_v30 = vmul.f32 0.0078125, %v12991_v35 }
0x1d91   : > { %16204 = vmatmul.mubr.f32.gmra.mrb[54].mxu1 %v13051_v46 }
0x1d92   : > { %v17562_v54 = vpop.eup %17561  ;;  %v13023_v52 = vadd.f32 1e-05, %v13007_v30 }
0x1d93   : > { %v13052_v48 = vmul.f32 %v17562_v54, %v21247_v7  ;;  %v14445_v7 = vld [vmem:[%s21626_s24] sm:$0xff]  }
0x1d94   : > { %17567 = vrsqrt.f32 %v13023_v52  ;;  %16805 = vmatprep.subr.bf16.mxu1 %v14445_v7 }
0x1d95   : > { %16206 = vmatprep.mubr.f32.mxu1 %v13052_v48  ;;  %16807 = vmatpush3.bf16.msra.mxu1 %v14445_v7 }
0x1d96   : > { %v17564_v10 = vpop.eup %17563 }
0x1d97   : > { %v13053_v60 = vmul.f32 %v17564_v10, %v21252_v51  ;;  %v14550_v51 = vld [vmem:[%s21626_s24 + $0x8] sm:$0xff]   ;;  %v14556_v10 = vld [vmem:[%s21626_s24 + $0x38] sm:$0xff]  }
0x1d98   : > { %16809 = vmatprep.subr.bf16.mxu1 %v14550_v51 }
0x1d99   : > { %16207 = vmatmul.mubr.f32.gmra.mrb[56].mxu1 %v13053_v60  ;;  %v21335_v60 = vld [vmem:[%s21529_s13 + $0x18] sm:$0x1] }
0x1d9a   : > { %v17566_v50 = vpop.eup %17565  ;;  %16811 = vmatpush3.bf16.msra.mxu1 %v14550_v51 }
0x1d9b   : > { %v13054_v17 = vmul.f32 %v17566_v50, %v21257_v62  ;;  %v14551_v62 = vld [vmem:[%s21626_s24 + $0x10] sm:$0xff]   ;;  %v568_v50 = vunpack.c.l.bf16 %v21335_v60 }
0x1d9c   : > { %16813 = vmatprep.subr.bf16.mxu1 %v14551_v62 }
0x1d9d   : > { %16209 = vmatprep.mubr.f32.mxu1 %v13054_v17  ;;  %v21628_v17 = vld [vmem:[#allocation16_spill] sm:$0xff] }
0x1d9e   : > { %v17568_v6 = vpop.eup %17567  ;;  %16815 = vmatpush3.bf16.msra.mxu1 %v14551_v62 }
0x1d9f   : > { %v13055_v61 = vmul.f32 %v17568_v6, %v21262_v27  ;;  %v14552_v27 = vld [vmem:[%s21626_s24 + $0x18] sm:$0xff]   ;;  %v13288_v6 = vrot.slane %v568_v50, %v21628_v17 }
0x1da0   : > { %16817 = vmatprep.subr.bf16.mxu1 %v14552_v27 }
0x1da1   : > { %16210 = vmatmul.mubr.f32.gmra.mrb[58].mxu1 %v13055_v61 }
0x1da2   : > { %16819 = vmatpush3.bf16.msra.mxu1 %v14552_v27 }
0x1da3   : > { %16821 = vmatprep.subr.bf16.mxu1 %v14553_v32 }
0x1da6   : > { %16823 = vmatpush3.bf16.msra.mxu1 %v14553_v32 }
0x1da7   : > { %16825 = vmatprep.subr.bf16.mxu1 %v14554_v26 }
0x1daa   : > { %16827 = vmatpush3.bf16.msra.mxu1 %v14554_v26 }
0x1dab   : > { %16829 = vmatprep.subr.bf16.mxu1 %v14555_v33 }
0x1dae   : > { %16831 = vmatpush3.bf16.msra.mxu1 %v14555_v33 }
0x1daf   : > { %16833 = vmatprep.subr.bf16.mxu1 %v14556_v10 }
0x1db2   : > { %16835 = vmatpush3.bf16.msra.mxu1 %v14556_v10 }
0x1e3c   : > { %v16190_v28 = vpop.f32.mrb[44].mxu1 }
0x1e3d   : > { %v13164_v24 = vadd.f32 %v16190_v28, %v13091_v43  ;;  %v13158_v25 = vpop.f32.mrb[45].mxu1 }
0x1e3e   : > { %v13159_v4 = vadd.f32 %v13158_v25, %v13091_v43 }
0x1e3f   : > { %v13238_v37 = vmax.f32 %v13164_v24, 0.0 }
0x1e40   : > { %v13237_v45 = vmax.f32 %v13159_v4, 0.0 }
0x1e42   : > { %16244 = vmatprep.mubr.f32.mxu0 %v13237_v45 }
0x1e43   : > { %16245 = vmatmul.mubr.f32.vlgmr.msra.gmra.mrb[68].mxu0 %v13238_v37 }
0x1e44   : > { %v16193_v38 = vpop.f32.mrb[46].mxu1 }
0x1e45   : > { %v13174_v0 = vadd.f32 %v16193_v38, %v13091_v43  ;;  %v13168_v2 = vpop.f32.mrb[47].mxu1 }
0x1e46   : > { %v13169_v14 = vadd.f32 %v13168_v2, %v13091_v43 }
0x1e47   : > { %v13240_v31 = vmax.f32 %v13174_v0, 0.0 }
0x1e48   : > { %v13239_v57 = vmax.f32 %v13169_v14, 0.0 }
0x1e4a   : > { %16247 = vmatprep.mubr.f32.mxu0 %v13239_v57 }
0x1e4b   : > { %16248 = vmatmul.mubr.f32.gmra.mrb[70].mxu0 %v13240_v31 }
0x1e4c   : > { %v16196_v42 = vpop.f32.mrb[48].mxu1 }
0x1e4d   : > { %v13184_v59 = vadd.f32 %v16196_v42, %v13091_v43  ;;  %v13178_v1 = vpop.f32.mrb[49].mxu1 }
0x1e4e   : > { %v13179_v22 = vadd.f32 %v13178_v1, %v13091_v43 }
0x1e4f   : > { %v13242_v8 = vmax.f32 %v13184_v59, 0.0 }
0x1e50   : > { %v13241_v16 = vmax.f32 %v13179_v22, 0.0 }
0x1e52   : > { %16250 = vmatprep.mubr.f32.mxu0 %v13241_v16 }
0x1e53   : > { %16251 = vmatmul.mubr.f32.gmra.mrb[72].mxu0 %v13242_v8 }
0x1e54   : > { %v16199_v19 = vpop.f32.mrb[50].mxu1 }
0x1e55   : > { %v13194_v5 = vadd.f32 %v16199_v19, %v13091_v43  ;;  %v13188_v11 = vpop.f32.mrb[51].mxu1 }
0x1e56   : > { %v13189_v58 = vadd.f32 %v13188_v11, %v13091_v43 }
0x1e57   : > { %v13244_v41 = vmax.f32 %v13194_v5, 0.0 }
0x1e58   : > { %v13243_v49 = vmax.f32 %v13189_v58, 0.0 }
0x1e5a   : > { %16253 = vmatprep.mubr.f32.mxu0 %v13243_v49 }
0x1e5b   : > { %16254 = vmatmul.mubr.f32.gmra.mrb[74].mxu0 %v13244_v41 }
0x1e5c   : > { %v16202_v3 = vpop.f32.mrb[52].mxu1 }
0x1e5d   : > { %v13204_v44 = vadd.f32 %v16202_v3, %v13091_v43  ;;  %v13198_v55 = vpop.f32.mrb[53].mxu1 }
0x1e5e   : > { %v13199_v53 = vadd.f32 %v13198_v55, %v13091_v43 }
0x1e5f   : > { %v13246_v40 = vmax.f32 %v13204_v44, 0.0 }
0x1e60   : > { %v13245_v15 = vmax.f32 %v13199_v53, 0.0 }
0x1e62   : > { %16256 = vmatprep.mubr.f32.mxu0 %v13245_v15 }
0x1e63   : > { %16257 = vmatmul.mubr.f32.gmra.mrb[76].mxu0 %v13246_v40 }
0x1e64   : > { %v16205_v56 = vpop.f32.mrb[54].mxu1 }
0x1e65   : > { %v13214_v39 = vadd.f32 %v16205_v56, %v13091_v43  ;;  %v13208_v34 = vpop.f32.mrb[55].mxu1 }
0x1e66   : > { %v13209_v9 = vadd.f32 %v13208_v34, %v13091_v43 }
0x1e67   : > { %v13248_v29 = vmax.f32 %v13214_v39, 0.0 }
0x1e68   : > { %v13247_v21 = vmax.f32 %v13209_v9, 0.0 }
0x1e6a   : > { %16259 = vmatprep.mubr.f32.mxu0 %v13247_v21 }
0x1e6b   : > { %16260 = vmatmul.mubr.f32.gmra.mrb[78].mxu0 %v13248_v29 }
0x1e6c   : > { %v16208_v12 = vpop.f32.mrb[56].mxu1 }
0x1e6d   : > { %v13224_v18 = vadd.f32 %v16208_v12, %v13091_v43  ;;  %v13218_v20 = vpop.f32.mrb[57].mxu1 }
0x1e6e   : > { %v13219_v36 = vadd.f32 %v13218_v20, %v13091_v43 }
0x1e6f   : > { %v13250_v47 = vmax.f32 %v13224_v18, 0.0  ;;  %v21629_v18 = vld [vmem:[#allocation17_spill] sm:$0xff] }
0x1e70   : > { %v13249_v63 = vmax.f32 %v13219_v36, 0.0  ;;  %v21344_v20 = vrot.slane %v568_v50, %v21629_v18 }
0x1e72   : > { %16262 = vmatprep.mubr.f32.mxu0 %v13249_v63 }
0x1e73   : > { %16263 = vmatmul.mubr.f32.gmra.mrb[80].mxu0 %v13250_v47 }
0x1e74   : > { %v16211_v35 = vpop.f32.mrb[58].mxu1 }
0x1e75   : > { %v13234_v46 = vadd.f32 %v16211_v35, %v13091_v43  ;;  %v13228_v30 = vpop.f32.mrb[59].mxu1 }
0x1e76   : > { %v13229_v54 = vadd.f32 %v13228_v30, %v13091_v43 }
0x1e77   : > { %v13252_v48 = vmax.f32 %v13234_v46, 0.0  ;;  %v21630_v46 = vld [vmem:[#allocation22_spill] sm:$0xff] }
0x1e78   : > { %v13251_v52 = vmax.f32 %v13229_v54, 0.0  ;;  %v21631_v54 = vld [vmem:[#allocation21_spill] sm:$0xff] }
0x1e7a   : > { %16265 = vmatprep.mubr.f32.mxu0 %v13251_v52 }
0x1e7b   : > { %16266 = vmatmul.mubr.f32.gmra.mrb[82].mxu0 %v13252_v48 }
0x1f16   : > { %v16246_v61 = vpop.f32.mrb[68].mxu0 }
0x1f17   : > { %v13361_v13 = vadd.f32 %v16246_v61, %v13288_v6  ;;  %v13355_v7 = vpop.f32.mrb[69].mxu0  ;;  %v21632_v61 = vld [vmem:[#allocation24_spill] sm:$0xff] }
0x1f18   : > { %v13356_v51 = vadd.f32 %v13355_v7, %v13288_v6  ;;  %v21633_v7 = vld [vmem:[#allocation23_spill] sm:$0xff] }
0x1f19   : > { %v13435_v27 = vmax.f32 %v13361_v13, 0.0 }
0x1f1a   : > { %v13434_v62 = vmax.f32 %v13356_v51, 0.0 }
0x1f1c   : > { %16300 = vmatprep.mubr.f32.mxu1 %v13434_v62 }
0x1f1d   : > { %16301 = vmatmul.mubr.f32.vlgmr.msra.gmra.mrb[60].mxu1 %v13435_v27 }
0x1f1e   : > { %v16249_v32 = vpop.f32.mrb[70].mxu0 }
0x1f1f   : > { %v13371_v26 = vadd.f32 %v16249_v32, %v13288_v6  ;;  %v13365_v33 = vpop.f32.mrb[71].mxu0 }
0x1f20   : > { %v13366_v23 = vadd.f32 %v13365_v33, %v13288_v6 }
0x1f21   : > { %v13437_v28 = vmax.f32 %v13371_v26, 0.0 }
0x1f22   : > { %v13436_v43 = vmax.f32 %v13366_v23, 0.0 }
0x1f24   : > { %16303 = vmatprep.mubr.f32.mxu1 %v13436_v43  ;;  %v21634_v43 = vld [vmem:[#allocation26_spill] sm:$0xff] }
0x1f25   : > { %16304 = vmatmul.mubr.f32.gmra.mrb[62].mxu1 %v13437_v28 }
0x1f26   : > { %v16252_v24 = vpop.f32.mrb[72].mxu0 }
0x1f27   : > { %v13381_v25 = vadd.f32 %v16252_v24, %v13288_v6  ;;  %v13375_v4 = vpop.f32.mrb[73].mxu0  ;;  %v21635_v24 = vld [vmem:[#allocation25_spill] sm:$0xff] }
0x1f28   : > { %v13376_v45 = vadd.f32 %v13375_v4, %v13288_v6 }
0x1f29   : > { %v13439_v38 = vmax.f32 %v13381_v25, 0.0 }
0x1f2a   : > { %v13438_v37 = vmax.f32 %v13376_v45, 0.0 }
0x1f2c   : > { %16306 = vmatprep.mubr.f32.mxu1 %v13438_v37 }
0x1f2d   : > { %16307 = vmatmul.mubr.f32.gmra.mrb[64].mxu1 %v13439_v38 }
0x1f2e   : > { %v16255_v0 = vpop.f32.mrb[74].mxu0 }
0x1f2f   : > { %v13391_v2 = vadd.f32 %v16255_v0, %v13288_v6  ;;  %v13385_v14 = vpop.f32.mrb[75].mxu0 }
0x1f30   : > { %v13386_v57 = vadd.f32 %v13385_v14, %v13288_v6  ;;  %v21636_v14 = vld [vmem:[#allocation27_spill] sm:$0xff] }
0x1f31   : > { %v13441_v42 = vmax.f32 %v13391_v2, 0.0 }
0x1f32   : > { %v13440_v31 = vmax.f32 %v13386_v57, 0.0 }
0x1f34   : > { %16309 = vmatprep.mubr.f32.mxu1 %v13440_v31  ;;  %v21637_v31 = vld [vmem:[#allocation28_spill] sm:$0xff] }
0x1f35   : > { %16310 = vmatmul.mubr.f32.gmra.mrb[66].mxu1 %v13441_v42 }
0x1f36   : > { %v16258_v59 = vpop.f32.mrb[76].mxu0 }
0x1f37   : > { %v13401_v1 = vadd.f32 %v16258_v59, %v13288_v6  ;;  %v13395_v22 = vpop.f32.mrb[77].mxu0 }
0x1f38   : > { %v13396_v16 = vadd.f32 %v13395_v22, %v13288_v6 }
0x1f39   : > { %v13443_v19 = vmax.f32 %v13401_v1, 0.0 }
0x1f3a   : > { %v13442_v8 = vmax.f32 %v13396_v16, 0.0 }
0x1f3c   : > { %16312 = vmatprep.mubr.f32.mxu1 %v13442_v8 }
0x1f3d   : > { %16313 = vmatmul.mubr.f32.gmra.mrb[68].mxu1 %v13443_v19 }
0x1f3e   : > { %v16261_v5 = vpop.f32.mrb[78].mxu0 }
0x1f3f   : > { %v13411_v11 = vadd.f32 %v16261_v5, %v13288_v6  ;;  %v13405_v58 = vpop.f32.mrb[79].mxu0  ;;  %v21638_v5 = vld [vmem:[#allocation29_spill] sm:$0xff] }
0x1f40   : > { %v13406_v49 = vadd.f32 %v13405_v58, %v13288_v6  ;;  %v21639_v58 = vld [vmem:[#allocation30_spill] sm:$0xff] }
0x1f41   : > { %v13445_v3 = vmax.f32 %v13411_v11, 0.0 }
0x1f42   : > { %v13444_v41 = vmax.f32 %v13406_v49, 0.0 }
0x1f44   : > { %16315 = vmatprep.mubr.f32.mxu1 %v13444_v41 }
0x1f45   : > { %16316 = vmatmul.mubr.f32.gmra.mrb[70].mxu1 %v13445_v3 }
0x1f46   : > { %v16264_v44 = vpop.f32.mrb[80].mxu0 }
0x1f47   : > { %v13421_v55 = vadd.f32 %v16264_v44, %v13288_v6  ;;  %v13415_v53 = vpop.f32.mrb[81].mxu0 }
0x1f48   : > { %v13416_v15 = vadd.f32 %v13415_v53, %v13288_v6 }
0x1f49   : > { %v13447_v56 = vmax.f32 %v13421_v55, 0.0 }
0x1f4a   : > { %v13446_v40 = vmax.f32 %v13416_v15, 0.0 }
0x1f4c   : > { %16318 = vmatprep.mubr.f32.mxu1 %v13446_v40  ;;  %v21640_v40 = vld [vmem:[#allocation31_spill] sm:$0xff] }
0x1f4d   : > { %16319 = vmatmul.mubr.f32.gmra.mrb[72].mxu1 %v13447_v56 }
0x1f4e   : > { %v16267_v39 = vpop.f32.mrb[82].mxu0 }
0x1f4f   : > { %v13431_v34 = vadd.f32 %v16267_v39, %v13288_v6  ;;  %v13425_v9 = vpop.f32.mrb[83].mxu0  ;;  %v21641_v39 = vld [vmem:[#allocation32_spill] sm:$0xff] }
0x1f50   : > { %v13426_v21 = vadd.f32 %v13425_v9, %v13288_v6 }
0x1f51   : > { %v13449_v12 = vmax.f32 %v13431_v34, 0.0 }
0x1f52   : > { %v13448_v29 = vmax.f32 %v13426_v21, 0.0 }
0x1f54   : > { %16321 = vmatprep.mubr.f32.mxu1 %v13448_v29 }
0x1f55   : > { %16322 = vmatmul.mubr.f32.gmra.mrb[74].mxu1 %v13449_v12 }
0x1ff0   : > { %v16302_v36 = vpop.f32.mrb[60].mxu1 }
0x1ff1   : > { %v21347_v63 = vadd.f32 %v16302_v36, %v21344_v20  ;;  %v13552_v47 = vpop.f32.mrb[61].mxu1 }
0x1ff2   : > { %v21350_v35 = vadd.f32 %v13552_v47, %v21344_v20  ;;  %v21642_v47 = vld [vmem:[#allocation33_spill] sm:$0xff] }
0x1ff3   : > { %v13632_v30 = vmul.f32 %v21347_v63, %v21630_v46 }
0x1ff4   : > { %v13631_v52 = vmul.f32 %v21350_v35, %v21631_v54 }
0x1ff5   : > { %v13650_v48 = vsel %vm2018_vm3, %v13632_v30, 0.0  ;;  %v21643_v30 = vld [vmem:[#allocation34_spill] sm:$0xff] }
0x1ff6   : > { %13651 = vadd.xlane.f32.xlu1 %v13650_v48  ;;  %v13647_v10 = vsel %vm2018_vm3, %v13631_v52, 0.0 }
0x1ff7   : > { %13648 = vadd.xlane.f32.xlu0 %v13647_v10 }
0x1ff8   : > { %v16305_v60 = vpop.f32.mrb[62].mxu1 }
0x1ff9   : > { %v21359_v50 = vadd.f32 %v16305_v60, %v21344_v20  ;;  %v13562_v17 = vpop.f32.mrb[63].mxu1 }
0x1ffa   : > { %v21362_v6 = vadd.f32 %v13562_v17, %v21344_v20 }
0x1ffb   : > { %v13634_v13 = vmul.f32 %v21359_v50, %v21632_v61 }
0x1ffc   : > { %v13633_v51 = vmul.f32 %v21362_v6, %v21633_v7 }
0x1ffd   : > { %v13656_v62 = vsel %vm2018_vm3, %v13634_v13, 0.0  ;;  %v21644_v13 = vld [vmem:[#allocation35_spill] sm:$0xff] }
0x1ffe   : > { %13657 = vadd.xlane.f32.xlu1 %v13656_v62  ;;  %v13653_v27 = vsel %vm2018_vm3, %v13633_v51, 0.0  ;;  %v21645_v51 = vld [vmem:[#allocation36_spill] sm:$0xff] }
0x1fff   : > { %13654 = vadd.xlane.f32.xlu0 %v13653_v27 }
0x2000   : > { %v16308_v32 = vpop.f32.mrb[64].mxu1 }
0x2001   : > { %v21371_v26 = vadd.f32 %v16308_v32, %v21344_v20  ;;  %v13572_v33 = vpop.f32.mrb[65].mxu1 }
0x2002   : > { %v21374_v23 = vadd.f32 %v13572_v33, %v21344_v20 }
0x2003   : > { %v13636_v28 = vmul.f32 %v21371_v26, %v21634_v43 }
0x2004   : > { %v13635_v25 = vmul.f32 %v21374_v23, %v21635_v24 }
0x2005   : > { %v13662_v4 = vsel %vm2018_vm3, %v13636_v28, 0.0 }
0x2006   : > { %13663 = vadd.xlane.f32.xlu1 %v13662_v4  ;;  %v13659_v45 = vsel %vm2018_vm3, %v13635_v25, 0.0 }
0x2007   : > { %13660 = vadd.xlane.f32.xlu0 %v13659_v45 }
0x2008   : > { %v16311_v37 = vpop.f32.mrb[66].mxu1 }
0x2009   : > { %v21383_v38 = vadd.f32 %v16311_v37, %v21344_v20  ;;  %v13582_v0 = vpop.f32.mrb[67].mxu1 }
0x200a   : > { %v21386_v2 = vadd.f32 %v13582_v0, %v21344_v20 }
0x200b   : > { %v13638_v57 = vmul.f32 %v21383_v38, %v21636_v14 }
0x200c   : > { %v13637_v42 = vmul.f32 %v21386_v2, %v21637_v31 }
0x200d   : > { %v13668_v59 = vsel %vm2018_vm3, %v13638_v57, 0.0 }
0x200e   : > { %13669 = vadd.xlane.f32.xlu1 %v13668_v59  ;;  %v13665_v1 = vsel %vm2018_vm3, %v13637_v42, 0.0 }
0x200f   : > { %13666 = vadd.xlane.f32.xlu0 %v13665_v1 }
0x2010   : > { %v16314_v22 = vpop.f32.mrb[68].mxu1 }
0x2011   : > { %v21395_v16 = vadd.f32 %v16314_v22, %v21344_v20  ;;  %v13592_v8 = vpop.f32.mrb[69].mxu1 }
0x2012   : > { %v21398_v19 = vadd.f32 %v13592_v8, %v21344_v20 }
0x2013   : > { %v13640_v11 = vmul.f32 %v21395_v16, %v21638_v5 }
0x2014   : > { %v13639_v49 = vmul.f32 %v21398_v19, %v21639_v58 }
0x2015   : > { %v13674_v41 = vsel %vm2018_vm3, %v13640_v11, 0.0 }
0x2016   : > { %13675 = vadd.xlane.f32.xlu1 %v13674_v41  ;;  %v13671_v3 = vsel %vm2018_vm3, %v13639_v49, 0.0 }
0x2017   : > { %13672 = vadd.xlane.f32.xlu0 %v13671_v3 }
0x2018   : > { %v16317_v44 = vpop.f32.mrb[70].mxu1 }
0x2019   : > { %v21407_v55 = vadd.f32 %v16317_v44, %v21344_v20  ;;  %v13602_v53 = vpop.f32.mrb[71].mxu1 }
0x201a   : > { %v21410_v15 = vadd.f32 %v13602_v53, %v21344_v20 }
0x201b   : > { %v13642_v56 = vmul.f32 %v21407_v55, %v21640_v40 }
0x201c   : > { %v13641_v34 = vmul.f32 %v21410_v15, %v21641_v39 }
0x201d   : > { %v13680_v9 = vsel %vm2018_vm3, %v13642_v56, 0.0 }
0x201e   : > { %13681 = vadd.xlane.f32.xlu1 %v13680_v9  ;;  %v13677_v21 = vsel %vm2018_vm3, %v13641_v34, 0.0 }
0x201f   : > { %13678 = vadd.xlane.f32.xlu0 %v13677_v21 }
0x2020   : > { %v16320_v29 = vpop.f32.mrb[72].mxu1 }
0x2021   : > { %v21419_v12 = vadd.f32 %v16320_v29, %v21344_v20  ;;  %v13612_v18 = vpop.f32.mrb[73].mxu1 }
0x2022   : > { %v21422_v36 = vadd.f32 %v13612_v18, %v21344_v20 }
0x2023   : > { %v13644_v46 = vmul.f32 %v21419_v12, %v21642_v47 }
0x2024   : > { %v13643_v54 = vmul.f32 %v21422_v36, %v21643_v30 }
0x2025   : > { %v13686_v52 = vsel %vm2018_vm3, %v13644_v46, 0.0 }
0x2026   : > { %13687 = vadd.xlane.f32.xlu1 %v13686_v52  ;;  %v13683_v48 = vsel %vm2018_vm3, %v13643_v54, 0.0 }
0x2027   : > { %13684 = vadd.xlane.f32.xlu0 %v13683_v48 }
0x2028   : > { %v16323_v10 = vpop.f32.mrb[74].mxu1 }
0x2029   : > { %v21431_v60 = vadd.f32 %v16323_v10, %v21344_v20  ;;  %v13622_v17 = vpop.f32.mrb[75].mxu1 }
0x202a   : > { %v21434_v61 = vadd.f32 %v13622_v17, %v21344_v20 }
0x202b   : > { %v13646_v7 = vmul.f32 %v21431_v60, %v21644_v13 }
0x202c   : > { %v13645_v62 = vmul.f32 %v21434_v61, %v21645_v51 }
0x202d   : > { %v13692_v27 = vsel %vm2018_vm3, %v13646_v7, 0.0 }
0x202e   : > { %13693 = vadd.xlane.f32.xlu1 %v13692_v27  ;;  %v13689_v32 = vsel %vm2018_vm3, %v13645_v62, 0.0 }
0x202f   : > { %13690 = vadd.xlane.f32.xlu0 %v13689_v32 }
0x2083   : > { %v13652_v20 = vpop.xlane.xlu1 %13651 }
0x2084   : > { %v13696_v33 = vsel %vm2018_vm3, %v21347_v63, %v13652_v20  ;;  %v13649_v43 = vpop.xlane.xlu0 %13648 }
0x2085   : > { %v13713_v28 = vsel %vm13711_vm6, %v13696_v33, 0.0  ;;  %v13695_v24 = vsel %vm2018_vm3, %v21350_v35, %v13649_v43 }
0x2086   : > { %13729 = vst [vmem:[%s21447_s17 + $0x8] sm:$0xff] %v13713_v28  ;;  %v13712_v25 = vsel %vm13711_vm6, %v13695_v24, 0.0 }
0x2087   : > { %13728 = vst [vmem:[%s21447_s17] sm:$0xff] %v13712_v25 }
0x208b   : > { %v13658_v4 = vpop.xlane.xlu1 %13657 }
0x208c   : > { %v13698_v45 = vsel %vm2018_vm3, %v21359_v50, %v13658_v4  ;;  %v13655_v37 = vpop.xlane.xlu0 %13654 }
0x208d   : > { %v13715_v0 = vsel %vm13711_vm6, %v13698_v45, 0.0  ;;  %v13697_v63 = vsel %vm2018_vm3, %v21362_v6, %v13655_v37 }
0x208e   : > { %13731 = vst [vmem:[%s21447_s17 + $0x18] sm:$0xff] %v13715_v0  ;;  %v13714_v35 = vsel %vm13711_vm6, %v13697_v63, 0.0 }
0x208f   : > { %13730 = vst [vmem:[%s21447_s17 + $0x10] sm:$0xff] %v13714_v35 }
0x2093   : > { %v13664_v14 = vpop.xlane.xlu1 %13663 }
0x2094   : > { %v13700_v57 = vsel %vm2018_vm3, %v21371_v26, %v13664_v14  ;;  %v13661_v31 = vpop.xlane.xlu0 %13660 }
0x2095   : > { %v13717_v42 = vsel %vm13711_vm6, %v13700_v57, 0.0  ;;  %v13699_v50 = vsel %vm2018_vm3, %v21374_v23, %v13661_v31 }
0x2096   : > { %13733 = vst [vmem:[%s21447_s17 + $0x28] sm:$0xff] %v13717_v42  ;;  %v13716_v6 = vsel %vm13711_vm6, %v13699_v50, 0.0 }
0x2097   : > { %13732 = vst [vmem:[%s21447_s17 + $0x20] sm:$0xff] %v13716_v6 }
0x209b   : > { %v13670_v59 = vpop.xlane.xlu1 %13669 }
0x209c   : > { %v13702_v1 = vsel %vm2018_vm3, %v21383_v38, %v13670_v59  ;;  %v13667_v22 = vpop.xlane.xlu0 %13666 }
0x209d   : > { %v13719_v8 = vsel %vm13711_vm6, %v13702_v1, 0.0  ;;  %v13701_v26 = vsel %vm2018_vm3, %v21386_v2, %v13667_v22 }
0x209e   : > { %13735 = vst [vmem:[%s21447_s17 + $0x38] sm:$0xff] %v13719_v8  ;;  %v13718_v23 = vsel %vm13711_vm6, %v13701_v26, 0.0 }
0x209f   : > { %13734 = vst [vmem:[%s21447_s17 + $0x30] sm:$0xff] %v13718_v23 }
0x20a3   : > { %v13676_v5 = vpop.xlane.xlu1 %13675 }
0x20a4   : > { %v13704_v11 = vsel %vm2018_vm3, %v21395_v16, %v13676_v5  ;;  %v13673_v58 = vpop.xlane.xlu0 %13672 }
0x20a5   : > { %v13721_v49 = vsel %vm13711_vm6, %v13704_v11, 0.0  ;;  %v13703_v38 = vsel %vm2018_vm3, %v21398_v19, %v13673_v58 }
0x20a6   : > { %13737 = vst [vmem:[%s21447_s17 + $0x48] sm:$0xff] %v13721_v49  ;;  %v13720_v2 = vsel %vm13711_vm6, %v13703_v38, 0.0 }
0x20a7   : > { %13736 = vst [vmem:[%s21447_s17 + $0x40] sm:$0xff] %v13720_v2 }
0x20ab   : > { %v13682_v41 = vpop.xlane.xlu1 %13681 }
0x20ac   : > { %v13706_v3 = vsel %vm2018_vm3, %v21407_v55, %v13682_v41  ;;  %v13679_v44 = vpop.xlane.xlu0 %13678 }
0x20ad   : > { %v13723_v53 = vsel %vm13711_vm6, %v13706_v3, 0.0  ;;  %v13705_v16 = vsel %vm2018_vm3, %v21410_v15, %v13679_v44 }
0x20ae   : > { %13739 = vst [vmem:[%s21447_s17 + $0x58] sm:$0xff] %v13723_v53  ;;  %v13722_v19 = vsel %vm13711_vm6, %v13705_v16, 0.0 }
0x20af   : > { %13738 = vst [vmem:[%s21447_s17 + $0x50] sm:$0xff] %v13722_v19 }
0x20b3   : > { %v13688_v40 = vpop.xlane.xlu1 %13687 }
0x20b4   : > { %v13708_v56 = vsel %vm2018_vm3, %v21419_v12, %v13688_v40  ;;  %v13685_v39 = vpop.xlane.xlu0 %13684 }
0x20b5   : > { %v13725_v34 = vsel %vm13711_vm6, %v13708_v56, 0.0  ;;  %v13707_v55 = vsel %vm2018_vm3, %v21422_v36, %v13685_v39 }
0x20b6   : > { %13741 = vst [vmem:[%s21447_s17 + $0x68] sm:$0xff] %v13725_v34  ;;  %v13724_v9 = vsel %vm13711_vm6, %v13707_v55, 0.0 }
0x20b7   : > { %13740 = vst [vmem:[%s21447_s17 + $0x60] sm:$0xff] %v13724_v9 }
0x20bb   : > { %v13694_v15 = vpop.xlane.xlu1 %13693 }
0x20bc   : > { %v13710_v21 = vsel %vm2018_vm3, %v21431_v60, %v13694_v15  ;;  %v13691_v29 = vpop.xlane.xlu0 %13690 }
0x20bd   : > { %v13727_v18 = vsel %vm13711_vm6, %v13710_v21, 0.0  ;;  %v13709_v12 = vsel %vm2018_vm3, %v21434_v61, %v13691_v29 }
0x20be   : > { %13743 = vst [vmem:[%s21447_s17 + $0x78] sm:$0xff] %v13727_v18  ;;  %v13726_v47 = vsel %vm13711_vm6, %v13709_v12, 0.0 }
0x20bf   : > { %13742 = vst [vmem:[%s21447_s17 + $0x70] sm:$0xff] %v13726_v47 }
0x20c0 PF: > { %s28_s29 = sadd.s32 1, %s17759_s29  }
0x20c1   : > { %p25_p12 = scmp.ge.s32.totalorder %s28_s29, 4  }
0x20c3   :  { %27 = sbr.rel (!%p25_p12) target bundleno = 10 (0xa), region = 137 }
0x20ca   :  { %13766 = vsyncpa [#allocation3], 1 }
0x20cb   :  { %13768 = vsyncpa [#allocation3 + $0x1], 1 }
0x20cc   :  { %13769 = vsyncpa [#allocation5], 1 }
0x20cd   :  { %13770 = vsyncpa [#allocation8], 1 }
0x20ce   :  { %13771 = vsyncpa [#allocation11], 1 }

</bundles_post_ra>
